<compile_context>
chip_gen: v6e
topology: v6e:2x2x1
jax: 0.10.0
libtpu: 0.0.40
codegen_flags: <defaults>
</compile_context>

<pallas_src>
import functools

import numpy as np
import jax
import jax.numpy as jnp
from jax.experimental import pallas as pl
from jax.experimental.pallas import tpu as pltpu

LEAKY_SLOPE = 0.2
BN_EPS = 1e-5
NUM_CLS = 5  # softmax classes = linear output (6) minus the v0 column

# (cin, cout, stride, pad, has_bn) -- kernel size is always 4
CONV_CFGS = [
    (1, 64, 2, 2, False),
    (64, 128, 2, 1, True),
    (128, 256, 2, 1, True),
    (256, 512, 2, 1, True),
    (512, 1024, 1, 0, False),
]
# (fin, fout, leaky_relu_after)
LIN_CFGS = [
    (1024, 512, True),
    (512, 256, True),
    (256, 6, False),
]


def _round_up(x, m):
    return ((x + m - 1) // m) * m


# ---------------------------------------------------------------------------
# Pallas kernels
# ---------------------------------------------------------------------------
def _matmul_affine_kernel(a_ref, w_ref, s_ref, b_ref, o_ref, *, leaky):
    """Accumulate a @ w directly into the resident output block over the K
    grid axis; on the last K step apply y = acc*scale + bias (+LeakyReLU)."""
    k = pl.program_id(2)

    @pl.when(k == 0)
    def _():
        o_ref[...] = jnp.zeros_like(o_ref)

    o_ref[...] += jnp.dot(a_ref[...], w_ref[...],
                          preferred_element_type=jnp.float32)

    @pl.when(k == pl.num_programs(2) - 1)
    def _():
        y = o_ref[...] * s_ref[...] + b_ref[...]
        if leaky:
            y = jnp.where(y >= 0.0, y, LEAKY_SLOPE * y)
        o_ref[...] = y


def fused_matmul_affine(a, w_mat, scale, bias, *, leaky,
                        tm_target=256, tn_target=256, tk_target=512):
    """(M, K) @ (K, N), bf16 MXU inputs / f32 accumulation, fused per-column
    affine (y = acc*scale + bias) and optional LeakyReLU."""
    m, k = a.shape
    k2, n = w_mat.shape
    assert k == k2

    # Lane-dense output: pad N to a multiple of 128 with zero weight columns.
    n_pad = _round_up(n, 128)
    tn = min(tn_target, n_pad)
    n_pad = _round_up(n_pad, tn)

    # bf16 sublane packing: M tiles are multiples of 16.
    tm = min(tm_target, _round_up(m, 16))
    m_pad = _round_up(m, tm)

    # VMEM-aware K tiling (double-buffered (tk, tn) bf16 weight tiles stay
    # small on v5e's 16 MiB scoped default and v7x's 64 MiB VMEM).
    tk = min(tk_target, k)
    assert k % tk == 0, (k, tk)

    a_p = a.astype(jnp.bfloat16)
    if m_pad != m:
        a_p = jnp.pad(a_p, ((0, m_pad - m), (0, 0)))
    w_p = w_mat.astype(jnp.bfloat16)
    s_p = scale.astype(jnp.float32)
    b_p = bias.astype(jnp.float32)
    if n_pad != n:
        w_p = jnp.pad(w_p, ((0, 0), (0, n_pad - n)))
        s_p = jnp.pad(s_p, (0, n_pad - n))
        b_p = jnp.pad(b_p, (0, n_pad - n))

    grid = (m_pad // tm, n_pad // tn, k // tk)
    cost = pl.CostEstimate(
        flops=2 * m_pad * k * n_pad,
        transcendentals=0,
        bytes_accessed=(m_pad * k + k * n_pad) * 2 + m_pad * n_pad * 4,
    )

    out = pl.pallas_call(
        functools.partial(_matmul_affine_kernel, leaky=leaky),
        out_shape=jax.ShapeDtypeStruct((m_pad, n_pad), jnp.float32),
        grid_spec=pltpu.PrefetchScalarGridSpec(
            num_scalar_prefetch=0,
            grid=grid,
            in_specs=[
                pl.BlockSpec((tm, tk), lambda i, j, kk: (i, kk)),
                pl.BlockSpec((tk, tn), lambda i, j, kk: (kk, j)),
                pl.BlockSpec((1, tn), lambda i, j, kk: (0, j)),
                pl.BlockSpec((1, tn), lambda i, j, kk: (0, j)),
            ],
            out_specs=pl.BlockSpec((tm, tn), lambda i, j, kk: (i, j)),
        ),
        compiler_params=pltpu.CompilerParams(
            dimension_semantics=("parallel", "parallel", "arbitrary"),
        ),
        cost_estimate=cost,
    )(a_p, w_p, s_p.reshape(1, n_pad), b_p.reshape(1, n_pad))
    return out[:m, :n]


def _fused_linear_head_kernel(x_ref, w1_ref, b1_ref, w2_ref, b2_ref,
                              w3_ref, b3_ref, o_ref):
    """All three Linear layers chained on VMEM-resident tiles, with the head
    fused into the epilogue: output col 0 = raw logit 0 (v0), cols 1..5 =
    softmax over logits 1..5, remaining (padded) cols = 0."""
    h = jnp.dot(x_ref[...], w1_ref[...],
                preferred_element_type=jnp.float32) + b1_ref[...]
    h = jnp.where(h >= 0.0, h, LEAKY_SLOPE * h)
    h = jnp.dot(h.astype(jnp.bfloat16), w2_ref[...],
                preferred_element_type=jnp.float32) + b2_ref[...]
    h = jnp.where(h >= 0.0, h, LEAKY_SLOPE * h)
    y = jnp.dot(h.astype(jnp.bfloat16), w3_ref[...],
                preferred_element_type=jnp.float32) + b3_ref[...]

    col = jax.lax.broadcasted_iota(jnp.int32, y.shape, 1)
    in_soft = jnp.logical_and(col >= 1, col <= NUM_CLS)
    mx = jnp.max(jnp.where(in_soft, y, -1e30), axis=1, keepdims=True)
    e = jnp.where(in_soft, jnp.exp(y - mx), 0.0)
    sm = e * pl.reciprocal(jnp.sum(e, axis=1, keepdims=True), approx=True)
    o_ref[...] = jnp.where(col == 0, y, sm)


def fused_linear_head(feat, lin_w, lin_b):
    """feat: (batch, 1024) -> (v0 (batch,), pre_c (batch, 5)) in one kernel."""
    m, k = feat.shape
    assert k == 1024
    tm = min(256, _round_up(m, 16))
    m_pad = _round_up(m, tm)

    x_p = feat.astype(jnp.bfloat16)
    if m_pad != m:
        x_p = jnp.pad(x_p, ((0, m_pad - m), (0, 0)))

    w1 = lin_w[0].T.astype(jnp.bfloat16)                     # (1024, 512)
    w2 = lin_w[1].T.astype(jnp.bfloat16)                     # (512, 256)
    w3 = jnp.pad(lin_w[2].T.astype(jnp.bfloat16),            # (256, 6)->(256,128)
                 ((0, 0), (0, 128 - 6)))
    b1 = lin_b[0].astype(jnp.float32).reshape(1, 512)
    b2 = lin_b[1].astype(jnp.float32).reshape(1, 256)
    b3 = jnp.pad(lin_b[2].astype(jnp.float32), (0, 128 - 6)).reshape(1, 128)

    cost = pl.CostEstimate(
        flops=2 * m_pad * (1024 * 512 + 512 * 256 + 256 * 128),
        transcendentals=m_pad * 128,
        bytes_accessed=(m_pad * 1024 + 1024 * 512 + 512 * 256 + 256 * 128) * 2
                       + m_pad * 128 * 4,
    )

    out = pl.pallas_call(
        _fused_linear_head_kernel,
        out_shape=jax.ShapeDtypeStruct((m_pad, 128), jnp.float32),
        grid_spec=pltpu.PrefetchScalarGridSpec(
            num_scalar_prefetch=0,
            grid=(m_pad // tm,),
            in_specs=[
                pl.BlockSpec((tm, 1024), lambda i: (i, 0)),
                pl.BlockSpec((1024, 512), lambda i: (0, 0)),
                pl.BlockSpec((1, 512), lambda i: (0, 0)),
                pl.BlockSpec((512, 256), lambda i: (0, 0)),
                pl.BlockSpec((1, 256), lambda i: (0, 0)),
                pl.BlockSpec((256, 128), lambda i: (0, 0)),
                pl.BlockSpec((1, 128), lambda i: (0, 0)),
            ],
            out_specs=pl.BlockSpec((tm, 128), lambda i: (i, 0)),
        ),
        compiler_params=pltpu.CompilerParams(
            dimension_semantics=("parallel",),
        ),
        cost_estimate=cost,
    )(x_p, w1, b1, w2, b2, w3, b3)

    v0 = out[:m, 0]
    pre_c = out[:m, 1:1 + NUM_CLS]
    return v0, pre_c


# ---------------------------------------------------------------------------
# JAX glue: im2col patch extraction, parameter setup, forward pass
# ---------------------------------------------------------------------------
def im2col_nhwc(x, k, stride, pad):
    """x: (N, H, W, C) -> (N*Ho*Wo, k*k*C) with (kh, kw, c) column order."""
    n, h, w, c = x.shape
    xp = jnp.pad(x, ((0, 0), (pad, pad), (pad, pad), (0, 0)))
    hp, wp = h + 2 * pad, w + 2 * pad
    ho = (hp - k) // stride + 1
    wo = (wp - k) // stride + 1
    cols = []
    for kh in range(k):
        for kw in range(k):
            cols.append(
                xp[:, kh:kh + (ho - 1) * stride + 1:stride,
                   kw:kw + (wo - 1) * stride + 1:stride, :]
            )
    a = jnp.stack(cols, axis=3)  # (n, ho, wo, k*k, c)
    return a.reshape(n * ho * wo, k * k * c), ho, wo


def init_params(key):
    params = {"conv_w": [], "conv_b": [], "bn_gamma": [], "bn_beta": [],
              "lin_w": [], "lin_b": []}
    for (cin, cout, _s, _p, has_bn) in CONV_CFGS:
        key, k1, k2, k3 = jax.random.split(key, 4)
        # weights_init: Conv weights ~ N(0, 0.02)
        params["conv_w"].append(0.02 * jax.random.normal(k1, (cout, cin, 4, 4),
                                                         jnp.float32))
        params["conv_b"].append(0.01 * jax.random.normal(k2, (cout,),
                                                         jnp.float32))
        if has_bn:
            # weights_init: BN weight ~ N(1, 0.02), bias = 0
            params["bn_gamma"].append(
                1.0 + 0.02 * jax.random.normal(k3, (cout,), jnp.float32))
            params["bn_beta"].append(jnp.zeros((cout,), jnp.float32))
        else:
            params["bn_gamma"].append(None)
            params["bn_beta"].append(None)
    for (fin, fout, _leaky) in LIN_CFGS:
        key, k1, k2 = jax.random.split(key, 3)
        params["lin_w"].append(0.05 * jax.random.normal(k1, (fout, fin),
                                                        jnp.float32))
        params["lin_b"].append(0.01 * jax.random.normal(k2, (fout,),
                                                        jnp.float32))
    return params


def discriminator_forward(params, gaf):
    # gaf: NCHW (batch, 1, 64, 64)
    x = jnp.transpose(gaf, (0, 2, 3, 1)).astype(jnp.float32)  # -> NHWC
    n = x.shape[0]
    for i, (cin, cout, stride, pad, has_bn) in enumerate(CONV_CFGS):
        w = params["conv_w"][i]
        b = params["conv_b"][i]
        # im2col in bf16: halves HBM traffic of the materialized patch matrix.
        a, ho, wo = im2col_nhwc(x.astype(jnp.bfloat16), 4, stride, pad)
        w_mat = jnp.transpose(w, (2, 3, 1, 0)).reshape(16 * cin, cout)
        if has_bn:
            gamma = params["bn_gamma"][i]
            beta = params["bn_beta"][i]
            scale = gamma / jnp.sqrt(1.0 + BN_EPS)  # eval-mode BN fold
            bias = scale * b + beta
        else:
            scale = jnp.ones((cout,), jnp.float32)
            bias = b
        y = fused_matmul_affine(a, w_mat, scale, bias, leaky=True)
        x = y.reshape(n, ho, wo, cout)

    feat = x.reshape(n, 1024)  # x is (n, 1, 1, 1024)
    # TODO(synk): Dropout layers are identity (inference mode).
    v0, pre_c = fused_linear_head(feat, params["lin_w"], params["lin_b"])
    return v0, pre_c


def reference_forward(params, gaf):
    """Pure-JAX reference (lax conv) with identical eval-mode semantics."""
    x = gaf.astype(jnp.float32)
    for i, (cin, cout, stride, pad, has_bn) in enumerate(CONV_CFGS):
        w = params["conv_w"][i]
        b = params["conv_b"][i]
        x = jax.lax.conv_general_dilated(
            x, w, window_strides=(stride, stride),
            padding=[(pad, pad), (pad, pad)],
            dimension_numbers=("NCHW", "OIHW", "NCHW"))
        x = x + b[None, :, None, None]
        if has_bn:
            gamma = params["bn_gamma"][i]
            beta = params["bn_beta"][i]
            x = (gamma[None, :, None, None] * x / jnp.sqrt(1.0 + BN_EPS)
                 + beta[None, :, None, None])
        x = jnp.where(x >= 0.0, x, LEAKY_SLOPE * x)
    h = x.reshape(x.shape[0], 1024)
    for i, (fin, fout, leaky) in enumerate(LIN_CFGS):
        h = h @ params["lin_w"][i].T + params["lin_b"][i]
        if leaky:
            h = jnp.where(h >= 0.0, h, LEAKY_SLOPE * h)
    v0 = h[:, 0]
    pre_c = jax.nn.softmax(h[:, 1:], axis=1)
    return v0, pre_c


if __name__ == "__main__":
    key = jax.random.PRNGKey(0)
    pkey, xkey = jax.random.split(key)
    params = init_params(pkey)
    gaf = jax.random.normal(xkey, (2, 1, 64, 64), jnp.float32)

    fwd = jax.jit(discriminator_forward)
    v0, pre_c = fwd(params, gaf)
    jax.block_until_ready((v0, pre_c))

    assert v0.shape == (2,)
    assert pre_c.shape == (2, 5)

    ref_v0, ref_pc = jax.jit(reference_forward)(params, gaf)
    np.testing.assert_allclose(np.asarray(v0), np.asarray(ref_v0),
                               rtol=5e-2, atol=5e-2)
    np.testing.assert_allclose(np.asarray(pre_c), np.asarray(ref_pc),
                               rtol=5e-2, atol=5e-2)

    print("KERNEL_OK")
</pallas_src>

<mosaic_0001>
module attributes {stable_mosaic.version = 11 : i64} {
  func.func @_matmul_affine_kernel(%arg0: i32, %arg1: i32, %arg2: i32, %arg3: memref<256x16xbf16, #tpu.memory_space<vmem>>, %arg4: memref<16x128xbf16, #tpu.memory_space<vmem>>, %arg5: memref<1x128xf32, #tpu.memory_space<vmem>>, %arg6: memref<1x128xf32, #tpu.memory_space<vmem>>, %arg7: memref<256x128xf32, #tpu.memory_space<vmem>>) attributes {dimension_semantics = [#tpu.dimension_semantics<parallel>, #tpu.dimension_semantics<parallel>, #tpu.dimension_semantics<arbitrary>], iteration_bounds = array<i64: 9, 1, 1>, scalar_prefetch = 0 : i64, scratch_operands = 0 : i64, tpu.core_type = #tpu.core_type<tc>, window_params = [{transform_indices = @transform_0, window_bounds = array<i64: 256, 16>}, {transform_indices = @transform_1, window_bounds = array<i64: 16, 128>}, {transform_indices = @transform_2, window_bounds = array<i64: 1, 128>}, {transform_indices = @transform_3, window_bounds = array<i64: 1, 128>}, {transform_indices = @transform_4, window_bounds = array<i64: 256, 128>}]} {
    %c0_i32 = arith.constant 0 : i32
    %0 = arith.cmpi eq, %arg2, %c0_i32 : i32
    %1 = arith.extui %0 : i1 to i32
    %c0_i32_0 = arith.constant 0 : i32
    %2 = arith.cmpi ne, %1, %c0_i32_0 : i32
    scf.if %2 {
      %cst_10 = arith.constant 0.000000e+00 : f32
      %12 = vector.broadcast %cst_10 : f32 to vector<256x128xf32>
      %c0_11 = arith.constant 0 : index
      %c0_12 = arith.constant 0 : index
      %13 = vector.load %arg7[%c0_11, %c0_12] : memref<256x128xf32, #tpu.memory_space<vmem>>, vector<256x128xf32>
      tpu.vector_store %arg7[%c0_11, %c0_12], %12 {strides = array<i32>} : memref<256x128xf32, #tpu.memory_space<vmem>>, vector<256x128xf32>,
    } else {
    }
    %c0 = arith.constant 0 : index
    %c0_1 = arith.constant 0 : index
    %3 = vector.load %arg7[%c0, %c0_1] : memref<256x128xf32, #tpu.memory_space<vmem>>, vector<256x128xf32>
    %c0_2 = arith.constant 0 : index
    %c0_3 = arith.constant 0 : index
    %4 = vector.load %arg3[%c0_2, %c0_3] : memref<256x16xbf16, #tpu.memory_space<vmem>>, vector<256x16xbf16>
    %c0_4 = arith.constant 0 : index
    %c0_5 = arith.constant 0 : index
    %5 = vector.load %arg4[%c0_4, %c0_5] : memref<16x128xbf16, #tpu.memory_space<vmem>>, vector<16x128xbf16>
    %cst = arith.constant dense<0.000000e+00> : vector<256x128xf32>
    %6 = tpu.matmul %4, %5, %cst {dimension_numbers = #tpu.dot_dimension_numbers<[1], [0], [0], [1], [0, 0, 1, 1], [], []>} : vector<256x16xbf16>, vector<16x128xbf16>, vector<256x128xf32> -> vector<256x128xf32>
    %7 = arith.addf %3, %6 : vector<256x128xf32>
    %c0_6 = arith.constant 0 : index
    %c0_7 = arith.constant 0 : index
    %8 = vector.load %arg7[%c0_6, %c0_7] : memref<256x128xf32, #tpu.memory_space<vmem>>, vector<256x128xf32>
    tpu.vector_store %arg7[%c0_6, %c0_7], %7 {strides = array<i32>} : memref<256x128xf32, #tpu.memory_space<vmem>>, vector<256x128xf32>,
    %c0_i32_8 = arith.constant 0 : i32
    %9 = arith.cmpi eq, %arg2, %c0_i32_8 : i32
    %10 = arith.extui %9 : i1 to i32
    %c0_i32_9 = arith.constant 0 : i32
    %11 = arith.cmpi ne, %10, %c0_i32_9 : i32
    scf.if %11 {
      %c0_10 = arith.constant 0 : index
      %c0_11 = arith.constant 0 : index
      %12 = vector.load %arg7[%c0_10, %c0_11] : memref<256x128xf32, #tpu.memory_space<vmem>>, vector<256x128xf32>
      %c0_12 = arith.constant 0 : index
      %c0_13 = arith.constant 0 : index
      %13 = vector.load %arg5[%c0_12, %c0_13] : memref<1x128xf32, #tpu.memory_space<vmem>>, vector<1x128xf32>
      %14 = vector.broadcast %13 : vector<1x128xf32> to vector<256x128xf32>
      %15 = arith.mulf %12, %14 : vector<256x128xf32>
      %c0_14 = arith.constant 0 : index
      %c0_15 = arith.constant 0 : index
      %16 = vector.load %arg6[%c0_14, %c0_15] : memref<1x128xf32, #tpu.memory_space<vmem>>, vector<1x128xf32>
      %17 = vector.broadcast %16 : vector<1x128xf32> to vector<256x128xf32>
      %18 = arith.addf %15, %17 : vector<256x128xf32>
      %cst_16 = arith.constant 0.000000e+00 : f32
      %19 = vector.broadcast %cst_16 : f32 to vector<256x128xf32>
      %20 = arith.cmpf oge, %18, %19 : vector<256x128xf32>
      %cst_17 = arith.constant 2.000000e-01 : f32
      %21 = vector.broadcast %cst_17 : f32 to vector<256x128xf32>
      %22 = arith.mulf %21, %18 : vector<256x128xf32>
      %23 = arith.select %20, %18, %22 : vector<256x128xi1>, vector<256x128xf32>
      %c0_18 = arith.constant 0 : index
      %c0_19 = arith.constant 0 : index
      %24 = vector.load %arg7[%c0_18, %c0_19] : memref<256x128xf32, #tpu.memory_space<vmem>>, vector<256x128xf32>
      tpu.vector_store %arg7[%c0_18, %c0_19], %23 {strides = array<i32>} : memref<256x128xf32, #tpu.memory_space<vmem>>, vector<256x128xf32>,
    } else {
    }
    return
  }
  func.func @transform_0(%arg0: i32, %arg1: i32, %arg2: i32) -> (i32, i32) {
    %c0_i32 = arith.constant 0 : i32
    return %arg0, %arg2 : i32, i32
  }
  func.func @transform_1(%arg0: i32, %arg1: i32, %arg2: i32) -> (i32, i32) {
    %c0_i32 = arith.constant 0 : i32
    return %arg2, %arg1 : i32, i32
  }
  func.func @transform_2(%arg0: i32, %arg1: i32, %arg2: i32) -> (i32, i32) {
    %c0_i32 = arith.constant 0 : i32
    %c0_i32_0 = arith.constant 0 : i32
    return %c0_i32, %arg1 : i32, i32
  }
  func.func @transform_3(%arg0: i32, %arg1: i32, %arg2: i32) -> (i32, i32) {
    %c0_i32 = arith.constant 0 : i32
    %c0_i32_0 = arith.constant 0 : i32
    return %c0_i32, %arg1 : i32, i32
  }
  func.func @transform_4(%arg0: i32, %arg1: i32, %arg2: i32) -> (i32, i32) {
    %c0_i32 = arith.constant 0 : i32
    return %arg0, %arg1 : i32, i32
  }
}

module attributes {stable_mosaic.version = 11 : i64} {
  func.func @_matmul_affine_kernel(%arg0: i32, %arg1: i32, %arg2: i32, %arg3: memref<256x512xbf16, #tpu.memory_space<vmem>>, %arg4: memref<512x128xbf16, #tpu.memory_space<vmem>>, %arg5: memref<1x128xf32, #tpu.memory_space<vmem>>, %arg6: memref<1x128xf32, #tpu.memory_space<vmem>>, %arg7: memref<256x128xf32, #tpu.memory_space<vmem>>) attributes {dimension_semantics = [#tpu.dimension_semantics<parallel>, #tpu.dimension_semantics<parallel>, #tpu.dimension_semantics<arbitrary>], iteration_bounds = array<i64: 2, 1, 2>, scalar_prefetch = 0 : i64, scratch_operands = 0 : i64, tpu.core_type = #tpu.core_type<tc>, window_params = [{transform_indices = @transform_0, window_bounds = array<i64: 256, 512>}, {transform_indices = @transform_1, window_bounds = array<i64: 512, 128>}, {transform_indices = @transform_2, window_bounds = array<i64: 1, 128>}, {transform_indices = @transform_3, window_bounds = array<i64: 1, 128>}, {transform_indices = @transform_4, window_bounds = array<i64: 256, 128>}]} {
    %c0_i32 = arith.constant 0 : i32
    %0 = arith.cmpi eq, %arg2, %c0_i32 : i32
    %1 = arith.extui %0 : i1 to i32
    %c0_i32_0 = arith.constant 0 : i32
    %2 = arith.cmpi ne, %1, %c0_i32_0 : i32
    scf.if %2 {
      %cst_9 = arith.constant 0.000000e+00 : f32
      %12 = vector.broadcast %cst_9 : f32 to vector<256x128xf32>
      %c0_10 = arith.constant 0 : index
      %c0_11 = arith.constant 0 : index
      %13 = vector.load %arg7[%c0_10, %c0_11] : memref<256x128xf32, #tpu.memory_space<vmem>>, vector<256x128xf32>
      tpu.vector_store %arg7[%c0_10, %c0_11], %12 {strides = array<i32>} : memref<256x128xf32, #tpu.memory_space<vmem>>, vector<256x128xf32>,
    } else {
    }
    %c0 = arith.constant 0 : index
    %c0_1 = arith.constant 0 : index
    %3 = vector.load %arg7[%c0, %c0_1] : memref<256x128xf32, #tpu.memory_space<vmem>>, vector<256x128xf32>
    %c0_2 = arith.constant 0 : index
    %c0_3 = arith.constant 0 : index
    %4 = vector.load %arg3[%c0_2, %c0_3] : memref<256x512xbf16, #tpu.memory_space<vmem>>, vector<256x512xbf16>
    %c0_4 = arith.constant 0 : index
    %c0_5 = arith.constant 0 : index
    %5 = vector.load %arg4[%c0_4, %c0_5] : memref<512x128xbf16, #tpu.memory_space<vmem>>, vector<512x128xbf16>
    %cst = arith.constant dense<0.000000e+00> : vector<256x128xf32>
    %6 = tpu.matmul %4, %5, %cst {dimension_numbers = #tpu.dot_dimension_numbers<[1], [0], [0], [1], [0, 0, 1, 1], [], []>} : vector<256x512xbf16>, vector<512x128xbf16>, vector<256x128xf32> -> vector<256x128xf32>
    %7 = arith.addf %3, %6 : vector<256x128xf32>
    %c0_6 = arith.constant 0 : index
    %c0_7 = arith.constant 0 : index
    %8 = vector.load %arg7[%c0_6, %c0_7] : memref<256x128xf32, #tpu.memory_space<vmem>>, vector<256x128xf32>
    tpu.vector_store %arg7[%c0_6, %c0_7], %7 {strides = array<i32>} : memref<256x128xf32, #tpu.memory_space<vmem>>, vector<256x128xf32>,
    %c1_i32 = arith.constant 1 : i32
    %9 = arith.cmpi eq, %arg2, %c1_i32 : i32
    %10 = arith.extui %9 : i1 to i32
    %c0_i32_8 = arith.constant 0 : i32
    %11 = arith.cmpi ne, %10, %c0_i32_8 : i32
    scf.if %11 {
      %c0_9 = arith.constant 0 : index
      %c0_10 = arith.constant 0 : index
      %12 = vector.load %arg7[%c0_9, %c0_10] : memref<256x128xf32, #tpu.memory_space<vmem>>, vector<256x128xf32>
      %c0_11 = arith.constant 0 : index
      %c0_12 = arith.constant 0 : index
      %13 = vector.load %arg5[%c0_11, %c0_12] : memref<1x128xf32, #tpu.memory_space<vmem>>, vector<1x128xf32>
      %14 = vector.broadcast %13 : vector<1x128xf32> to vector<256x128xf32>
      %15 = arith.mulf %12, %14 : vector<256x128xf32>
      %c0_13 = arith.constant 0 : index
      %c0_14 = arith.constant 0 : index
      %16 = vector.load %arg6[%c0_13, %c0_14] : memref<1x128xf32, #tpu.memory_space<vmem>>, vector<1x128xf32>
      %17 = vector.broadcast %16 : vector<1x128xf32> to vector<256x128xf32>
      %18 = arith.addf %15, %17 : vector<256x128xf32>
      %cst_15 = arith.constant 0.000000e+00 : f32
      %19 = vector.broadcast %cst_15 : f32 to vector<256x128xf32>
      %20 = arith.cmpf oge, %18, %19 : vector<256x128xf32>
      %cst_16 = arith.constant 2.000000e-01 : f32
      %21 = vector.broadcast %cst_16 : f32 to vector<256x128xf32>
      %22 = arith.mulf %21, %18 : vector<256x128xf32>
      %23 = arith.select %20, %18, %22 : vector<256x128xi1>, vector<256x128xf32>
      %c0_17 = arith.constant 0 : index
      %c0_18 = arith.constant 0 : index
      %24 = vector.load %arg7[%c0_17, %c0_18] : memref<256x128xf32, #tpu.memory_space<vmem>>, vector<256x128xf32>
      tpu.vector_store %arg7[%c0_17, %c0_18], %23 {strides = array<i32>} : memref<256x128xf32, #tpu.memory_space<vmem>>, vector<256x128xf32>,
    } else {
    }
    return
  }
  func.func @transform_0(%arg0: i32, %arg1: i32, %arg2: i32) -> (i32, i32) {
    %c0_i32 = arith.constant 0 : i32
    return %arg0, %arg2 : i32, i32
  }
  func.func @transform_1(%arg0: i32, %arg1: i32, %arg2: i32) -> (i32, i32) {
    %c0_i32 = arith.constant 0 : i32
    return %arg2, %arg1 : i32, i32
  }
  func.func @transform_2(%arg0: i32, %arg1: i32, %arg2: i32) -> (i32, i32) {
    %c0_i32 = arith.constant 0 : i32
    %c0_i32_0 = arith.constant 0 : i32
    return %c0_i32, %arg1 : i32, i32
  }
  func.func @transform_3(%arg0: i32, %arg1: i32, %arg2: i32) -> (i32, i32) {
    %c0_i32 = arith.constant 0 : i32
    %c0_i32_0 = arith.constant 0 : i32
    return %c0_i32, %arg1 : i32, i32
  }
  func.func @transform_4(%arg0: i32, %arg1: i32, %arg2: i32) -> (i32, i32) {
    %c0_i32 = arith.constant 0 : i32
    return %arg0, %arg1 : i32, i32
  }
}

module attributes {stable_mosaic.version = 11 : i64} {
  func.func @_matmul_affine_kernel(%arg0: i32, %arg1: i32, %arg2: i32, %arg3: memref<128x512xbf16, #tpu.memory_space<vmem>>, %arg4: memref<512x256xbf16, #tpu.memory_space<vmem>>, %arg5: memref<1x256xf32, #tpu.memory_space<vmem>>, %arg6: memref<1x256xf32, #tpu.memory_space<vmem>>, %arg7: memref<128x256xf32, #tpu.memory_space<vmem>>) attributes {dimension_semantics = [#tpu.dimension_semantics<parallel>, #tpu.dimension_semantics<parallel>, #tpu.dimension_semantics<arbitrary>], iteration_bounds = array<i64: 1, 1, 4>, scalar_prefetch = 0 : i64, scratch_operands = 0 : i64, tpu.core_type = #tpu.core_type<tc>, window_params = [{transform_indices = @transform_0, window_bounds = array<i64: 128, 512>}, {transform_indices = @transform_1, window_bounds = array<i64: 512, 256>}, {transform_indices = @transform_2, window_bounds = array<i64: 1, 256>}, {transform_indices = @transform_3, window_bounds = array<i64: 1, 256>}, {transform_indices = @transform_4, window_bounds = array<i64: 128, 256>}]} {
    %c0_i32 = arith.constant 0 : i32
    %0 = arith.cmpi eq, %arg2, %c0_i32 : i32
    %1 = arith.extui %0 : i1 to i32
    %c0_i32_0 = arith.constant 0 : i32
    %2 = arith.cmpi ne, %1, %c0_i32_0 : i32
    scf.if %2 {
      %cst_9 = arith.constant 0.000000e+00 : f32
      %12 = vector.broadcast %cst_9 : f32 to vector<128x256xf32>
      %c0_10 = arith.constant 0 : index
      %c0_11 = arith.constant 0 : index
      %13 = vector.load %arg7[%c0_10, %c0_11] : memref<128x256xf32, #tpu.memory_space<vmem>>, vector<128x256xf32>
      tpu.vector_store %arg7[%c0_10, %c0_11], %12 {strides = array<i32>} : memref<128x256xf32, #tpu.memory_space<vmem>>, vector<128x256xf32>,
    } else {
    }
    %c0 = arith.constant 0 : index
    %c0_1 = arith.constant 0 : index
    %3 = vector.load %arg7[%c0, %c0_1] : memref<128x256xf32, #tpu.memory_space<vmem>>, vector<128x256xf32>
    %c0_2 = arith.constant 0 : index
    %c0_3 = arith.constant 0 : index
    %4 = vector.load %arg3[%c0_2, %c0_3] : memref<128x512xbf16, #tpu.memory_space<vmem>>, vector<128x512xbf16>
    %c0_4 = arith.constant 0 : index
    %c0_5 = arith.constant 0 : index
    %5 = vector.load %arg4[%c0_4, %c0_5] : memref<512x256xbf16, #tpu.memory_space<vmem>>, vector<512x256xbf16>
    %cst = arith.constant dense<0.000000e+00> : vector<128x256xf32>
    %6 = tpu.matmul %4, %5, %cst {dimension_numbers = #tpu.dot_dimension_numbers<[1], [0], [0], [1], [0, 0, 1, 1], [], []>} : vector<128x512xbf16>, vector<512x256xbf16>, vector<128x256xf32> -> vector<128x256xf32>
    %7 = arith.addf %3, %6 : vector<128x256xf32>
    %c0_6 = arith.constant 0 : index
    %c0_7 = arith.constant 0 : index
    %8 = vector.load %arg7[%c0_6, %c0_7] : memref<128x256xf32, #tpu.memory_space<vmem>>, vector<128x256xf32>
    tpu.vector_store %arg7[%c0_6, %c0_7], %7 {strides = array<i32>} : memref<128x256xf32, #tpu.memory_space<vmem>>, vector<128x256xf32>,
    %c3_i32 = arith.constant 3 : i32
    %9 = arith.cmpi eq, %arg2, %c3_i32 : i32
    %10 = arith.extui %9 : i1 to i32
    %c0_i32_8 = arith.constant 0 : i32
    %11 = arith.cmpi ne, %10, %c0_i32_8 : i32
    scf.if %11 {
      %c0_9 = arith.constant 0 : index
      %c0_10 = arith.constant 0 : index
      %12 = vector.load %arg7[%c0_9, %c0_10] : memref<128x256xf32, #tpu.memory_space<vmem>>, vector<128x256xf32>
      %c0_11 = arith.constant 0 : index
      %c0_12 = arith.constant 0 : index
      %13 = vector.load %arg5[%c0_11, %c0_12] : memref<1x256xf32, #tpu.memory_space<vmem>>, vector<1x256xf32>
      %14 = vector.broadcast %13 : vector<1x256xf32> to vector<128x256xf32>
      %15 = arith.mulf %12, %14 : vector<128x256xf32>
      %c0_13 = arith.constant 0 : index
      %c0_14 = arith.constant 0 : index
      %16 = vector.load %arg6[%c0_13, %c0_14] : memref<1x256xf32, #tpu.memory_space<vmem>>, vector<1x256xf32>
      %17 = vector.broadcast %16 : vector<1x256xf32> to vector<128x256xf32>
      %18 = arith.addf %15, %17 : vector<128x256xf32>
      %cst_15 = arith.constant 0.000000e+00 : f32
      %19 = vector.broadcast %cst_15 : f32 to vector<128x256xf32>
      %20 = arith.cmpf oge, %18, %19 : vector<128x256xf32>
      %cst_16 = arith.constant 2.000000e-01 : f32
      %21 = vector.broadcast %cst_16 : f32 to vector<128x256xf32>
      %22 = arith.mulf %21, %18 : vector<128x256xf32>
      %23 = arith.select %20, %18, %22 : vector<128x256xi1>, vector<128x256xf32>
      %c0_17 = arith.constant 0 : index
      %c0_18 = arith.constant 0 : index
      %24 = vector.load %arg7[%c0_17, %c0_18] : memref<128x256xf32, #tpu.memory_space<vmem>>, vector<128x256xf32>
      tpu.vector_store %arg7[%c0_17, %c0_18], %23 {strides = array<i32>} : memref<128x256xf32, #tpu.memory_space<vmem>>, vector<128x256xf32>,
    } else {
    }
    return
  }
  func.func @transform_0(%arg0: i32, %arg1: i32, %arg2: i32) -> (i32, i32) {
    %c0_i32 = arith.constant 0 : i32
    return %arg0, %arg2 : i32, i32
  }
  func.func @transform_1(%arg0: i32, %arg1: i32, %arg2: i32) -> (i32, i32) {
    %c0_i32 = arith.constant 0 : i32
    return %arg2, %arg1 : i32, i32
  }
  func.func @transform_2(%arg0: i32, %arg1: i32, %arg2: i32) -> (i32, i32) {
    %c0_i32 = arith.constant 0 : i32
    %c0_i32_0 = arith.constant 0 : i32
    return %c0_i32, %arg1 : i32, i32
  }
  func.func @transform_3(%arg0: i32, %arg1: i32, %arg2: i32) -> (i32, i32) {
    %c0_i32 = arith.constant 0 : i32
    %c0_i32_0 = arith.constant 0 : i32
    return %c0_i32, %arg1 : i32, i32
  }
  func.func @transform_4(%arg0: i32, %arg1: i32, %arg2: i32) -> (i32, i32) {
    %c0_i32 = arith.constant 0 : i32
    return %arg0, %arg1 : i32, i32
  }
}

module attributes {stable_mosaic.version = 11 : i64} {
  func.func @_matmul_affine_kernel(%arg0: i32, %arg1: i32, %arg2: i32, %arg3: memref<32x512xbf16, #tpu.memory_space<vmem>>, %arg4: memref<512x256xbf16, #tpu.memory_space<vmem>>, %arg5: memref<1x256xf32, #tpu.memory_space<vmem>>, %arg6: memref<1x256xf32, #tpu.memory_space<vmem>>, %arg7: memref<32x256xf32, #tpu.memory_space<vmem>>) attributes {dimension_semantics = [#tpu.dimension_semantics<parallel>, #tpu.dimension_semantics<parallel>, #tpu.dimension_semantics<arbitrary>], iteration_bounds = array<i64: 1, 2, 8>, scalar_prefetch = 0 : i64, scratch_operands = 0 : i64, tpu.core_type = #tpu.core_type<tc>, window_params = [{transform_indices = @transform_0, window_bounds = array<i64: 32, 512>}, {transform_indices = @transform_1, window_bounds = array<i64: 512, 256>}, {transform_indices = @transform_2, window_bounds = array<i64: 1, 256>}, {transform_indices = @transform_3, window_bounds = array<i64: 1, 256>}, {transform_indices = @transform_4, window_bounds = array<i64: 32, 256>}]} {
    %c0_i32 = arith.constant 0 : i32
    %0 = arith.cmpi eq, %arg2, %c0_i32 : i32
    %1 = arith.extui %0 : i1 to i32
    %c0_i32_0 = arith.constant 0 : i32
    %2 = arith.cmpi ne, %1, %c0_i32_0 : i32
    scf.if %2 {
      %cst_9 = arith.constant 0.000000e+00 : f32
      %12 = vector.broadcast %cst_9 : f32 to vector<32x256xf32>
      %c0_10 = arith.constant 0 : index
      %c0_11 = arith.constant 0 : index
      %13 = vector.load %arg7[%c0_10, %c0_11] : memref<32x256xf32, #tpu.memory_space<vmem>>, vector<32x256xf32>
      tpu.vector_store %arg7[%c0_10, %c0_11], %12 {strides = array<i32>} : memref<32x256xf32, #tpu.memory_space<vmem>>, vector<32x256xf32>,
    } else {
    }
    %c0 = arith.constant 0 : index
    %c0_1 = arith.constant 0 : index
    %3 = vector.load %arg7[%c0, %c0_1] : memref<32x256xf32, #tpu.memory_space<vmem>>, vector<32x256xf32>
    %c0_2 = arith.constant 0 : index
    %c0_3 = arith.constant 0 : index
    %4 = vector.load %arg3[%c0_2, %c0_3] : memref<32x512xbf16, #tpu.memory_space<vmem>>, vector<32x512xbf16>
    %c0_4 = arith.constant 0 : index
    %c0_5 = arith.constant 0 : index
    %5 = vector.load %arg4[%c0_4, %c0_5] : memref<512x256xbf16, #tpu.memory_space<vmem>>, vector<512x256xbf16>
    %cst = arith.constant dense<0.000000e+00> : vector<32x256xf32>
    %6 = tpu.matmul %4, %5, %cst {dimension_numbers = #tpu.dot_dimension_numbers<[1], [0], [0], [1], [0, 0, 1, 1], [], []>} : vector<32x512xbf16>, vector<512x256xbf16>, vector<32x256xf32> -> vector<32x256xf32>
    %7 = arith.addf %3, %6 : vector<32x256xf32>
    %c0_6 = arith.constant 0 : index
    %c0_7 = arith.constant 0 : index
    %8 = vector.load %arg7[%c0_6, %c0_7] : memref<32x256xf32, #tpu.memory_space<vmem>>, vector<32x256xf32>
    tpu.vector_store %arg7[%c0_6, %c0_7], %7 {strides = array<i32>} : memref<32x256xf32, #tpu.memory_space<vmem>>, vector<32x256xf32>,
    %c7_i32 = arith.constant 7 : i32
    %9 = arith.cmpi eq, %arg2, %c7_i32 : i32
    %10 = arith.extui %9 : i1 to i32
    %c0_i32_8 = arith.constant 0 : i32
    %11 = arith.cmpi ne, %10, %c0_i32_8 : i32
    scf.if %11 {
      %c0_9 = arith.constant 0 : index
      %c0_10 = arith.constant 0 : index
      %12 = vector.load %arg7[%c0_9, %c0_10] : memref<32x256xf32, #tpu.memory_space<vmem>>, vector<32x256xf32>
      %c0_11 = arith.constant 0 : index
      %c0_12 = arith.constant 0 : index
      %13 = vector.load %arg5[%c0_11, %c0_12] : memref<1x256xf32, #tpu.memory_space<vmem>>, vector<1x256xf32>
      %14 = vector.broadcast %13 : vector<1x256xf32> to vector<32x256xf32>
      %15 = arith.mulf %12, %14 : vector<32x256xf32>
      %c0_13 = arith.constant 0 : index
      %c0_14 = arith.constant 0 : index
      %16 = vector.load %arg6[%c0_13, %c0_14] : memref<1x256xf32, #tpu.memory_space<vmem>>, vector<1x256xf32>
      %17 = vector.broadcast %16 : vector<1x256xf32> to vector<32x256xf32>
      %18 = arith.addf %15, %17 : vector<32x256xf32>
      %cst_15 = arith.constant 0.000000e+00 : f32
      %19 = vector.broadcast %cst_15 : f32 to vector<32x256xf32>
      %20 = arith.cmpf oge, %18, %19 : vector<32x256xf32>
      %cst_16 = arith.constant 2.000000e-01 : f32
      %21 = vector.broadcast %cst_16 : f32 to vector<32x256xf32>
      %22 = arith.mulf %21, %18 : vector<32x256xf32>
      %23 = arith.select %20, %18, %22 : vector<32x256xi1>, vector<32x256xf32>
      %c0_17 = arith.constant 0 : index
      %c0_18 = arith.constant 0 : index
      %24 = vector.load %arg7[%c0_17, %c0_18] : memref<32x256xf32, #tpu.memory_space<vmem>>, vector<32x256xf32>
      tpu.vector_store %arg7[%c0_17, %c0_18], %23 {strides = array<i32>} : memref<32x256xf32, #tpu.memory_space<vmem>>, vector<32x256xf32>,
    } else {
    }
    return
  }
  func.func @transform_0(%arg0: i32, %arg1: i32, %arg2: i32) -> (i32, i32) {
    %c0_i32 = arith.constant 0 : i32
    return %arg0, %arg2 : i32, i32
  }
  func.func @transform_1(%arg0: i32, %arg1: i32, %arg2: i32) -> (i32, i32) {
    %c0_i32 = arith.constant 0 : i32
    return %arg2, %arg1 : i32, i32
  }
  func.func @transform_2(%arg0: i32, %arg1: i32, %arg2: i32) -> (i32, i32) {
    %c0_i32 = arith.constant 0 : i32
    %c0_i32_0 = arith.constant 0 : i32
    return %c0_i32, %arg1 : i32, i32
  }
  func.func @transform_3(%arg0: i32, %arg1: i32, %arg2: i32) -> (i32, i32) {
    %c0_i32 = arith.constant 0 : i32
    %c0_i32_0 = arith.constant 0 : i32
    return %c0_i32, %arg1 : i32, i32
  }
  func.func @transform_4(%arg0: i32, %arg1: i32, %arg2: i32) -> (i32, i32) {
    %c0_i32 = arith.constant 0 : i32
    return %arg0, %arg1 : i32, i32
  }
}

module attributes {stable_mosaic.version = 11 : i64} {
  func.func @_matmul_affine_kernel(%arg0: i32, %arg1: i32, %arg2: i32, %arg3: memref<16x512xbf16, #tpu.memory_space<vmem>>, %arg4: memref<512x256xbf16, #tpu.memory_space<vmem>>, %arg5: memref<1x256xf32, #tpu.memory_space<vmem>>, %arg6: memref<1x256xf32, #tpu.memory_space<vmem>>, %arg7: memref<16x256xf32, #tpu.memory_space<vmem>>) attributes {dimension_semantics = [#tpu.dimension_semantics<parallel>, #tpu.dimension_semantics<parallel>, #tpu.dimension_semantics<arbitrary>], iteration_bounds = array<i64: 1, 4, 16>, scalar_prefetch = 0 : i64, scratch_operands = 0 : i64, tpu.core_type = #tpu.core_type<tc>, window_params = [{transform_indices = @transform_0, window_bounds = array<i64: 16, 512>}, {transform_indices = @transform_1, window_bounds = array<i64: 512, 256>}, {transform_indices = @transform_2, window_bounds = array<i64: 1, 256>}, {transform_indices = @transform_3, window_bounds = array<i64: 1, 256>}, {transform_indices = @transform_4, window_bounds = array<i64: 16, 256>}]} {
    %c0_i32 = arith.constant 0 : i32
    %0 = arith.cmpi eq, %arg2, %c0_i32 : i32
    %1 = arith.extui %0 : i1 to i32
    %c0_i32_0 = arith.constant 0 : i32
    %2 = arith.cmpi ne, %1, %c0_i32_0 : i32
    scf.if %2 {
      %cst_9 = arith.constant 0.000000e+00 : f32
      %12 = vector.broadcast %cst_9 : f32 to vector<16x256xf32>
      %c0_10 = arith.constant 0 : index
      %c0_11 = arith.constant 0 : index
      %13 = vector.load %arg7[%c0_10, %c0_11] : memref<16x256xf32, #tpu.memory_space<vmem>>, vector<16x256xf32>
      tpu.vector_store %arg7[%c0_10, %c0_11], %12 {strides = array<i32>} : memref<16x256xf32, #tpu.memory_space<vmem>>, vector<16x256xf32>,
    } else {
    }
    %c0 = arith.constant 0 : index
    %c0_1 = arith.constant 0 : index
    %3 = vector.load %arg7[%c0, %c0_1] : memref<16x256xf32, #tpu.memory_space<vmem>>, vector<16x256xf32>
    %c0_2 = arith.constant 0 : index
    %c0_3 = arith.constant 0 : index
    %4 = vector.load %arg3[%c0_2, %c0_3] : memref<16x512xbf16, #tpu.memory_space<vmem>>, vector<16x512xbf16>
    %c0_4 = arith.constant 0 : index
    %c0_5 = arith.constant 0 : index
    %5 = vector.load %arg4[%c0_4, %c0_5] : memref<512x256xbf16, #tpu.memory_space<vmem>>, vector<512x256xbf16>
    %cst = arith.constant dense<0.000000e+00> : vector<16x256xf32>
    %6 = tpu.matmul %4, %5, %cst {dimension_numbers = #tpu.dot_dimension_numbers<[1], [0], [0], [1], [0, 0, 1, 1], [], []>} : vector<16x512xbf16>, vector<512x256xbf16>, vector<16x256xf32> -> vector<16x256xf32>
    %7 = arith.addf %3, %6 : vector<16x256xf32>
    %c0_6 = arith.constant 0 : index
    %c0_7 = arith.constant 0 : index
    %8 = vector.load %arg7[%c0_6, %c0_7] : memref<16x256xf32, #tpu.memory_space<vmem>>, vector<16x256xf32>
    tpu.vector_store %arg7[%c0_6, %c0_7], %7 {strides = array<i32>} : memref<16x256xf32, #tpu.memory_space<vmem>>, vector<16x256xf32>,
    %c15_i32 = arith.constant 15 : i32
    %9 = arith.cmpi eq, %arg2, %c15_i32 : i32
    %10 = arith.extui %9 : i1 to i32
    %c0_i32_8 = arith.constant 0 : i32
    %11 = arith.cmpi ne, %10, %c0_i32_8 : i32
    scf.if %11 {
      %c0_9 = arith.constant 0 : index
      %c0_10 = arith.constant 0 : index
      %12 = vector.load %arg7[%c0_9, %c0_10] : memref<16x256xf32, #tpu.memory_space<vmem>>, vector<16x256xf32>
      %c0_11 = arith.constant 0 : index
      %c0_12 = arith.constant 0 : index
      %13 = vector.load %arg5[%c0_11, %c0_12] : memref<1x256xf32, #tpu.memory_space<vmem>>, vector<1x256xf32>
      %14 = vector.broadcast %13 : vector<1x256xf32> to vector<16x256xf32>
      %15 = arith.mulf %12, %14 : vector<16x256xf32>
      %c0_13 = arith.constant 0 : index
      %c0_14 = arith.constant 0 : index
      %16 = vector.load %arg6[%c0_13, %c0_14] : memref<1x256xf32, #tpu.memory_space<vmem>>, vector<1x256xf32>
      %17 = vector.broadcast %16 : vector<1x256xf32> to vector<16x256xf32>
      %18 = arith.addf %15, %17 : vector<16x256xf32>
      %cst_15 = arith.constant 0.000000e+00 : f32
      %19 = vector.broadcast %cst_15 : f32 to vector<16x256xf32>
      %20 = arith.cmpf oge, %18, %19 : vector<16x256xf32>
      %cst_16 = arith.constant 2.000000e-01 : f32
      %21 = vector.broadcast %cst_16 : f32 to vector<16x256xf32>
      %22 = arith.mulf %21, %18 : vector<16x256xf32>
      %23 = arith.select %20, %18, %22 : vector<16x256xi1>, vector<16x256xf32>
      %c0_17 = arith.constant 0 : index
      %c0_18 = arith.constant 0 : index
      %24 = vector.load %arg7[%c0_17, %c0_18] : memref<16x256xf32, #tpu.memory_space<vmem>>, vector<16x256xf32>
      tpu.vector_store %arg7[%c0_17, %c0_18], %23 {strides = array<i32>} : memref<16x256xf32, #tpu.memory_space<vmem>>, vector<16x256xf32>,
    } else {
    }
    return
  }
  func.func @transform_0(%arg0: i32, %arg1: i32, %arg2: i32) -> (i32, i32) {
    %c0_i32 = arith.constant 0 : i32
    return %arg0, %arg2 : i32, i32
  }
  func.func @transform_1(%arg0: i32, %arg1: i32, %arg2: i32) -> (i32, i32) {
    %c0_i32 = arith.constant 0 : i32
    return %arg2, %arg1 : i32, i32
  }
  func.func @transform_2(%arg0: i32, %arg1: i32, %arg2: i32) -> (i32, i32) {
    %c0_i32 = arith.constant 0 : i32
    %c0_i32_0 = arith.constant 0 : i32
    return %c0_i32, %arg1 : i32, i32
  }
  func.func @transform_3(%arg0: i32, %arg1: i32, %arg2: i32) -> (i32, i32) {
    %c0_i32 = arith.constant 0 : i32
    %c0_i32_0 = arith.constant 0 : i32
    return %c0_i32, %arg1 : i32, i32
  }
  func.func @transform_4(%arg0: i32, %arg1: i32, %arg2: i32) -> (i32, i32) {
    %c0_i32 = arith.constant 0 : i32
    return %arg0, %arg1 : i32, i32
  }
}

module attributes {stable_mosaic.version = 11 : i64} {
  func.func @_fused_linear_head_kernel(%arg0: i32, %arg1: memref<16x1024xbf16, #tpu.memory_space<vmem>>, %arg2: memref<1024x512xbf16, #tpu.memory_space<vmem>>, %arg3: memref<1x512xf32, #tpu.memory_space<vmem>>, %arg4: memref<512x256xbf16, #tpu.memory_space<vmem>>, %arg5: memref<1x256xf32, #tpu.memory_space<vmem>>, %arg6: memref<256x128xbf16, #tpu.memory_space<vmem>>, %arg7: memref<1x128xf32, #tpu.memory_space<vmem>>, %arg8: memref<16x128xf32, #tpu.memory_space<vmem>>) attributes {dimension_semantics = [#tpu.dimension_semantics<parallel>], iteration_bounds = array<i64: 1>, scalar_prefetch = 0 : i64, scratch_operands = 0 : i64, tpu.core_type = #tpu.core_type<tc>, window_params = [{transform_indices = @transform_0, window_bounds = array<i64: 16, 1024>}, {pipeline_mode = #tpu.pipeline_mode<synchronous>, transform_indices = @transform_1, window_bounds = array<i64: 1024, 512>}, {pipeline_mode = #tpu.pipeline_mode<synchronous>, transform_indices = @transform_2, window_bounds = array<i64: 1, 512>}, {pipeline_mode = #tpu.pipeline_mode<synchronous>, transform_indices = @transform_3, window_bounds = array<i64: 512, 256>}, {pipeline_mode = #tpu.pipeline_mode<synchronous>, transform_indices = @transform_4, window_bounds = array<i64: 1, 256>}, {pipeline_mode = #tpu.pipeline_mode<synchronous>, transform_indices = @transform_5, window_bounds = array<i64: 256, 128>}, {pipeline_mode = #tpu.pipeline_mode<synchronous>, transform_indices = @transform_6, window_bounds = array<i64: 1, 128>}, {transform_indices = @transform_7, window_bounds = array<i64: 16, 128>}]} {
    %c0 = arith.constant 0 : index
    %c0_0 = arith.constant 0 : index
    %0 = vector.load %arg1[%c0, %c0_0] : memref<16x1024xbf16, #tpu.memory_space<vmem>>, vector<16x1024xbf16>
    %c0_1 = arith.constant 0 : index
    %c0_2 = arith.constant 0 : index
    %1 = vector.load %arg2[%c0_1, %c0_2] : memref<1024x512xbf16, #tpu.memory_space<vmem>>, vector<1024x512xbf16>
    %cst = arith.constant dense<0.000000e+00> : vector<16x512xf32>
    %2 = tpu.matmul %0, %1, %cst {dimension_numbers = #tpu.dot_dimension_numbers<[1], [0], [0], [1], [0, 0, 1, 1], [], []>} : vector<16x1024xbf16>, vector<1024x512xbf16>, vector<16x512xf32> -> vector<16x512xf32>
    %c0_3 = arith.constant 0 : index
    %c0_4 = arith.constant 0 : index
    %3 = vector.load %arg3[%c0_3, %c0_4] : memref<1x512xf32, #tpu.memory_space<vmem>>, vector<1x512xf32>
    %4 = vector.broadcast %3 : vector<1x512xf32> to vector<16x512xf32>
    %5 = arith.addf %2, %4 : vector<16x512xf32>
    %cst_5 = arith.constant 0.000000e+00 : f32
    %6 = vector.broadcast %cst_5 : f32 to vector<16x512xf32>
    %7 = arith.cmpf oge, %5, %6 : vector<16x512xf32>
    %cst_6 = arith.constant 2.000000e-01 : f32
    %8 = vector.broadcast %cst_6 : f32 to vector<16x512xf32>
    %9 = arith.mulf %8, %5 : vector<16x512xf32>
    %10 = arith.select %7, %5, %9 : vector<16x512xi1>, vector<16x512xf32>
    %11 = arith.truncf %10 : vector<16x512xf32> to vector<16x512xbf16>
    %c0_7 = arith.constant 0 : index
    %c0_8 = arith.constant 0 : index
    %12 = vector.load %arg4[%c0_7, %c0_8] : memref<512x256xbf16, #tpu.memory_space<vmem>>, vector<512x256xbf16>
    %cst_9 = arith.constant dense<0.000000e+00> : vector<16x256xf32>
    %13 = tpu.matmul %11, %12, %cst_9 {dimension_numbers = #tpu.dot_dimension_numbers<[1], [0], [0], [1], [0, 0, 1, 1], [], []>} : vector<16x512xbf16>, vector<512x256xbf16>, vector<16x256xf32> -> vector<16x256xf32>
    %c0_10 = arith.constant 0 : index
    %c0_11 = arith.constant 0 : index
    %14 = vector.load %arg5[%c0_10, %c0_11] : memref<1x256xf32, #tpu.memory_space<vmem>>, vector<1x256xf32>
    %15 = vector.broadcast %14 : vector<1x256xf32> to vector<16x256xf32>
    %16 = arith.addf %13, %15 : vector<16x256xf32>
    %cst_12 = arith.constant 0.000000e+00 : f32
    %17 = vector.broadcast %cst_12 : f32 to vector<16x256xf32>
    %18 = arith.cmpf oge, %16, %17 : vector<16x256xf32>
    %cst_13 = arith.constant 2.000000e-01 : f32
    %19 = vector.broadcast %cst_13 : f32 to vector<16x256xf32>
    %20 = arith.mulf %19, %16 : vector<16x256xf32>
    %21 = arith.select %18, %16, %20 : vector<16x256xi1>, vector<16x256xf32>
    %22 = arith.truncf %21 : vector<16x256xf32> to vector<16x256xbf16>
    %c0_14 = arith.constant 0 : index
    %c0_15 = arith.constant 0 : index
    %23 = vector.load %arg6[%c0_14, %c0_15] : memref<256x128xbf16, #tpu.memory_space<vmem>>, vector<256x128xbf16>
    %cst_16 = arith.constant dense<0.000000e+00> : vector<16x128xf32>
    %24 = tpu.matmul %22, %23, %cst_16 {dimension_numbers = #tpu.dot_dimension_numbers<[1], [0], [0], [1], [0, 0, 1, 1], [], []>} : vector<16x256xbf16>, vector<256x128xbf16>, vector<16x128xf32> -> vector<16x128xf32>
    %c0_17 = arith.constant 0 : index
    %c0_18 = arith.constant 0 : index
    %25 = vector.load %arg7[%c0_17, %c0_18] : memref<1x128xf32, #tpu.memory_space<vmem>>, vector<1x128xf32>
    %26 = vector.broadcast %25 : vector<1x128xf32> to vector<16x128xf32>
    %27 = arith.addf %24, %26 : vector<16x128xf32>
    %28 = tpu.iota {dimensions = array<i32: 1>} : vector<16x128xi32>
    %c1_i32 = arith.constant 1 : i32
    %29 = vector.broadcast %c1_i32 : i32 to vector<16x128xi32>
    %30 = arith.cmpi sge, %28, %29 : vector<16x128xi32>
    %c5_i32 = arith.constant 5 : i32
    %31 = vector.broadcast %c5_i32 : i32 to vector<16x128xi32>
    %32 = arith.cmpi sle, %28, %31 : vector<16x128xi32>
    %33 = arith.andi %30, %32 : vector<16x128xi1>
    %cst_19 = arith.constant -1.000000e+30 : f32
    %34 = vector.broadcast %cst_19 : f32 to vector<16x128xf32>
    %35 = arith.select %33, %27, %34 : vector<16x128xi1>, vector<16x128xf32>
    %cst_20 = arith.constant dense<0xFF800000> : vector<16xf32>
    %36 = vector.multi_reduction <maximumf>, %35, %cst_20 [1] : vector<16x128xf32> to vector<16xf32>
    %37 = vector.shape_cast %36 : vector<16xf32> to vector<16x1xf32>
    %38 = vector.broadcast %37 : vector<16x1xf32> to vector<16x128xf32>
    %39 = arith.subf %27, %38 : vector<16x128xf32>
    %40 = math.exp %39 : vector<16x128xf32>
    %cst_21 = arith.constant 0.000000e+00 : f32
    %41 = vector.broadcast %cst_21 : f32 to vector<16x128xf32>
    %42 = arith.select %33, %40, %41 : vector<16x128xi1>, vector<16x128xf32>
    %cst_22 = arith.constant dense<0.000000e+00> : vector<16xf32>
    %43 = vector.multi_reduction <add>, %42, %cst_22 [1] : vector<16x128xf32> to vector<16xf32>
    %44 = vector.shape_cast %43 : vector<16xf32> to vector<16x1xf32>
    %45 = tpu.reciprocal %44 {approx = true} : vector<16x1xf32> -> vector<16x1xf32>
    %46 = vector.broadcast %45 : vector<16x1xf32> to vector<16x128xf32>
    %47 = arith.mulf %42, %46 : vector<16x128xf32>
    %c0_i32 = arith.constant 0 : i32
    %48 = vector.broadcast %c0_i32 : i32 to vector<16x128xi32>
    %49 = arith.cmpi eq, %28, %48 : vector<16x128xi32>
    %50 = arith.select %49, %27, %47 : vector<16x128xi1>, vector<16x128xf32>
    %c0_23 = arith.constant 0 : index
    %c0_24 = arith.constant 0 : index
    %51 = vector.load %arg8[%c0_23, %c0_24] : memref<16x128xf32, #tpu.memory_space<vmem>>, vector<16x128xf32>
    tpu.vector_store %arg8[%c0_23, %c0_24], %50 {strides = array<i32>} : memref<16x128xf32, #tpu.memory_space<vmem>>, vector<16x128xf32>,
    return
  }
  func.func @transform_0(%arg0: i32) -> (i32, i32) {
    %c0_i32 = arith.constant 0 : i32
    %c0_i32_0 = arith.constant 0 : i32
    return %arg0, %c0_i32 : i32, i32
  }
  func.func @transform_1(%arg0: i32) -> (i32, i32) {
    %c0_i32 = arith.constant 0 : i32
    %c0_i32_0 = arith.constant 0 : i32
    %c0_i32_1 = arith.constant 0 : i32
    return %c0_i32, %c0_i32_0 : i32, i32
  }
  func.func @transform_2(%arg0: i32) -> (i32, i32) {
    %c0_i32 = arith.constant 0 : i32
    %c0_i32_0 = arith.constant 0 : i32
    %c0_i32_1 = arith.constant 0 : i32
    return %c0_i32, %c0_i32_0 : i32, i32
  }
  func.func @transform_3(%arg0: i32) -> (i32, i32) {
    %c0_i32 = arith.constant 0 : i32
    %c0_i32_0 = arith.constant 0 : i32
    %c0_i32_1 = arith.constant 0 : i32
    return %c0_i32, %c0_i32_0 : i32, i32
  }
  func.func @transform_4(%arg0: i32) -> (i32, i32) {
    %c0_i32 = arith.constant 0 : i32
    %c0_i32_0 = arith.constant 0 : i32
    %c0_i32_1 = arith.constant 0 : i32
    return %c0_i32, %c0_i32_0 : i32, i32
  }
  func.func @transform_5(%arg0: i32) -> (i32, i32) {
    %c0_i32 = arith.constant 0 : i32
    %c0_i32_0 = arith.constant 0 : i32
    %c0_i32_1 = arith.constant 0 : i32
    return %c0_i32, %c0_i32_0 : i32, i32
  }
  func.func @transform_6(%arg0: i32) -> (i32, i32) {
    %c0_i32 = arith.constant 0 : i32
    %c0_i32_0 = arith.constant 0 : i32
    %c0_i32_1 = arith.constant 0 : i32
    return %c0_i32, %c0_i32_0 : i32, i32
  }
  func.func @transform_7(%arg0: i32) -> (i32, i32) {
    %c0_i32 = arith.constant 0 : i32
    %c0_i32_0 = arith.constant 0 : i32
    return %arg0, %c0_i32 : i32, i32
  }
}

</mosaic_0001>

<bundles_post_ra>
// kernel: discriminator_forward.6
= control target key start
LH: loop header
LB: loop body
LE: loop exit
PB: predicated region body
PF: predicated region fallthrough
CT: control target
= control target key end

     0   :  { %s1320_s15 = smov 0   ;;  %s1322_s16 = smov 0   ;;  %s1505_s0 = inlined_call_operand.vmem [shape: bf16[2304,16], index: 0, kind: input, shape index: {}]   ;;  %s1506_s1 = inlined_call_operand.vmem [shape: bf16[16,128], index: 1, kind: input, shape index: {}]   ;;  %s1507_s2 = inlined_call_operand.vmem [shape: f32[1,128], index: 2, kind: input, shape index: {}]   ;;  %s1508_s3 = inlined_call_operand.vmem [shape: f32[1,128], index: 3, kind: input, shape index: {}]   ;;  %s1509_s4 = inlined_call_operand.vmem [shape: f32[2304,128], index: 4, kind: output, shape index: {}]  }
   0x1   :  { %s1324_s17 = smov 0  }
   0x2 LB: > { %s33_s18 = sadd.s32 1, %s1289_s16  ;;  %p1134_p0 = scmp.ge.s32.totalorder %s1293_s17, 1  ;;  %s1293_s17 = sphi %s1324_s17, %s14_s17   ;;  %s1289_s16 = sphi %s1322_s16, %s1511_s16   ;;  %s1285_s15 = sphi %s1320_s15, %s1510_s15  }
   0x3   : > { %p35_p1 = scmp.ge.s32.totalorder %s33_s18, 9  ;;  %p221_p2 = scmp.lt.s32.totalorder %s1293_s17, 10 }
   0x5   : > { %s1513_s18 = smov (%p35_p1, %s33_s18), 0  ;;  %p222_p3 = pnand %p1134_p0, %p221_p2 }
   0x6   : > { %s1135_s21 = sshll.u32 (!%p222_p3), %s1285_s15, 5 }
   0x7   : > { %225 = sbr.rel (%p222_p3) target bundleno = 257 (0x101), region = 36  ;;  %p268_p4 = scmp.lt.s32.totalorder (!%p222_p3), %s1135_s21, 287 }
   0xc   : > { %v1254_v0 = vld [vmem:[%s1506_s1] sm:$0xff]   ;;  %s1515_s21 = smov (!%p268_p4, %s1135_s21), 287  ;;  %vm489_vm0 = vcmask 130048  }
   0xd   : > { %1193 = vmatprep.subr.bf16.mxu0 %v1254_v0  ;;  %1227 = vmatprep.subr.bf16.mxu1 %v1254_v0  ;;  %s1136_s22 = sshll.u32 %s1515_s21, 2  ;;  %v1384_v18 = vld [vmem:[%s1507_s2] ss:$0 sm:$0xff]  ;;  %s1138_s30 = sshll.u32 %s1515_s21, 3 }
   0xe   : > { %1194 = vmatpush3.bf16.msra.mxu0 %v1254_v0  ;;  %1228 = vmatpush3.bf16.msra.mxu1 %v1254_v0  ;;  %s1347_s25 = scalar_lea.vmem %s1505_s0, %s1136_s22  ;;  %v1389_v20 = vld [vmem:[%s1508_s3] ss:$0 sm:$0xff]  ;;  %s1401_s7 = scalar_lea.vmem %s1509_s4, %s1138_s30 }
   0xf   : > { %v1255_v1 = vld [vmem:[%s1347_s25] sm:$0xff]   ;;  %v1257_v3 = vld [vmem:[%s1347_s25 + $0x8] sm:$0xff]   ;;  %v1259_v5 = vld [vmem:[%s1347_s25 + $0x10] sm:$0xff]  }
  0x10   : > { %v1256_v2 = vld [vmem:[%s1347_s25 + $0x40] sm:$0xff]   ;;  %1195 = vmatprep.mubr.msk.bf16.mxu0 %vm489_vm0, %v1255_v1  ;;  %v1258_v4 = vld [vmem:[%s1347_s25 + $0x48] sm:$0xff]   ;;  %v1260_v6 = vld [vmem:[%s1347_s25 + $0x50] sm:$0xff]  }
  0x11   : > { %1211 = vmatprep.mubr.msk.bf16.mxu1 %vm489_vm0, %v1256_v2  ;;  %1196 = vmatmul.mubr.msk.bf16.vlgmr.msra.gmra.mxu0 %vm489_vm0, %v1257_v3  ;;  %v1261_v7 = vld [vmem:[%s1347_s25 + $0x18] sm:$0xff]   ;;  %v1263_v9 = vld [vmem:[%s1347_s25 + $0x20] sm:$0xff]   ;;  %v1265_v11 = vld [vmem:[%s1347_s25 + $0x28] sm:$0xff]  }
  0x12   : > { %1212 = vmatmul.mubr.msk.bf16.vlgmr.msra.gmra.mxu1 %vm489_vm0, %v1258_v4  ;;  %1199 = vmatprep.mubr.msk.bf16.mxu0 %vm489_vm0, %v1259_v5  ;;  %v1262_v8 = vld [vmem:[%s1347_s25 + $0x58] sm:$0xff]   ;;  %v1264_v10 = vld [vmem:[%s1347_s25 + $0x60] sm:$0xff]   ;;  %v1266_v12 = vld [vmem:[%s1347_s25 + $0x68] sm:$0xff]  }
  0x13   : > { %1215 = vmatprep.mubr.msk.bf16.mxu1 %vm489_vm0, %v1260_v6  ;;  %v1267_v13 = vld [vmem:[%s1347_s25 + $0x30] sm:$0xff]   ;;  %v1269_v15 = vld [vmem:[%s1347_s25 + $0x38] sm:$0xff]  }
  0x14   : > { %v1268_v14 = vld [vmem:[%s1347_s25 + $0x70] sm:$0xff]   ;;  %v1270_v16 = vld [vmem:[%s1347_s25 + $0x78] sm:$0xff]  }
  0x19   : > { %1200 = vmatmul.mubr.msk.bf16.gmra.mxu0 %vm489_vm0, %v1261_v7 }
  0x1a   : > { %1216 = vmatmul.mubr.msk.bf16.gmra.mxu1 %vm489_vm0, %v1262_v8  ;;  %1203 = vmatprep.mubr.msk.bf16.mxu0 %vm489_vm0, %v1263_v9 }
  0x1b   : > { %1219 = vmatprep.mubr.msk.bf16.mxu1 %vm489_vm0, %v1264_v10 }
  0x21   : > { %1204 = vmatmul.mubr.msk.bf16.gmra.mxu0 %vm489_vm0, %v1265_v11 }
  0x22   : > { %1220 = vmatmul.mubr.msk.bf16.gmra.mxu1 %vm489_vm0, %v1266_v12  ;;  %1207 = vmatprep.mubr.msk.bf16.mxu0 %vm489_vm0, %v1267_v13 }
  0x23   : > { %1223 = vmatprep.mubr.msk.bf16.mxu1 %vm489_vm0, %v1268_v14 }
  0x29   : > { %1208 = vmatmul.mubr.msk.bf16.gmra.mxu0 %vm489_vm0, %v1269_v15 }
  0x2a   : > { %1224 = vmatmul.mubr.msk.bf16.gmra.mxu1 %vm489_vm0, %v1270_v16 }
  0xd1   : > { %v1197_v17 = vpop.f32.mrf.mxu0 }
  0xd2   : > { %v1213_v19 = vpop.f32.mrf.mxu1  ;;  %v807_v22 = vmul.f32 %v1197_v17, %v1384_v18 }
  0xd3   : > { %v572_v21 = vpop.f32.mrf.mxu0  ;;  %v823_v24 = vmul.f32 %v1213_v19, %v1384_v18 }
  0xd4   : > { %v636_v23 = vpop.f32.mrf.mxu1  ;;  %v846_v26 = vadd.f32 %v1389_v20, %v807_v22  ;;  %v805_v27 = vmul.f32 %v1384_v18, %v572_v21 }
  0xd5   : > { %v1198_v25 = vpop.f32.mrf.mxu0  ;;  %v862_v29 = vadd.f32 %v1389_v20, %v823_v24  ;;  %v821_v30 = vmul.f32 %v1384_v18, %v636_v23 }
  0xd6   : > { %v1214_v28 = vpop.f32.mrf.mxu1  ;;  %vm878_vm1 = vcmp.ge.f32.partialorder %v846_v26, 0.0  ;;  %v910_v32 = vmul.f32 0.2, %v846_v26  ;;  %v844_v33 = vadd.f32 %v1389_v20, %v805_v27  ;;  %v808_v34 = vmul.f32 %v1198_v25, %v1384_v18 }
  0xd7   : > { %v575_v31 = vpop.f32.mrf.mxu0  ;;  %vm894_vm2 = vcmp.ge.f32.partialorder %v862_v29, 0.0  ;;  %v926_v36 = vmul.f32 0.2, %v862_v29  ;;  %v860_v37 = vadd.f32 %v1389_v20, %v821_v30  ;;  %v824_v38 = vmul.f32 %v1214_v28, %v1384_v18 }
  0xd8   : > { %v639_v35 = vpop.f32.mrf.mxu1  ;;  %v942_v40 = vsel %vm878_vm1, %v846_v26, %v910_v32  ;;  %vm876_vm3 = vcmp.ge.f32.partialorder %v844_v33, 0.0  ;;  %v908_v41 = vmul.f32 0.2, %v844_v33  ;;  %v847_v42 = vadd.f32 %v1389_v20, %v808_v34 }
  0xd9   : > { %v1201_v39 = vpop.f32.mrf.mxu0  ;;  %974 = vst [vmem:[%s1401_s7 + $0x10] sm:$0xff] %v942_v40  ;;  %v958_v44 = vsel %vm894_vm2, %v862_v29, %v926_v36  ;;  %vm892_vm4 = vcmp.ge.f32.partialorder %v860_v37, 0.0  ;;  %v924_v45 = vmul.f32 0.2, %v860_v37  ;;  %v863_v46 = vadd.f32 %v1389_v20, %v824_v38 }
  0xda   : > { %v1217_v43 = vpop.f32.mrf.mxu1  ;;  %990 = vst [vmem:[%s1401_s7 + $0x90] sm:$0xff] %v958_v44  ;;  %v940_v48 = vsel %vm876_vm3, %v844_v33, %v908_v41  ;;  %vm879_vm5 = vcmp.ge.f32.partialorder %v847_v42, 0.0  ;;  %v911_v49 = vmul.f32 0.2, %v847_v42  ;;  %v806_v55 = vmul.f32 %v1384_v18, %v575_v31 }
  0xdb   : > { %v588_v47 = vpop.f32.mrf.mxu0  ;;  %972 = vst [vmem:[%s1401_s7] sm:$0xff] %v940_v48  ;;  %v956_v51 = vsel %vm892_vm4, %v860_v37, %v924_v45  ;;  %vm895_vm6 = vcmp.ge.f32.partialorder %v863_v46, 0.0  ;;  %v927_v52 = vmul.f32 0.2, %v863_v46  ;;  %v822_v58 = vmul.f32 %v1384_v18, %v639_v35 }
  0xdc   : > { %v652_v50 = vpop.f32.mrf.mxu1  ;;  %988 = vst [vmem:[%s1401_s7 + $0x80] sm:$0xff] %v956_v51  ;;  %v943_v54 = vsel %vm879_vm5, %v847_v42, %v911_v49  ;;  %v845_v60 = vadd.f32 %v1389_v20, %v806_v55  ;;  %v811_v61 = vmul.f32 %v1201_v39, %v1384_v18  ;;  %v827_v62 = vmul.f32 %v1217_v43, %v1384_v18 }
  0xdd   : > { %v1202_v53 = vpop.f32.mrf.mxu0  ;;  %975 = vst [vmem:[%s1401_s7 + $0x18] sm:$0xff] %v943_v54  ;;  %v959_v57 = vsel %vm895_vm6, %v863_v46, %v927_v52  ;;  %v861_v0 = vadd.f32 %v1389_v20, %v822_v58  ;;  %v809_v1 = vmul.f32 %v1384_v18, %v588_v47  ;;  %v825_v2 = vmul.f32 %v1384_v18, %v652_v50 }
  0xde   : > { %v1218_v56 = vpop.f32.mrf.mxu1  ;;  %991 = vst [vmem:[%s1401_s7 + $0x98] sm:$0xff] %v959_v57  ;;  %vm877_vm7 = vcmp.ge.f32.partialorder %v845_v60, 0.0  ;;  %v909_v4 = vmul.f32 0.2, %v845_v60  ;;  %v850_v5 = vadd.f32 %v1389_v20, %v811_v61  ;;  %v866_v6 = vadd.f32 %v1389_v20, %v827_v62 }
  0xdf   : > { %v591_v59 = vpop.f32.mrf.mxu0  ;;  %vm893_vm8 = vcmp.ge.f32.partialorder %v861_v0, 0.0  ;;  %v925_v8 = vmul.f32 0.2, %v861_v0  ;;  %v848_v9 = vadd.f32 %v1389_v20, %v809_v1  ;;  %v864_v10 = vadd.f32 %v1389_v20, %v825_v2 }
  0xe0   : > { %v655_v63 = vpop.f32.mrf.mxu1  ;;  %v941_v12 = vsel %vm877_vm7, %v845_v60, %v909_v4  ;;  %vm882_vm9 = vcmp.ge.f32.partialorder %v850_v5, 0.0  ;;  %v914_v13 = vmul.f32 0.2, %v850_v5  ;;  %vm898_vm10 = vcmp.ge.f32.partialorder %v866_v6, 0.0 }
  0xe1   : > { %v1205_v3 = vpop.f32.mrf.mxu0  ;;  %973 = vst [vmem:[%s1401_s7 + $0x8] sm:$0xff] %v941_v12  ;;  %v957_v15 = vsel %vm893_vm8, %v861_v0, %v925_v8  ;;  %v930_v16 = vmul.f32 0.2, %v866_v6  ;;  %vm880_vm11 = vcmp.ge.f32.partialorder %v848_v9, 0.0  ;;  %v912_v17 = vmul.f32 0.2, %v848_v9 }
  0xe2   : > { %v1221_v7 = vpop.f32.mrf.mxu1  ;;  %989 = vst [vmem:[%s1401_s7 + $0x88] sm:$0xff] %v957_v15  ;;  %v946_v19 = vsel %vm882_vm9, %v850_v5, %v914_v13  ;;  %vm896_vm12 = vcmp.ge.f32.partialorder %v864_v10, 0.0  ;;  %v928_v21 = vmul.f32 0.2, %v864_v10  ;;  %v812_v22 = vmul.f32 %v1202_v53, %v1384_v18 }
  0xe3   : > { %v604_v11 = vpop.f32.mrf.mxu0  ;;  %978 = vst [vmem:[%s1401_s7 + $0x30] sm:$0xff] %v946_v19  ;;  %v962_v24 = vsel %vm898_vm10, %v866_v6, %v930_v16  ;;  %v944_v25 = vsel %vm880_vm11, %v848_v9, %v912_v17  ;;  %v828_v26 = vmul.f32 %v1218_v56, %v1384_v18  ;;  %v810_v31 = vmul.f32 %v1384_v18, %v591_v59 }
  0xe4   : > { %v1427_v14 = vpop.f32.mrf.mxu1  ;;  %994 = vst [vmem:[%s1401_s7 + $0xb0] sm:$0xff] %v962_v24  ;;  %976 = vst [vmem:[%s1401_s7 + $0x20] sm:$0xff] %v944_v25  ;;  %v960_v28 = vsel %vm896_vm12, %v864_v10, %v928_v21  ;;  %v851_v29 = vadd.f32 %v1389_v20, %v812_v22  ;;  %v826_v33 = vmul.f32 %v1384_v18, %v655_v63 }
  0xe5   : > { %v1206_v23 = vpop.f32.mrf.mxu0  ;;  %992 = vst [vmem:[%s1401_s7 + $0xa0] sm:$0xff] %v960_v28  ;;  %v867_v30 = vadd.f32 %v1389_v20, %v828_v26  ;;  %v815_v34 = vmul.f32 %v1205_v3, %v1384_v18  ;;  %v849_v37 = vadd.f32 %v1389_v20, %v810_v31  ;;  %v831_v38 = vmul.f32 %v1221_v7, %v1384_v18 }
  0xe6   : > { %v1222_v27 = vpop.f32.mrf.mxu1  ;;  %vm883_vm13 = vcmp.ge.f32.partialorder %v851_v29, 0.0  ;;  %v915_v32 = vmul.f32 0.2, %v851_v29  ;;  %v865_v41 = vadd.f32 %v1389_v20, %v826_v33  ;;  %v813_v43 = vmul.f32 %v1384_v18, %v604_v11 }
  0xe7   : > { %v607_v35 = vpop.f32.mrf.mxu0  ;;  %vm899_vm14 = vcmp.ge.f32.partialorder %v867_v30, 0.0  ;;  %v931_v36 = vmul.f32 0.2, %v867_v30  ;;  %v854_v42 = vadd.f32 %v1389_v20, %v815_v34  ;;  %vm881_vm15 = vcmp.ge.f32.partialorder %v849_v37, 0.0 }
  0xe8   : > { %v671_v39 = vpop.f32.mrf.mxu1  ;;  %v947_v40 = vsel %vm883_vm13, %v851_v29, %v915_v32  ;;  %v913_v45 = vmul.f32 0.2, %v849_v37  ;;  %v870_v46 = vadd.f32 %v1389_v20, %v831_v38  ;;  %vm897_vm0 = vcmp.ge.f32.partialorder %v865_v41, 0.0 }
  0xe9   : > { %979 = vst [vmem:[%s1401_s7 + $0x38] sm:$0xff] %v947_v40  ;;  %v963_v44 = vsel %vm899_vm14, %v867_v30, %v931_v36  ;;  %v929_v47 = vmul.f32 0.2, %v865_v41  ;;  %vm886_vm1 = vcmp.ge.f32.partialorder %v854_v42, 0.0  ;;  %v918_v48 = vmul.f32 0.2, %v854_v42  ;;  %v1209_v49 = vpop.f32.mrf.mxu0 }
  0xea   : > { %995 = vst [vmem:[%s1401_s7 + $0xb8] sm:$0xff] %v963_v44  ;;  %v945_v50 = vsel %vm881_vm15, %v849_v37, %v913_v45  ;;  %vm902_vm2 = vcmp.ge.f32.partialorder %v870_v46, 0.0  ;;  %v934_v51 = vmul.f32 0.2, %v870_v46  ;;  %v852_v52 = vadd.f32 %v1389_v20, %v813_v43  ;;  %v1225_v53 = vpop.f32.mrf.mxu1 }
  0xeb   : > { %977 = vst [vmem:[%s1401_s7 + $0x28] sm:$0xff] %v945_v50  ;;  %v961_v54 = vsel %vm897_vm0, %v865_v41, %v929_v47  ;;  %v950_v55 = vsel %vm886_vm1, %v854_v42, %v918_v48  ;;  %v829_v58 = vmul.f32 %v1384_v18, %v1427_v14  ;;  %v816_v59 = vmul.f32 %v1206_v23, %v1384_v18  ;;  %v620_v60 = vpop.f32.mrf.mxu0 }
  0xec   : > { %993 = vst [vmem:[%s1401_s7 + $0xa8] sm:$0xff] %v961_v54  ;;  %982 = vst [vmem:[%s1401_s7 + $0x50] sm:$0xff] %v950_v55  ;;  %v966_v56 = vsel %vm902_vm2, %v870_v46, %v934_v51  ;;  %vm884_vm3 = vcmp.ge.f32.partialorder %v852_v52, 0.0  ;;  %v916_v57 = vmul.f32 0.2, %v852_v52  ;;  %v832_v62 = vmul.f32 %v1222_v27, %v1384_v18  ;;  %v684_v63 = vpop.f32.mrf.mxu1 }
  0xed   : > { %998 = vst [vmem:[%s1401_s7 + $0xd0] sm:$0xff] %v966_v56  ;;  %v868_v0 = vadd.f32 %v1389_v20, %v829_v58  ;;  %v855_v1 = vadd.f32 %v1389_v20, %v816_v59  ;;  %v814_v2 = vmul.f32 %v1384_v18, %v607_v35  ;;  %v830_v3 = vmul.f32 %v1384_v18, %v671_v39  ;;  %v1210_v9 = vpop.f32.mrf.mxu0 }
  0xee   : > { %v948_v61 = vsel %vm884_vm3, %v852_v52, %v916_v57  ;;  %v871_v4 = vadd.f32 %v1389_v20, %v832_v62  ;;  %v819_v5 = vmul.f32 %v1209_v49, %v1384_v18  ;;  %v835_v6 = vmul.f32 %v1225_v53, %v1384_v18  ;;  %v1226_v13 = vpop.f32.mrf.mxu1 }
  0xef   : > { %980 = vst [vmem:[%s1401_s7 + $0x40] sm:$0xff] %v948_v61  ;;  %vm900_vm4 = vcmp.ge.f32.partialorder %v868_v0, 0.0  ;;  %v932_v7 = vmul.f32 0.2, %v868_v0  ;;  %vm887_vm5 = vcmp.ge.f32.partialorder %v855_v1, 0.0  ;;  %v853_v11 = vadd.f32 %v1389_v20, %v814_v2  ;;  %v623_v24 = vpop.f32.mrf.mxu0 }
  0xf0   : > { %v919_v8 = vmul.f32 0.2, %v855_v1  ;;  %vm903_vm6 = vcmp.ge.f32.partialorder %v871_v4, 0.0  ;;  %v935_v10 = vmul.f32 0.2, %v871_v4  ;;  %v869_v12 = vadd.f32 %v1389_v20, %v830_v3  ;;  %v687_v28 = vpop.f32.mrf.mxu1 }
  0xf1   : > { %v964_v14 = vsel %vm900_vm4, %v868_v0, %v932_v7  ;;  %v858_v16 = vadd.f32 %v1389_v20, %v819_v5  ;;  %v874_v17 = vadd.f32 %v1389_v20, %v835_v6  ;;  %vm885_vm7 = vcmp.ge.f32.partialorder %v853_v11, 0.0 }
  0xf2   : > { %v951_v15 = vsel %vm887_vm5, %v855_v1, %v919_v8  ;;  %996 = vst [vmem:[%s1401_s7 + $0xc0] sm:$0xff] %v964_v14  ;;  %v967_v19 = vsel %vm903_vm6, %v871_v4, %v935_v10  ;;  %v917_v21 = vmul.f32 0.2, %v853_v11  ;;  %vm901_vm8 = vcmp.ge.f32.partialorder %v869_v12, 0.0 }
  0xf3   : > { %983 = vst [vmem:[%s1401_s7 + $0x58] sm:$0xff] %v951_v15  ;;  %999 = vst [vmem:[%s1401_s7 + $0xd8] sm:$0xff] %v967_v19  ;;  %v933_v22 = vmul.f32 0.2, %v869_v12  ;;  %vm890_vm9 = vcmp.ge.f32.partialorder %v858_v16, 0.0  ;;  %vm906_vm10 = vcmp.ge.f32.partialorder %v874_v17, 0.0  ;;  %v817_v27 = vmul.f32 %v1384_v18, %v620_v60 }
  0xf4   : > { %v922_v23 = vmul.f32 0.2, %v858_v16  ;;  %v949_v25 = vsel %vm885_vm7, %v853_v11, %v917_v21  ;;  %v938_v26 = vmul.f32 0.2, %v874_v17  ;;  %v833_v33 = vmul.f32 %v1384_v18, %v684_v63 }
  0xf5   : > { %981 = vst [vmem:[%s1401_s7 + $0x48] sm:$0xff] %v949_v25  ;;  %v965_v29 = vsel %vm901_vm8, %v869_v12, %v933_v22  ;;  %v856_v32 = vadd.f32 %v1389_v20, %v817_v27  ;;  %v820_v34 = vmul.f32 %v1210_v9, %v1384_v18  ;;  %v836_v35 = vmul.f32 %v1226_v13, %v1384_v18 }
  0xf6   : > { %v954_v30 = vsel %vm890_vm9, %v858_v16, %v922_v23  ;;  %997 = vst [vmem:[%s1401_s7 + $0xc8] sm:$0xff] %v965_v29  ;;  %v970_v31 = vsel %vm906_vm10, %v874_v17, %v938_v26  ;;  %v872_v37 = vadd.f32 %v1389_v20, %v833_v33  ;;  %v818_v38 = vmul.f32 %v1384_v18, %v623_v24 }
  0xf7   : > { %986 = vst [vmem:[%s1401_s7 + $0x70] sm:$0xff] %v954_v30  ;;  %1002 = vst [vmem:[%s1401_s7 + $0xf0] sm:$0xff] %v970_v31  ;;  %vm888_vm11 = vcmp.ge.f32.partialorder %v856_v32, 0.0  ;;  %v920_v36 = vmul.f32 0.2, %v856_v32  ;;  %v859_v39 = vadd.f32 %v1389_v20, %v820_v34  ;;  %v875_v40 = vadd.f32 %v1389_v20, %v836_v35 }
  0xf8   : > { %v834_v41 = vmul.f32 %v1384_v18, %v687_v28  ;;  %vm904_vm12 = vcmp.ge.f32.partialorder %v872_v37, 0.0  ;;  %v936_v43 = vmul.f32 0.2, %v872_v37  ;;  %v857_v44 = vadd.f32 %v1389_v20, %v818_v38 }
  0xf9   : > { %v952_v42 = vsel %vm888_vm11, %v856_v32, %v920_v36  ;;  %vm891_vm13 = vcmp.ge.f32.partialorder %v859_v39, 0.0  ;;  %v923_v45 = vmul.f32 0.2, %v859_v39  ;;  %vm907_vm14 = vcmp.ge.f32.partialorder %v875_v40, 0.0 }
  0xfa   : > { %984 = vst [vmem:[%s1401_s7 + $0x60] sm:$0xff] %v952_v42  ;;  %v939_v46 = vmul.f32 0.2, %v875_v40  ;;  %v968_v47 = vsel %vm904_vm12, %v872_v37, %v936_v43  ;;  %vm889_vm15 = vcmp.ge.f32.partialorder %v857_v44, 0.0  ;;  %v921_v48 = vmul.f32 0.2, %v857_v44 }
  0xfb   : > { %v873_v49 = vadd.f32 %v1389_v20, %v834_v41  ;;  %1000 = vst [vmem:[%s1401_s7 + $0xe0] sm:$0xff] %v968_v47  ;;  %v955_v18 = vsel %vm891_vm13, %v859_v39, %v923_v45 }
  0xfc   : > { %v971_v50 = vsel %vm907_vm14, %v875_v40, %v939_v46  ;;  %987 = vst [vmem:[%s1401_s7 + $0x78] sm:$0xff] %v955_v18  ;;  %v953_v51 = vsel %vm889_vm15, %v857_v44, %v921_v48 }
  0xfd   : > { %1003 = vst [vmem:[%s1401_s7 + $0xf8] sm:$0xff] %v971_v50  ;;  %vm905_vm0 = vcmp.ge.f32.partialorder %v873_v49, 0.0  ;;  %v937_v52 = vmul.f32 0.2, %v873_v49  ;;  %985 = vst [vmem:[%s1401_s7 + $0x68] sm:$0xff] %v953_v51 }
  0xff   : > { %v969_v53 = vsel %vm905_vm0, %v873_v49, %v937_v52 }
 0x100   : > { %1001 = vst [vmem:[%s1401_s7 + $0xe8] sm:$0xff] %v969_v53 }
 0x101 PF: > { %s14_s17 = sadd.s32 1, %s1293_s17   ;;  %s1510_s15 = smov %s1289_s16 }
 0x102   : > { %p11_p5 = scmp.ge.s32.totalorder %s14_s17, 11   ;;  %s1511_s16 = smov %s1513_s18 }
 0x104   :  { %13 = sbr.rel (!%p11_p5) target bundleno = 2 (0x2), region = 83 }

// kernel: discriminator_forward.7
= control target key start
LH: loop header
LB: loop body
LE: loop exit
PB: predicated region body
PF: predicated region fallthrough
CT: control target
= control target key end

     0   :  { %s2517_s15 = smov 0   ;;  %s2519_s16 = smov 0   ;;  %s3081_s0 = inlined_call_operand.vmem [shape: bf16[512,1024], index: 0, kind: input, shape index: {}]   ;;  %s3082_s1 = inlined_call_operand.vmem [shape: bf16[1024,128], index: 1, kind: input, shape index: {}]   ;;  %s3083_s2 = inlined_call_operand.vmem [shape: f32[1,128], index: 2, kind: input, shape index: {}]   ;;  %s3084_s3 = inlined_call_operand.vmem [shape: f32[1,128], index: 3, kind: input, shape index: {}]   ;;  %s3085_s4 = inlined_call_operand.vmem [shape: f32[512,128], index: 4, kind: output, shape index: {}]  }
   0x1   :  { %s2521_s17 = smov 0   ;;  %s2523_s18 = smov 0  }
   0x2   :  { %s2525_s19 = smov 0   ;;  %s2527_s20 = smov 0  }
   0x3   :  { %s2529_s21 = smov 0  }
   0x4 LB: > { %s26_s22 = sadd.s32 1, %s2481_s19  ;;  %s33_s23 = sadd.s32 1, %s2485_s20  ;;  %s2489_s21 = sphi %s2529_s21, %s14_s21   ;;  %s2485_s20 = sphi %s2527_s20, %s3091_s20   ;;  %s2481_s19 = sphi %s2525_s19, %s3090_s19   ;;  %s2477_s18 = sphi %s2523_s18, %s3089_s18   ;;  %s2473_s17 = sphi %s2521_s17, %s3088_s17   ;;  %s2469_s16 = sphi %s2519_s16, %s3087_s16   ;;  %s2465_s15 = sphi %s2517_s15, %s3086_s15  }
   0x5   : > { %p27_p0 = scmp.ge.s32.totalorder %s26_s22, 2  ;;  %p49_p1 = scmp.ne.s32.totalorder %s2469_s16, %s2465_s15 }
   0x6   : > { %p50_p2 = scmp.eq.s32.totalorder %s2489_s21, 0  ;;  %s42_s27 = sadd.s32 1, %s2469_s16 }
   0x7   : > { %s3093_s22 = smov (%p27_p0, %s26_s22), 0  ;;  %s3095_s23 = smov (!%p27_p0, %s33_s23), %s2485_s20 }
   0x8   : > { %p51_p3 = por %p50_p2, %p49_p1  ;;  %p35_p4 = scmp.ge.s32.totalorder %s3095_s23, 2 }
   0x9   : > { %s38_s24 = ssub.s32 %s2481_s19, %s3093_s22  ;;  %p1911_p6 = scmp.ge.s32.totalorder %s2489_s21, 4 }
   0xa   : > { %s3097_s23 = smov (%p35_p4, %s3095_s23), 0 }
   0xb   : > { %s37_s25 = ssub.s32 %s2485_s20, %s3097_s23  ;;  %195 = sbr.rel (%p1911_p6) target bundleno = 55 (0x37), region = 24 }
   0xc   : > { %s39_s26 = sor.u32 %s38_s24, %s37_s25 }
   0xd   : > { %p40_p5 = scmp.eq.s32.totalorder %s39_s26, 0 }
   0xf   : > { %s2568_s28 = scalar_select %p40_p5, %s2469_s16, %s42_s27  }
  0x10   : > { %198 = sbr.rel (!%p51_p3) target bundleno = 55 (0x37), region = 28  ;;  %s200_s29 = sand.u32 (%p51_p3), 1, %s2469_s16  }
  0x11   : > { %s1914_s30 = sshll.u32 (%p51_p3), %s2481_s19, 2  ;;  %s1912_s5 = sshll.u32 (%p51_p3), %s200_s29, 9 }
  0x12   : > { %s2025_s6 = sshll.u32 (%p51_p3), %s2485_s20, 8  ;;  %s2582_s12 = scalar_lea.vmem (%p51_p3), [#allocation2], %s1912_s5 }
  0x13   : > { %s206_s7 = sadd.s32 (%p51_p3), %s2025_s6, %s1914_s30 }
  0x14   : > { %s1916_s8 = sshll.u32 (%p51_p3), %s206_s7, 2 }
  0x15   : > { %s2577_s11 = scalar_lea.vmem %s3081_s0, %s1916_s8 }
  0x16   : > { %v221_v0 = vld [vmem:[%s2577_s11] sm:$0xff]  ;;  %v223_v1 = vld [vmem:[%s2577_s11 + $0x8] sm:$0xff] }
  0x17   : > { %v225_v2 = vld [vmem:[%s2577_s11 + $0x20] sm:$0xff]  ;;  %222 = vst [vmem:[%s2582_s12] sm:$0xff] %v221_v0  ;;  %224 = vst [vmem:[%s2582_s12 + $0x8] sm:$0xff] %v223_v1  ;;  %v227_v3 = vld [vmem:[%s2577_s11 + $0x28] sm:$0xff] }
  0x18   : > { %226 = vst [vmem:[%s2582_s12 + $0x10] sm:$0xff] %v225_v2  ;;  %v229_v4 = vld [vmem:[%s2577_s11 + $0x40] sm:$0xff]  ;;  %v231_v5 = vld [vmem:[%s2577_s11 + $0x48] sm:$0xff]  ;;  %228 = vst [vmem:[%s2582_s12 + $0x18] sm:$0xff] %v227_v3 }
  0x19   : > { %230 = vst [vmem:[%s2582_s12 + $0x20] sm:$0xff] %v229_v4  ;;  %232 = vst [vmem:[%s2582_s12 + $0x28] sm:$0xff] %v231_v5  ;;  %v233_v6 = vld [vmem:[%s2577_s11 + $0x60] sm:$0xff]  ;;  %v235_v7 = vld [vmem:[%s2577_s11 + $0x68] sm:$0xff] }
  0x1a   : > { %v237_v8 = vld [vmem:[%s2577_s11 + $0x80] sm:$0xff]  ;;  %234 = vst [vmem:[%s2582_s12 + $0x30] sm:$0xff] %v233_v6  ;;  %236 = vst [vmem:[%s2582_s12 + $0x38] sm:$0xff] %v235_v7  ;;  %v239_v9 = vld [vmem:[%s2577_s11 + $0x88] sm:$0xff] }
  0x1b   : > { %238 = vst [vmem:[%s2582_s12 + $0x40] sm:$0xff] %v237_v8  ;;  %v241_v10 = vld [vmem:[%s2577_s11 + $0xa0] sm:$0xff]  ;;  %v243_v11 = vld [vmem:[%s2577_s11 + $0xa8] sm:$0xff]  ;;  %240 = vst [vmem:[%s2582_s12 + $0x48] sm:$0xff] %v239_v9 }
  0x1c   : > { %242 = vst [vmem:[%s2582_s12 + $0x50] sm:$0xff] %v241_v10  ;;  %244 = vst [vmem:[%s2582_s12 + $0x58] sm:$0xff] %v243_v11  ;;  %v245_v12 = vld [vmem:[%s2577_s11 + $0xc0] sm:$0xff]  ;;  %v247_v13 = vld [vmem:[%s2577_s11 + $0xc8] sm:$0xff] }
  0x1d   : > { %v249_v14 = vld [vmem:[%s2577_s11 + $0xe0] sm:$0xff]  ;;  %246 = vst [vmem:[%s2582_s12 + $0x60] sm:$0xff] %v245_v12  ;;  %248 = vst [vmem:[%s2582_s12 + $0x68] sm:$0xff] %v247_v13  ;;  %v251_v15 = vld [vmem:[%s2577_s11 + $0xe8] sm:$0xff] }
  0x1e   : > { %250 = vst [vmem:[%s2582_s12 + $0x70] sm:$0xff] %v249_v14  ;;  %v253_v16 = vld [vmem:[%s2577_s11 + $0x100] sm:$0xff]  ;;  %v255_v17 = vld [vmem:[%s2577_s11 + $0x108] sm:$0xff]  ;;  %252 = vst [vmem:[%s2582_s12 + $0x78] sm:$0xff] %v251_v15 }
  0x1f   : > { %254 = vst [vmem:[%s2582_s12 + $0x80] sm:$0xff] %v253_v16  ;;  %256 = vst [vmem:[%s2582_s12 + $0x88] sm:$0xff] %v255_v17  ;;  %v257_v18 = vld [vmem:[%s2577_s11 + $0x120] sm:$0xff]  ;;  %v259_v19 = vld [vmem:[%s2577_s11 + $0x128] sm:$0xff] }
  0x20   : > { %v261_v20 = vld [vmem:[%s2577_s11 + $0x140] sm:$0xff]  ;;  %258 = vst [vmem:[%s2582_s12 + $0x90] sm:$0xff] %v257_v18  ;;  %260 = vst [vmem:[%s2582_s12 + $0x98] sm:$0xff] %v259_v19  ;;  %v263_v21 = vld [vmem:[%s2577_s11 + $0x148] sm:$0xff] }
  0x21   : > { %262 = vst [vmem:[%s2582_s12 + $0xa0] sm:$0xff] %v261_v20  ;;  %v265_v22 = vld [vmem:[%s2577_s11 + $0x160] sm:$0xff]  ;;  %v267_v23 = vld [vmem:[%s2577_s11 + $0x168] sm:$0xff]  ;;  %264 = vst [vmem:[%s2582_s12 + $0xa8] sm:$0xff] %v263_v21 }
  0x22   : > { %266 = vst [vmem:[%s2582_s12 + $0xb0] sm:$0xff] %v265_v22  ;;  %268 = vst [vmem:[%s2582_s12 + $0xb8] sm:$0xff] %v267_v23  ;;  %v269_v24 = vld [vmem:[%s2577_s11 + $0x180] sm:$0xff]  ;;  %v271_v25 = vld [vmem:[%s2577_s11 + $0x188] sm:$0xff] }
  0x23   : > { %v273_v26 = vld [vmem:[%s2577_s11 + $0x1a0] sm:$0xff]  ;;  %270 = vst [vmem:[%s2582_s12 + $0xc0] sm:$0xff] %v269_v24  ;;  %272 = vst [vmem:[%s2582_s12 + $0xc8] sm:$0xff] %v271_v25  ;;  %v275_v27 = vld [vmem:[%s2577_s11 + $0x1a8] sm:$0xff] }
  0x24   : > { %274 = vst [vmem:[%s2582_s12 + $0xd0] sm:$0xff] %v273_v26  ;;  %v277_v28 = vld [vmem:[%s2577_s11 + $0x1c0] sm:$0xff]  ;;  %v279_v29 = vld [vmem:[%s2577_s11 + $0x1c8] sm:$0xff]  ;;  %276 = vst [vmem:[%s2582_s12 + $0xd8] sm:$0xff] %v275_v27 }
  0x25   : > { %278 = vst [vmem:[%s2582_s12 + $0xe0] sm:$0xff] %v277_v28  ;;  %280 = vst [vmem:[%s2582_s12 + $0xe8] sm:$0xff] %v279_v29  ;;  %v281_v30 = vld [vmem:[%s2577_s11 + $0x1e0] sm:$0xff]  ;;  %v283_v31 = vld [vmem:[%s2577_s11 + $0x1e8] sm:$0xff] }
  0x26   : > { %v285_v32 = vld [vmem:[%s2577_s11 + $0x200] sm:$0xff]  ;;  %282 = vst [vmem:[%s2582_s12 + $0xf0] sm:$0xff] %v281_v30  ;;  %284 = vst [vmem:[%s2582_s12 + $0xf8] sm:$0xff] %v283_v31  ;;  %v287_v33 = vld [vmem:[%s2577_s11 + $0x208] sm:$0xff] }
  0x27   : > { %286 = vst [vmem:[%s2582_s12 + $0x100] sm:$0xff] %v285_v32  ;;  %v289_v34 = vld [vmem:[%s2577_s11 + $0x220] sm:$0xff]  ;;  %v291_v35 = vld [vmem:[%s2577_s11 + $0x228] sm:$0xff]  ;;  %288 = vst [vmem:[%s2582_s12 + $0x108] sm:$0xff] %v287_v33 }
  0x28   : > { %290 = vst [vmem:[%s2582_s12 + $0x110] sm:$0xff] %v289_v34  ;;  %292 = vst [vmem:[%s2582_s12 + $0x118] sm:$0xff] %v291_v35  ;;  %v293_v36 = vld [vmem:[%s2577_s11 + $0x240] sm:$0xff]  ;;  %v295_v37 = vld [vmem:[%s2577_s11 + $0x248] sm:$0xff] }
  0x29   : > { %v297_v38 = vld [vmem:[%s2577_s11 + $0x260] sm:$0xff]  ;;  %294 = vst [vmem:[%s2582_s12 + $0x120] sm:$0xff] %v293_v36  ;;  %296 = vst [vmem:[%s2582_s12 + $0x128] sm:$0xff] %v295_v37  ;;  %v299_v39 = vld [vmem:[%s2577_s11 + $0x268] sm:$0xff] }
  0x2a   : > { %298 = vst [vmem:[%s2582_s12 + $0x130] sm:$0xff] %v297_v38  ;;  %v301_v40 = vld [vmem:[%s2577_s11 + $0x280] sm:$0xff]  ;;  %v303_v41 = vld [vmem:[%s2577_s11 + $0x288] sm:$0xff]  ;;  %300 = vst [vmem:[%s2582_s12 + $0x138] sm:$0xff] %v299_v39 }
  0x2b   : > { %302 = vst [vmem:[%s2582_s12 + $0x140] sm:$0xff] %v301_v40  ;;  %304 = vst [vmem:[%s2582_s12 + $0x148] sm:$0xff] %v303_v41  ;;  %v305_v42 = vld [vmem:[%s2577_s11 + $0x2a0] sm:$0xff]  ;;  %v307_v43 = vld [vmem:[%s2577_s11 + $0x2a8] sm:$0xff] }
  0x2c   : > { %v309_v44 = vld [vmem:[%s2577_s11 + $0x2c0] sm:$0xff]  ;;  %306 = vst [vmem:[%s2582_s12 + $0x150] sm:$0xff] %v305_v42  ;;  %308 = vst [vmem:[%s2582_s12 + $0x158] sm:$0xff] %v307_v43  ;;  %v311_v45 = vld [vmem:[%s2577_s11 + $0x2c8] sm:$0xff] }
  0x2d   : > { %310 = vst [vmem:[%s2582_s12 + $0x160] sm:$0xff] %v309_v44  ;;  %v313_v46 = vld [vmem:[%s2577_s11 + $0x2e0] sm:$0xff]  ;;  %v315_v47 = vld [vmem:[%s2577_s11 + $0x2e8] sm:$0xff]  ;;  %312 = vst [vmem:[%s2582_s12 + $0x168] sm:$0xff] %v311_v45 }
  0x2e   : > { %314 = vst [vmem:[%s2582_s12 + $0x170] sm:$0xff] %v313_v46  ;;  %316 = vst [vmem:[%s2582_s12 + $0x178] sm:$0xff] %v315_v47  ;;  %v317_v48 = vld [vmem:[%s2577_s11 + $0x300] sm:$0xff]  ;;  %v319_v49 = vld [vmem:[%s2577_s11 + $0x308] sm:$0xff] }
  0x2f   : > { %v321_v50 = vld [vmem:[%s2577_s11 + $0x320] sm:$0xff]  ;;  %318 = vst [vmem:[%s2582_s12 + $0x180] sm:$0xff] %v317_v48  ;;  %320 = vst [vmem:[%s2582_s12 + $0x188] sm:$0xff] %v319_v49  ;;  %v323_v51 = vld [vmem:[%s2577_s11 + $0x328] sm:$0xff] }
  0x30   : > { %322 = vst [vmem:[%s2582_s12 + $0x190] sm:$0xff] %v321_v50  ;;  %v325_v52 = vld [vmem:[%s2577_s11 + $0x340] sm:$0xff]  ;;  %v327_v53 = vld [vmem:[%s2577_s11 + $0x348] sm:$0xff]  ;;  %324 = vst [vmem:[%s2582_s12 + $0x198] sm:$0xff] %v323_v51 }
  0x31   : > { %326 = vst [vmem:[%s2582_s12 + $0x1a0] sm:$0xff] %v325_v52  ;;  %328 = vst [vmem:[%s2582_s12 + $0x1a8] sm:$0xff] %v327_v53  ;;  %v329_v54 = vld [vmem:[%s2577_s11 + $0x360] sm:$0xff]  ;;  %v331_v55 = vld [vmem:[%s2577_s11 + $0x368] sm:$0xff] }
  0x32   : > { %v333_v56 = vld [vmem:[%s2577_s11 + $0x380] sm:$0xff]  ;;  %330 = vst [vmem:[%s2582_s12 + $0x1b0] sm:$0xff] %v329_v54  ;;  %332 = vst [vmem:[%s2582_s12 + $0x1b8] sm:$0xff] %v331_v55  ;;  %v335_v57 = vld [vmem:[%s2577_s11 + $0x388] sm:$0xff] }
  0x33   : > { %334 = vst [vmem:[%s2582_s12 + $0x1c0] sm:$0xff] %v333_v56  ;;  %v337_v58 = vld [vmem:[%s2577_s11 + $0x3a0] sm:$0xff]  ;;  %v339_v59 = vld [vmem:[%s2577_s11 + $0x3a8] sm:$0xff]  ;;  %336 = vst [vmem:[%s2582_s12 + $0x1c8] sm:$0xff] %v335_v57 }
  0x34   : > { %338 = vst [vmem:[%s2582_s12 + $0x1d0] sm:$0xff] %v337_v58  ;;  %340 = vst [vmem:[%s2582_s12 + $0x1d8] sm:$0xff] %v339_v59  ;;  %v341_v60 = vld [vmem:[%s2577_s11 + $0x3c0] sm:$0xff]  ;;  %v343_v61 = vld [vmem:[%s2577_s11 + $0x3c8] sm:$0xff] }
  0x35   : > { %v345_v62 = vld [vmem:[%s2577_s11 + $0x3e0] sm:$0xff]  ;;  %342 = vst [vmem:[%s2582_s12 + $0x1e0] sm:$0xff] %v341_v60  ;;  %344 = vst [vmem:[%s2582_s12 + $0x1e8] sm:$0xff] %v343_v61  ;;  %v347_v63 = vld [vmem:[%s2577_s11 + $0x3e8] sm:$0xff] }
  0x36   : > { %346 = vst [vmem:[%s2582_s12 + $0x1f0] sm:$0xff] %v345_v62  ;;  %348 = vst [vmem:[%s2582_s12 + $0x1f8] sm:$0xff] %v347_v63 }
  0x37 PF: > { %p1917_p7 = scmp.ge.s32.totalorder %s2489_s21, 1  ;;  %p365_p8 = scmp.lt.s32.totalorder %s2489_s21, 5 }
  0x39   : > { %p366_p9 = pnand %p1917_p7, %p365_p8 }
  0x3a   : > { %s372_s13 = sand.u32 (!%p366_p9), 1, %s2465_s15   ;;  %s1919_s14 = sshll.u32 (!%p366_p9), %s2473_s17, 6 }
  0x3b   : > { %369 = sbr.rel (%p366_p9) target bundleno = 497 (0x1f1), region = 55  ;;  %s1918_s24 = sshll.u32 (!%p366_p9), %s372_s13, 9 }
  0x3c   : > { %p417_p10 = scmp.lt.s32.totalorder (!%p366_p9), %s1919_s14, 127  ;;  %s1921_s25 = sshll.u32 (!%p366_p9), %s2477_s18, 5 }
  0x3d   : > { %p432_p11 = scmp.lt.s32.totalorder (!%p366_p9), %s1921_s25, 63  ;;  %s2724_s15 = scalar_lea.vmem (!%p366_p9), [#allocation2], %s1918_s24 }
  0x3e   : > { %p1923_p12 = scmp.ne.s32.totalorder (!%p366_p9), %s2473_s17, 0 }
  0x40   : > { %s3099_s14 = smov (!%p417_p10, %s1919_s14), 127  ;;  %s3101_s25 = smov (!%p432_p11, %s1921_s25), 63 }
  0x41   : > { %s1920_s26 = sshll.u32 %s3099_s14, 2  ;;  %s1922_s5 = sshll.u32 %s3101_s25, 3 }
  0x42   : > { %s2717_s30 = scalar_lea.vmem %s3082_s1, %s1920_s26  ;;  %s2722_s8 = scalar_lea.vmem %s3085_s4, %s1922_s5 }
  0x43   : > { %444 = sbr.rel (%p1923_p12) target bundleno = 89 (0x59), region = 63 }
  0x48   : > { %v2491_v0 = vmov 0.0  }
  0x49   : > { %445 = vst [vmem:[%s2722_s8] sm:$0xff] %v2491_v0  ;;  %446 = vst [vmem:[%s2722_s8 + $0x8] sm:$0xff] %v2491_v0 }
  0x4a   : > { %447 = vst [vmem:[%s2722_s8 + $0x10] sm:$0xff] %v2491_v0  ;;  %448 = vst [vmem:[%s2722_s8 + $0x18] sm:$0xff] %v2491_v0 }
  0x4b   : > { %449 = vst [vmem:[%s2722_s8 + $0x20] sm:$0xff] %v2491_v0  ;;  %450 = vst [vmem:[%s2722_s8 + $0x28] sm:$0xff] %v2491_v0 }
  0x4c   : > { %451 = vst [vmem:[%s2722_s8 + $0x30] sm:$0xff] %v2491_v0  ;;  %452 = vst [vmem:[%s2722_s8 + $0x38] sm:$0xff] %v2491_v0 }
  0x4d   : > { %453 = vst [vmem:[%s2722_s8 + $0x40] sm:$0xff] %v2491_v0  ;;  %454 = vst [vmem:[%s2722_s8 + $0x48] sm:$0xff] %v2491_v0 }
  0x4e   : > { %455 = vst [vmem:[%s2722_s8 + $0x50] sm:$0xff] %v2491_v0  ;;  %456 = vst [vmem:[%s2722_s8 + $0x58] sm:$0xff] %v2491_v0 }
  0x4f   : > { %457 = vst [vmem:[%s2722_s8 + $0x60] sm:$0xff] %v2491_v0  ;;  %458 = vst [vmem:[%s2722_s8 + $0x68] sm:$0xff] %v2491_v0 }
  0x50   : > { %459 = vst [vmem:[%s2722_s8 + $0x70] sm:$0xff] %v2491_v0  ;;  %460 = vst [vmem:[%s2722_s8 + $0x78] sm:$0xff] %v2491_v0 }
  0x51   : > { %461 = vst [vmem:[%s2722_s8 + $0x80] sm:$0xff] %v2491_v0  ;;  %462 = vst [vmem:[%s2722_s8 + $0x88] sm:$0xff] %v2491_v0 }
  0x52   : > { %463 = vst [vmem:[%s2722_s8 + $0x90] sm:$0xff] %v2491_v0  ;;  %464 = vst [vmem:[%s2722_s8 + $0x98] sm:$0xff] %v2491_v0 }
  0x53   : > { %465 = vst [vmem:[%s2722_s8 + $0xa0] sm:$0xff] %v2491_v0  ;;  %466 = vst [vmem:[%s2722_s8 + $0xa8] sm:$0xff] %v2491_v0 }
  0x54   : > { %467 = vst [vmem:[%s2722_s8 + $0xb0] sm:$0xff] %v2491_v0  ;;  %468 = vst [vmem:[%s2722_s8 + $0xb8] sm:$0xff] %v2491_v0 }
  0x55   : > { %469 = vst [vmem:[%s2722_s8 + $0xc0] sm:$0xff] %v2491_v0  ;;  %470 = vst [vmem:[%s2722_s8 + $0xc8] sm:$0xff] %v2491_v0 }
  0x56   : > { %471 = vst [vmem:[%s2722_s8 + $0xd0] sm:$0xff] %v2491_v0  ;;  %472 = vst [vmem:[%s2722_s8 + $0xd8] sm:$0xff] %v2491_v0 }
  0x57   : > { %473 = vst [vmem:[%s2722_s8 + $0xe0] sm:$0xff] %v2491_v0  ;;  %474 = vst [vmem:[%s2722_s8 + $0xe8] sm:$0xff] %v2491_v0 }
  0x58   : > { %475 = vst [vmem:[%s2722_s8 + $0xf0] sm:$0xff] %v2491_v0  ;;  %476 = vst [vmem:[%s2722_s8 + $0xf8] sm:$0xff] %v2491_v0 }
  0x59 PF: > { %v2307_v1 = vld [vmem:[%s2717_s30 + $0x78] sm:$0xff]   ;;  %v2311_v5 = vld [vmem:[%s2717_s30 + $0x70] sm:$0xff]   ;;  %v2315_v9 = vld [vmem:[%s2717_s30 + $0x68] sm:$0xff]   ;;  %p2020_p13 = scmp.ne.s32.totalorder %s2473_s17, 1 }
  0x5a   : > { %v2308_v2 = vld [vmem:[%s2717_s30 + $0xf8] sm:$0xff]   ;;  %2026 = vmatprep.subr.bf16.mxu0 %v2307_v1  ;;  %v2312_v6 = vld [vmem:[%s2717_s30 + $0xf0] sm:$0xff]   ;;  %v2316_v10 = vld [vmem:[%s2717_s30 + $0xe8] sm:$0xff]  }
  0x5b   : > { %v2309_v3 = vld [vmem:[%s2717_s30 + $0x38] sm:$0xff]   ;;  %2138 = vmatprep.subr.bf16.mxu1 %v2308_v2  ;;  %v2313_v7 = vld [vmem:[%s2717_s30 + $0x30] sm:$0xff]   ;;  %v2317_v11 = vld [vmem:[%s2717_s30 + $0x28] sm:$0xff]  }
  0x5c   : > { %v2310_v4 = vld [vmem:[%s2717_s30 + $0xb8] sm:$0xff]   ;;  %2027 = vmatpush3.bf16.msra.mxu0 %v2309_v3  ;;  %v2314_v8 = vld [vmem:[%s2717_s30 + $0xb0] sm:$0xff]   ;;  %v2318_v12 = vld [vmem:[%s2717_s30 + $0xa8] sm:$0xff]  }
  0x5d   : > { %2139 = vmatpush3.bf16.msra.mxu1 %v2310_v4  ;;  %2028 = vmatprep.subr.bf16.mxu0 %v2311_v5  ;;  %v2319_v13 = vld [vmem:[%s2717_s30 + $0x60] sm:$0xff]   ;;  %v2323_v17 = vld [vmem:[%s2717_s30 + $0x58] sm:$0xff]   ;;  %v2327_v21 = vld [vmem:[%s2717_s30 + $0x50] sm:$0xff]  }
  0x5e   : > { %2140 = vmatprep.subr.bf16.mxu1 %v2312_v6  ;;  %v2320_v14 = vld [vmem:[%s2717_s30 + $0xe0] sm:$0xff]   ;;  %v2324_v18 = vld [vmem:[%s2717_s30 + $0xd8] sm:$0xff]   ;;  %v2328_v22 = vld [vmem:[%s2717_s30 + $0xd0] sm:$0xff]  }
  0x5f   : > { %v2321_v15 = vld [vmem:[%s2717_s30 + $0x20] sm:$0xff]   ;;  %v2325_v19 = vld [vmem:[%s2717_s30 + $0x18] sm:$0xff]   ;;  %v2329_v23 = vld [vmem:[%s2717_s30 + $0x10] sm:$0xff]  }
  0x60   : > { %2029 = vmatpush3.bf16.msra.mxu0 %v2313_v7  ;;  %v2322_v16 = vld [vmem:[%s2717_s30 + $0xa0] sm:$0xff]   ;;  %v2326_v20 = vld [vmem:[%s2717_s30 + $0x98] sm:$0xff]   ;;  %v2330_v24 = vld [vmem:[%s2717_s30 + $0x90] sm:$0xff]  }
  0x61   : > { %2141 = vmatpush3.bf16.msra.mxu1 %v2314_v8  ;;  %2030 = vmatprep.subr.bf16.mxu0 %v2315_v9  ;;  %v2331_v25 = vld [vmem:[%s2717_s30 + $0x48] sm:$0xff]   ;;  %v2335_v29 = vld [vmem:[%s2717_s30 + $0x40] sm:$0xff]  }
  0x62   : > { %2142 = vmatprep.subr.bf16.mxu1 %v2316_v10  ;;  %v2332_v26 = vld [vmem:[%s2717_s30 + $0xc8] sm:$0xff]   ;;  %v2336_v30 = vld [vmem:[%s2717_s30 + $0xc0] sm:$0xff]  }
  0x63   : > { %v2333_v27 = vld [vmem:[%s2717_s30 + $0x8] sm:$0xff]   ;;  %v2337_v31 = vld [vmem:[%s2717_s30] sm:$0xff]  }
  0x64   : > { %2031 = vmatpush3.bf16.msra.mxu0 %v2317_v11  ;;  %v2334_v28 = vld [vmem:[%s2717_s30 + $0x88] sm:$0xff]   ;;  %v2338_v32 = vld [vmem:[%s2717_s30 + $0x80] sm:$0xff]  }
  0x65   : > { %2143 = vmatpush3.bf16.msra.mxu1 %v2318_v12  ;;  %2032 = vmatprep.subr.bf16.mxu0 %v2319_v13  ;;  %v2339_v33 = vld [vmem:[%s2724_s15] ss:$16 sps:$4 sm:$0xff]   ;;  %v2341_v34 = vld [vmem:[%s2724_s15 + $0x4] ss:$16 sps:$4 sm:$0xff]   ;;  %v2342_v35 = vld [vmem:[%s2724_s15 + $0x8] ss:$16 sps:$4 sm:$0xff]  }
  0x66   : > { %2144 = vmatprep.subr.bf16.mxu1 %v2320_v14  ;;  %v2344_v36 = vld [vmem:[%s2724_s15 + $0xc] ss:$16 sps:$4 sm:$0xff]   ;;  %1181 = vmatprep.mubr.bf16.mxu0 %v2341_v34  ;;  %v2345_v37 = vld [vmem:[%s2724_s15 + $0x24] ss:$16 sps:$4 sm:$0xff]   ;;  %v2349_v39 = vld [vmem:[%s2724_s15 + $0x20] ss:$16 sps:$4 sm:$0xff]  }
  0x67   : > { %1342 = vmatprep.mubr.bf16.mxu1 %v2344_v36  ;;  %v2347_v38 = vld [vmem:[%s2724_s15 + $0x2c] ss:$16 sps:$4 sm:$0xff]   ;;  %v2350_v40 = vld [vmem:[%s2724_s15 + $0x28] ss:$16 sps:$4 sm:$0xff]   ;;  %v2351_v41 = vld [vmem:[%s2724_s15 + $0x44] ss:$16 sps:$4 sm:$0xff]  }
  0x68   : > { %2033 = vmatpush3.bf16.msra.mxu0 %v2321_v15  ;;  %v2353_v42 = vld [vmem:[%s2724_s15 + $0x4c] ss:$16 sps:$4 sm:$0xff]   ;;  %v2355_v43 = vld [vmem:[%s2724_s15 + $0x40] ss:$16 sps:$4 sm:$0xff]   ;;  %v2356_v44 = vld [vmem:[%s2724_s15 + $0x48] ss:$16 sps:$4 sm:$0xff]  }
  0x69   : > { %2145 = vmatpush3.bf16.msra.mxu1 %v2322_v16  ;;  %2034 = vmatprep.subr.bf16.mxu0 %v2323_v17  ;;  %v2357_v45 = vld [vmem:[%s2724_s15 + $0x64] ss:$16 sps:$4 sm:$0xff]   ;;  %v2359_v46 = vld [vmem:[%s2724_s15 + $0x6c] ss:$16 sps:$4 sm:$0xff]   ;;  %v2361_v47 = vld [vmem:[%s2724_s15 + $0x60] ss:$16 sps:$4 sm:$0xff]  }
  0x6a   : > { %2146 = vmatprep.subr.bf16.mxu1 %v2324_v18  ;;  %v2362_v48 = vld [vmem:[%s2724_s15 + $0x68] ss:$16 sps:$4 sm:$0xff]   ;;  %v2363_v49 = vld [vmem:[%s2724_s15 + $0x84] ss:$16 sps:$4 sm:$0xff]   ;;  %v2365_v50 = vld [vmem:[%s2724_s15 + $0x8c] ss:$16 sps:$4 sm:$0xff]  }
  0x6b   : > { %v2367_v51 = vld [vmem:[%s2724_s15 + $0x80] ss:$16 sps:$4 sm:$0xff]   ;;  %v2368_v52 = vld [vmem:[%s2724_s15 + $0x88] ss:$16 sps:$4 sm:$0xff]   ;;  %v2369_v53 = vld [vmem:[%s2724_s15 + $0xa4] ss:$16 sps:$4 sm:$0xff]  }
  0x6c   : > { %2035 = vmatpush3.bf16.msra.mxu0 %v2325_v19  ;;  %v2371_v54 = vld [vmem:[%s2724_s15 + $0xac] ss:$16 sps:$4 sm:$0xff]   ;;  %v2373_v55 = vld [vmem:[%s2724_s15 + $0xa0] ss:$16 sps:$4 sm:$0xff]   ;;  %v2374_v56 = vld [vmem:[%s2724_s15 + $0xa8] ss:$16 sps:$4 sm:$0xff]  }
  0x6d   : > { %2147 = vmatpush3.bf16.msra.mxu1 %v2326_v20  ;;  %2036 = vmatprep.subr.bf16.mxu0 %v2327_v21  ;;  %v2375_v57 = vld [vmem:[%s2724_s15 + $0xc4] ss:$16 sps:$4 sm:$0xff]   ;;  %v2377_v58 = vld [vmem:[%s2724_s15 + $0xcc] ss:$16 sps:$4 sm:$0xff]   ;;  %v2379_v59 = vld [vmem:[%s2724_s15 + $0xc0] ss:$16 sps:$4 sm:$0xff]  }
  0x6e   : > { %2148 = vmatprep.subr.bf16.mxu1 %v2328_v22  ;;  %v2380_v60 = vld [vmem:[%s2724_s15 + $0xc8] ss:$16 sps:$4 sm:$0xff]   ;;  %v2381_v61 = vld [vmem:[%s2724_s15 + $0xe4] ss:$16 sps:$4 sm:$0xff]   ;;  %v2383_v62 = vld [vmem:[%s2724_s15 + $0xec] ss:$16 sps:$4 sm:$0xff]  }
  0x6f   : > { %v2385_v63 = vld [vmem:[%s2724_s15 + $0xe0] ss:$16 sps:$4 sm:$0xff]   ;;  %v2386_v0 = vld [vmem:[%s2724_s15 + $0xe8] ss:$16 sps:$4 sm:$0xff]   ;;  %v2387_v1 = vld [vmem:[%s2724_s15 + $0x104] ss:$16 sps:$4 sm:$0xff]  }
  0x70   : > { %2037 = vmatpush3.bf16.msra.mxu0 %v2329_v23  ;;  %v2389_v2 = vld [vmem:[%s2724_s15 + $0x10c] ss:$16 sps:$4 sm:$0xff]   ;;  %v2391_v3 = vld [vmem:[%s2724_s15 + $0x100] ss:$16 sps:$4 sm:$0xff]   ;;  %v2392_v4 = vld [vmem:[%s2724_s15 + $0x108] ss:$16 sps:$4 sm:$0xff]  }
  0x71   : > { %2149 = vmatpush3.bf16.msra.mxu1 %v2330_v24  ;;  %2038 = vmatprep.subr.bf16.mxu0 %v2331_v25  ;;  %v2393_v5 = vld [vmem:[%s2724_s15 + $0x124] ss:$16 sps:$4 sm:$0xff]   ;;  %v2395_v6 = vld [vmem:[%s2724_s15 + $0x12c] ss:$16 sps:$4 sm:$0xff]   ;;  %v2397_v7 = vld [vmem:[%s2724_s15 + $0x120] ss:$16 sps:$4 sm:$0xff]  }
  0x72   : > { %2150 = vmatprep.subr.bf16.mxu1 %v2332_v26  ;;  %v2398_v8 = vld [vmem:[%s2724_s15 + $0x128] ss:$16 sps:$4 sm:$0xff]   ;;  %v2399_v9 = vld [vmem:[%s2724_s15 + $0x144] ss:$16 sps:$4 sm:$0xff]   ;;  %v2401_v10 = vld [vmem:[%s2724_s15 + $0x14c] ss:$16 sps:$4 sm:$0xff]  }
  0x73   : > { %v2403_v11 = vld [vmem:[%s2724_s15 + $0x140] ss:$16 sps:$4 sm:$0xff]   ;;  %v2404_v12 = vld [vmem:[%s2724_s15 + $0x148] ss:$16 sps:$4 sm:$0xff]   ;;  %v2405_v13 = vld [vmem:[%s2724_s15 + $0x164] ss:$16 sps:$4 sm:$0xff]  }
  0x74   : > { %2039 = vmatpush3.bf16.msra.mxu0 %v2333_v27  ;;  %v2407_v14 = vld [vmem:[%s2724_s15 + $0x16c] ss:$16 sps:$4 sm:$0xff]   ;;  %v2409_v15 = vld [vmem:[%s2724_s15 + $0x160] ss:$16 sps:$4 sm:$0xff]   ;;  %v2410_v16 = vld [vmem:[%s2724_s15 + $0x168] ss:$16 sps:$4 sm:$0xff]  }
  0x75   : > { %2151 = vmatpush3.bf16.msra.mxu1 %v2334_v28  ;;  %2040 = vmatprep.subr.bf16.mxu0 %v2335_v29  ;;  %v2411_v17 = vld [vmem:[%s2724_s15 + $0x184] ss:$16 sps:$4 sm:$0xff]   ;;  %v2413_v18 = vld [vmem:[%s2724_s15 + $0x18c] ss:$16 sps:$4 sm:$0xff]   ;;  %v2415_v19 = vld [vmem:[%s2724_s15 + $0x180] ss:$16 sps:$4 sm:$0xff]  }
  0x76   : > { %2152 = vmatprep.subr.bf16.mxu1 %v2336_v30  ;;  %v2416_v20 = vld [vmem:[%s2724_s15 + $0x188] ss:$16 sps:$4 sm:$0xff]   ;;  %v2417_v21 = vld [vmem:[%s2724_s15 + $0x1a4] ss:$16 sps:$4 sm:$0xff]   ;;  %v2419_v22 = vld [vmem:[%s2724_s15 + $0x1ac] ss:$16 sps:$4 sm:$0xff]  }
  0x77   : > { %v2421_v23 = vld [vmem:[%s2724_s15 + $0x1a0] ss:$16 sps:$4 sm:$0xff]   ;;  %v2422_v24 = vld [vmem:[%s2724_s15 + $0x1a8] ss:$16 sps:$4 sm:$0xff]   ;;  %v2423_v25 = vld [vmem:[%s2724_s15 + $0x1c4] ss:$16 sps:$4 sm:$0xff]  }
  0x78   : > { %2041 = vmatpush3.bf16.msra.mxu0 %v2337_v31  ;;  %v2425_v26 = vld [vmem:[%s2724_s15 + $0x1cc] ss:$16 sps:$4 sm:$0xff]   ;;  %v2427_v27 = vld [vmem:[%s2724_s15 + $0x1c0] ss:$16 sps:$4 sm:$0xff]   ;;  %v2428_v28 = vld [vmem:[%s2724_s15 + $0x1c8] ss:$16 sps:$4 sm:$0xff]  }
  0x79   : > { %2153 = vmatpush3.bf16.msra.mxu1 %v2338_v32  ;;  %v2429_v29 = vld [vmem:[%s2724_s15 + $0x1e4] ss:$16 sps:$4 sm:$0xff]   ;;  %v2431_v30 = vld [vmem:[%s2724_s15 + $0x1ec] ss:$16 sps:$4 sm:$0xff]   ;;  %v2433_v31 = vld [vmem:[%s2724_s15 + $0x1e0] ss:$16 sps:$4 sm:$0xff]  }
  0x7a   : > { %v2434_v32 = vld [vmem:[%s2724_s15 + $0x1e8] ss:$16 sps:$4 sm:$0xff]  }
  0x7b   : > { %1182 = vmatmul.mubr.bf16.vlgmr.msra.gmra.mxu0 %v2339_v33 }
  0x7c   : > { %1343 = vmatmul.mubr.bf16.vlgmr.msra.gmra.mxu1 %v2342_v35  ;;  %1189 = vmatprep.mubr.bf16.mxu0 %v2345_v37 }
  0x7d   : > { %1350 = vmatprep.mubr.bf16.mxu1 %v2347_v38 }
  0x83   : > { %1190 = vmatmul.mubr.bf16.gmra.mxu0 %v2349_v39 }
  0x84   : > { %1351 = vmatmul.mubr.bf16.gmra.mxu1 %v2350_v40  ;;  %1197 = vmatprep.mubr.bf16.mxu0 %v2351_v41  ;;  %v477_v40 = vld [vmem:[%s2722_s8] sm:$0xff] }
  0x85   : > { %1358 = vmatprep.mubr.bf16.mxu1 %v2353_v42 }
  0x8b   : > { %1198 = vmatmul.mubr.bf16.gmra.mxu0 %v2355_v43 }
  0x8c   : > { %1359 = vmatmul.mubr.bf16.gmra.mxu1 %v2356_v44  ;;  %1205 = vmatprep.mubr.bf16.mxu0 %v2357_v45 }
  0x8d   : > { %1366 = vmatprep.mubr.bf16.mxu1 %v2359_v46 }
  0x93   : > { %1206 = vmatmul.mubr.bf16.gmra.mxu0 %v2361_v47 }
  0x94   : > { %1367 = vmatmul.mubr.bf16.gmra.mxu1 %v2362_v48  ;;  %1213 = vmatprep.mubr.bf16.mxu0 %v2363_v49  ;;  %v478_v49 = vld [vmem:[%s2722_s8 + $0x8] sm:$0xff] }
  0x95   : > { %1374 = vmatprep.mubr.bf16.mxu1 %v2365_v50 }
  0x9b   : > { %1214 = vmatmul.mubr.bf16.gmra.mxu0 %v2367_v51 }
  0x9c   : > { %1375 = vmatmul.mubr.bf16.gmra.mxu1 %v2368_v52  ;;  %1221 = vmatprep.mubr.bf16.mxu0 %v2369_v53 }
  0x9d   : > { %1382 = vmatprep.mubr.bf16.mxu1 %v2371_v54 }
  0xa3   : > { %1222 = vmatmul.mubr.bf16.gmra.mxu0 %v2373_v55 }
  0xa4   : > { %1383 = vmatmul.mubr.bf16.gmra.mxu1 %v2374_v56  ;;  %1229 = vmatprep.mubr.bf16.mxu0 %v2375_v57 }
  0xa5   : > { %1390 = vmatprep.mubr.bf16.mxu1 %v2377_v58  ;;  %v479_v58 = vld [vmem:[%s2722_s8 + $0x10] sm:$0xff] }
  0xab   : > { %1230 = vmatmul.mubr.bf16.gmra.mxu0 %v2379_v59 }
  0xac   : > { %1391 = vmatmul.mubr.bf16.gmra.mxu1 %v2380_v60  ;;  %1237 = vmatprep.mubr.bf16.mxu0 %v2381_v61 }
  0xad   : > { %1398 = vmatprep.mubr.bf16.mxu1 %v2383_v62 }
  0xb3   : > { %1238 = vmatmul.mubr.bf16.gmra.mxu0 %v2385_v63 }
  0xb4   : > { %1399 = vmatmul.mubr.bf16.gmra.mxu1 %v2386_v0  ;;  %1245 = vmatprep.mubr.bf16.mxu0 %v2387_v1 }
  0xb5   : > { %1406 = vmatprep.mubr.bf16.mxu1 %v2389_v2 }
  0xbb   : > { %1246 = vmatmul.mubr.bf16.gmra.mxu0 %v2391_v3  ;;  %v480_v3 = vld [vmem:[%s2722_s8 + $0x18] sm:$0xff] }
  0xbc   : > { %1407 = vmatmul.mubr.bf16.gmra.mxu1 %v2392_v4  ;;  %1253 = vmatprep.mubr.bf16.mxu0 %v2393_v5 }
  0xbd   : > { %1414 = vmatprep.mubr.bf16.mxu1 %v2395_v6 }
  0xc3   : > { %1254 = vmatmul.mubr.bf16.gmra.mxu0 %v2397_v7 }
  0xc4   : > { %1415 = vmatmul.mubr.bf16.gmra.mxu1 %v2398_v8  ;;  %1261 = vmatprep.mubr.bf16.mxu0 %v2399_v9 }
  0xc5   : > { %1422 = vmatprep.mubr.bf16.mxu1 %v2401_v10 }
  0xcb   : > { %1262 = vmatmul.mubr.bf16.gmra.mxu0 %v2403_v11 }
  0xcc   : > { %1423 = vmatmul.mubr.bf16.gmra.mxu1 %v2404_v12  ;;  %1269 = vmatprep.mubr.bf16.mxu0 %v2405_v13  ;;  %v481_v12 = vld [vmem:[%s2722_s8 + $0x20] sm:$0xff] }
  0xcd   : > { %1430 = vmatprep.mubr.bf16.mxu1 %v2407_v14 }
  0xd3   : > { %1270 = vmatmul.mubr.bf16.gmra.mxu0 %v2409_v15 }
  0xd4   : > { %1431 = vmatmul.mubr.bf16.gmra.mxu1 %v2410_v16  ;;  %1277 = vmatprep.mubr.bf16.mxu0 %v2411_v17 }
  0xd5   : > { %1438 = vmatprep.mubr.bf16.mxu1 %v2413_v18 }
  0xdb   : > { %1278 = vmatmul.mubr.bf16.gmra.mxu0 %v2415_v19 }
  0xdc   : > { %1439 = vmatmul.mubr.bf16.gmra.mxu1 %v2416_v20  ;;  %1285 = vmatprep.mubr.bf16.mxu0 %v2417_v21  ;;  %v482_v21 = vld [vmem:[%s2722_s8 + $0x28] sm:$0xff] }
  0xdd   : > { %1446 = vmatprep.mubr.bf16.mxu1 %v2419_v22 }
  0xe3   : > { %1286 = vmatmul.mubr.bf16.gmra.mxu0 %v2421_v23 }
  0xe4   : > { %1447 = vmatmul.mubr.bf16.gmra.mxu1 %v2422_v24  ;;  %1293 = vmatprep.mubr.bf16.mxu0 %v2423_v25 }
  0xe5   : > { %1454 = vmatprep.mubr.bf16.mxu1 %v2425_v26 }
  0xeb   : > { %1294 = vmatmul.mubr.bf16.gmra.mxu0 %v2427_v27 }
  0xec   : > { %1455 = vmatmul.mubr.bf16.gmra.mxu1 %v2428_v28  ;;  %1301 = vmatprep.mubr.bf16.mxu0 %v2429_v29 }
  0xed   : > { %1462 = vmatprep.mubr.bf16.mxu1 %v2431_v30  ;;  %v483_v30 = vld [vmem:[%s2722_s8 + $0x30] sm:$0xff] }
  0xf3   : > { %1302 = vmatmul.mubr.bf16.gmra.mxu0 %v2433_v31 }
  0xf4   : > { %1463 = vmatmul.mubr.bf16.gmra.mxu1 %v2434_v32 }
 0x13b   : > { %v2042_v33 = vpop.f32.mrf.mxu0 }
 0x13c   : > { %v2154_v34 = vpop.f32.mrf.mxu1 }
 0x13d   : > { %v2043_v35 = vpop.f32.mrf.mxu0 }
 0x13e   : > { %v2044_v36 = vadd.f32 %v2043_v35, %v2042_v33  ;;  %v2155_v37 = vpop.f32.mrf.mxu1 }
 0x13f   : > { %v2156_v38 = vadd.f32 %v2155_v37, %v2154_v34  ;;  %v2045_v39 = vpop.f32.mrf.mxu0 }
 0x140   : > { %v2157_v41 = vpop.f32.mrf.mxu1 }
 0x141   : > { %v1345_v42 = vadd.f32 %v2156_v38, %v2044_v36  ;;  %v2046_v43 = vpop.f32.mrf.mxu0 }
 0x142   : > { %v2047_v44 = vadd.f32 %v2046_v43, %v2045_v39  ;;  %v2158_v45 = vpop.f32.mrf.mxu1  ;;  %v484_v39 = vld [vmem:[%s2722_s8 + $0x38] sm:$0xff] }
 0x143   : > { %v1471_v46 = vadd.f32 %v1345_v42, %v477_v40  ;;  %v2159_v47 = vadd.f32 %v2158_v45, %v2157_v41  ;;  %v2048_v48 = vpop.f32.mrf.mxu0 }
 0x144   : > { %v2160_v50 = vpop.f32.mrf.mxu1 }
 0x145   : > { %1503 = vst [vmem:[%s2722_s8] sm:$0xff] %v1471_v46  ;;  %v1348_v51 = vadd.f32 %v2159_v47, %v2047_v44  ;;  %v2049_v52 = vpop.f32.mrf.mxu0 }
 0x146   : > { %v2050_v53 = vadd.f32 %v2049_v52, %v2048_v48  ;;  %v2161_v54 = vpop.f32.mrf.mxu1  ;;  %v485_v48 = vld [vmem:[%s2722_s8 + $0x40] sm:$0xff] }
 0x147   : > { %v1472_v55 = vadd.f32 %v1348_v51, %v478_v49  ;;  %v2162_v56 = vadd.f32 %v2161_v54, %v2160_v50  ;;  %v2051_v57 = vpop.f32.mrf.mxu0 }
 0x148   : > { %v2163_v59 = vpop.f32.mrf.mxu1 }
 0x149   : > { %1504 = vst [vmem:[%s2722_s8 + $0x8] sm:$0xff] %v1472_v55  ;;  %v1353_v60 = vadd.f32 %v2162_v56, %v2050_v53  ;;  %v2052_v61 = vpop.f32.mrf.mxu0 }
 0x14a   : > { %v2053_v62 = vadd.f32 %v2052_v61, %v2051_v57  ;;  %v2164_v63 = vpop.f32.mrf.mxu1  ;;  %v486_v57 = vld [vmem:[%s2722_s8 + $0x48] sm:$0xff] }
 0x14b   : > { %v1473_v0 = vadd.f32 %v1353_v60, %v479_v58  ;;  %v2165_v1 = vadd.f32 %v2164_v63, %v2163_v59  ;;  %v2054_v2 = vpop.f32.mrf.mxu0 }
 0x14c   : > { %v2166_v4 = vpop.f32.mrf.mxu1 }
 0x14d   : > { %1505 = vst [vmem:[%s2722_s8 + $0x10] sm:$0xff] %v1473_v0  ;;  %v1356_v5 = vadd.f32 %v2165_v1, %v2053_v62  ;;  %v2055_v6 = vpop.f32.mrf.mxu0 }
 0x14e   : > { %v2056_v7 = vadd.f32 %v2055_v6, %v2054_v2  ;;  %v2167_v8 = vpop.f32.mrf.mxu1  ;;  %v487_v2 = vld [vmem:[%s2722_s8 + $0x50] sm:$0xff] }
 0x14f   : > { %v1474_v9 = vadd.f32 %v1356_v5, %v480_v3  ;;  %v2168_v10 = vadd.f32 %v2167_v8, %v2166_v4  ;;  %v2057_v11 = vpop.f32.mrf.mxu0 }
 0x150   : > { %v2169_v13 = vpop.f32.mrf.mxu1 }
 0x151   : > { %1506 = vst [vmem:[%s2722_s8 + $0x18] sm:$0xff] %v1474_v9  ;;  %v1361_v14 = vadd.f32 %v2168_v10, %v2056_v7  ;;  %v2058_v15 = vpop.f32.mrf.mxu0 }
 0x152   : > { %v2059_v16 = vadd.f32 %v2058_v15, %v2057_v11  ;;  %v2170_v17 = vpop.f32.mrf.mxu1  ;;  %v488_v11 = vld [vmem:[%s2722_s8 + $0x58] sm:$0xff] }
 0x153   : > { %v1475_v18 = vadd.f32 %v1361_v14, %v481_v12  ;;  %v2171_v19 = vadd.f32 %v2170_v17, %v2169_v13  ;;  %v2060_v20 = vpop.f32.mrf.mxu0 }
 0x154   : > { %v2172_v22 = vpop.f32.mrf.mxu1 }
 0x155   : > { %1507 = vst [vmem:[%s2722_s8 + $0x20] sm:$0xff] %v1475_v18  ;;  %v1364_v23 = vadd.f32 %v2171_v19, %v2059_v16  ;;  %v2061_v24 = vpop.f32.mrf.mxu0 }
 0x156   : > { %v2062_v25 = vadd.f32 %v2061_v24, %v2060_v20  ;;  %v2173_v26 = vpop.f32.mrf.mxu1  ;;  %v489_v20 = vld [vmem:[%s2722_s8 + $0x60] sm:$0xff] }
 0x157   : > { %v1476_v27 = vadd.f32 %v1364_v23, %v482_v21  ;;  %v2174_v28 = vadd.f32 %v2173_v26, %v2172_v22  ;;  %v2063_v29 = vpop.f32.mrf.mxu0 }
 0x158   : > { %v2175_v31 = vpop.f32.mrf.mxu1 }
 0x159   : > { %1508 = vst [vmem:[%s2722_s8 + $0x28] sm:$0xff] %v1476_v27  ;;  %v1369_v32 = vadd.f32 %v2174_v28, %v2062_v25  ;;  %v2064_v33 = vpop.f32.mrf.mxu0 }
 0x15a   : > { %v2065_v34 = vadd.f32 %v2064_v33, %v2063_v29  ;;  %v2176_v35 = vpop.f32.mrf.mxu1  ;;  %v490_v29 = vld [vmem:[%s2722_s8 + $0x68] sm:$0xff] }
 0x15b   : > { %v1477_v36 = vadd.f32 %v1369_v32, %v483_v30  ;;  %v2177_v37 = vadd.f32 %v2176_v35, %v2175_v31  ;;  %v2066_v38 = vpop.f32.mrf.mxu0 }
 0x15c   : > { %v2178_v40 = vpop.f32.mrf.mxu1 }
 0x15d   : > { %1509 = vst [vmem:[%s2722_s8 + $0x30] sm:$0xff] %v1477_v36  ;;  %v1372_v41 = vadd.f32 %v2177_v37, %v2065_v34  ;;  %v2067_v42 = vpop.f32.mrf.mxu0 }
 0x15e   : > { %v2068_v43 = vadd.f32 %v2067_v42, %v2066_v38  ;;  %v2179_v44 = vpop.f32.mrf.mxu1  ;;  %v491_v38 = vld [vmem:[%s2722_s8 + $0x70] sm:$0xff] }
 0x15f   : > { %v1478_v45 = vadd.f32 %v1372_v41, %v484_v39  ;;  %v2180_v46 = vadd.f32 %v2179_v44, %v2178_v40  ;;  %v2069_v47 = vpop.f32.mrf.mxu0 }
 0x160   : > { %v2181_v49 = vpop.f32.mrf.mxu1 }
 0x161   : > { %1510 = vst [vmem:[%s2722_s8 + $0x38] sm:$0xff] %v1478_v45  ;;  %v1377_v50 = vadd.f32 %v2180_v46, %v2068_v43  ;;  %v2070_v51 = vpop.f32.mrf.mxu0 }
 0x162   : > { %v2071_v52 = vadd.f32 %v2070_v51, %v2069_v47  ;;  %v2182_v53 = vpop.f32.mrf.mxu1  ;;  %v492_v47 = vld [vmem:[%s2722_s8 + $0x78] sm:$0xff] }
 0x163   : > { %v1479_v54 = vadd.f32 %v1377_v50, %v485_v48  ;;  %v2183_v55 = vadd.f32 %v2182_v53, %v2181_v49  ;;  %v2072_v56 = vpop.f32.mrf.mxu0 }
 0x164   : > { %v2184_v58 = vpop.f32.mrf.mxu1 }
 0x165   : > { %1511 = vst [vmem:[%s2722_s8 + $0x40] sm:$0xff] %v1479_v54  ;;  %v1380_v59 = vadd.f32 %v2183_v55, %v2071_v52  ;;  %v2073_v60 = vpop.f32.mrf.mxu0 }
 0x166   : > { %v2074_v61 = vadd.f32 %v2073_v60, %v2072_v56  ;;  %v2185_v62 = vpop.f32.mrf.mxu1  ;;  %v493_v56 = vld [vmem:[%s2722_s8 + $0x80] sm:$0xff] }
 0x167   : > { %v1480_v63 = vadd.f32 %v1380_v59, %v486_v57  ;;  %v2186_v0 = vadd.f32 %v2185_v62, %v2184_v58  ;;  %v2075_v1 = vpop.f32.mrf.mxu0 }
 0x168   : > { %v2187_v3 = vpop.f32.mrf.mxu1 }
 0x169   : > { %1512 = vst [vmem:[%s2722_s8 + $0x48] sm:$0xff] %v1480_v63  ;;  %v1385_v4 = vadd.f32 %v2186_v0, %v2074_v61  ;;  %v2076_v5 = vpop.f32.mrf.mxu0 }
 0x16a   : > { %v2077_v6 = vadd.f32 %v2076_v5, %v2075_v1  ;;  %v2188_v7 = vpop.f32.mrf.mxu1  ;;  %v494_v1 = vld [vmem:[%s2722_s8 + $0x88] sm:$0xff] }
 0x16b   : > { %v1481_v8 = vadd.f32 %v1385_v4, %v487_v2  ;;  %v2189_v9 = vadd.f32 %v2188_v7, %v2187_v3  ;;  %v2078_v10 = vpop.f32.mrf.mxu0 }
 0x16c   : > { %v2190_v12 = vpop.f32.mrf.mxu1 }
 0x16d   : > { %1513 = vst [vmem:[%s2722_s8 + $0x50] sm:$0xff] %v1481_v8  ;;  %v1388_v13 = vadd.f32 %v2189_v9, %v2077_v6  ;;  %v2079_v14 = vpop.f32.mrf.mxu0 }
 0x16e   : > { %v2080_v15 = vadd.f32 %v2079_v14, %v2078_v10  ;;  %v2191_v16 = vpop.f32.mrf.mxu1  ;;  %v495_v10 = vld [vmem:[%s2722_s8 + $0x90] sm:$0xff] }
 0x16f   : > { %v1482_v17 = vadd.f32 %v1388_v13, %v488_v11  ;;  %v2192_v18 = vadd.f32 %v2191_v16, %v2190_v12  ;;  %v2081_v19 = vpop.f32.mrf.mxu0 }
 0x170   : > { %v2193_v21 = vpop.f32.mrf.mxu1 }
 0x171   : > { %1514 = vst [vmem:[%s2722_s8 + $0x58] sm:$0xff] %v1482_v17  ;;  %v1393_v22 = vadd.f32 %v2192_v18, %v2080_v15  ;;  %v2082_v23 = vpop.f32.mrf.mxu0 }
 0x172   : > { %v2083_v24 = vadd.f32 %v2082_v23, %v2081_v19  ;;  %v2194_v25 = vpop.f32.mrf.mxu1  ;;  %v496_v19 = vld [vmem:[%s2722_s8 + $0x98] sm:$0xff] }
 0x173   : > { %v1483_v26 = vadd.f32 %v1393_v22, %v489_v20  ;;  %v2195_v27 = vadd.f32 %v2194_v25, %v2193_v21  ;;  %v2084_v28 = vpop.f32.mrf.mxu0 }
 0x174   : > { %v2196_v30 = vpop.f32.mrf.mxu1 }
 0x175   : > { %1515 = vst [vmem:[%s2722_s8 + $0x60] sm:$0xff] %v1483_v26  ;;  %v1396_v31 = vadd.f32 %v2195_v27, %v2083_v24  ;;  %v2085_v32 = vpop.f32.mrf.mxu0 }
 0x176   : > { %v2086_v33 = vadd.f32 %v2085_v32, %v2084_v28  ;;  %v2197_v34 = vpop.f32.mrf.mxu1  ;;  %v497_v28 = vld [vmem:[%s2722_s8 + $0xa0] sm:$0xff] }
 0x177   : > { %v1484_v35 = vadd.f32 %v1396_v31, %v490_v29  ;;  %v2198_v36 = vadd.f32 %v2197_v34, %v2196_v30  ;;  %v2087_v37 = vpop.f32.mrf.mxu0 }
 0x178   : > { %v2199_v39 = vpop.f32.mrf.mxu1 }
 0x179   : > { %1516 = vst [vmem:[%s2722_s8 + $0x68] sm:$0xff] %v1484_v35  ;;  %v1401_v40 = vadd.f32 %v2198_v36, %v2086_v33  ;;  %v2088_v41 = vpop.f32.mrf.mxu0 }
 0x17a   : > { %v2089_v42 = vadd.f32 %v2088_v41, %v2087_v37  ;;  %v2200_v43 = vpop.f32.mrf.mxu1  ;;  %v498_v37 = vld [vmem:[%s2722_s8 + $0xa8] sm:$0xff] }
 0x17b   : > { %v1485_v44 = vadd.f32 %v1401_v40, %v491_v38  ;;  %v2201_v45 = vadd.f32 %v2200_v43, %v2199_v39  ;;  %v2090_v46 = vpop.f32.mrf.mxu0 }
 0x17c   : > { %v2202_v48 = vpop.f32.mrf.mxu1 }
 0x17d   : > { %1517 = vst [vmem:[%s2722_s8 + $0x70] sm:$0xff] %v1485_v44  ;;  %v1404_v49 = vadd.f32 %v2201_v45, %v2089_v42  ;;  %v2091_v50 = vpop.f32.mrf.mxu0 }
 0x17e   : > { %v2092_v51 = vadd.f32 %v2091_v50, %v2090_v46  ;;  %v2203_v52 = vpop.f32.mrf.mxu1  ;;  %v499_v46 = vld [vmem:[%s2722_s8 + $0xb0] sm:$0xff] }
 0x17f   : > { %v1486_v53 = vadd.f32 %v1404_v49, %v492_v47  ;;  %v2204_v54 = vadd.f32 %v2203_v52, %v2202_v48  ;;  %v2093_v55 = vpop.f32.mrf.mxu0 }
 0x180   : > { %v2205_v57 = vpop.f32.mrf.mxu1 }
 0x181   : > { %1518 = vst [vmem:[%s2722_s8 + $0x78] sm:$0xff] %v1486_v53  ;;  %v1409_v58 = vadd.f32 %v2204_v54, %v2092_v51  ;;  %v2094_v59 = vpop.f32.mrf.mxu0 }
 0x182   : > { %v2095_v60 = vadd.f32 %v2094_v59, %v2093_v55  ;;  %v2206_v61 = vpop.f32.mrf.mxu1  ;;  %v500_v55 = vld [vmem:[%s2722_s8 + $0xb8] sm:$0xff] }
 0x183   : > { %v1487_v62 = vadd.f32 %v1409_v58, %v493_v56  ;;  %v2207_v63 = vadd.f32 %v2206_v61, %v2205_v57  ;;  %v2096_v0 = vpop.f32.mrf.mxu0 }
 0x184   : > { %v2208_v2 = vpop.f32.mrf.mxu1 }
 0x185   : > { %1519 = vst [vmem:[%s2722_s8 + $0x80] sm:$0xff] %v1487_v62  ;;  %v1412_v3 = vadd.f32 %v2207_v63, %v2095_v60  ;;  %v2097_v4 = vpop.f32.mrf.mxu0 }
 0x186   : > { %v2098_v5 = vadd.f32 %v2097_v4, %v2096_v0  ;;  %v2209_v6 = vpop.f32.mrf.mxu1  ;;  %v501_v0 = vld [vmem:[%s2722_s8 + $0xc0] sm:$0xff] }
 0x187   : > { %v1488_v7 = vadd.f32 %v1412_v3, %v494_v1  ;;  %v2210_v8 = vadd.f32 %v2209_v6, %v2208_v2  ;;  %v2099_v9 = vpop.f32.mrf.mxu0 }
 0x188   : > { %v2211_v11 = vpop.f32.mrf.mxu1 }
 0x189   : > { %1520 = vst [vmem:[%s2722_s8 + $0x88] sm:$0xff] %v1488_v7  ;;  %v1417_v12 = vadd.f32 %v2210_v8, %v2098_v5  ;;  %v2100_v13 = vpop.f32.mrf.mxu0 }
 0x18a   : > { %v2101_v14 = vadd.f32 %v2100_v13, %v2099_v9  ;;  %v2212_v15 = vpop.f32.mrf.mxu1  ;;  %v502_v9 = vld [vmem:[%s2722_s8 + $0xc8] sm:$0xff] }
 0x18b   : > { %v1489_v16 = vadd.f32 %v1417_v12, %v495_v10  ;;  %v2213_v17 = vadd.f32 %v2212_v15, %v2211_v11  ;;  %v2102_v18 = vpop.f32.mrf.mxu0 }
 0x18c   : > { %v2214_v20 = vpop.f32.mrf.mxu1 }
 0x18d   : > { %1521 = vst [vmem:[%s2722_s8 + $0x90] sm:$0xff] %v1489_v16  ;;  %v1420_v21 = vadd.f32 %v2213_v17, %v2101_v14  ;;  %v2103_v22 = vpop.f32.mrf.mxu0 }
 0x18e   : > { %v2104_v23 = vadd.f32 %v2103_v22, %v2102_v18  ;;  %v2215_v24 = vpop.f32.mrf.mxu1  ;;  %v503_v18 = vld [vmem:[%s2722_s8 + $0xd0] sm:$0xff] }
 0x18f   : > { %v1490_v25 = vadd.f32 %v1420_v21, %v496_v19  ;;  %v2216_v26 = vadd.f32 %v2215_v24, %v2214_v20  ;;  %v2105_v27 = vpop.f32.mrf.mxu0 }
 0x190   : > { %v2217_v29 = vpop.f32.mrf.mxu1 }
 0x191   : > { %1522 = vst [vmem:[%s2722_s8 + $0x98] sm:$0xff] %v1490_v25  ;;  %v1425_v30 = vadd.f32 %v2216_v26, %v2104_v23  ;;  %v2106_v31 = vpop.f32.mrf.mxu0 }
 0x192   : > { %v2107_v32 = vadd.f32 %v2106_v31, %v2105_v27  ;;  %v2218_v33 = vpop.f32.mrf.mxu1  ;;  %v504_v27 = vld [vmem:[%s2722_s8 + $0xd8] sm:$0xff] }
 0x193   : > { %v1491_v34 = vadd.f32 %v1425_v30, %v497_v28  ;;  %v2219_v35 = vadd.f32 %v2218_v33, %v2217_v29  ;;  %v2108_v36 = vpop.f32.mrf.mxu0 }
 0x194   : > { %v2220_v38 = vpop.f32.mrf.mxu1 }
 0x195   : > { %1523 = vst [vmem:[%s2722_s8 + $0xa0] sm:$0xff] %v1491_v34  ;;  %v1428_v39 = vadd.f32 %v2219_v35, %v2107_v32  ;;  %v2109_v40 = vpop.f32.mrf.mxu0 }
 0x196   : > { %v2110_v41 = vadd.f32 %v2109_v40, %v2108_v36  ;;  %v2221_v42 = vpop.f32.mrf.mxu1  ;;  %v505_v36 = vld [vmem:[%s2722_s8 + $0xe0] sm:$0xff] }
 0x197   : > { %v1492_v43 = vadd.f32 %v1428_v39, %v498_v37  ;;  %v2222_v44 = vadd.f32 %v2221_v42, %v2220_v38  ;;  %v2111_v45 = vpop.f32.mrf.mxu0 }
 0x198   : > { %v2223_v47 = vpop.f32.mrf.mxu1 }
 0x199   : > { %1524 = vst [vmem:[%s2722_s8 + $0xa8] sm:$0xff] %v1492_v43  ;;  %v1433_v48 = vadd.f32 %v2222_v44, %v2110_v41  ;;  %v2112_v49 = vpop.f32.mrf.mxu0 }
 0x19a   : > { %v2113_v50 = vadd.f32 %v2112_v49, %v2111_v45  ;;  %v2224_v51 = vpop.f32.mrf.mxu1  ;;  %v506_v45 = vld [vmem:[%s2722_s8 + $0xe8] sm:$0xff] }
 0x19b   : > { %v1493_v52 = vadd.f32 %v1433_v48, %v499_v46  ;;  %v2225_v53 = vadd.f32 %v2224_v51, %v2223_v47  ;;  %v2114_v54 = vpop.f32.mrf.mxu0 }
 0x19c   : > { %v2226_v56 = vpop.f32.mrf.mxu1 }
 0x19d   : > { %1525 = vst [vmem:[%s2722_s8 + $0xb0] sm:$0xff] %v1493_v52  ;;  %v1436_v57 = vadd.f32 %v2225_v53, %v2113_v50  ;;  %v2115_v58 = vpop.f32.mrf.mxu0 }
 0x19e   : > { %v2116_v59 = vadd.f32 %v2115_v58, %v2114_v54  ;;  %v2227_v60 = vpop.f32.mrf.mxu1  ;;  %v507_v54 = vld [vmem:[%s2722_s8 + $0xf0] sm:$0xff] }
 0x19f   : > { %v1494_v61 = vadd.f32 %v1436_v57, %v500_v55  ;;  %v2228_v62 = vadd.f32 %v2227_v60, %v2226_v56  ;;  %v2117_v63 = vpop.f32.mrf.mxu0 }
 0x1a0   : > { %v2229_v1 = vpop.f32.mrf.mxu1 }
 0x1a1   : > { %1526 = vst [vmem:[%s2722_s8 + $0xb8] sm:$0xff] %v1494_v61  ;;  %v1441_v2 = vadd.f32 %v2228_v62, %v2116_v59  ;;  %v2118_v3 = vpop.f32.mrf.mxu0  ;;  %v508_v62 = vld [vmem:[%s2722_s8 + $0xf8] sm:$0xff] }
 0x1a2   : > { %v2119_v4 = vadd.f32 %v2118_v3, %v2117_v63  ;;  %v2230_v5 = vpop.f32.mrf.mxu1 }
 0x1a3   : > { %v1495_v6 = vadd.f32 %v1441_v2, %v501_v0  ;;  %v2231_v7 = vadd.f32 %v2230_v5, %v2229_v1  ;;  %v2120_v8 = vpop.f32.mrf.mxu0 }
 0x1a4   : > { %v2232_v10 = vpop.f32.mrf.mxu1 }
 0x1a5   : > { %1527 = vst [vmem:[%s2722_s8 + $0xc0] sm:$0xff] %v1495_v6  ;;  %v1444_v11 = vadd.f32 %v2231_v7, %v2119_v4  ;;  %v2121_v12 = vpop.f32.mrf.mxu0 }
 0x1a6   : > { %v2122_v13 = vadd.f32 %v2121_v12, %v2120_v8  ;;  %v2233_v14 = vpop.f32.mrf.mxu1 }
 0x1a7   : > { %v1496_v15 = vadd.f32 %v1444_v11, %v502_v9  ;;  %v2234_v16 = vadd.f32 %v2233_v14, %v2232_v10  ;;  %v2123_v17 = vpop.f32.mrf.mxu0 }
 0x1a8   : > { %v2235_v19 = vpop.f32.mrf.mxu1 }
 0x1a9   : > { %1528 = vst [vmem:[%s2722_s8 + $0xc8] sm:$0xff] %v1496_v15  ;;  %v1449_v20 = vadd.f32 %v2234_v16, %v2122_v13  ;;  %v2124_v21 = vpop.f32.mrf.mxu0 }
 0x1aa   : > { %v2125_v22 = vadd.f32 %v2124_v21, %v2123_v17  ;;  %v2236_v23 = vpop.f32.mrf.mxu1 }
 0x1ab   : > { %v1497_v24 = vadd.f32 %v1449_v20, %v503_v18  ;;  %v2237_v25 = vadd.f32 %v2236_v23, %v2235_v19  ;;  %v2126_v26 = vpop.f32.mrf.mxu0 }
 0x1ac   : > { %v2238_v28 = vpop.f32.mrf.mxu1 }
 0x1ad   : > { %1529 = vst [vmem:[%s2722_s8 + $0xd0] sm:$0xff] %v1497_v24  ;;  %v1452_v29 = vadd.f32 %v2237_v25, %v2125_v22  ;;  %v2127_v30 = vpop.f32.mrf.mxu0 }
 0x1ae   : > { %v2128_v31 = vadd.f32 %v2127_v30, %v2126_v26  ;;  %v2239_v32 = vpop.f32.mrf.mxu1 }
 0x1af   : > { %v1498_v33 = vadd.f32 %v1452_v29, %v504_v27  ;;  %v2240_v34 = vadd.f32 %v2239_v32, %v2238_v28  ;;  %v2129_v35 = vpop.f32.mrf.mxu0 }
 0x1b0   : > { %v2241_v37 = vpop.f32.mrf.mxu1 }
 0x1b1   : > { %1530 = vst [vmem:[%s2722_s8 + $0xd8] sm:$0xff] %v1498_v33  ;;  %v1457_v38 = vadd.f32 %v2240_v34, %v2128_v31  ;;  %v2130_v39 = vpop.f32.mrf.mxu0 }
 0x1b2   : > { %v2131_v40 = vadd.f32 %v2130_v39, %v2129_v35  ;;  %v2242_v41 = vpop.f32.mrf.mxu1 }
 0x1b3   : > { %v1499_v42 = vadd.f32 %v1457_v38, %v505_v36  ;;  %v2243_v43 = vadd.f32 %v2242_v41, %v2241_v37  ;;  %v2132_v44 = vpop.f32.mrf.mxu0 }
 0x1b4   : > { %v2244_v46 = vpop.f32.mrf.mxu1 }
 0x1b5   : > { %1531 = vst [vmem:[%s2722_s8 + $0xe0] sm:$0xff] %v1499_v42  ;;  %v1460_v47 = vadd.f32 %v2243_v43, %v2131_v40  ;;  %v2133_v48 = vpop.f32.mrf.mxu0 }
 0x1b6   : > { %v2134_v49 = vadd.f32 %v2133_v48, %v2132_v44  ;;  %v2245_v50 = vpop.f32.mrf.mxu1 }
 0x1b7   : > { %v1500_v51 = vadd.f32 %v1460_v47, %v506_v45  ;;  %v2246_v52 = vadd.f32 %v2245_v50, %v2244_v46  ;;  %v2135_v53 = vpop.f32.mrf.mxu0 }
 0x1b8   : > { %v2247_v55 = vpop.f32.mrf.mxu1 }
 0x1b9   : > { %1532 = vst [vmem:[%s2722_s8 + $0xe8] sm:$0xff] %v1500_v51  ;;  %v1465_v56 = vadd.f32 %v2246_v52, %v2134_v49  ;;  %v2136_v57 = vpop.f32.mrf.mxu0 }
 0x1ba   : > { %v2137_v58 = vadd.f32 %v2136_v57, %v2135_v53  ;;  %v2248_v59 = vpop.f32.mrf.mxu1 }
 0x1bb   : > { %v1501_v60 = vadd.f32 %v1465_v56, %v507_v54  ;;  %v2249_v61 = vadd.f32 %v2248_v59, %v2247_v55 }
 0x1bd   : > { %1533 = vst [vmem:[%s2722_s8 + $0xf0] sm:$0xff] %v1501_v60  ;;  %v1468_v63 = vadd.f32 %v2249_v61, %v2137_v58  ;;  %1538 = sbr.rel (%p2020_p13) target bundleno = 497 (0x1f1), region = 67 }
 0x1bf   : > { %v1502_v0 = vadd.f32 %v1468_v63, %v508_v62 }
 0x1c1   : > { %1534 = vst [vmem:[%s2722_s8 + $0xf8] sm:$0xff] %v1502_v0 }
 0x1c2   : > { %v1539_v1 = vld [vmem:[%s2722_s8] sm:$0xff]  ;;  %v1540_v5 = vld [vmem:[%s2722_s8 + $0x8] sm:$0xff]  ;;  %v1541_v6 = vld [vmem:[%s2722_s8 + $0x10] sm:$0xff] }
 0x1c3   : > { %v2924_v2 = vld [vmem:[%s3083_s2] ss:$0 sm:$0xff]  ;;  %v1542_v7 = vld [vmem:[%s2722_s8 + $0x18] sm:$0xff]  ;;  %v1544_v12 = vld [vmem:[%s2722_s8 + $0x28] sm:$0xff] }
 0x1c4   : > { %v2929_v3 = vld [vmem:[%s3084_s3] ss:$0 sm:$0xff]  ;;  %v1578_v4 = vmul.f32 %v2924_v2, %v1539_v1  ;;  %v1579_v8 = vmul.f32 %v2924_v2, %v1540_v5  ;;  %v1580_v9 = vmul.f32 %v2924_v2, %v1541_v6  ;;  %v1581_v10 = vmul.f32 %v2924_v2, %v1542_v7  ;;  %v1545_v13 = vld [vmem:[%s2722_s8 + $0x30] sm:$0xff]  ;;  %v1546_v18 = vld [vmem:[%s2722_s8 + $0x38] sm:$0xff] }
 0x1c5   : > { %v1543_v11 = vld [vmem:[%s2722_s8 + $0x20] sm:$0xff]  ;;  %v1583_v16 = vmul.f32 %v2924_v2, %v1544_v12  ;;  %v1584_v17 = vmul.f32 %v2924_v2, %v1545_v13  ;;  %v1585_v22 = vmul.f32 %v2924_v2, %v1546_v18  ;;  %v1548_v31 = vld [vmem:[%s2722_s8 + $0x48] sm:$0xff]  ;;  %v1549_v32 = vld [vmem:[%s2722_s8 + $0x50] sm:$0xff] }
 0x1c6   : > { %v1617_v14 = vadd.f32 %v2929_v3, %v1578_v4  ;;  %v1582_v15 = vmul.f32 %v2924_v2, %v1543_v11  ;;  %v1618_v19 = vadd.f32 %v2929_v3, %v1579_v8  ;;  %v1619_v20 = vadd.f32 %v2929_v3, %v1580_v9  ;;  %v1547_v26 = vld [vmem:[%s2722_s8 + $0x40] sm:$0xff]  ;;  %v1550_v44 = vld [vmem:[%s2722_s8 + $0x58] sm:$0xff]  ;;  %v1552_v46 = vld [vmem:[%s2722_s8 + $0x68] sm:$0xff] }
 0x1c7   : > { %v1620_v21 = vadd.f32 %v2929_v3, %v1581_v10  ;;  %v1622_v25 = vadd.f32 %v2929_v3, %v1583_v16  ;;  %v1623_v38 = vadd.f32 %v2929_v3, %v1584_v17  ;;  %v1624_v39 = vadd.f32 %v2929_v3, %v1585_v22  ;;  %v1551_v45 = vld [vmem:[%s2722_s8 + $0x60] sm:$0xff]  ;;  %v1553_v57 = vld [vmem:[%s2722_s8 + $0x70] sm:$0xff]  ;;  %v1554_v5 = vld [vmem:[%s2722_s8 + $0x78] sm:$0xff] }
 0x1c8   : > { %vm1649_vm0 = vcmp.ge.f32.partialorder %v1617_v14, 0.0  ;;  %v1681_v23 = vmul.f32 0.2, %v1617_v14  ;;  %v1621_v24 = vadd.f32 %v2929_v3, %v1582_v15  ;;  %vm1650_vm1 = vcmp.ge.f32.partialorder %v1618_v19, 0.0  ;;  %v1555_v6 = vld [vmem:[%s2722_s8 + $0x80] sm:$0xff]  ;;  %v1556_v10 = vld [vmem:[%s2722_s8 + $0x88] sm:$0xff] }
 0x1c9   : > { %v1682_v27 = vmul.f32 0.2, %v1618_v19  ;;  %vm1651_vm2 = vcmp.ge.f32.partialorder %v1619_v20, 0.0  ;;  %v1683_v28 = vmul.f32 0.2, %v1619_v20  ;;  %vm1652_vm3 = vcmp.ge.f32.partialorder %v1620_v21, 0.0 }
 0x1ca   : > { %v1713_v29 = vsel %vm1649_vm0, %v1617_v14, %v1681_v23  ;;  %v1684_v30 = vmul.f32 0.2, %v1620_v21  ;;  %vm1653_vm4 = vcmp.ge.f32.partialorder %v1621_v24, 0.0  ;;  %v1685_v35 = vmul.f32 0.2, %v1621_v24  ;;  %v1557_v11 = vld [vmem:[%s2722_s8 + $0x90] sm:$0xff] }
 0x1cb   : > { %1745 = vst [vmem:[%s2722_s8] sm:$0xff] %v1713_v29  ;;  %v1714_v33 = vsel %vm1650_vm1, %v1618_v19, %v1682_v27  ;;  %v1715_v34 = vsel %vm1651_vm2, %v1619_v20, %v1683_v28  ;;  %vm1654_vm5 = vcmp.ge.f32.partialorder %v1622_v25, 0.0  ;;  %v1686_v37 = vmul.f32 0.2, %v1622_v25  ;;  %v1558_v18 = vld [vmem:[%s2722_s8 + $0x98] sm:$0xff]  ;;  %v1559_v19 = vld [vmem:[%s2722_s8 + $0xa0] sm:$0xff] }
 0x1cc   : > { %1746 = vst [vmem:[%s2722_s8 + $0x8] sm:$0xff] %v1714_v33  ;;  %1747 = vst [vmem:[%s2722_s8 + $0x10] sm:$0xff] %v1715_v34  ;;  %v1716_v36 = vsel %vm1652_vm3, %v1620_v21, %v1684_v30  ;;  %v1717_v40 = vsel %vm1653_vm4, %v1621_v24, %v1685_v35  ;;  %v1586_v41 = vmul.f32 %v2924_v2, %v1547_v26  ;;  %vm1655_vm6 = vcmp.ge.f32.partialorder %v1623_v38, 0.0  ;;  %v1560_v33 = vld [vmem:[%s2722_s8 + $0xa8] sm:$0xff]  ;;  %v1561_v34 = vld [vmem:[%s2722_s8 + $0xb0] sm:$0xff] }
 0x1cd   : > { %1748 = vst [vmem:[%s2722_s8 + $0x18] sm:$0xff] %v1716_v36  ;;  %v1587_v42 = vmul.f32 %v2924_v2, %v1548_v31  ;;  %v1588_v43 = vmul.f32 %v2924_v2, %v1549_v32  ;;  %1749 = vst [vmem:[%s2722_s8 + $0x20] sm:$0xff] %v1717_v40  ;;  %v1718_v47 = vsel %vm1654_vm5, %v1622_v25, %v1686_v37  ;;  %v1687_v48 = vmul.f32 0.2, %v1623_v38 }
 0x1ce   : > { %vm1656_vm7 = vcmp.ge.f32.partialorder %v1624_v39, 0.0  ;;  %1750 = vst [vmem:[%s2722_s8 + $0x28] sm:$0xff] %v1718_v47  ;;  %v1688_v49 = vmul.f32 0.2, %v1624_v39  ;;  %v1625_v50 = vadd.f32 %v2929_v3, %v1586_v41  ;;  %v1589_v54 = vmul.f32 %v2924_v2, %v1550_v44  ;;  %v1562_v41 = vld [vmem:[%s2722_s8 + $0xb8] sm:$0xff]  ;;  %v1564_v47 = vld [vmem:[%s2722_s8 + $0xc8] sm:$0xff] }
 0x1cf   : > { %v1626_v51 = vadd.f32 %v2929_v3, %v1587_v42  ;;  %v1627_v52 = vadd.f32 %v2929_v3, %v1588_v43  ;;  %v1719_v53 = vsel %vm1655_vm6, %v1623_v38, %v1687_v48  ;;  %v1590_v55 = vmul.f32 %v2924_v2, %v1551_v45  ;;  %v1565_v48 = vld [vmem:[%s2722_s8 + $0xd0] sm:$0xff] }
 0x1d0   : > { %v1591_v56 = vmul.f32 %v2924_v2, %v1552_v46  ;;  %1751 = vst [vmem:[%s2722_s8 + $0x30] sm:$0xff] %v1719_v53  ;;  %v1720_v58 = vsel %vm1656_vm7, %v1624_v39, %v1688_v49  ;;  %vm1657_vm8 = vcmp.ge.f32.partialorder %v1625_v50, 0.0  ;;  %v1689_v59 = vmul.f32 0.2, %v1625_v50  ;;  %v1563_v46 = vld [vmem:[%s2722_s8 + $0xc0] sm:$0xff] }
 0x1d1   : > { %vm1658_vm9 = vcmp.ge.f32.partialorder %v1626_v51, 0.0  ;;  %1752 = vst [vmem:[%s2722_s8 + $0x38] sm:$0xff] %v1720_v58  ;;  %v1690_v60 = vmul.f32 0.2, %v1626_v51  ;;  %vm1659_vm10 = vcmp.ge.f32.partialorder %v1627_v52, 0.0  ;;  %v1628_v62 = vadd.f32 %v2929_v3, %v1589_v54 }
 0x1d2   : > { %v1691_v61 = vmul.f32 0.2, %v1627_v52  ;;  %v1721_v63 = vsel %vm1657_vm8, %v1625_v50, %v1689_v59  ;;  %v1629_v0 = vadd.f32 %v2929_v3, %v1590_v55  ;;  %v1630_v1 = vadd.f32 %v2929_v3, %v1591_v56  ;;  %v1566_v59 = vld [vmem:[%s2722_s8 + $0xd8] sm:$0xff] }
 0x1d3   : > { %v1592_v4 = vmul.f32 %v2924_v2, %v1553_v57  ;;  %1753 = vst [vmem:[%s2722_s8 + $0x40] sm:$0xff] %v1721_v63  ;;  %v1722_v7 = vsel %vm1658_vm9, %v1626_v51, %v1690_v60  ;;  %vm1660_vm11 = vcmp.ge.f32.partialorder %v1628_v62, 0.0  ;;  %v1692_v9 = vmul.f32 0.2, %v1628_v62  ;;  %v1567_v60 = vld [vmem:[%s2722_s8 + $0xe0] sm:$0xff] }
 0x1d4   : > { %v1723_v8 = vsel %vm1659_vm10, %v1627_v52, %v1691_v61  ;;  %1754 = vst [vmem:[%s2722_s8 + $0x48] sm:$0xff] %v1722_v7  ;;  %vm1661_vm12 = vcmp.ge.f32.partialorder %v1629_v0, 0.0  ;;  %v1693_v12 = vmul.f32 0.2, %v1629_v0  ;;  %vm1662_vm13 = vcmp.ge.f32.partialorder %v1630_v1, 0.0 }
 0x1d5   : > { %1755 = vst [vmem:[%s2722_s8 + $0x50] sm:$0xff] %v1723_v8  ;;  %v1694_v13 = vmul.f32 0.2, %v1630_v1  ;;  %v1724_v14 = vsel %vm1660_vm11, %v1628_v62, %v1692_v9  ;;  %v1631_v15 = vadd.f32 %v2929_v3, %v1592_v4  ;;  %v1593_v16 = vmul.f32 %v2924_v2, %v1554_v5 }
 0x1d6   : > { %v1594_v17 = vmul.f32 %v2924_v2, %v1555_v6  ;;  %1756 = vst [vmem:[%s2722_s8 + $0x58] sm:$0xff] %v1724_v14  ;;  %v1725_v20 = vsel %vm1661_vm12, %v1629_v0, %v1693_v12  ;;  %v1595_v22 = vmul.f32 %v2924_v2, %v1556_v10  ;;  %v1596_v23 = vmul.f32 %v2924_v2, %v1557_v11  ;;  %v1568_v11 = vld [vmem:[%s2722_s8 + $0xe8] sm:$0xff]  ;;  %v1569_v12 = vld [vmem:[%s2722_s8 + $0xf0] sm:$0xff] }
 0x1d7   : > { %v1726_v21 = vsel %vm1662_vm13, %v1630_v1, %v1694_v13  ;;  %1757 = vst [vmem:[%s2722_s8 + $0x60] sm:$0xff] %v1725_v20  ;;  %vm1663_vm14 = vcmp.ge.f32.partialorder %v1631_v15, 0.0  ;;  %v1695_v24 = vmul.f32 0.2, %v1631_v15  ;;  %v1632_v25 = vadd.f32 %v2929_v3, %v1593_v16 }
 0x1d8   : > { %1758 = vst [vmem:[%s2722_s8 + $0x68] sm:$0xff] %v1726_v21  ;;  %v1633_v26 = vadd.f32 %v2929_v3, %v1594_v17  ;;  %v1634_v27 = vadd.f32 %v2929_v3, %v1595_v22  ;;  %v1635_v28 = vadd.f32 %v2929_v3, %v1596_v23  ;;  %v1597_v29 = vmul.f32 %v2924_v2, %v1558_v18 }
 0x1d9   : > { %v1598_v30 = vmul.f32 %v2924_v2, %v1559_v19  ;;  %v1727_v31 = vsel %vm1663_vm14, %v1631_v15, %v1695_v24  ;;  %vm1664_vm15 = vcmp.ge.f32.partialorder %v1632_v25, 0.0  ;;  %v1696_v32 = vmul.f32 0.2, %v1632_v25  ;;  %v1570_v19 = vld [vmem:[%s2722_s8 + $0xf8] sm:$0xff] }
 0x1da   : > { %vm1665_vm0 = vcmp.ge.f32.partialorder %v1633_v26, 0.0  ;;  %1759 = vst [vmem:[%s2722_s8 + $0x70] sm:$0xff] %v1727_v31  ;;  %v1697_v35 = vmul.f32 0.2, %v1633_v26  ;;  %vm1666_vm1 = vcmp.ge.f32.partialorder %v1634_v27, 0.0  ;;  %vm1667_vm2 = vcmp.ge.f32.partialorder %v1635_v28, 0.0 }
 0x1db   : > { %v1698_v36 = vmul.f32 0.2, %v1634_v27  ;;  %v1728_v37 = vsel %vm1664_vm15, %v1632_v25, %v1696_v32  ;;  %v1699_v38 = vmul.f32 0.2, %v1635_v28  ;;  %v1636_v39 = vadd.f32 %v2929_v3, %v1597_v29 }
 0x1dc   : > { %v1637_v40 = vadd.f32 %v2929_v3, %v1598_v30  ;;  %1760 = vst [vmem:[%s2722_s8 + $0x78] sm:$0xff] %v1728_v37  ;;  %v1729_v42 = vsel %vm1665_vm0, %v1633_v26, %v1697_v35  ;;  %v1599_v44 = vmul.f32 %v2924_v2, %v1560_v33  ;;  %v1600_v45 = vmul.f32 %v2924_v2, %v1561_v34 }
 0x1dd   : > { %v1730_v43 = vsel %vm1666_vm1, %v1634_v27, %v1698_v36  ;;  %1761 = vst [vmem:[%s2722_s8 + $0x80] sm:$0xff] %v1729_v42  ;;  %v1731_v49 = vsel %vm1667_vm2, %v1635_v28, %v1699_v38  ;;  %vm1668_vm3 = vcmp.ge.f32.partialorder %v1636_v39, 0.0  ;;  %v1700_v50 = vmul.f32 0.2, %v1636_v39 }
 0x1de   : > { %1762 = vst [vmem:[%s2722_s8 + $0x88] sm:$0xff] %v1730_v43  ;;  %vm1669_vm4 = vcmp.ge.f32.partialorder %v1637_v40, 0.0  ;;  %1763 = vst [vmem:[%s2722_s8 + $0x90] sm:$0xff] %v1731_v49  ;;  %v1701_v51 = vmul.f32 0.2, %v1637_v40  ;;  %v1638_v52 = vadd.f32 %v2929_v3, %v1599_v44  ;;  %v1639_v53 = vadd.f32 %v2929_v3, %v1600_v45 }
 0x1df   : > { %v1601_v54 = vmul.f32 %v2924_v2, %v1562_v41  ;;  %v1732_v55 = vsel %vm1668_vm3, %v1636_v39, %v1700_v50  ;;  %v1602_v56 = vmul.f32 %v2924_v2, %v1563_v46  ;;  %v1603_v57 = vmul.f32 %v2924_v2, %v1564_v47 }
 0x1e0   : > { %v1604_v58 = vmul.f32 %v2924_v2, %v1565_v48  ;;  %1764 = vst [vmem:[%s2722_s8 + $0x98] sm:$0xff] %v1732_v55  ;;  %v1733_v61 = vsel %vm1669_vm4, %v1637_v40, %v1701_v51  ;;  %vm1670_vm5 = vcmp.ge.f32.partialorder %v1638_v52, 0.0  ;;  %v1702_v62 = vmul.f32 0.2, %v1638_v52 }
 0x1e1   : > { %vm1671_vm6 = vcmp.ge.f32.partialorder %v1639_v53, 0.0  ;;  %1765 = vst [vmem:[%s2722_s8 + $0xa0] sm:$0xff] %v1733_v61  ;;  %v1703_v63 = vmul.f32 0.2, %v1639_v53  ;;  %v1640_v0 = vadd.f32 %v2929_v3, %v1601_v54  ;;  %v1641_v1 = vadd.f32 %v2929_v3, %v1602_v56 }
 0x1e2   : > { %v1642_v4 = vadd.f32 %v2929_v3, %v1603_v57  ;;  %v1734_v5 = vsel %vm1670_vm5, %v1638_v52, %v1702_v62  ;;  %v1643_v6 = vadd.f32 %v2929_v3, %v1604_v58  ;;  %v1605_v7 = vmul.f32 %v2924_v2, %v1566_v59 }
 0x1e3   : > { %v1606_v8 = vmul.f32 %v2924_v2, %v1567_v60  ;;  %1766 = vst [vmem:[%s2722_s8 + $0xa8] sm:$0xff] %v1734_v5  ;;  %v1735_v9 = vsel %vm1671_vm6, %v1639_v53, %v1703_v63  ;;  %vm1672_vm7 = vcmp.ge.f32.partialorder %v1640_v0, 0.0  ;;  %v1704_v10 = vmul.f32 0.2, %v1640_v0 }
 0x1e4   : > { %vm1673_vm8 = vcmp.ge.f32.partialorder %v1641_v1, 0.0  ;;  %1767 = vst [vmem:[%s2722_s8 + $0xb0] sm:$0xff] %v1735_v9  ;;  %v1705_v13 = vmul.f32 0.2, %v1641_v1  ;;  %vm1674_vm9 = vcmp.ge.f32.partialorder %v1642_v4, 0.0  ;;  %vm1675_vm10 = vcmp.ge.f32.partialorder %v1643_v6, 0.0 }
 0x1e5   : > { %v1706_v14 = vmul.f32 0.2, %v1642_v4  ;;  %v1736_v15 = vsel %vm1672_vm7, %v1640_v0, %v1704_v10  ;;  %v1707_v16 = vmul.f32 0.2, %v1643_v6  ;;  %v1644_v17 = vadd.f32 %v2929_v3, %v1605_v7 }
 0x1e6   : > { %v1645_v18 = vadd.f32 %v2929_v3, %v1606_v8  ;;  %1768 = vst [vmem:[%s2722_s8 + $0xb8] sm:$0xff] %v1736_v15  ;;  %v1737_v20 = vsel %vm1673_vm8, %v1641_v1, %v1705_v13  ;;  %v1607_v22 = vmul.f32 %v2924_v2, %v1568_v11  ;;  %v1608_v23 = vmul.f32 %v2924_v2, %v1569_v12 }
 0x1e7   : > { %v1738_v21 = vsel %vm1674_vm9, %v1642_v4, %v1706_v14  ;;  %1769 = vst [vmem:[%s2722_s8 + $0xc0] sm:$0xff] %v1737_v20  ;;  %v1739_v24 = vsel %vm1675_vm10, %v1643_v6, %v1707_v16  ;;  %vm1676_vm11 = vcmp.ge.f32.partialorder %v1644_v17, 0.0  ;;  %v1708_v25 = vmul.f32 0.2, %v1644_v17 }
 0x1e8   : > { %1770 = vst [vmem:[%s2722_s8 + $0xc8] sm:$0xff] %v1738_v21  ;;  %vm1677_vm12 = vcmp.ge.f32.partialorder %v1645_v18, 0.0  ;;  %1771 = vst [vmem:[%s2722_s8 + $0xd0] sm:$0xff] %v1739_v24  ;;  %v1709_v26 = vmul.f32 0.2, %v1645_v18  ;;  %v1646_v27 = vadd.f32 %v2929_v3, %v1607_v22  ;;  %v1647_v28 = vadd.f32 %v2929_v3, %v1608_v23 }
 0x1e9   : > { %v1609_v29 = vmul.f32 %v2924_v2, %v1570_v19  ;;  %v1740_v30 = vsel %vm1676_vm11, %v1644_v17, %v1708_v25 }
 0x1ea   : > { %1772 = vst [vmem:[%s2722_s8 + $0xd8] sm:$0xff] %v1740_v30  ;;  %v1741_v31 = vsel %vm1677_vm12, %v1645_v18, %v1709_v26  ;;  %vm1678_vm13 = vcmp.ge.f32.partialorder %v1646_v27, 0.0  ;;  %v1710_v32 = vmul.f32 0.2, %v1646_v27  ;;  %vm1679_vm14 = vcmp.ge.f32.partialorder %v1647_v28, 0.0 }
 0x1eb   : > { %1773 = vst [vmem:[%s2722_s8 + $0xe0] sm:$0xff] %v1741_v31  ;;  %v1711_v33 = vmul.f32 0.2, %v1647_v28  ;;  %v1648_v34 = vadd.f32 %v2929_v3, %v1609_v29 }
 0x1ec   : > { %v1742_v35 = vsel %vm1678_vm13, %v1646_v27, %v1710_v32 }
 0x1ed   : > { %1774 = vst [vmem:[%s2722_s8 + $0xe8] sm:$0xff] %v1742_v35  ;;  %v1743_v36 = vsel %vm1679_vm14, %v1647_v28, %v1711_v33  ;;  %vm1680_vm15 = vcmp.ge.f32.partialorder %v1648_v34, 0.0  ;;  %v1712_v37 = vmul.f32 0.2, %v1648_v34 }
 0x1ee   : > { %1775 = vst [vmem:[%s2722_s8 + $0xf0] sm:$0xff] %v1743_v36 }
 0x1ef   : > { %v1744_v38 = vsel %vm1680_vm15, %v1648_v34, %v1712_v37 }
 0x1f0   : > { %1776 = vst [vmem:[%s2722_s8 + $0xf8] sm:$0xff] %v1744_v38 }
 0x1f1 PF: > { %s14_s21 = sadd.s32 1, %s2489_s21   ;;  %s3086_s15 = smov %s2469_s16 }
 0x1f2   : > { %p11_p0 = scmp.ge.s32.totalorder %s14_s21, 6   ;;  %s3087_s16 = smov %s2568_s28 }
 0x1f3   : > { %s3088_s17 = smov %s2481_s19  ;;  %s3089_s18 = smov %s2485_s20 }
 0x1f4   : > { %s3090_s19 = smov %s3093_s22  ;;  %s3091_s20 = smov %s3097_s23 }
 0x1f5   :  { %13 = sbr.rel (!%p11_p0) target bundleno = 4 (0x4), region = 111 }

// kernel: discriminator_forward.8
= control target key start
LH: loop header
LB: loop body
LE: loop exit
PB: predicated region body
PF: predicated region fallthrough
CT: control target
= control target key end

     0   :  { %s2088_s15 = smov 0   ;;  %s2090_s16 = smov 0   ;;  %s2881_s0 = inlined_call_operand.vmem [shape: bf16[128,2048], index: 0, kind: input, shape index: {}]   ;;  %s2882_s1 = inlined_call_operand.vmem [shape: bf16[2048,256], index: 1, kind: input, shape index: {}]   ;;  %s2883_s2 = inlined_call_operand.vmem [shape: f32[1,256], index: 2, kind: input, shape index: {}]   ;;  %s2884_s3 = inlined_call_operand.vmem [shape: f32[1,256], index: 3, kind: input, shape index: {}]   ;;  %s2885_s4 = inlined_call_operand.vmem [shape: f32[128,256], index: 4, kind: output, shape index: {}]  }
   0x1   :  { %s2092_s17 = smov 0   ;;  %s2094_s18 = smov 0  }
   0x2   :  { %s2096_s19 = smov 0  }
   0x3 LB: > { %s26_s20 = sadd.s32 1, %s2056_s18  ;;  %p49_p1 = scmp.ne.s32.totalorder %s2048_s16, %s2044_s15  ;;  %s2060_s19 = sphi %s2096_s19, %s14_s19   ;;  %s2056_s18 = sphi %s2094_s18, %s2889_s18   ;;  %s2052_s17 = sphi %s2092_s17, %s2888_s17   ;;  %s2048_s16 = sphi %s2090_s16, %s2887_s16   ;;  %s2044_s15 = sphi %s2088_s15, %s2886_s15  }
   0x4   : > { %p27_p0 = scmp.ge.s32.totalorder %s26_s20, 4  ;;  %p50_p2 = scmp.eq.s32.totalorder %s2060_s19, 0 }
   0x5   : > { %s42_s22 = sadd.s32 1, %s2048_s16  ;;  %p1724_p5 = scmp.ge.s32.totalorder %s2060_s19, 4 }
   0x6   : > { %s2891_s20 = smov (%p27_p0, %s26_s20), 0  ;;  %p51_p3 = por %p50_p2, %p49_p1 }
   0x7   : > { %s38_s21 = ssub.s32 %s2056_s18, %s2891_s20  ;;  %199 = sbr.rel (%p1724_p5) target bundleno = 32 (0x20), region = 24 }
   0x8   : > { %p40_p4 = scmp.eq.s32.totalorder %s38_s21, 0 }
   0xa   : > { %s2123_s23 = scalar_select %p40_p4, %s2048_s16, %s42_s22  }
   0xc   : > { %202 = sbr.rel (!%p51_p3) target bundleno = 32 (0x20), region = 28  ;;  %s204_s24 = sand.u32 (%p51_p3), 1, %s2048_s16  }
   0xd   : > { %s1835_s25 = sshll.u32 (%p51_p3), %s2056_s18, 4  ;;  %s1725_s26 = sshll.u32 (%p51_p3), %s204_s24, 8 }
   0xe   : > { %s2131_s29 = scalar_lea.vmem (%p51_p3), %s2881_s0, %s1835_s25  ;;  %s2136_s30 = scalar_lea.vmem (%p51_p3), [#allocation2], %s1725_s26 }
   0xf   : > { %v225_v0 = vld [vmem:[%s2131_s29] sm:$0xff] (%p51_p3)  ;;  %v227_v1 = vld [vmem:[%s2131_s29 + $0x8] sm:$0xff] (%p51_p3) }
  0x10   : > { %v229_v2 = vld [vmem:[%s2131_s29 + $0x40] sm:$0xff] (%p51_p3)  ;;  %226 = vst [vmem:[%s2136_s30] sm:$0xff] (%p51_p3), %v225_v0  ;;  %228 = vst [vmem:[%s2136_s30 + $0x8] sm:$0xff] (%p51_p3), %v227_v1  ;;  %v231_v3 = vld [vmem:[%s2131_s29 + $0x48] sm:$0xff] (%p51_p3) }
  0x11   : > { %230 = vst [vmem:[%s2136_s30 + $0x10] sm:$0xff] %v229_v2  ;;  %v233_v4 = vld [vmem:[%s2131_s29 + $0x80] sm:$0xff]  ;;  %v235_v5 = vld [vmem:[%s2131_s29 + $0x88] sm:$0xff]  ;;  %232 = vst [vmem:[%s2136_s30 + $0x18] sm:$0xff] %v231_v3 }
  0x12   : > { %234 = vst [vmem:[%s2136_s30 + $0x20] sm:$0xff] %v233_v4  ;;  %236 = vst [vmem:[%s2136_s30 + $0x28] sm:$0xff] %v235_v5  ;;  %v237_v6 = vld [vmem:[%s2131_s29 + $0xc0] sm:$0xff]  ;;  %v239_v7 = vld [vmem:[%s2131_s29 + $0xc8] sm:$0xff] }
  0x13   : > { %v241_v8 = vld [vmem:[%s2131_s29 + $0x100] sm:$0xff]  ;;  %238 = vst [vmem:[%s2136_s30 + $0x30] sm:$0xff] %v237_v6  ;;  %240 = vst [vmem:[%s2136_s30 + $0x38] sm:$0xff] %v239_v7  ;;  %v243_v9 = vld [vmem:[%s2131_s29 + $0x108] sm:$0xff] }
  0x14   : > { %242 = vst [vmem:[%s2136_s30 + $0x40] sm:$0xff] %v241_v8  ;;  %v245_v10 = vld [vmem:[%s2131_s29 + $0x140] sm:$0xff]  ;;  %v247_v11 = vld [vmem:[%s2131_s29 + $0x148] sm:$0xff]  ;;  %244 = vst [vmem:[%s2136_s30 + $0x48] sm:$0xff] %v243_v9 }
  0x15   : > { %246 = vst [vmem:[%s2136_s30 + $0x50] sm:$0xff] %v245_v10  ;;  %248 = vst [vmem:[%s2136_s30 + $0x58] sm:$0xff] %v247_v11  ;;  %v249_v12 = vld [vmem:[%s2131_s29 + $0x180] sm:$0xff]  ;;  %v251_v13 = vld [vmem:[%s2131_s29 + $0x188] sm:$0xff] }
  0x16   : > { %v253_v14 = vld [vmem:[%s2131_s29 + $0x1c0] sm:$0xff]  ;;  %250 = vst [vmem:[%s2136_s30 + $0x60] sm:$0xff] %v249_v12  ;;  %252 = vst [vmem:[%s2136_s30 + $0x68] sm:$0xff] %v251_v13  ;;  %v255_v15 = vld [vmem:[%s2131_s29 + $0x1c8] sm:$0xff] }
  0x17   : > { %254 = vst [vmem:[%s2136_s30 + $0x70] sm:$0xff] %v253_v14  ;;  %v257_v16 = vld [vmem:[%s2131_s29 + $0x200] sm:$0xff]  ;;  %v259_v17 = vld [vmem:[%s2131_s29 + $0x208] sm:$0xff]  ;;  %256 = vst [vmem:[%s2136_s30 + $0x78] sm:$0xff] %v255_v15 }
  0x18   : > { %258 = vst [vmem:[%s2136_s30 + $0x80] sm:$0xff] %v257_v16  ;;  %260 = vst [vmem:[%s2136_s30 + $0x88] sm:$0xff] %v259_v17  ;;  %v261_v18 = vld [vmem:[%s2131_s29 + $0x240] sm:$0xff]  ;;  %v263_v19 = vld [vmem:[%s2131_s29 + $0x248] sm:$0xff] }
  0x19   : > { %v265_v20 = vld [vmem:[%s2131_s29 + $0x280] sm:$0xff]  ;;  %262 = vst [vmem:[%s2136_s30 + $0x90] sm:$0xff] %v261_v18  ;;  %264 = vst [vmem:[%s2136_s30 + $0x98] sm:$0xff] %v263_v19  ;;  %v267_v21 = vld [vmem:[%s2131_s29 + $0x288] sm:$0xff] }
  0x1a   : > { %266 = vst [vmem:[%s2136_s30 + $0xa0] sm:$0xff] %v265_v20  ;;  %v269_v22 = vld [vmem:[%s2131_s29 + $0x2c0] sm:$0xff]  ;;  %v271_v23 = vld [vmem:[%s2131_s29 + $0x2c8] sm:$0xff]  ;;  %268 = vst [vmem:[%s2136_s30 + $0xa8] sm:$0xff] %v267_v21 }
  0x1b   : > { %270 = vst [vmem:[%s2136_s30 + $0xb0] sm:$0xff] %v269_v22  ;;  %272 = vst [vmem:[%s2136_s30 + $0xb8] sm:$0xff] %v271_v23  ;;  %v273_v24 = vld [vmem:[%s2131_s29 + $0x300] sm:$0xff]  ;;  %v275_v25 = vld [vmem:[%s2131_s29 + $0x308] sm:$0xff] }
  0x1c   : > { %v277_v26 = vld [vmem:[%s2131_s29 + $0x340] sm:$0xff]  ;;  %274 = vst [vmem:[%s2136_s30 + $0xc0] sm:$0xff] %v273_v24  ;;  %276 = vst [vmem:[%s2136_s30 + $0xc8] sm:$0xff] %v275_v25  ;;  %v279_v27 = vld [vmem:[%s2131_s29 + $0x348] sm:$0xff] }
  0x1d   : > { %278 = vst [vmem:[%s2136_s30 + $0xd0] sm:$0xff] %v277_v26  ;;  %v281_v28 = vld [vmem:[%s2131_s29 + $0x380] sm:$0xff]  ;;  %v283_v29 = vld [vmem:[%s2131_s29 + $0x388] sm:$0xff]  ;;  %280 = vst [vmem:[%s2136_s30 + $0xd8] sm:$0xff] %v279_v27 }
  0x1e   : > { %282 = vst [vmem:[%s2136_s30 + $0xe0] sm:$0xff] %v281_v28  ;;  %284 = vst [vmem:[%s2136_s30 + $0xe8] sm:$0xff] %v283_v29  ;;  %v285_v30 = vld [vmem:[%s2131_s29 + $0x3c0] sm:$0xff]  ;;  %v287_v31 = vld [vmem:[%s2131_s29 + $0x3c8] sm:$0xff] }
  0x1f   : > { %286 = vst [vmem:[%s2136_s30 + $0xf0] sm:$0xff] %v285_v30  ;;  %288 = vst [vmem:[%s2136_s30 + $0xf8] sm:$0xff] %v287_v31 }
  0x20 PF: > { %p1728_p6 = scmp.ge.s32.totalorder %s2060_s19, 1  ;;  %p308_p7 = scmp.lt.s32.totalorder %s2060_s19, 5 }
  0x22   : > { %p309_p8 = pnand %p1728_p6, %p308_p7 }
  0x23   : > { %s315_s5 = sand.u32 (!%p309_p8), 1, %s2044_s15   ;;  %s1730_s6 = sshll.u32 (!%p309_p8), %s2052_s17, 6 }
  0x24   : > { %312 = sbr.rel (%p309_p8) target bundleno = 442 (0x1ba), region = 55  ;;  %s1729_s7 = sshll.u32 (!%p309_p8), %s315_s5, 8 }
  0x25   : > { %p367_p9 = scmp.lt.s32.totalorder (!%p309_p8), %s1730_s6, 255  ;;  %s2208_s12 = scalar_lea.vmem (!%p309_p8), [#allocation2], %s1729_s7 }
  0x26   : > { %p1733_p10 = scmp.ne.s32.totalorder (!%p309_p8), %s2052_s17, 0 }
  0x29   : > { %s2893_s6 = smov (!%p367_p9, %s1730_s6), 255  ;;  %402 = sbr.rel (%p1733_p10) target bundleno = 63 (0x3f), region = 63 }
  0x2a   : > { %s1836_s8 = sshll.u32 %s2893_s6, 3 }
  0x2b   : > { %s2206_s11 = scalar_lea.vmem %s2882_s1, %s1836_s8 }
  0x2e   : > { %v2062_v32 = vmov 0.0  }
  0x2f   : > { %403 = vst [vmem:[%s2885_s4] sm:$0xff] %v2062_v32  ;;  %404 = vst [vmem:[%s2885_s4 + $0x8] sm:$0xff] %v2062_v32 }
  0x30   : > { %405 = vst [vmem:[%s2885_s4 + $0x10] sm:$0xff] %v2062_v32  ;;  %406 = vst [vmem:[%s2885_s4 + $0x18] sm:$0xff] %v2062_v32 }
  0x31   : > { %407 = vst [vmem:[%s2885_s4 + $0x20] sm:$0xff] %v2062_v32  ;;  %408 = vst [vmem:[%s2885_s4 + $0x28] sm:$0xff] %v2062_v32 }
  0x32   : > { %409 = vst [vmem:[%s2885_s4 + $0x30] sm:$0xff] %v2062_v32  ;;  %410 = vst [vmem:[%s2885_s4 + $0x38] sm:$0xff] %v2062_v32 }
  0x33   : > { %411 = vst [vmem:[%s2885_s4 + $0x40] sm:$0xff] %v2062_v32  ;;  %412 = vst [vmem:[%s2885_s4 + $0x48] sm:$0xff] %v2062_v32 }
  0x34   : > { %413 = vst [vmem:[%s2885_s4 + $0x50] sm:$0xff] %v2062_v32  ;;  %414 = vst [vmem:[%s2885_s4 + $0x58] sm:$0xff] %v2062_v32 }
  0x35   : > { %415 = vst [vmem:[%s2885_s4 + $0x60] sm:$0xff] %v2062_v32  ;;  %416 = vst [vmem:[%s2885_s4 + $0x68] sm:$0xff] %v2062_v32 }
  0x36   : > { %417 = vst [vmem:[%s2885_s4 + $0x70] sm:$0xff] %v2062_v32  ;;  %418 = vst [vmem:[%s2885_s4 + $0x78] sm:$0xff] %v2062_v32 }
  0x37   : > { %419 = vst [vmem:[%s2885_s4 + $0x80] sm:$0xff] %v2062_v32  ;;  %420 = vst [vmem:[%s2885_s4 + $0x88] sm:$0xff] %v2062_v32 }
  0x38   : > { %421 = vst [vmem:[%s2885_s4 + $0x90] sm:$0xff] %v2062_v32  ;;  %422 = vst [vmem:[%s2885_s4 + $0x98] sm:$0xff] %v2062_v32 }
  0x39   : > { %423 = vst [vmem:[%s2885_s4 + $0xa0] sm:$0xff] %v2062_v32  ;;  %424 = vst [vmem:[%s2885_s4 + $0xa8] sm:$0xff] %v2062_v32 }
  0x3a   : > { %425 = vst [vmem:[%s2885_s4 + $0xb0] sm:$0xff] %v2062_v32  ;;  %426 = vst [vmem:[%s2885_s4 + $0xb8] sm:$0xff] %v2062_v32 }
  0x3b   : > { %427 = vst [vmem:[%s2885_s4 + $0xc0] sm:$0xff] %v2062_v32  ;;  %428 = vst [vmem:[%s2885_s4 + $0xc8] sm:$0xff] %v2062_v32 }
  0x3c   : > { %429 = vst [vmem:[%s2885_s4 + $0xd0] sm:$0xff] %v2062_v32  ;;  %430 = vst [vmem:[%s2885_s4 + $0xd8] sm:$0xff] %v2062_v32 }
  0x3d   : > { %431 = vst [vmem:[%s2885_s4 + $0xe0] sm:$0xff] %v2062_v32  ;;  %432 = vst [vmem:[%s2885_s4 + $0xe8] sm:$0xff] %v2062_v32 }
  0x3e   : > { %433 = vst [vmem:[%s2885_s4 + $0xf0] sm:$0xff] %v2062_v32  ;;  %434 = vst [vmem:[%s2885_s4 + $0xf8] sm:$0xff] %v2062_v32 }
  0x3f PF: > { %v1878_v33 = vld [vmem:[%s2206_s11 + $0x74] ss:$8 sps:$4 sm:$0xff]   ;;  %v1882_v35 = vld [vmem:[%s2206_s11 + $0x70] ss:$8 sps:$4 sm:$0xff]   ;;  %v1884_v37 = vld [vmem:[%s2206_s11 + $0x64] ss:$8 sps:$4 sm:$0xff]  }
  0x40   : > { %v1880_v34 = vld [vmem:[%s2206_s11 + $0x174] ss:$8 sps:$4 sm:$0xff]   ;;  %1043 = vmatprep.subr.bf16.mxu0 %v1878_v33  ;;  %v1883_v36 = vld [vmem:[%s2206_s11 + $0x170] ss:$8 sps:$4 sm:$0xff]   ;;  %v1886_v38 = vld [vmem:[%s2206_s11 + $0x164] ss:$8 sps:$4 sm:$0xff]  }
  0x41   : > { %1156 = vmatprep.subr.bf16.mxu1 %v1880_v34  ;;  %1044 = vmatpush1.bf16.msra.mxu0 %v1882_v35  ;;  %v1888_v39 = vld [vmem:[%s2206_s11 + $0x60] ss:$8 sps:$4 sm:$0xff]   ;;  %v1890_v41 = vld [vmem:[%s2206_s11 + $0x54] ss:$8 sps:$4 sm:$0xff]   ;;  %v1894_v43 = vld [vmem:[%s2206_s11 + $0x50] ss:$8 sps:$4 sm:$0xff]  }
  0x42   : > { %1157 = vmatpush1.bf16.msra.mxu1 %v1883_v36  ;;  %1045 = vmatprep.subr.bf16.mxu0 %v1884_v37  ;;  %v1889_v40 = vld [vmem:[%s2206_s11 + $0x160] ss:$8 sps:$4 sm:$0xff]   ;;  %v1892_v42 = vld [vmem:[%s2206_s11 + $0x154] ss:$8 sps:$4 sm:$0xff]   ;;  %v1895_v44 = vld [vmem:[%s2206_s11 + $0x150] ss:$8 sps:$4 sm:$0xff]  }
  0x43   : > { %1158 = vmatprep.subr.bf16.mxu1 %v1886_v38  ;;  %v1896_v45 = vld [vmem:[%s2206_s11 + $0x44] ss:$8 sps:$4 sm:$0xff]   ;;  %v1900_v47 = vld [vmem:[%s2206_s11 + $0x40] ss:$8 sps:$4 sm:$0xff]   ;;  %v1902_v49 = vld [vmem:[%s2206_s11 + $0x34] ss:$8 sps:$4 sm:$0xff]  }
  0x44   : > { %v1898_v46 = vld [vmem:[%s2206_s11 + $0x144] ss:$8 sps:$4 sm:$0xff]   ;;  %v1901_v48 = vld [vmem:[%s2206_s11 + $0x140] ss:$8 sps:$4 sm:$0xff]   ;;  %v1904_v50 = vld [vmem:[%s2206_s11 + $0x134] ss:$8 sps:$4 sm:$0xff]  }
  0x45   : > { %1046 = vmatpush1.bf16.msra.mxu0 %v1888_v39  ;;  %v1906_v51 = vld [vmem:[%s2206_s11 + $0x30] ss:$8 sps:$4 sm:$0xff]   ;;  %v1908_v53 = vld [vmem:[%s2206_s11 + $0x24] ss:$8 sps:$4 sm:$0xff]   ;;  %v1912_v55 = vld [vmem:[%s2206_s11 + $0x20] ss:$8 sps:$4 sm:$0xff]  }
  0x46   : > { %1159 = vmatpush1.bf16.msra.mxu1 %v1889_v40  ;;  %1047 = vmatprep.subr.bf16.mxu0 %v1890_v41  ;;  %v1907_v52 = vld [vmem:[%s2206_s11 + $0x130] ss:$8 sps:$4 sm:$0xff]   ;;  %v1910_v54 = vld [vmem:[%s2206_s11 + $0x124] ss:$8 sps:$4 sm:$0xff]   ;;  %v1913_v56 = vld [vmem:[%s2206_s11 + $0x120] ss:$8 sps:$4 sm:$0xff]  }
  0x47   : > { %1160 = vmatprep.subr.bf16.mxu1 %v1892_v42  ;;  %v1914_v57 = vld [vmem:[%s2206_s11 + $0x14] ss:$8 sps:$4 sm:$0xff]   ;;  %v1918_v59 = vld [vmem:[%s2206_s11 + $0x10] ss:$8 sps:$4 sm:$0xff]   ;;  %v1920_v61 = vld [vmem:[%s2206_s11 + $0x4] ss:$8 sps:$4 sm:$0xff]  }
  0x48   : > { %v1916_v58 = vld [vmem:[%s2206_s11 + $0x114] ss:$8 sps:$4 sm:$0xff]   ;;  %v1919_v60 = vld [vmem:[%s2206_s11 + $0x110] ss:$8 sps:$4 sm:$0xff]   ;;  %v1922_v62 = vld [vmem:[%s2206_s11 + $0x104] ss:$8 sps:$4 sm:$0xff]  }
  0x49   : > { %1048 = vmatpush1.bf16.msra.mxu0 %v1894_v43  ;;  %v1924_v63 = vld [vmem:[%s2206_s11] ss:$8 sps:$4 sm:$0xff]   ;;  %v1926_v1 = vld [vmem:[%s2206_s11 + $0xf4] ss:$8 sps:$4 sm:$0xff]   ;;  %v1930_v3 = vld [vmem:[%s2206_s11 + $0xf0] ss:$8 sps:$4 sm:$0xff]  }
  0x4a   : > { %1161 = vmatpush1.bf16.msra.mxu1 %v1895_v44  ;;  %1049 = vmatprep.subr.bf16.mxu0 %v1896_v45  ;;  %v1925_v0 = vld [vmem:[%s2206_s11 + $0x100] ss:$8 sps:$4 sm:$0xff]   ;;  %v1928_v2 = vld [vmem:[%s2206_s11 + $0x1f4] ss:$8 sps:$4 sm:$0xff]   ;;  %v1931_v4 = vld [vmem:[%s2206_s11 + $0x1f0] ss:$8 sps:$4 sm:$0xff]  }
  0x4b   : > { %1162 = vmatprep.subr.bf16.mxu1 %v1898_v46  ;;  %v1932_v5 = vld [vmem:[%s2206_s11 + $0xe4] ss:$8 sps:$4 sm:$0xff]   ;;  %v1936_v7 = vld [vmem:[%s2206_s11 + $0xe0] ss:$8 sps:$4 sm:$0xff]   ;;  %v1938_v9 = vld [vmem:[%s2206_s11 + $0xd4] ss:$8 sps:$4 sm:$0xff]  }
  0x4c   : > { %v1934_v6 = vld [vmem:[%s2206_s11 + $0x1e4] ss:$8 sps:$4 sm:$0xff]   ;;  %v1937_v8 = vld [vmem:[%s2206_s11 + $0x1e0] ss:$8 sps:$4 sm:$0xff]   ;;  %v1940_v10 = vld [vmem:[%s2206_s11 + $0x1d4] ss:$8 sps:$4 sm:$0xff]  }
  0x4d   : > { %1050 = vmatpush1.bf16.msra.mxu0 %v1900_v47  ;;  %v1942_v11 = vld [vmem:[%s2206_s11 + $0xd0] ss:$8 sps:$4 sm:$0xff]   ;;  %v1944_v13 = vld [vmem:[%s2206_s11 + $0xc4] ss:$8 sps:$4 sm:$0xff]   ;;  %v1948_v15 = vld [vmem:[%s2206_s11 + $0xc0] ss:$8 sps:$4 sm:$0xff]  }
  0x4e   : > { %1163 = vmatpush1.bf16.msra.mxu1 %v1901_v48  ;;  %1051 = vmatprep.subr.bf16.mxu0 %v1902_v49  ;;  %v1943_v12 = vld [vmem:[%s2206_s11 + $0x1d0] ss:$8 sps:$4 sm:$0xff]   ;;  %v1946_v14 = vld [vmem:[%s2206_s11 + $0x1c4] ss:$8 sps:$4 sm:$0xff]   ;;  %v1949_v16 = vld [vmem:[%s2206_s11 + $0x1c0] ss:$8 sps:$4 sm:$0xff]  }
  0x4f   : > { %1164 = vmatprep.subr.bf16.mxu1 %v1904_v50  ;;  %v1950_v17 = vld [vmem:[%s2206_s11 + $0xb4] ss:$8 sps:$4 sm:$0xff]   ;;  %v1954_v21 = vld [vmem:[%s2206_s11 + $0xb0] ss:$8 sps:$4 sm:$0xff]   ;;  %v1956_v23 = vld [vmem:[%s2206_s11 + $0xa4] ss:$8 sps:$4 sm:$0xff]  }
  0x50   : > { %v1976_v18 = vld [vmem:[%s2208_s12 + $0x4] ss:$16 sps:$4 sm:$0xff]   ;;  %v1979_v20 = vld [vmem:[%s2208_s12 + $0xc] ss:$16 sps:$4 sm:$0xff]   ;;  %v1955_v22 = vld [vmem:[%s2206_s11 + $0x1b0] ss:$8 sps:$4 sm:$0xff]  }
  0x51   : > { %1052 = vmatpush1.bf16.msra.mxu0 %v1906_v51  ;;  %v1952_v19 = vld [vmem:[%s2206_s11 + $0x1b4] ss:$8 sps:$4 sm:$0xff]   ;;  %1075 = vmatprep.mubr.bf16.mxu0 %v1976_v18  ;;  %v1958_v24 = vld [vmem:[%s2206_s11 + $0x1a4] ss:$8 sps:$4 sm:$0xff]   ;;  %v1960_v25 = vld [vmem:[%s2206_s11 + $0xa0] ss:$8 sps:$4 sm:$0xff]  }
  0x52   : > { %1165 = vmatpush1.bf16.msra.mxu1 %v1907_v52  ;;  %1053 = vmatprep.subr.bf16.mxu0 %v1908_v53  ;;  %v1961_v26 = vld [vmem:[%s2206_s11 + $0x1a0] ss:$8 sps:$4 sm:$0xff]   ;;  %v1962_v27 = vld [vmem:[%s2206_s11 + $0x94] ss:$8 sps:$4 sm:$0xff]   ;;  %v1966_v29 = vld [vmem:[%s2206_s11 + $0x90] ss:$8 sps:$4 sm:$0xff]  }
  0x53   : > { %1166 = vmatprep.subr.bf16.mxu1 %v1910_v54  ;;  %1188 = vmatprep.mubr.bf16.mxu1 %v1979_v20  ;;  %v1964_v28 = vld [vmem:[%s2206_s11 + $0x194] ss:$8 sps:$4 sm:$0xff]   ;;  %v1967_v30 = vld [vmem:[%s2206_s11 + $0x190] ss:$8 sps:$4 sm:$0xff]   ;;  %v1968_v31 = vld [vmem:[%s2206_s11 + $0x84] ss:$8 sps:$4 sm:$0xff]  }
  0x54   : > { %v1970_v32 = vld [vmem:[%s2206_s11 + $0x184] ss:$8 sps:$4 sm:$0xff]   ;;  %v1972_v33 = vld [vmem:[%s2206_s11 + $0x80] ss:$8 sps:$4 sm:$0xff]   ;;  %p1830_p11 = scmp.ne.s32.totalorder %s2052_s17, 3 }
  0x55   : > { %1054 = vmatpush1.bf16.msra.mxu0 %v1912_v55  ;;  %v1973_v34 = vld [vmem:[%s2206_s11 + $0x180] ss:$8 sps:$4 sm:$0xff]   ;;  %v1980_v37 = vld [vmem:[%s2208_s12 + $0x24] ss:$16 sps:$4 sm:$0xff]   ;;  %v1982_v38 = vld [vmem:[%s2208_s12 + $0x2c] ss:$16 sps:$4 sm:$0xff]  }
  0x56   : > { %1167 = vmatpush1.bf16.msra.mxu1 %v1913_v56  ;;  %1055 = vmatprep.subr.bf16.mxu0 %v1914_v57  ;;  %v1974_v35 = vld [vmem:[%s2208_s12] ss:$16 sps:$4 sm:$0xff]   ;;  %v1977_v36 = vld [vmem:[%s2208_s12 + $0x8] ss:$16 sps:$4 sm:$0xff]   ;;  %v1986_v41 = vld [vmem:[%s2208_s12 + $0x44] ss:$16 sps:$4 sm:$0xff]  }
  0x57   : > { %1168 = vmatprep.subr.bf16.mxu1 %v1916_v58  ;;  %v1984_v39 = vld [vmem:[%s2208_s12 + $0x20] ss:$16 sps:$4 sm:$0xff]   ;;  %v1985_v40 = vld [vmem:[%s2208_s12 + $0x28] ss:$16 sps:$4 sm:$0xff]   ;;  %v1988_v42 = vld [vmem:[%s2208_s12 + $0x4c] ss:$16 sps:$4 sm:$0xff]  }
  0x58   : > { %v1990_v43 = vld [vmem:[%s2208_s12 + $0x40] ss:$16 sps:$4 sm:$0xff]   ;;  %v1991_v44 = vld [vmem:[%s2208_s12 + $0x48] ss:$16 sps:$4 sm:$0xff]   ;;  %v1992_v45 = vld [vmem:[%s2208_s12 + $0x64] ss:$16 sps:$4 sm:$0xff]  }
  0x59   : > { %1056 = vmatpush1.bf16.msra.mxu0 %v1918_v59  ;;  %v1994_v46 = vld [vmem:[%s2208_s12 + $0x6c] ss:$16 sps:$4 sm:$0xff]   ;;  %v1996_v47 = vld [vmem:[%s2208_s12 + $0x60] ss:$16 sps:$4 sm:$0xff]   ;;  %v1997_v48 = vld [vmem:[%s2208_s12 + $0x68] ss:$16 sps:$4 sm:$0xff]  }
  0x5a   : > { %1169 = vmatpush1.bf16.msra.mxu1 %v1919_v60  ;;  %1057 = vmatprep.subr.bf16.mxu0 %v1920_v61  ;;  %v1998_v49 = vld [vmem:[%s2208_s12 + $0x84] ss:$16 sps:$4 sm:$0xff]   ;;  %v2000_v50 = vld [vmem:[%s2208_s12 + $0x8c] ss:$16 sps:$4 sm:$0xff]   ;;  %v2002_v51 = vld [vmem:[%s2208_s12 + $0x80] ss:$16 sps:$4 sm:$0xff]  }
  0x5b   : > { %1170 = vmatprep.subr.bf16.mxu1 %v1922_v62  ;;  %v2003_v52 = vld [vmem:[%s2208_s12 + $0x88] ss:$16 sps:$4 sm:$0xff]   ;;  %v2004_v53 = vld [vmem:[%s2208_s12 + $0xa4] ss:$16 sps:$4 sm:$0xff]   ;;  %v2006_v54 = vld [vmem:[%s2208_s12 + $0xac] ss:$16 sps:$4 sm:$0xff]  }
  0x5c   : > { %v2008_v55 = vld [vmem:[%s2208_s12 + $0xa0] ss:$16 sps:$4 sm:$0xff]   ;;  %v2009_v56 = vld [vmem:[%s2208_s12 + $0xa8] ss:$16 sps:$4 sm:$0xff]   ;;  %v2010_v57 = vld [vmem:[%s2208_s12 + $0xc4] ss:$16 sps:$4 sm:$0xff]  }
  0x5d   : > { %1058 = vmatpush1.bf16.msra.mxu0 %v1924_v63  ;;  %v2012_v58 = vld [vmem:[%s2208_s12 + $0xcc] ss:$16 sps:$4 sm:$0xff]   ;;  %v2014_v59 = vld [vmem:[%s2208_s12 + $0xc0] ss:$16 sps:$4 sm:$0xff]   ;;  %v2015_v60 = vld [vmem:[%s2208_s12 + $0xc8] ss:$16 sps:$4 sm:$0xff]  }
  0x5e   : > { %1171 = vmatpush1.bf16.msra.mxu1 %v1925_v0  ;;  %1059 = vmatprep.subr.bf16.mxu0 %v1926_v1  ;;  %v2016_v61 = vld [vmem:[%s2208_s12 + $0xe4] ss:$16 sps:$4 sm:$0xff]   ;;  %v2018_v62 = vld [vmem:[%s2208_s12 + $0xec] ss:$16 sps:$4 sm:$0xff]   ;;  %v2020_v63 = vld [vmem:[%s2208_s12 + $0xe0] ss:$16 sps:$4 sm:$0xff]  }
  0x5f   : > { %1172 = vmatprep.subr.bf16.mxu1 %v1928_v2  ;;  %v2021_v0 = vld [vmem:[%s2208_s12 + $0xe8] ss:$16 sps:$4 sm:$0xff]   ;;  %v435_v2 = vld [vmem:[%s2885_s4] sm:$0xff] }
  0x61   : > { %1060 = vmatpush2.bf16.msra.mxu0 %v1930_v3 }
  0x62   : > { %1173 = vmatpush2.bf16.msra.mxu1 %v1931_v4  ;;  %1061 = vmatprep.subr.bf16.mxu0 %v1932_v5 }
  0x63   : > { %1174 = vmatprep.subr.bf16.mxu1 %v1934_v6  ;;  %v436_v6 = vld [vmem:[%s2885_s4 + $0x8] sm:$0xff] }
  0x65   : > { %1062 = vmatpush2.bf16.msra.mxu0 %v1936_v7 }
  0x66   : > { %1175 = vmatpush2.bf16.msra.mxu1 %v1937_v8  ;;  %1063 = vmatprep.subr.bf16.mxu0 %v1938_v9 }
  0x67   : > { %1176 = vmatprep.subr.bf16.mxu1 %v1940_v10 }
  0x69   : > { %1064 = vmatpush2.bf16.msra.mxu0 %v1942_v11  ;;  %v437_v11 = vld [vmem:[%s2885_s4 + $0x10] sm:$0xff] }
  0x6a   : > { %1177 = vmatpush2.bf16.msra.mxu1 %v1943_v12  ;;  %1065 = vmatprep.subr.bf16.mxu0 %v1944_v13 }
  0x6b   : > { %1178 = vmatprep.subr.bf16.mxu1 %v1946_v14 }
  0x6d   : > { %1066 = vmatpush2.bf16.msra.mxu0 %v1948_v15 }
  0x6e   : > { %1179 = vmatpush2.bf16.msra.mxu1 %v1949_v16  ;;  %1067 = vmatprep.subr.bf16.mxu0 %v1950_v17  ;;  %v438_v16 = vld [vmem:[%s2885_s4 + $0x18] sm:$0xff] }
  0x6f   : > { %1180 = vmatprep.subr.bf16.mxu1 %v1952_v19 }
  0x71   : > { %1068 = vmatpush2.bf16.msra.mxu0 %v1954_v21  ;;  %v439_v21 = vld [vmem:[%s2885_s4 + $0x20] sm:$0xff] }
  0x72   : > { %1181 = vmatpush2.bf16.msra.mxu1 %v1955_v22  ;;  %1069 = vmatprep.subr.bf16.mxu0 %v1956_v23 }
  0x73   : > { %1182 = vmatprep.subr.bf16.mxu1 %v1958_v24 }
  0x75   : > { %1070 = vmatpush2.bf16.msra.mxu0 %v1960_v25 }
  0x76   : > { %1183 = vmatpush2.bf16.msra.mxu1 %v1961_v26  ;;  %1071 = vmatprep.subr.bf16.mxu0 %v1962_v27  ;;  %v440_v26 = vld [vmem:[%s2885_s4 + $0x28] sm:$0xff] }
  0x77   : > { %1184 = vmatprep.subr.bf16.mxu1 %v1964_v28 }
  0x79   : > { %1072 = vmatpush2.bf16.msra.mxu0 %v1966_v29 }
  0x7a   : > { %1185 = vmatpush2.bf16.msra.mxu1 %v1967_v30  ;;  %1073 = vmatprep.subr.bf16.mxu0 %v1968_v31  ;;  %v441_v31 = vld [vmem:[%s2885_s4 + $0x30] sm:$0xff] }
  0x7b   : > { %1186 = vmatprep.subr.bf16.mxu1 %v1970_v32 }
  0x7d   : > { %1074 = vmatpush2.bf16.msra.mxu0 %v1972_v33 }
  0x7e   : > { %1187 = vmatpush2.bf16.msra.mxu1 %v1973_v34 }
  0x80   : > { %1076 = vmatmul.mubr.bf16.vlgmr.msra.gmra.mxu0 %v1974_v35 }
  0x81   : > { %1189 = vmatmul.mubr.bf16.vlgmr.msra.gmra.mxu1 %v1977_v36  ;;  %1085 = vmatprep.mubr.bf16.mxu0 %v1980_v37  ;;  %v442_v36 = vld [vmem:[%s2885_s4 + $0x38] sm:$0xff] }
  0x82   : > { %1198 = vmatprep.mubr.bf16.mxu1 %v1982_v38 }
  0x88   : > { %1086 = vmatmul.mubr.bf16.gmra.mxu0 %v1984_v39 }
  0x89   : > { %1199 = vmatmul.mubr.bf16.gmra.mxu1 %v1985_v40  ;;  %1095 = vmatprep.mubr.bf16.mxu0 %v1986_v41  ;;  %v443_v41 = vld [vmem:[%s2885_s4 + $0x40] sm:$0xff] }
  0x8a   : > { %1208 = vmatprep.mubr.bf16.mxu1 %v1988_v42 }
  0x90   : > { %1096 = vmatmul.mubr.bf16.gmra.mxu0 %v1990_v43 }
  0x91   : > { %1209 = vmatmul.mubr.bf16.gmra.mxu1 %v1991_v44  ;;  %1105 = vmatprep.mubr.bf16.mxu0 %v1992_v45 }
  0x92   : > { %1218 = vmatprep.mubr.bf16.mxu1 %v1994_v46  ;;  %v444_v46 = vld [vmem:[%s2885_s4 + $0x48] sm:$0xff] }
  0x98   : > { %1106 = vmatmul.mubr.bf16.gmra.mxu0 %v1996_v47 }
  0x99   : > { %1219 = vmatmul.mubr.bf16.gmra.mxu1 %v1997_v48  ;;  %1115 = vmatprep.mubr.bf16.mxu0 %v1998_v49 }
  0x9a   : > { %1228 = vmatprep.mubr.bf16.mxu1 %v2000_v50 }
  0xa0   : > { %1116 = vmatmul.mubr.bf16.gmra.mxu0 %v2002_v51  ;;  %v445_v51 = vld [vmem:[%s2885_s4 + $0x50] sm:$0xff] }
  0xa1   : > { %1229 = vmatmul.mubr.bf16.gmra.mxu1 %v2003_v52  ;;  %1125 = vmatprep.mubr.bf16.mxu0 %v2004_v53 }
  0xa2   : > { %1238 = vmatprep.mubr.bf16.mxu1 %v2006_v54 }
  0xa8   : > { %1126 = vmatmul.mubr.bf16.gmra.mxu0 %v2008_v55 }
  0xa9   : > { %1239 = vmatmul.mubr.bf16.gmra.mxu1 %v2009_v56  ;;  %1135 = vmatprep.mubr.bf16.mxu0 %v2010_v57  ;;  %v446_v56 = vld [vmem:[%s2885_s4 + $0x58] sm:$0xff] }
  0xaa   : > { %1248 = vmatprep.mubr.bf16.mxu1 %v2012_v58 }
  0xb0   : > { %1136 = vmatmul.mubr.bf16.gmra.mxu0 %v2014_v59 }
  0xb1   : > { %1249 = vmatmul.mubr.bf16.gmra.mxu1 %v2015_v60  ;;  %1145 = vmatprep.mubr.bf16.mxu0 %v2016_v61  ;;  %v447_v61 = vld [vmem:[%s2885_s4 + $0x60] sm:$0xff] }
  0xb2   : > { %1258 = vmatprep.mubr.bf16.mxu1 %v2018_v62 }
  0xb8   : > { %1146 = vmatmul.mubr.bf16.gmra.mxu0 %v2020_v63 }
  0xb9   : > { %1259 = vmatmul.mubr.bf16.gmra.mxu1 %v2021_v0 }
 0x140   : > { %v1077_v1 = vpop.f32.mrf.mxu0 }
 0x141   : > { %v1190_v3 = vpop.f32.mrf.mxu1 }
 0x142   : > { %v1191_v4 = vadd.f32 %v1190_v3, %v1077_v1  ;;  %v1079_v5 = vpop.f32.mrf.mxu0 }
 0x143   : > { %v1192_v7 = vpop.f32.mrf.mxu1 }
 0x144   : > { %v1269_v8 = vadd.f32 %v1191_v4, %v435_v2  ;;  %v1193_v9 = vadd.f32 %v1192_v7, %v1079_v5  ;;  %v1081_v10 = vpop.f32.mrf.mxu0  ;;  %v448_v2 = vld [vmem:[%s2885_s4 + $0x68] sm:$0xff]  ;;  %v449_v7 = vld [vmem:[%s2885_s4 + $0x70] sm:$0xff] }
 0x145   : > { %v1194_v12 = vpop.f32.mrf.mxu1 }
 0x146   : > { %1301 = vst [vmem:[%s2885_s4] sm:$0xff] %v1269_v8  ;;  %v1270_v13 = vadd.f32 %v1193_v9, %v436_v6  ;;  %v1195_v14 = vadd.f32 %v1194_v12, %v1081_v10  ;;  %v1083_v15 = vpop.f32.mrf.mxu0  ;;  %v450_v12 = vld [vmem:[%s2885_s4 + $0x78] sm:$0xff] }
 0x147   : > { %v1196_v17 = vpop.f32.mrf.mxu1 }
 0x148   : > { %1302 = vst [vmem:[%s2885_s4 + $0x8] sm:$0xff] %v1270_v13  ;;  %v1271_v18 = vadd.f32 %v1195_v14, %v437_v11  ;;  %v1197_v19 = vadd.f32 %v1196_v17, %v1083_v15  ;;  %v1087_v20 = vpop.f32.mrf.mxu0  ;;  %v451_v17 = vld [vmem:[%s2885_s4 + $0x80] sm:$0xff] }
 0x149   : > { %v1200_v22 = vpop.f32.mrf.mxu1 }
 0x14a   : > { %1303 = vst [vmem:[%s2885_s4 + $0x10] sm:$0xff] %v1271_v18  ;;  %v1272_v23 = vadd.f32 %v1197_v19, %v438_v16  ;;  %v1201_v24 = vadd.f32 %v1200_v22, %v1087_v20  ;;  %v1089_v25 = vpop.f32.mrf.mxu0  ;;  %v452_v22 = vld [vmem:[%s2885_s4 + $0x88] sm:$0xff] }
 0x14b   : > { %v1202_v27 = vpop.f32.mrf.mxu1 }
 0x14c   : > { %1304 = vst [vmem:[%s2885_s4 + $0x18] sm:$0xff] %v1272_v23  ;;  %v1273_v28 = vadd.f32 %v1201_v24, %v439_v21  ;;  %v1203_v29 = vadd.f32 %v1202_v27, %v1089_v25  ;;  %v1091_v30 = vpop.f32.mrf.mxu0  ;;  %v453_v27 = vld [vmem:[%s2885_s4 + $0x90] sm:$0xff] }
 0x14d   : > { %v1204_v32 = vpop.f32.mrf.mxu1 }
 0x14e   : > { %1305 = vst [vmem:[%s2885_s4 + $0x20] sm:$0xff] %v1273_v28  ;;  %v1274_v33 = vadd.f32 %v1203_v29, %v440_v26  ;;  %v1205_v34 = vadd.f32 %v1204_v32, %v1091_v30  ;;  %v1093_v35 = vpop.f32.mrf.mxu0  ;;  %v454_v32 = vld [vmem:[%s2885_s4 + $0x98] sm:$0xff] }
 0x14f   : > { %v1206_v37 = vpop.f32.mrf.mxu1 }
 0x150   : > { %1306 = vst [vmem:[%s2885_s4 + $0x28] sm:$0xff] %v1274_v33  ;;  %v1275_v38 = vadd.f32 %v1205_v34, %v441_v31  ;;  %v1207_v39 = vadd.f32 %v1206_v37, %v1093_v35  ;;  %v1097_v40 = vpop.f32.mrf.mxu0  ;;  %v455_v37 = vld [vmem:[%s2885_s4 + $0xa0] sm:$0xff] }
 0x151   : > { %v1210_v42 = vpop.f32.mrf.mxu1 }
 0x152   : > { %1307 = vst [vmem:[%s2885_s4 + $0x30] sm:$0xff] %v1275_v38  ;;  %v1276_v43 = vadd.f32 %v1207_v39, %v442_v36  ;;  %v1211_v44 = vadd.f32 %v1210_v42, %v1097_v40  ;;  %v1099_v45 = vpop.f32.mrf.mxu0  ;;  %v456_v42 = vld [vmem:[%s2885_s4 + $0xa8] sm:$0xff] }
 0x153   : > { %v1212_v47 = vpop.f32.mrf.mxu1 }
 0x154   : > { %1308 = vst [vmem:[%s2885_s4 + $0x38] sm:$0xff] %v1276_v43  ;;  %v1277_v48 = vadd.f32 %v1211_v44, %v443_v41  ;;  %v1213_v49 = vadd.f32 %v1212_v47, %v1099_v45  ;;  %v1101_v50 = vpop.f32.mrf.mxu0  ;;  %v457_v47 = vld [vmem:[%s2885_s4 + $0xb0] sm:$0xff] }
 0x155   : > { %v1214_v52 = vpop.f32.mrf.mxu1 }
 0x156   : > { %1309 = vst [vmem:[%s2885_s4 + $0x40] sm:$0xff] %v1277_v48  ;;  %v1278_v53 = vadd.f32 %v1213_v49, %v444_v46  ;;  %v1215_v54 = vadd.f32 %v1214_v52, %v1101_v50  ;;  %v1103_v55 = vpop.f32.mrf.mxu0  ;;  %v458_v52 = vld [vmem:[%s2885_s4 + $0xb8] sm:$0xff] }
 0x157   : > { %v1216_v57 = vpop.f32.mrf.mxu1 }
 0x158   : > { %1310 = vst [vmem:[%s2885_s4 + $0x48] sm:$0xff] %v1278_v53  ;;  %v1279_v58 = vadd.f32 %v1215_v54, %v445_v51  ;;  %v1217_v59 = vadd.f32 %v1216_v57, %v1103_v55  ;;  %v1107_v60 = vpop.f32.mrf.mxu0  ;;  %v459_v57 = vld [vmem:[%s2885_s4 + $0xc0] sm:$0xff] }
 0x159   : > { %v1220_v62 = vpop.f32.mrf.mxu1 }
 0x15a   : > { %1311 = vst [vmem:[%s2885_s4 + $0x50] sm:$0xff] %v1279_v58  ;;  %v1280_v63 = vadd.f32 %v1217_v59, %v446_v56  ;;  %v1221_v0 = vadd.f32 %v1220_v62, %v1107_v60  ;;  %v1109_v1 = vpop.f32.mrf.mxu0  ;;  %v460_v62 = vld [vmem:[%s2885_s4 + $0xc8] sm:$0xff] }
 0x15b   : > { %v1222_v3 = vpop.f32.mrf.mxu1 }
 0x15c   : > { %1312 = vst [vmem:[%s2885_s4 + $0x58] sm:$0xff] %v1280_v63  ;;  %v1281_v4 = vadd.f32 %v1221_v0, %v447_v61  ;;  %v1223_v5 = vadd.f32 %v1222_v3, %v1109_v1  ;;  %v1111_v6 = vpop.f32.mrf.mxu0  ;;  %v461_v3 = vld [vmem:[%s2885_s4 + $0xd0] sm:$0xff] }
 0x15d   : > { %v1224_v8 = vpop.f32.mrf.mxu1 }
 0x15e   : > { %1313 = vst [vmem:[%s2885_s4 + $0x60] sm:$0xff] %v1281_v4  ;;  %v1282_v9 = vadd.f32 %v1223_v5, %v448_v2  ;;  %v1225_v10 = vadd.f32 %v1224_v8, %v1111_v6  ;;  %v1113_v11 = vpop.f32.mrf.mxu0  ;;  %v462_v8 = vld [vmem:[%s2885_s4 + $0xd8] sm:$0xff] }
 0x15f   : > { %v1226_v13 = vpop.f32.mrf.mxu1 }
 0x160   : > { %1314 = vst [vmem:[%s2885_s4 + $0x68] sm:$0xff] %v1282_v9  ;;  %v1283_v14 = vadd.f32 %v1225_v10, %v449_v7  ;;  %v1227_v15 = vadd.f32 %v1226_v13, %v1113_v11  ;;  %v1117_v16 = vpop.f32.mrf.mxu0  ;;  %v463_v13 = vld [vmem:[%s2885_s4 + $0xe0] sm:$0xff] }
 0x161   : > { %v1230_v18 = vpop.f32.mrf.mxu1 }
 0x162   : > { %1315 = vst [vmem:[%s2885_s4 + $0x70] sm:$0xff] %v1283_v14  ;;  %v1284_v19 = vadd.f32 %v1227_v15, %v450_v12  ;;  %v1231_v20 = vadd.f32 %v1230_v18, %v1117_v16  ;;  %v1119_v21 = vpop.f32.mrf.mxu0  ;;  %v464_v18 = vld [vmem:[%s2885_s4 + $0xe8] sm:$0xff] }
 0x163   : > { %v1232_v23 = vpop.f32.mrf.mxu1 }
 0x164   : > { %1316 = vst [vmem:[%s2885_s4 + $0x78] sm:$0xff] %v1284_v19  ;;  %v1285_v24 = vadd.f32 %v1231_v20, %v451_v17  ;;  %v1233_v25 = vadd.f32 %v1232_v23, %v1119_v21  ;;  %v1121_v26 = vpop.f32.mrf.mxu0  ;;  %v465_v23 = vld [vmem:[%s2885_s4 + $0xf0] sm:$0xff] }
 0x165   : > { %v1234_v28 = vpop.f32.mrf.mxu1 }
 0x166   : > { %1317 = vst [vmem:[%s2885_s4 + $0x80] sm:$0xff] %v1285_v24  ;;  %v1286_v29 = vadd.f32 %v1233_v25, %v452_v22  ;;  %v1235_v30 = vadd.f32 %v1234_v28, %v1121_v26  ;;  %v1123_v31 = vpop.f32.mrf.mxu0  ;;  %v466_v28 = vld [vmem:[%s2885_s4 + $0xf8] sm:$0xff] }
 0x167   : > { %v1236_v33 = vpop.f32.mrf.mxu1 }
 0x168   : > { %1318 = vst [vmem:[%s2885_s4 + $0x88] sm:$0xff] %v1286_v29  ;;  %v1287_v34 = vadd.f32 %v1235_v30, %v453_v27  ;;  %v1237_v35 = vadd.f32 %v1236_v33, %v1123_v31  ;;  %v1127_v36 = vpop.f32.mrf.mxu0 }
 0x169   : > { %v1240_v38 = vpop.f32.mrf.mxu1 }
 0x16a   : > { %1319 = vst [vmem:[%s2885_s4 + $0x90] sm:$0xff] %v1287_v34  ;;  %v1288_v39 = vadd.f32 %v1237_v35, %v454_v32  ;;  %v1241_v40 = vadd.f32 %v1240_v38, %v1127_v36  ;;  %v1129_v41 = vpop.f32.mrf.mxu0 }
 0x16b   : > { %v1242_v43 = vpop.f32.mrf.mxu1 }
 0x16c   : > { %1320 = vst [vmem:[%s2885_s4 + $0x98] sm:$0xff] %v1288_v39  ;;  %v1289_v44 = vadd.f32 %v1241_v40, %v455_v37  ;;  %v1243_v45 = vadd.f32 %v1242_v43, %v1129_v41  ;;  %v1131_v46 = vpop.f32.mrf.mxu0 }
 0x16d   : > { %v1244_v48 = vpop.f32.mrf.mxu1 }
 0x16e   : > { %1321 = vst [vmem:[%s2885_s4 + $0xa0] sm:$0xff] %v1289_v44  ;;  %v1290_v49 = vadd.f32 %v1243_v45, %v456_v42  ;;  %v1245_v50 = vadd.f32 %v1244_v48, %v1131_v46  ;;  %v1133_v51 = vpop.f32.mrf.mxu0 }
 0x16f   : > { %v1246_v53 = vpop.f32.mrf.mxu1 }
 0x170   : > { %1322 = vst [vmem:[%s2885_s4 + $0xa8] sm:$0xff] %v1290_v49  ;;  %v1291_v54 = vadd.f32 %v1245_v50, %v457_v47  ;;  %v1247_v55 = vadd.f32 %v1246_v53, %v1133_v51  ;;  %v1137_v56 = vpop.f32.mrf.mxu0 }
 0x171   : > { %v1250_v58 = vpop.f32.mrf.mxu1 }
 0x172   : > { %1323 = vst [vmem:[%s2885_s4 + $0xb0] sm:$0xff] %v1291_v54  ;;  %v1292_v59 = vadd.f32 %v1247_v55, %v458_v52  ;;  %v1251_v60 = vadd.f32 %v1250_v58, %v1137_v56  ;;  %v1139_v61 = vpop.f32.mrf.mxu0 }
 0x173   : > { %v1252_v63 = vpop.f32.mrf.mxu1 }
 0x174   : > { %1324 = vst [vmem:[%s2885_s4 + $0xb8] sm:$0xff] %v1292_v59  ;;  %v1293_v0 = vadd.f32 %v1251_v60, %v459_v57  ;;  %v1253_v1 = vadd.f32 %v1252_v63, %v1139_v61  ;;  %v1141_v2 = vpop.f32.mrf.mxu0 }
 0x175   : > { %v1254_v4 = vpop.f32.mrf.mxu1 }
 0x176   : > { %1325 = vst [vmem:[%s2885_s4 + $0xc0] sm:$0xff] %v1293_v0  ;;  %v1294_v5 = vadd.f32 %v1253_v1, %v460_v62  ;;  %v1255_v6 = vadd.f32 %v1254_v4, %v1141_v2  ;;  %v1143_v7 = vpop.f32.mrf.mxu0 }
 0x177   : > { %v1256_v9 = vpop.f32.mrf.mxu1 }
 0x178   : > { %1326 = vst [vmem:[%s2885_s4 + $0xc8] sm:$0xff] %v1294_v5  ;;  %v1295_v10 = vadd.f32 %v1255_v6, %v461_v3  ;;  %v1257_v11 = vadd.f32 %v1256_v9, %v1143_v7  ;;  %v1147_v12 = vpop.f32.mrf.mxu0 }
 0x179   : > { %v1260_v14 = vpop.f32.mrf.mxu1 }
 0x17a   : > { %1327 = vst [vmem:[%s2885_s4 + $0xd0] sm:$0xff] %v1295_v10  ;;  %v1296_v15 = vadd.f32 %v1257_v11, %v462_v8  ;;  %v1261_v16 = vadd.f32 %v1260_v14, %v1147_v12  ;;  %v1149_v17 = vpop.f32.mrf.mxu0 }
 0x17b   : > { %v1262_v19 = vpop.f32.mrf.mxu1 }
 0x17c   : > { %1328 = vst [vmem:[%s2885_s4 + $0xd8] sm:$0xff] %v1296_v15  ;;  %v1297_v20 = vadd.f32 %v1261_v16, %v463_v13  ;;  %v1263_v21 = vadd.f32 %v1262_v19, %v1149_v17  ;;  %v1151_v22 = vpop.f32.mrf.mxu0 }
 0x17d   : > { %v1264_v24 = vpop.f32.mrf.mxu1 }
 0x17e   : > { %1329 = vst [vmem:[%s2885_s4 + $0xe0] sm:$0xff] %v1297_v20  ;;  %v1298_v25 = vadd.f32 %v1263_v21, %v464_v18  ;;  %v1265_v26 = vadd.f32 %v1264_v24, %v1151_v22  ;;  %v1153_v27 = vpop.f32.mrf.mxu0 }
 0x17f   : > { %v1266_v29 = vpop.f32.mrf.mxu1 }
 0x180   : > { %1330 = vst [vmem:[%s2885_s4 + $0xe8] sm:$0xff] %v1298_v25  ;;  %v1299_v30 = vadd.f32 %v1265_v26, %v465_v23  ;;  %v1267_v31 = vadd.f32 %v1266_v29, %v1153_v27  ;;  %1336 = sbr.rel (%p1830_p11) target bundleno = 442 (0x1ba), region = 67 }
 0x182   : > { %1331 = vst [vmem:[%s2885_s4 + $0xf0] sm:$0xff] %v1299_v30  ;;  %v1300_v32 = vadd.f32 %v1267_v31, %v466_v28 }
 0x184   : > { %1332 = vst [vmem:[%s2885_s4 + $0xf8] sm:$0xff] %v1300_v32 }
 0x185   : > { %v1371_v33 = vlaneseq  ;;  %v1369_v35 = vld [vmem:[%s2883_s2] sm:$0x3]  ;;  %v1338_v39 = vld [vmem:[%s2885_s4 + $0x8] sm:$0xff]  ;;  %v1339_v41 = vld [vmem:[%s2885_s4 + $0x10] sm:$0xff] }
 0x186   : > { %v1413_v36 = vld [vmem:[%s2884_s3] sm:$0x3]  ;;  %v1340_v42 = vld [vmem:[%s2885_s4 + $0x18] sm:$0xff]  ;;  %v1342_v48 = vld [vmem:[%s2885_s4 + $0x28] sm:$0xff] }
 0x187   : > { %v1372_v34 = vshrl.u32 %v1371_v33, 7  ;;  %v1337_v37 = vld [vmem:[%s2885_s4] sm:$0xff]  ;;  %v1343_v49 = vld [vmem:[%s2885_s4 + $0x30] sm:$0xff]  ;;  %v1344_v50 = vld [vmem:[%s2885_s4 + $0x38] sm:$0xff] }
 0x188   : > { %v1341_v43 = vld [vmem:[%s2885_s4 + $0x20] sm:$0xff]  ;;  %v1346_v11 = vld [vmem:[%s2885_s4 + $0x48] sm:$0xff]  ;;  %v1347_v15 = vld [vmem:[%s2885_s4 + $0x50] sm:$0xff] }
 0x189   : > { %v1373_v38 = vsub.s32 0, %v1372_v34  ;;  %v1377_v40 = vsub.s32 1, %v1372_v34  ;;  %v1345_v10 = vld [vmem:[%s2885_s4 + $0x40] sm:$0xff]  ;;  %v1348_v16 = vld [vmem:[%s2885_s4 + $0x58] sm:$0xff]  ;;  %v1350_v20 = vld [vmem:[%s2885_s4 + $0x68] sm:$0xff] }
 0x18a   : > { %v1349_v17 = vld [vmem:[%s2885_s4 + $0x60] sm:$0xff]  ;;  %v1351_v25 = vld [vmem:[%s2885_s4 + $0x70] sm:$0xff] }
 0x18b   : > { %v2617_v44 = vrot.slane %v1369_v35, %v1373_v38  ;;  %v2619_v45 = vrot.slane %v1413_v36, %v1373_v38  ;;  %v2621_v46 = vrot.slane %v1369_v35, %v1377_v40  ;;  %v2623_v47 = vrot.slane %v1413_v36, %v1377_v40  ;;  %v1352_v38 = vld [vmem:[%s2885_s4 + $0x78] sm:$0xff]  ;;  %v1354_v40 = vld [vmem:[%s2885_s4 + $0x88] sm:$0xff] }
 0x18d   : > { %v1381_v51 = vmul.f32 %v2617_v44, %v1337_v37  ;;  %v1382_v52 = vmul.f32 %v2621_v46, %v1338_v39  ;;  %v1383_v53 = vmul.f32 %v2617_v44, %v1339_v41  ;;  %v1384_v54 = vmul.f32 %v2621_v46, %v1340_v42  ;;  %v1353_v39 = vld [vmem:[%s2885_s4 + $0x80] sm:$0xff] }
 0x18e   : > { %v1385_v55 = vmul.f32 %v2617_v44, %v1341_v43  ;;  %v1386_v56 = vmul.f32 %v2621_v46, %v1342_v48  ;;  %v1387_v57 = vmul.f32 %v2617_v44, %v1343_v49  ;;  %v1388_v58 = vmul.f32 %v2621_v46, %v1344_v50 }
 0x18f   : > { %v1425_v59 = vadd.f32 %v2619_v45, %v1381_v51  ;;  %v1426_v60 = vadd.f32 %v2623_v47, %v1382_v52  ;;  %v1427_v61 = vadd.f32 %v2619_v45, %v1383_v53  ;;  %v1428_v62 = vadd.f32 %v2623_v47, %v1384_v54 }
 0x190   : > { %v1429_v63 = vadd.f32 %v2619_v45, %v1385_v55  ;;  %v1430_v0 = vadd.f32 %v2623_v47, %v1386_v56  ;;  %v1431_v1 = vadd.f32 %v2619_v45, %v1387_v57  ;;  %v1432_v2 = vadd.f32 %v2623_v47, %v1388_v58  ;;  %v1355_v56 = vld [vmem:[%s2885_s4 + $0x90] sm:$0xff] }
 0x191   : > { %vm1457_vm0 = vcmp.ge.f32.partialorder %v1425_v59, 0.0  ;;  %v1489_v3 = vmul.f32 0.2, %v1425_v59  ;;  %vm1458_vm1 = vcmp.ge.f32.partialorder %v1426_v60, 0.0  ;;  %v1490_v4 = vmul.f32 0.2, %v1426_v60 }
 0x192   : > { %vm1459_vm2 = vcmp.ge.f32.partialorder %v1427_v61, 0.0  ;;  %v1491_v5 = vmul.f32 0.2, %v1427_v61  ;;  %vm1460_vm3 = vcmp.ge.f32.partialorder %v1428_v62, 0.0  ;;  %v1492_v6 = vmul.f32 0.2, %v1428_v62 }
 0x193   : > { %v1521_v7 = vsel %vm1457_vm0, %v1425_v59, %v1489_v3  ;;  %v1522_v8 = vsel %vm1458_vm1, %v1426_v60, %v1490_v4  ;;  %vm1461_vm4 = vcmp.ge.f32.partialorder %v1429_v63, 0.0  ;;  %v1493_v9 = vmul.f32 0.2, %v1429_v63 }
 0x194   : > { %1553 = vst [vmem:[%s2885_s4] sm:$0xff] %v1521_v7  ;;  %1554 = vst [vmem:[%s2885_s4 + $0x8] sm:$0xff] %v1522_v8  ;;  %v1523_v12 = vsel %vm1459_vm2, %v1427_v61, %v1491_v5  ;;  %v1524_v13 = vsel %vm1460_vm3, %v1428_v62, %v1492_v6  ;;  %vm1462_vm5 = vcmp.ge.f32.partialorder %v1430_v0, 0.0  ;;  %v1494_v14 = vmul.f32 0.2, %v1430_v0  ;;  %v1356_v61 = vld [vmem:[%s2885_s4 + $0x98] sm:$0xff]  ;;  %v1357_v62 = vld [vmem:[%s2885_s4 + $0xa0] sm:$0xff] }
 0x195   : > { %1555 = vst [vmem:[%s2885_s4 + $0x10] sm:$0xff] %v1523_v12  ;;  %1556 = vst [vmem:[%s2885_s4 + $0x18] sm:$0xff] %v1524_v13  ;;  %v1525_v18 = vsel %vm1461_vm4, %v1429_v63, %v1493_v9  ;;  %vm1463_vm6 = vcmp.ge.f32.partialorder %v1431_v1, 0.0  ;;  %v1495_v19 = vmul.f32 0.2, %v1431_v1  ;;  %vm1464_vm7 = vcmp.ge.f32.partialorder %v1432_v2, 0.0 }
 0x196   : > { %1557 = vst [vmem:[%s2885_s4 + $0x20] sm:$0xff] %v1525_v18  ;;  %v1526_v21 = vsel %vm1462_vm5, %v1430_v0, %v1494_v14  ;;  %v1496_v22 = vmul.f32 0.2, %v1432_v2  ;;  %v1389_v23 = vmul.f32 %v2617_v44, %v1345_v10  ;;  %v1390_v24 = vmul.f32 %v2621_v46, %v1346_v11  ;;  %v1358_v9 = vld [vmem:[%s2885_s4 + $0xa8] sm:$0xff] }
 0x197   : > { %1558 = vst [vmem:[%s2885_s4 + $0x28] sm:$0xff] %v1526_v21  ;;  %v1527_v26 = vsel %vm1463_vm6, %v1431_v1, %v1495_v19  ;;  %v1391_v27 = vmul.f32 %v2617_v44, %v1347_v15  ;;  %v1392_v28 = vmul.f32 %v2621_v46, %v1348_v16  ;;  %v1393_v29 = vmul.f32 %v2617_v44, %v1349_v17  ;;  %v1359_v19 = vld [vmem:[%s2885_s4 + $0xb0] sm:$0xff]  ;;  %v1361_v21 = vld [vmem:[%s2885_s4 + $0xc0] sm:$0xff] }
 0x198   : > { %1559 = vst [vmem:[%s2885_s4 + $0x30] sm:$0xff] %v1527_v26  ;;  %v1528_v30 = vsel %vm1464_vm7, %v1432_v2, %v1496_v22  ;;  %v1433_v31 = vadd.f32 %v2619_v45, %v1389_v23  ;;  %v1434_v32 = vadd.f32 %v2623_v47, %v1390_v24  ;;  %v1394_v33 = vmul.f32 %v2621_v46, %v1350_v20  ;;  %v1360_v20 = vld [vmem:[%s2885_s4 + $0xb8] sm:$0xff] }
 0x199   : > { %1560 = vst [vmem:[%s2885_s4 + $0x38] sm:$0xff] %v1528_v30  ;;  %v1435_v34 = vadd.f32 %v2619_v45, %v1391_v27  ;;  %v1436_v35 = vadd.f32 %v2623_v47, %v1392_v28  ;;  %v1437_v36 = vadd.f32 %v2619_v45, %v1393_v29  ;;  %v1395_v37 = vmul.f32 %v2617_v44, %v1351_v25  ;;  %v1362_v27 = vld [vmem:[%s2885_s4 + $0xc8] sm:$0xff] }
 0x19a   : > { %vm1465_vm8 = vcmp.ge.f32.partialorder %v1433_v31, 0.0  ;;  %v1497_v41 = vmul.f32 0.2, %v1433_v31  ;;  %vm1466_vm9 = vcmp.ge.f32.partialorder %v1434_v32, 0.0  ;;  %v1498_v42 = vmul.f32 0.2, %v1434_v32 }
 0x19b   : > { %vm1467_vm10 = vcmp.ge.f32.partialorder %v1435_v34, 0.0  ;;  %v1499_v43 = vmul.f32 0.2, %v1435_v34  ;;  %vm1468_vm11 = vcmp.ge.f32.partialorder %v1436_v35, 0.0  ;;  %v1500_v48 = vmul.f32 0.2, %v1436_v35 }
 0x19c   : > { %v1529_v49 = vsel %vm1465_vm8, %v1433_v31, %v1497_v41  ;;  %v1530_v50 = vsel %vm1466_vm9, %v1434_v32, %v1498_v42  ;;  %vm1469_vm12 = vcmp.ge.f32.partialorder %v1437_v36, 0.0  ;;  %v1501_v51 = vmul.f32 0.2, %v1437_v36  ;;  %v1363_v32 = vld [vmem:[%s2885_s4 + $0xd0] sm:$0xff] }
 0x19d   : > { %1561 = vst [vmem:[%s2885_s4 + $0x40] sm:$0xff] %v1529_v49  ;;  %1562 = vst [vmem:[%s2885_s4 + $0x48] sm:$0xff] %v1530_v50  ;;  %v1531_v52 = vsel %vm1467_vm10, %v1435_v34, %v1499_v43  ;;  %v1532_v53 = vsel %vm1468_vm11, %v1436_v35, %v1500_v48  ;;  %v1438_v54 = vadd.f32 %v2623_v47, %v1394_v33  ;;  %v1364_v33 = vld [vmem:[%s2885_s4 + $0xd8] sm:$0xff]  ;;  %v1365_v34 = vld [vmem:[%s2885_s4 + $0xe0] sm:$0xff] }
 0x19e   : > { %v1439_v55 = vadd.f32 %v2619_v45, %v1395_v37  ;;  %1563 = vst [vmem:[%s2885_s4 + $0x50] sm:$0xff] %v1531_v52  ;;  %1564 = vst [vmem:[%s2885_s4 + $0x58] sm:$0xff] %v1532_v53  ;;  %v1533_v57 = vsel %vm1469_vm12, %v1437_v36, %v1501_v51  ;;  %v1396_v58 = vmul.f32 %v2621_v46, %v1352_v38 }
 0x19f   : > { %v1397_v59 = vmul.f32 %v2617_v44, %v1353_v39  ;;  %v1398_v60 = vmul.f32 %v2621_v46, %v1354_v40  ;;  %1565 = vst [vmem:[%s2885_s4 + $0x60] sm:$0xff] %v1533_v57  ;;  %vm1470_vm13 = vcmp.ge.f32.partialorder %v1438_v54, 0.0  ;;  %v1502_v63 = vmul.f32 0.2, %v1438_v54 }
 0x1a0   : > { %vm1471_vm14 = vcmp.ge.f32.partialorder %v1439_v55, 0.0  ;;  %v1503_v0 = vmul.f32 0.2, %v1439_v55  ;;  %v1440_v1 = vadd.f32 %v2623_v47, %v1396_v58  ;;  %v1399_v4 = vmul.f32 %v2617_v44, %v1355_v56 }
 0x1a1   : > { %v1441_v2 = vadd.f32 %v2619_v45, %v1397_v59  ;;  %v1442_v3 = vadd.f32 %v2623_v47, %v1398_v60  ;;  %v1534_v5 = vsel %vm1470_vm13, %v1438_v54, %v1502_v63  ;;  %v1400_v7 = vmul.f32 %v2621_v46, %v1356_v61  ;;  %v1366_v59 = vld [vmem:[%s2885_s4 + $0xe8] sm:$0xff]  ;;  %v1367_v60 = vld [vmem:[%s2885_s4 + $0xf0] sm:$0xff]  ;;  %v1368_v63 = vld [vmem:[%s2885_s4 + $0xf8] sm:$0xff] }
 0x1a2   : > { %v1535_v6 = vsel %vm1471_vm14, %v1439_v55, %v1503_v0  ;;  %v1401_v8 = vmul.f32 %v2617_v44, %v1357_v62  ;;  %1566 = vst [vmem:[%s2885_s4 + $0x68] sm:$0xff] %v1534_v5  ;;  %vm1472_vm15 = vcmp.ge.f32.partialorder %v1440_v1, 0.0  ;;  %v1504_v10 = vmul.f32 0.2, %v1440_v1 }
 0x1a3   : > { %1567 = vst [vmem:[%s2885_s4 + $0x70] sm:$0xff] %v1535_v6  ;;  %vm1473_vm0 = vcmp.ge.f32.partialorder %v1441_v2, 0.0  ;;  %v1505_v11 = vmul.f32 0.2, %v1441_v2  ;;  %vm1474_vm1 = vcmp.ge.f32.partialorder %v1442_v3, 0.0  ;;  %v1443_v13 = vadd.f32 %v2619_v45, %v1399_v4 }
 0x1a4   : > { %v1506_v12 = vmul.f32 0.2, %v1442_v3  ;;  %v1444_v14 = vadd.f32 %v2623_v47, %v1400_v7  ;;  %v1536_v15 = vsel %vm1472_vm15, %v1440_v1, %v1504_v10  ;;  %v1445_v17 = vadd.f32 %v2619_v45, %v1401_v8 }
 0x1a5   : > { %v1537_v16 = vsel %vm1473_vm0, %v1441_v2, %v1505_v11  ;;  %v1402_v18 = vmul.f32 %v2621_v46, %v1358_v9  ;;  %1568 = vst [vmem:[%s2885_s4 + $0x78] sm:$0xff] %v1536_v15  ;;  %vm1475_vm2 = vcmp.ge.f32.partialorder %v1443_v13, 0.0  ;;  %v1507_v23 = vmul.f32 0.2, %v1443_v13 }
 0x1a6   : > { %1569 = vst [vmem:[%s2885_s4 + $0x80] sm:$0xff] %v1537_v16  ;;  %v1538_v22 = vsel %vm1474_vm1, %v1442_v3, %v1506_v12  ;;  %vm1476_vm3 = vcmp.ge.f32.partialorder %v1444_v14, 0.0  ;;  %v1508_v24 = vmul.f32 0.2, %v1444_v14  ;;  %vm1477_vm4 = vcmp.ge.f32.partialorder %v1445_v17, 0.0 }
 0x1a7   : > { %1570 = vst [vmem:[%s2885_s4 + $0x88] sm:$0xff] %v1538_v22  ;;  %v1509_v25 = vmul.f32 0.2, %v1445_v17  ;;  %v1446_v26 = vadd.f32 %v2623_v47, %v1402_v18  ;;  %v1539_v28 = vsel %vm1475_vm2, %v1443_v13, %v1507_v23  ;;  %v1403_v29 = vmul.f32 %v2617_v44, %v1359_v19 }
 0x1a8   : > { %v1404_v30 = vmul.f32 %v2621_v46, %v1360_v20  ;;  %v1405_v31 = vmul.f32 %v2617_v44, %v1361_v21  ;;  %1571 = vst [vmem:[%s2885_s4 + $0x90] sm:$0xff] %v1539_v28  ;;  %v1540_v35 = vsel %vm1476_vm3, %v1444_v14, %v1508_v24  ;;  %v1406_v41 = vmul.f32 %v2621_v46, %v1362_v27 }
 0x1a9   : > { %v1541_v36 = vsel %vm1477_vm4, %v1445_v17, %v1509_v25  ;;  %vm1478_vm5 = vcmp.ge.f32.partialorder %v1446_v26, 0.0  ;;  %v1510_v37 = vmul.f32 0.2, %v1446_v26  ;;  %1572 = vst [vmem:[%s2885_s4 + $0x98] sm:$0xff] %v1540_v35  ;;  %v1447_v38 = vadd.f32 %v2619_v45, %v1403_v29 }
 0x1aa   : > { %1573 = vst [vmem:[%s2885_s4 + $0xa0] sm:$0xff] %v1541_v36  ;;  %v1448_v39 = vadd.f32 %v2623_v47, %v1404_v30  ;;  %v1449_v40 = vadd.f32 %v2619_v45, %v1405_v31  ;;  %v1407_v43 = vmul.f32 %v2617_v44, %v1363_v32  ;;  %v1408_v48 = vmul.f32 %v2621_v46, %v1364_v33 }
 0x1ab   : > { %v1542_v42 = vsel %vm1478_vm5, %v1446_v26, %v1510_v37  ;;  %v1409_v49 = vmul.f32 %v2617_v44, %v1365_v34  ;;  %vm1479_vm6 = vcmp.ge.f32.partialorder %v1447_v38, 0.0  ;;  %v1511_v50 = vmul.f32 0.2, %v1447_v38 }
 0x1ac   : > { %1574 = vst [vmem:[%s2885_s4 + $0xa8] sm:$0xff] %v1542_v42  ;;  %vm1480_vm7 = vcmp.ge.f32.partialorder %v1448_v39, 0.0  ;;  %v1512_v51 = vmul.f32 0.2, %v1448_v39  ;;  %vm1481_vm8 = vcmp.ge.f32.partialorder %v1449_v40, 0.0  ;;  %v1450_v53 = vadd.f32 %v2623_v47, %v1406_v41 }
 0x1ad   : > { %v1513_v52 = vmul.f32 0.2, %v1449_v40  ;;  %v1451_v54 = vadd.f32 %v2619_v45, %v1407_v43  ;;  %v1543_v55 = vsel %vm1479_vm6, %v1447_v38, %v1511_v50  ;;  %v1452_v57 = vadd.f32 %v2623_v47, %v1408_v48 }
 0x1ae   : > { %v1544_v56 = vsel %vm1480_vm7, %v1448_v39, %v1512_v51  ;;  %v1453_v58 = vadd.f32 %v2619_v45, %v1409_v49  ;;  %1575 = vst [vmem:[%s2885_s4 + $0xb0] sm:$0xff] %v1543_v55  ;;  %vm1482_vm9 = vcmp.ge.f32.partialorder %v1450_v53, 0.0  ;;  %v1514_v62 = vmul.f32 0.2, %v1450_v53 }
 0x1af   : > { %1576 = vst [vmem:[%s2885_s4 + $0xb8] sm:$0xff] %v1544_v56  ;;  %v1545_v61 = vsel %vm1481_vm8, %v1449_v40, %v1513_v52  ;;  %vm1483_vm10 = vcmp.ge.f32.partialorder %v1451_v54, 0.0  ;;  %v1515_v0 = vmul.f32 0.2, %v1451_v54  ;;  %vm1484_vm11 = vcmp.ge.f32.partialorder %v1452_v57, 0.0 }
 0x1b0   : > { %1577 = vst [vmem:[%s2885_s4 + $0xc0] sm:$0xff] %v1545_v61  ;;  %v1516_v1 = vmul.f32 0.2, %v1452_v57  ;;  %vm1485_vm12 = vcmp.ge.f32.partialorder %v1453_v58, 0.0  ;;  %v1546_v2 = vsel %vm1482_vm9, %v1450_v53, %v1514_v62  ;;  %v1517_v3 = vmul.f32 0.2, %v1453_v58 }
 0x1b1   : > { %v1410_v4 = vmul.f32 %v2621_v46, %v1366_v59  ;;  %v1411_v5 = vmul.f32 %v2617_v44, %v1367_v60  ;;  %1578 = vst [vmem:[%s2885_s4 + $0xc8] sm:$0xff] %v1546_v2  ;;  %v1547_v6 = vsel %vm1483_vm10, %v1451_v54, %v1515_v0  ;;  %v1412_v8 = vmul.f32 %v2621_v46, %v1368_v63 }
 0x1b2   : > { %v1548_v7 = vsel %vm1484_vm11, %v1452_v57, %v1516_v1  ;;  %1579 = vst [vmem:[%s2885_s4 + $0xd0] sm:$0xff] %v1547_v6  ;;  %v1549_v9 = vsel %vm1485_vm12, %v1453_v58, %v1517_v3 }
 0x1b3   : > { %1580 = vst [vmem:[%s2885_s4 + $0xd8] sm:$0xff] %v1548_v7  ;;  %v1454_v10 = vadd.f32 %v2623_v47, %v1410_v4  ;;  %v1455_v44 = vadd.f32 %v2619_v45, %v1411_v5  ;;  %1581 = vst [vmem:[%s2885_s4 + $0xe0] sm:$0xff] %v1549_v9  ;;  %v1456_v11 = vadd.f32 %v2623_v47, %v1412_v8 }
 0x1b5   : > { %vm1486_vm13 = vcmp.ge.f32.partialorder %v1454_v10, 0.0  ;;  %v1518_v46 = vmul.f32 0.2, %v1454_v10  ;;  %vm1487_vm14 = vcmp.ge.f32.partialorder %v1455_v44, 0.0  ;;  %v1519_v12 = vmul.f32 0.2, %v1455_v44 }
 0x1b6   : > { %vm1488_vm15 = vcmp.ge.f32.partialorder %v1456_v11, 0.0  ;;  %v1520_v13 = vmul.f32 0.2, %v1456_v11 }
 0x1b7   : > { %v1550_v14 = vsel %vm1486_vm13, %v1454_v10, %v1518_v46  ;;  %v1551_v15 = vsel %vm1487_vm14, %v1455_v44, %v1519_v12 }
 0x1b8   : > { %1582 = vst [vmem:[%s2885_s4 + $0xe8] sm:$0xff] %v1550_v14  ;;  %1583 = vst [vmem:[%s2885_s4 + $0xf0] sm:$0xff] %v1551_v15  ;;  %v1552_v45 = vsel %vm1488_vm15, %v1456_v11, %v1520_v13 }
 0x1b9   : > { %1584 = vst [vmem:[%s2885_s4 + $0xf8] sm:$0xff] %v1552_v45 }
 0x1ba PF: > { %s14_s19 = sadd.s32 1, %s2060_s19   ;;  %s2886_s15 = smov %s2048_s16 }
 0x1bb   : > { %p11_p12 = scmp.ge.s32.totalorder %s14_s19, 6   ;;  %s2887_s16 = smov %s2123_s23 }
 0x1bc   : > { %s2888_s17 = smov %s2056_s18  ;;  %s2889_s18 = smov %s2891_s20 }
 0x1bd   :  { %13 = sbr.rel (!%p11_p12) target bundleno = 3 (0x3), region = 111 }

// kernel: discriminator_forward.9
= control target key start
LH: loop header
LB: loop body
LE: loop exit
PB: predicated region body
PF: predicated region fallthrough
CT: control target
= control target key end

     0   :  { %s2277_s0 = inlined_call_operand.vmem [shape: bf16[32,4096], index: 0, kind: input, shape index: {}]   ;;  %s2278_s1 = inlined_call_operand.vmem [shape: bf16[4096,512], index: 1, kind: input, shape index: {}]   ;;  %s2279_s2 = inlined_call_operand.vmem [shape: f32[1,512], index: 2, kind: input, shape index: {}]   ;;  %s2280_s3 = inlined_call_operand.vmem [shape: f32[1,512], index: 3, kind: input, shape index: {}]   ;;  %s2281_s4 = inlined_call_operand.vmem [shape: f32[32,512], index: 4, kind: output, shape index: {}]  }
   0x1   :  { %2284 = sst [smem:[#allocation7_spill]] %s2277_s0 }
   0x2   :  { %2285 = sst [smem:[#allocation8_spill]] %s2278_s1 }
   0x3   :  { %s1838_s15 = smov 0   ;;  %s1840_s16 = smov 0  }
   0x4   :  { %s1842_s17 = smov 0   ;;  %s1844_s18 = smov 0  }
   0x5   :  { %s1846_s19 = smov 0   ;;  %s1848_s20 = smov 0  }
   0x6   :  { %s1850_s21 = smov 0   ;;  %s1852_s22 = smov 0  }
   0x7   :  { %s1854_s23 = smov 0   ;;  %s1856_s24 = smov 0  }
   0x8   :  { %s1858_s25 = smov 0  }
   0x9 LB: > { %s1427_s26 = sadd.s32 4294967295, %s1810_s25   ;;  %s26_s27 = sadd.s32 1, %s1802_s23  ;;  %s1810_s25 = sphi %s1858_s25, %s14_s25   ;;  %s1806_s24 = sphi %s1856_s24, %s2304_s24   ;;  %s1802_s23 = sphi %s1854_s23, %s2303_s23   ;;  %s1798_s22 = sphi %s1852_s22, %s2302_s22   ;;  %s1794_s21 = sphi %s1850_s21, %s2301_s21   ;;  %s1790_s20 = sphi %s1848_s20, %s2300_s20   ;;  %s1786_s19 = sphi %s1846_s19, %s2299_s19   ;;  %s1782_s18 = sphi %s1844_s18, %s2298_s18   ;;  %s1778_s17 = sphi %s1842_s17, %s2297_s17   ;;  %s1774_s16 = sphi %s1840_s16, %s2296_s16   ;;  %s1770_s15 = sphi %s1838_s15, %s2295_s15  }
   0xa   : > { %p27_p0 = scmp.ge.s32.totalorder %s26_s27, 8  ;;  %s29_s28 = sadd.s32 1, %s1806_s24 }
   0xb   : > { %s42_s29 = sadd.s32 1, %s1790_s20  ;;  %p49_p1 = scmp.ne.s32.totalorder %s1790_s20, %s1786_s19 }
   0xc   : > { %s2306_s27 = smov (%p27_p0, %s26_s27), 0  ;;  %s2308_s28 = smov (!%p27_p0, %s29_s28), %s1806_s24 }
   0xd   : > { %2286 = sst [smem:[#allocation5_spill]] %s2306_s27  ;;  %s38_s30 = ssub.s32 %s1802_s23, %s2306_s27 }
   0xe   : > { %p50_p2 = scmp.eq.s32.totalorder %s1810_s25, 0  ;;  %p31_p3 = scmp.ge.s32.totalorder %s2308_s28, 2 }
   0xf   : > { %p40_p4 = scmp.eq.s32.totalorder %s38_s30, 0  ;;  %s70_s6 = sadd.s32 1, %s1782_s18 }
  0x10   : > { %p1905_p5 = por %p50_p2, %p49_p1  ;;  %s2310_s28 = smov (%p31_p3, %s2308_s28), 0 }
  0x11   : > { %2288 = sst [smem:[#allocation6_spill]] %s2310_s28  ;;  %s66_s8 = ssub.s32 %s1806_s24, %s2310_s28 }
  0x12   : > { %s1913_s7 = scalar_select %p40_p4, %s1790_s20, %s42_s29  }
  0x13   : > { %p77_p6 = scmp.ne.s32.totalorder %s1782_s18, %s1778_s17  ;;  %s67_s9 = sor.u32 %s66_s8, %s38_s30 }
  0x14   : > { %p148_p7 = scmp.eq.s32.totalorder %s66_s8, 0  ;;  %p68_p8 = scmp.eq.s32.totalorder %s67_s9, 0 }
  0x15   : > { %p1919_p9 = por %p77_p6, %p50_p2  ;;  %s150_s11 = sadd.s32 1, %s1774_s16 }
  0x16   : > { %p160_p10 = scmp.ne.s32.totalorder %s1774_s16, %s1770_s15  ;;  %p161_p11 = scmp.eq.s32.totalorder %s1427_s26, 15 }
  0x17   : > { %s1927_s12 = scalar_select %p68_p8, %s1782_s18, %s70_s6  }
  0x18   : > { %s1930_s13 = scalar_select %p148_p7, %s1774_s16, %s150_s11  }
  0x19   : > { %p1932_p12 = por %p161_p11, %p160_p10  ;;  %p1430_p13 = scmp.ge.s32.totalorder %s1810_s25, 16 }
  0x1b   : > { %183 = sbr.rel (%p1430_p13) target bundleno = 88 (0x58), region = 16 }
  0x20   : > { %186 = sbr.rel (!%p1905_p5) target bundleno = 46 (0x2e), region = 20  ;;  %s188_s29 = sand.u32 (%p1905_p5), 1, %s1790_s20  }
  0x21   : > { %s1524_s30 = sshll.u32 (%p1905_p5), %s1802_s23, 4  ;;  %s1431_s8 = sshll.u32 (%p1905_p5), %s188_s29, 6 }
  0x22   : > { %s2291_s0 = sld [smem:[#allocation7_spill]] (%p1905_p5)  ;;  %s190_s26 = scalar_lea.vmem (%p1905_p5), [#allocation2], %s1431_s8 }
  0x28   : > { %s196_s11 = scalar_lea.vmem %s2291_s0, %s1524_s30 }
  0x29   : > { %v209_v0 = vld [vmem:[%s196_s11] sm:$0xff]  ;;  %v211_v1 = vld [vmem:[%s196_s11 + $0x8] sm:$0xff] }
  0x2a   : > { %v213_v2 = vld [vmem:[%s196_s11 + $0x80] sm:$0xff]  ;;  %210 = vst [vmem:[%s190_s26] sm:$0xff] %v209_v0  ;;  %212 = vst [vmem:[%s190_s26 + $0x8] sm:$0xff] %v211_v1  ;;  %v215_v3 = vld [vmem:[%s196_s11 + $0x88] sm:$0xff] }
  0x2b   : > { %214 = vst [vmem:[%s190_s26 + $0x10] sm:$0xff] %v213_v2  ;;  %v217_v4 = vld [vmem:[%s196_s11 + $0x100] sm:$0xff]  ;;  %v219_v5 = vld [vmem:[%s196_s11 + $0x108] sm:$0xff]  ;;  %216 = vst [vmem:[%s190_s26 + $0x18] sm:$0xff] %v215_v3 }
  0x2c   : > { %218 = vst [vmem:[%s190_s26 + $0x20] sm:$0xff] %v217_v4  ;;  %220 = vst [vmem:[%s190_s26 + $0x28] sm:$0xff] %v219_v5  ;;  %v221_v6 = vld [vmem:[%s196_s11 + $0x180] sm:$0xff]  ;;  %v223_v7 = vld [vmem:[%s196_s11 + $0x188] sm:$0xff] }
  0x2d   : > { %222 = vst [vmem:[%s190_s26 + $0x30] sm:$0xff] %v221_v6  ;;  %224 = vst [vmem:[%s190_s26 + $0x38] sm:$0xff] %v223_v7 }
  0x2e PF: > { %230 = sbr.rel (!%p1919_p9) target bundleno = 88 (0x58), region = 43  ;;  %s232_s5 = sand.u32 (%p1919_p9), 1, %s1782_s18  }
  0x2f   : > { %s1436_s29 = sshll.u32 (%p1919_p9), %s1806_s24, 1  ;;  %s1434_s30 = sshll.u32 (%p1919_p9), %s232_s5, 9 }
  0x30   : > { %s1525_s8 = sshll.u32 (%p1919_p9), %s1802_s23, 8  ;;  %s2292_s1 = sld [smem:[#allocation8_spill]] (%p1919_p9) }
  0x31   : > { %s238_s6 = sadd.s32 (%p1919_p9), %s1525_s8, %s1436_s29  ;;  %s1957_s10 = scalar_lea.vmem (%p1919_p9), [#allocation3], %s1434_s30 }
  0x32   : > { %s1438_s9 = sshll.u32 (%p1919_p9), %s238_s6, 2 }
  0x36   : > { %s1952_s27 = scalar_lea.vmem %s2292_s1, %s1438_s9 }
  0x37   : > { %v395_v8 = vld [vmem:[%s1952_s27] sm:$0xff]  ;;  %v397_v9 = vld [vmem:[%s1952_s27 + $0x10] sm:$0xff] }
  0x38   : > { %v399_v10 = vld [vmem:[%s1952_s27 + $0x20] sm:$0xff]  ;;  %396 = vst [vmem:[%s1957_s10] sm:$0xff] %v395_v8  ;;  %398 = vst [vmem:[%s1957_s10 + $0x8] sm:$0xff] %v397_v9  ;;  %v401_v11 = vld [vmem:[%s1952_s27 + $0x30] sm:$0xff] }
  0x39   : > { %400 = vst [vmem:[%s1957_s10 + $0x10] sm:$0xff] %v399_v10  ;;  %v403_v12 = vld [vmem:[%s1952_s27 + $0x40] sm:$0xff]  ;;  %v405_v13 = vld [vmem:[%s1952_s27 + $0x50] sm:$0xff]  ;;  %402 = vst [vmem:[%s1957_s10 + $0x18] sm:$0xff] %v401_v11 }
  0x3a   : > { %404 = vst [vmem:[%s1957_s10 + $0x20] sm:$0xff] %v403_v12  ;;  %406 = vst [vmem:[%s1957_s10 + $0x28] sm:$0xff] %v405_v13  ;;  %v407_v14 = vld [vmem:[%s1952_s27 + $0x60] sm:$0xff]  ;;  %v409_v15 = vld [vmem:[%s1952_s27 + $0x70] sm:$0xff] }
  0x3b   : > { %v411_v16 = vld [vmem:[%s1952_s27 + $0x80] sm:$0xff]  ;;  %408 = vst [vmem:[%s1957_s10 + $0x30] sm:$0xff] %v407_v14  ;;  %410 = vst [vmem:[%s1957_s10 + $0x38] sm:$0xff] %v409_v15  ;;  %v413_v17 = vld [vmem:[%s1952_s27 + $0x90] sm:$0xff] }
  0x3c   : > { %412 = vst [vmem:[%s1957_s10 + $0x40] sm:$0xff] %v411_v16  ;;  %v415_v18 = vld [vmem:[%s1952_s27 + $0xa0] sm:$0xff]  ;;  %v417_v19 = vld [vmem:[%s1952_s27 + $0xb0] sm:$0xff]  ;;  %414 = vst [vmem:[%s1957_s10 + $0x48] sm:$0xff] %v413_v17 }
  0x3d   : > { %416 = vst [vmem:[%s1957_s10 + $0x50] sm:$0xff] %v415_v18  ;;  %418 = vst [vmem:[%s1957_s10 + $0x58] sm:$0xff] %v417_v19  ;;  %v419_v20 = vld [vmem:[%s1952_s27 + $0xc0] sm:$0xff]  ;;  %v421_v21 = vld [vmem:[%s1952_s27 + $0xd0] sm:$0xff] }
  0x3e   : > { %v423_v22 = vld [vmem:[%s1952_s27 + $0xe0] sm:$0xff]  ;;  %420 = vst [vmem:[%s1957_s10 + $0x60] sm:$0xff] %v419_v20  ;;  %422 = vst [vmem:[%s1957_s10 + $0x68] sm:$0xff] %v421_v21  ;;  %v425_v23 = vld [vmem:[%s1952_s27 + $0xf0] sm:$0xff] }
  0x3f   : > { %424 = vst [vmem:[%s1957_s10 + $0x70] sm:$0xff] %v423_v22  ;;  %v427_v24 = vld [vmem:[%s1952_s27 + $0x100] sm:$0xff]  ;;  %v429_v25 = vld [vmem:[%s1952_s27 + $0x110] sm:$0xff]  ;;  %426 = vst [vmem:[%s1957_s10 + $0x78] sm:$0xff] %v425_v23 }
  0x40   : > { %428 = vst [vmem:[%s1957_s10 + $0x80] sm:$0xff] %v427_v24  ;;  %430 = vst [vmem:[%s1957_s10 + $0x88] sm:$0xff] %v429_v25  ;;  %v431_v26 = vld [vmem:[%s1952_s27 + $0x120] sm:$0xff]  ;;  %v433_v27 = vld [vmem:[%s1952_s27 + $0x130] sm:$0xff] }
  0x41   : > { %v435_v28 = vld [vmem:[%s1952_s27 + $0x140] sm:$0xff]  ;;  %432 = vst [vmem:[%s1957_s10 + $0x90] sm:$0xff] %v431_v26  ;;  %434 = vst [vmem:[%s1957_s10 + $0x98] sm:$0xff] %v433_v27  ;;  %v437_v29 = vld [vmem:[%s1952_s27 + $0x150] sm:$0xff] }
  0x42   : > { %436 = vst [vmem:[%s1957_s10 + $0xa0] sm:$0xff] %v435_v28  ;;  %v439_v30 = vld [vmem:[%s1952_s27 + $0x160] sm:$0xff]  ;;  %v441_v31 = vld [vmem:[%s1952_s27 + $0x170] sm:$0xff]  ;;  %438 = vst [vmem:[%s1957_s10 + $0xa8] sm:$0xff] %v437_v29 }
  0x43   : > { %440 = vst [vmem:[%s1957_s10 + $0xb0] sm:$0xff] %v439_v30  ;;  %442 = vst [vmem:[%s1957_s10 + $0xb8] sm:$0xff] %v441_v31  ;;  %v443_v32 = vld [vmem:[%s1952_s27 + $0x180] sm:$0xff]  ;;  %v445_v33 = vld [vmem:[%s1952_s27 + $0x190] sm:$0xff] }
  0x44   : > { %v447_v34 = vld [vmem:[%s1952_s27 + $0x1a0] sm:$0xff]  ;;  %444 = vst [vmem:[%s1957_s10 + $0xc0] sm:$0xff] %v443_v32  ;;  %446 = vst [vmem:[%s1957_s10 + $0xc8] sm:$0xff] %v445_v33  ;;  %v449_v35 = vld [vmem:[%s1952_s27 + $0x1b0] sm:$0xff] }
  0x45   : > { %448 = vst [vmem:[%s1957_s10 + $0xd0] sm:$0xff] %v447_v34  ;;  %v451_v36 = vld [vmem:[%s1952_s27 + $0x1c0] sm:$0xff]  ;;  %v453_v37 = vld [vmem:[%s1952_s27 + $0x1d0] sm:$0xff]  ;;  %450 = vst [vmem:[%s1957_s10 + $0xd8] sm:$0xff] %v449_v35 }
  0x46   : > { %452 = vst [vmem:[%s1957_s10 + $0xe0] sm:$0xff] %v451_v36  ;;  %454 = vst [vmem:[%s1957_s10 + $0xe8] sm:$0xff] %v453_v37  ;;  %v455_v38 = vld [vmem:[%s1952_s27 + $0x1e0] sm:$0xff]  ;;  %v457_v39 = vld [vmem:[%s1952_s27 + $0x1f0] sm:$0xff] }
  0x47   : > { %v459_v40 = vld [vmem:[%s1952_s27 + $0x200] sm:$0xff]  ;;  %456 = vst [vmem:[%s1957_s10 + $0xf0] sm:$0xff] %v455_v38  ;;  %458 = vst [vmem:[%s1957_s10 + $0xf8] sm:$0xff] %v457_v39  ;;  %v461_v41 = vld [vmem:[%s1952_s27 + $0x210] sm:$0xff] }
  0x48   : > { %460 = vst [vmem:[%s1957_s10 + $0x100] sm:$0xff] %v459_v40  ;;  %v463_v42 = vld [vmem:[%s1952_s27 + $0x220] sm:$0xff]  ;;  %v465_v43 = vld [vmem:[%s1952_s27 + $0x230] sm:$0xff]  ;;  %462 = vst [vmem:[%s1957_s10 + $0x108] sm:$0xff] %v461_v41 }
  0x49   : > { %464 = vst [vmem:[%s1957_s10 + $0x110] sm:$0xff] %v463_v42  ;;  %466 = vst [vmem:[%s1957_s10 + $0x118] sm:$0xff] %v465_v43  ;;  %v467_v44 = vld [vmem:[%s1952_s27 + $0x240] sm:$0xff]  ;;  %v469_v45 = vld [vmem:[%s1952_s27 + $0x250] sm:$0xff] }
  0x4a   : > { %v471_v46 = vld [vmem:[%s1952_s27 + $0x260] sm:$0xff]  ;;  %468 = vst [vmem:[%s1957_s10 + $0x120] sm:$0xff] %v467_v44  ;;  %470 = vst [vmem:[%s1957_s10 + $0x128] sm:$0xff] %v469_v45  ;;  %v473_v47 = vld [vmem:[%s1952_s27 + $0x270] sm:$0xff] }
  0x4b   : > { %472 = vst [vmem:[%s1957_s10 + $0x130] sm:$0xff] %v471_v46  ;;  %v475_v48 = vld [vmem:[%s1952_s27 + $0x280] sm:$0xff]  ;;  %v477_v49 = vld [vmem:[%s1952_s27 + $0x290] sm:$0xff]  ;;  %474 = vst [vmem:[%s1957_s10 + $0x138] sm:$0xff] %v473_v47 }
  0x4c   : > { %476 = vst [vmem:[%s1957_s10 + $0x140] sm:$0xff] %v475_v48  ;;  %478 = vst [vmem:[%s1957_s10 + $0x148] sm:$0xff] %v477_v49  ;;  %v479_v50 = vld [vmem:[%s1952_s27 + $0x2a0] sm:$0xff]  ;;  %v481_v51 = vld [vmem:[%s1952_s27 + $0x2b0] sm:$0xff] }
  0x4d   : > { %v483_v52 = vld [vmem:[%s1952_s27 + $0x2c0] sm:$0xff]  ;;  %480 = vst [vmem:[%s1957_s10 + $0x150] sm:$0xff] %v479_v50  ;;  %482 = vst [vmem:[%s1957_s10 + $0x158] sm:$0xff] %v481_v51  ;;  %v485_v53 = vld [vmem:[%s1952_s27 + $0x2d0] sm:$0xff] }
  0x4e   : > { %484 = vst [vmem:[%s1957_s10 + $0x160] sm:$0xff] %v483_v52  ;;  %v487_v54 = vld [vmem:[%s1952_s27 + $0x2e0] sm:$0xff]  ;;  %v489_v55 = vld [vmem:[%s1952_s27 + $0x2f0] sm:$0xff]  ;;  %486 = vst [vmem:[%s1957_s10 + $0x168] sm:$0xff] %v485_v53 }
  0x4f   : > { %488 = vst [vmem:[%s1957_s10 + $0x170] sm:$0xff] %v487_v54  ;;  %490 = vst [vmem:[%s1957_s10 + $0x178] sm:$0xff] %v489_v55  ;;  %v491_v56 = vld [vmem:[%s1952_s27 + $0x300] sm:$0xff]  ;;  %v493_v57 = vld [vmem:[%s1952_s27 + $0x310] sm:$0xff] }
  0x50   : > { %v495_v58 = vld [vmem:[%s1952_s27 + $0x320] sm:$0xff]  ;;  %492 = vst [vmem:[%s1957_s10 + $0x180] sm:$0xff] %v491_v56  ;;  %494 = vst [vmem:[%s1957_s10 + $0x188] sm:$0xff] %v493_v57  ;;  %v497_v59 = vld [vmem:[%s1952_s27 + $0x330] sm:$0xff] }
  0x51   : > { %496 = vst [vmem:[%s1957_s10 + $0x190] sm:$0xff] %v495_v58  ;;  %v499_v60 = vld [vmem:[%s1952_s27 + $0x340] sm:$0xff]  ;;  %v501_v61 = vld [vmem:[%s1952_s27 + $0x350] sm:$0xff]  ;;  %498 = vst [vmem:[%s1957_s10 + $0x198] sm:$0xff] %v497_v59 }
  0x52   : > { %500 = vst [vmem:[%s1957_s10 + $0x1a0] sm:$0xff] %v499_v60  ;;  %502 = vst [vmem:[%s1957_s10 + $0x1a8] sm:$0xff] %v501_v61  ;;  %v503_v62 = vld [vmem:[%s1952_s27 + $0x360] sm:$0xff]  ;;  %v505_v63 = vld [vmem:[%s1952_s27 + $0x370] sm:$0xff] }
  0x53   : > { %v507_v0 = vld [vmem:[%s1952_s27 + $0x380] sm:$0xff]  ;;  %504 = vst [vmem:[%s1957_s10 + $0x1b0] sm:$0xff] %v503_v62  ;;  %506 = vst [vmem:[%s1957_s10 + $0x1b8] sm:$0xff] %v505_v63  ;;  %v509_v1 = vld [vmem:[%s1952_s27 + $0x390] sm:$0xff] }
  0x54   : > { %508 = vst [vmem:[%s1957_s10 + $0x1c0] sm:$0xff] %v507_v0  ;;  %v511_v2 = vld [vmem:[%s1952_s27 + $0x3a0] sm:$0xff]  ;;  %v513_v3 = vld [vmem:[%s1952_s27 + $0x3b0] sm:$0xff]  ;;  %510 = vst [vmem:[%s1957_s10 + $0x1c8] sm:$0xff] %v509_v1 }
  0x55   : > { %512 = vst [vmem:[%s1957_s10 + $0x1d0] sm:$0xff] %v511_v2  ;;  %514 = vst [vmem:[%s1957_s10 + $0x1d8] sm:$0xff] %v513_v3  ;;  %v515_v4 = vld [vmem:[%s1952_s27 + $0x3c0] sm:$0xff]  ;;  %v517_v5 = vld [vmem:[%s1952_s27 + $0x3d0] sm:$0xff] }
  0x56   : > { %v519_v6 = vld [vmem:[%s1952_s27 + $0x3e0] sm:$0xff]  ;;  %516 = vst [vmem:[%s1957_s10 + $0x1e0] sm:$0xff] %v515_v4  ;;  %518 = vst [vmem:[%s1957_s10 + $0x1e8] sm:$0xff] %v517_v5  ;;  %v521_v7 = vld [vmem:[%s1952_s27 + $0x3f0] sm:$0xff] }
  0x57   : > { %520 = vst [vmem:[%s1957_s10 + $0x1f0] sm:$0xff] %v519_v6  ;;  %522 = vst [vmem:[%s1957_s10 + $0x1f8] sm:$0xff] %v521_v7 }
  0x58 PF: > { %p1439_p0 = scmp.ge.s32.totalorder %s1810_s25, 1  ;;  %p543_p1 = scmp.lt.s32.totalorder %s1810_s25, 17 }
  0x5a   : > { %p544_p2 = pnand %p1439_p0, %p543_p1 }
  0x5b   : > { %s550_s0 = sand.u32 (!%p544_p2), 1, %s1786_s19   ;;  %s557_s28 = sand.u32 (!%p544_p2), 1, %s1778_s17  }
  0x5c   : > { %547 = sbr.rel (%p544_p2) target bundleno = 416 (0x1a0), region = 89  ;;  %s1440_s11 = sshll.u32 (!%p544_p2), %s550_s0, 6 }
  0x5d   : > { %s1441_s26 = sshll.u32 (!%p544_p2), %s557_s28, 9  ;;  %s590_s5 = sand.u32 (!%p544_p2), 1, %s1770_s15  }
  0x5e   : > { %s1443_s29 = sshll.u32 (!%p544_p2), %s1798_s22, 1  ;;  %s1442_s27 = sshll.u32 (!%p544_p2), %s590_s5, 6 }
  0x5f   : > { %p598_p3 = scmp.lt.s32.totalorder (!%p544_p2), %s1443_s29, 3  ;;  %s2100_s19 = scalar_lea.vmem (!%p544_p2), [#allocation2], %s1440_s11 }
  0x60   : > { %s2102_s17 = scalar_lea.vmem (!%p544_p2), [#allocation3], %s1441_s26  ;;  %s2104_s15 = scalar_lea.vmem (!%p544_p2), [#allocation4], %s1442_s27 }
  0x61   : > { %s2312_s29 = smov (!%p598_p3, %s1443_s29), 3  ;;  %p1445_p4 = scmp.ne.s32.totalorder %s1794_s21, 0 }
  0x62   : > { %s600_s6 = scalar_lea.vmem %s2279_s2, %s2312_s29  ;;  %s605_s1 = scalar_lea.vmem %s2280_s3, %s2312_s29 }
  0x63   : > { %612 = sbr.rel (%p1445_p4) target bundleno = 109 (0x6d), region = 101 }
  0x68   : > { %v1812_v8 = vmov 0.0  }
  0x69   : > { %613 = vst [vmem:[%s2104_s15] sm:$0xff] %v1812_v8  ;;  %614 = vst [vmem:[%s2104_s15 + $0x8] sm:$0xff] %v1812_v8 }
  0x6a   : > { %615 = vst [vmem:[%s2104_s15 + $0x10] sm:$0xff] %v1812_v8  ;;  %616 = vst [vmem:[%s2104_s15 + $0x18] sm:$0xff] %v1812_v8 }
  0x6b   : > { %617 = vst [vmem:[%s2104_s15 + $0x20] sm:$0xff] %v1812_v8  ;;  %618 = vst [vmem:[%s2104_s15 + $0x28] sm:$0xff] %v1812_v8 }
  0x6c   : > { %619 = vst [vmem:[%s2104_s15 + $0x30] sm:$0xff] %v1812_v8  ;;  %620 = vst [vmem:[%s2104_s15 + $0x38] sm:$0xff] %v1812_v8 }
  0x6d PF: > { %v1616_v9 = vld [vmem:[%s2102_s17 + $0x74] ss:$8 sps:$4 sm:$0xff]   ;;  %v1620_v11 = vld [vmem:[%s2102_s17 + $0x70] ss:$8 sps:$4 sm:$0xff]   ;;  %v1622_v13 = vld [vmem:[%s2102_s17 + $0x64] ss:$8 sps:$4 sm:$0xff]  }
  0x6e   : > { %v1618_v10 = vld [vmem:[%s2102_s17 + $0x174] ss:$8 sps:$4 sm:$0xff]   ;;  %1061 = vmatprep.subr.bf16.mxu0 %v1616_v9  ;;  %v1621_v12 = vld [vmem:[%s2102_s17 + $0x170] ss:$8 sps:$4 sm:$0xff]   ;;  %v1624_v14 = vld [vmem:[%s2102_s17 + $0x164] ss:$8 sps:$4 sm:$0xff]  }
  0x6f   : > { %1114 = vmatprep.subr.bf16.mxu1 %v1618_v10  ;;  %1062 = vmatpush1.bf16.msra.mxu0 %v1620_v11  ;;  %v1626_v15 = vld [vmem:[%s2102_s17 + $0x60] ss:$8 sps:$4 sm:$0xff]   ;;  %v1628_v17 = vld [vmem:[%s2102_s17 + $0x54] ss:$8 sps:$4 sm:$0xff]   ;;  %v1632_v19 = vld [vmem:[%s2102_s17 + $0x50] ss:$8 sps:$4 sm:$0xff]  }
  0x70   : > { %1115 = vmatpush1.bf16.msra.mxu1 %v1621_v12  ;;  %1063 = vmatprep.subr.bf16.mxu0 %v1622_v13  ;;  %v1627_v16 = vld [vmem:[%s2102_s17 + $0x160] ss:$8 sps:$4 sm:$0xff]   ;;  %v1630_v18 = vld [vmem:[%s2102_s17 + $0x154] ss:$8 sps:$4 sm:$0xff]   ;;  %v1633_v20 = vld [vmem:[%s2102_s17 + $0x150] ss:$8 sps:$4 sm:$0xff]  }
  0x71   : > { %1116 = vmatprep.subr.bf16.mxu1 %v1624_v14  ;;  %v1634_v21 = vld [vmem:[%s2102_s17 + $0x44] ss:$8 sps:$4 sm:$0xff]   ;;  %v1638_v23 = vld [vmem:[%s2102_s17 + $0x40] ss:$8 sps:$4 sm:$0xff]   ;;  %v1640_v25 = vld [vmem:[%s2102_s17 + $0x34] ss:$8 sps:$4 sm:$0xff]  }
  0x72   : > { %v1636_v22 = vld [vmem:[%s2102_s17 + $0x144] ss:$8 sps:$4 sm:$0xff]   ;;  %v1639_v24 = vld [vmem:[%s2102_s17 + $0x140] ss:$8 sps:$4 sm:$0xff]   ;;  %v1642_v26 = vld [vmem:[%s2102_s17 + $0x134] ss:$8 sps:$4 sm:$0xff]  }
  0x73   : > { %1064 = vmatpush1.bf16.msra.mxu0 %v1626_v15  ;;  %v1644_v27 = vld [vmem:[%s2102_s17 + $0x30] ss:$8 sps:$4 sm:$0xff]   ;;  %v1646_v29 = vld [vmem:[%s2102_s17 + $0x24] ss:$8 sps:$4 sm:$0xff]   ;;  %v1650_v31 = vld [vmem:[%s2102_s17 + $0x20] ss:$8 sps:$4 sm:$0xff]  }
  0x74   : > { %1117 = vmatpush1.bf16.msra.mxu1 %v1627_v16  ;;  %1065 = vmatprep.subr.bf16.mxu0 %v1628_v17  ;;  %v1645_v28 = vld [vmem:[%s2102_s17 + $0x130] ss:$8 sps:$4 sm:$0xff]   ;;  %v1648_v30 = vld [vmem:[%s2102_s17 + $0x124] ss:$8 sps:$4 sm:$0xff]   ;;  %v1651_v32 = vld [vmem:[%s2102_s17 + $0x120] ss:$8 sps:$4 sm:$0xff]  }
  0x75   : > { %1118 = vmatprep.subr.bf16.mxu1 %v1630_v18  ;;  %v1652_v33 = vld [vmem:[%s2102_s17 + $0x14] ss:$8 sps:$4 sm:$0xff]   ;;  %v1656_v35 = vld [vmem:[%s2102_s17 + $0x10] ss:$8 sps:$4 sm:$0xff]   ;;  %v1658_v37 = vld [vmem:[%s2102_s17 + $0x4] ss:$8 sps:$4 sm:$0xff]  }
  0x76   : > { %v1654_v34 = vld [vmem:[%s2102_s17 + $0x114] ss:$8 sps:$4 sm:$0xff]   ;;  %v1657_v36 = vld [vmem:[%s2102_s17 + $0x110] ss:$8 sps:$4 sm:$0xff]   ;;  %v1660_v38 = vld [vmem:[%s2102_s17 + $0x104] ss:$8 sps:$4 sm:$0xff]  }
  0x77   : > { %1066 = vmatpush1.bf16.msra.mxu0 %v1632_v19  ;;  %v1662_v39 = vld [vmem:[%s2102_s17] ss:$8 sps:$4 sm:$0xff]   ;;  %v1664_v41 = vld [vmem:[%s2102_s17 + $0xf4] ss:$8 sps:$4 sm:$0xff]   ;;  %v1668_v43 = vld [vmem:[%s2102_s17 + $0xf0] ss:$8 sps:$4 sm:$0xff]  }
  0x78   : > { %1119 = vmatpush1.bf16.msra.mxu1 %v1633_v20  ;;  %1067 = vmatprep.subr.bf16.mxu0 %v1634_v21  ;;  %v1663_v40 = vld [vmem:[%s2102_s17 + $0x100] ss:$8 sps:$4 sm:$0xff]   ;;  %v1666_v42 = vld [vmem:[%s2102_s17 + $0x1f4] ss:$8 sps:$4 sm:$0xff]   ;;  %v1669_v44 = vld [vmem:[%s2102_s17 + $0x1f0] ss:$8 sps:$4 sm:$0xff]  }
  0x79   : > { %1120 = vmatprep.subr.bf16.mxu1 %v1636_v22  ;;  %v1670_v45 = vld [vmem:[%s2102_s17 + $0xe4] ss:$8 sps:$4 sm:$0xff]   ;;  %v1674_v47 = vld [vmem:[%s2102_s17 + $0xe0] ss:$8 sps:$4 sm:$0xff]   ;;  %v1676_v49 = vld [vmem:[%s2102_s17 + $0xd4] ss:$8 sps:$4 sm:$0xff]  }
  0x7a   : > { %v1672_v46 = vld [vmem:[%s2102_s17 + $0x1e4] ss:$8 sps:$4 sm:$0xff]   ;;  %v1675_v48 = vld [vmem:[%s2102_s17 + $0x1e0] ss:$8 sps:$4 sm:$0xff]   ;;  %v1678_v50 = vld [vmem:[%s2102_s17 + $0x1d4] ss:$8 sps:$4 sm:$0xff]  }
  0x7b   : > { %1068 = vmatpush1.bf16.msra.mxu0 %v1638_v23  ;;  %v1680_v51 = vld [vmem:[%s2102_s17 + $0xd0] ss:$8 sps:$4 sm:$0xff]   ;;  %v1682_v53 = vld [vmem:[%s2102_s17 + $0xc4] ss:$8 sps:$4 sm:$0xff]   ;;  %v1686_v55 = vld [vmem:[%s2102_s17 + $0xc0] ss:$8 sps:$4 sm:$0xff]  }
  0x7c   : > { %1121 = vmatpush1.bf16.msra.mxu1 %v1639_v24  ;;  %1069 = vmatprep.subr.bf16.mxu0 %v1640_v25  ;;  %v1681_v52 = vld [vmem:[%s2102_s17 + $0x1d0] ss:$8 sps:$4 sm:$0xff]   ;;  %v1684_v54 = vld [vmem:[%s2102_s17 + $0x1c4] ss:$8 sps:$4 sm:$0xff]   ;;  %v1687_v56 = vld [vmem:[%s2102_s17 + $0x1c0] ss:$8 sps:$4 sm:$0xff]  }
  0x7d   : > { %1122 = vmatprep.subr.bf16.mxu1 %v1642_v26  ;;  %v1688_v57 = vld [vmem:[%s2102_s17 + $0xb4] ss:$8 sps:$4 sm:$0xff]   ;;  %v1692_v61 = vld [vmem:[%s2102_s17 + $0xb0] ss:$8 sps:$4 sm:$0xff]   ;;  %v1694_v63 = vld [vmem:[%s2102_s17 + $0xa4] ss:$8 sps:$4 sm:$0xff]  }
  0x7e   : > { %v1714_v58 = vld [vmem:[%s2100_s19 + $0x4] ss:$16 sps:$4 sm:$0xff]   ;;  %v1717_v60 = vld [vmem:[%s2100_s19 + $0xc] ss:$16 sps:$4 sm:$0xff]   ;;  %v1693_v62 = vld [vmem:[%s2102_s17 + $0x1b0] ss:$8 sps:$4 sm:$0xff]  }
  0x7f   : > { %1070 = vmatpush1.bf16.msra.mxu0 %v1644_v27  ;;  %v1690_v59 = vld [vmem:[%s2102_s17 + $0x1b4] ss:$8 sps:$4 sm:$0xff]   ;;  %1093 = vmatprep.mubr.bf16.mxu0 %v1714_v58  ;;  %v1696_v0 = vld [vmem:[%s2102_s17 + $0x1a4] ss:$8 sps:$4 sm:$0xff]   ;;  %v1698_v1 = vld [vmem:[%s2102_s17 + $0xa0] ss:$8 sps:$4 sm:$0xff]  }
  0x80   : > { %1123 = vmatpush1.bf16.msra.mxu1 %v1645_v28  ;;  %1071 = vmatprep.subr.bf16.mxu0 %v1646_v29  ;;  %v1699_v2 = vld [vmem:[%s2102_s17 + $0x1a0] ss:$8 sps:$4 sm:$0xff]   ;;  %v1700_v3 = vld [vmem:[%s2102_s17 + $0x94] ss:$8 sps:$4 sm:$0xff]   ;;  %v1704_v5 = vld [vmem:[%s2102_s17 + $0x90] ss:$8 sps:$4 sm:$0xff]  }
  0x81   : > { %1124 = vmatprep.subr.bf16.mxu1 %v1648_v30  ;;  %1146 = vmatprep.mubr.bf16.mxu1 %v1717_v60  ;;  %v1702_v4 = vld [vmem:[%s2102_s17 + $0x194] ss:$8 sps:$4 sm:$0xff]   ;;  %v1705_v6 = vld [vmem:[%s2102_s17 + $0x190] ss:$8 sps:$4 sm:$0xff]   ;;  %v1706_v7 = vld [vmem:[%s2102_s17 + $0x84] ss:$8 sps:$4 sm:$0xff]  }
  0x82   : > { %v1708_v8 = vld [vmem:[%s2102_s17 + $0x184] ss:$8 sps:$4 sm:$0xff]   ;;  %v1710_v9 = vld [vmem:[%s2102_s17 + $0x80] ss:$8 sps:$4 sm:$0xff]   ;;  %v623_v27 = vld [vmem:[%s2104_s15 + $0x10] sm:$0xff]  ;;  %p1518_p5 = scmp.ne.s32.totalorder %s1794_s21, 7 }
  0x83   : > { %1072 = vmatpush1.bf16.msra.mxu0 %v1650_v31  ;;  %v1711_v10 = vld [vmem:[%s2102_s17 + $0x180] ss:$8 sps:$4 sm:$0xff]   ;;  %v1718_v13 = vld [vmem:[%s2100_s19 + $0x24] ss:$16 sps:$4 sm:$0xff]   ;;  %v1720_v14 = vld [vmem:[%s2100_s19 + $0x2c] ss:$16 sps:$4 sm:$0xff]  }
  0x84   : > { %1125 = vmatpush1.bf16.msra.mxu1 %v1651_v32  ;;  %1073 = vmatprep.subr.bf16.mxu0 %v1652_v33  ;;  %v1712_v11 = vld [vmem:[%s2100_s19] ss:$16 sps:$4 sm:$0xff]   ;;  %v1715_v12 = vld [vmem:[%s2100_s19 + $0x8] ss:$16 sps:$4 sm:$0xff]  }
  0x85   : > { %1126 = vmatprep.subr.bf16.mxu1 %v1654_v34  ;;  %v1722_v15 = vld [vmem:[%s2100_s19 + $0x20] ss:$16 sps:$4 sm:$0xff]   ;;  %v1723_v16 = vld [vmem:[%s2100_s19 + $0x28] ss:$16 sps:$4 sm:$0xff]  }
  0x86   : > { %v621_v18 = vld [vmem:[%s2104_s15] sm:$0xff]  ;;  %v622_v22 = vld [vmem:[%s2104_s15 + $0x8] sm:$0xff]  ;;  %v624_v32 = vld [vmem:[%s2104_s15 + $0x18] sm:$0xff] }
  0x87   : > { %1074 = vmatpush1.bf16.msra.mxu0 %v1656_v35 }
  0x88   : > { %1127 = vmatpush1.bf16.msra.mxu1 %v1657_v36  ;;  %1075 = vmatprep.subr.bf16.mxu0 %v1658_v37  ;;  %v625_v37 = vld [vmem:[%s2104_s15 + $0x20] sm:$0xff] }
  0x89   : > { %1128 = vmatprep.subr.bf16.mxu1 %v1660_v38 }
  0x8b   : > { %1076 = vmatpush1.bf16.msra.mxu0 %v1662_v39 }
  0x8c   : > { %1129 = vmatpush1.bf16.msra.mxu1 %v1663_v40  ;;  %1077 = vmatprep.subr.bf16.mxu0 %v1664_v41 }
  0x8d   : > { %1130 = vmatprep.subr.bf16.mxu1 %v1666_v42  ;;  %v626_v42 = vld [vmem:[%s2104_s15 + $0x28] sm:$0xff] }
  0x8f   : > { %1078 = vmatpush2.bf16.msra.mxu0 %v1668_v43 }
  0x90   : > { %1131 = vmatpush2.bf16.msra.mxu1 %v1669_v44  ;;  %1079 = vmatprep.subr.bf16.mxu0 %v1670_v45 }
  0x91   : > { %1132 = vmatprep.subr.bf16.mxu1 %v1672_v46 }
  0x93   : > { %1080 = vmatpush2.bf16.msra.mxu0 %v1674_v47  ;;  %v627_v47 = vld [vmem:[%s2104_s15 + $0x30] sm:$0xff] }
  0x94   : > { %1133 = vmatpush2.bf16.msra.mxu1 %v1675_v48  ;;  %1081 = vmatprep.subr.bf16.mxu0 %v1676_v49 }
  0x95   : > { %1134 = vmatprep.subr.bf16.mxu1 %v1678_v50 }
  0x97   : > { %1082 = vmatpush2.bf16.msra.mxu0 %v1680_v51 }
  0x98   : > { %1135 = vmatpush2.bf16.msra.mxu1 %v1681_v52  ;;  %1083 = vmatprep.subr.bf16.mxu0 %v1682_v53  ;;  %v628_v52 = vld [vmem:[%s2104_s15 + $0x38] sm:$0xff] }
  0x99   : > { %1136 = vmatprep.subr.bf16.mxu1 %v1684_v54 }
  0x9b   : > { %1084 = vmatpush2.bf16.msra.mxu0 %v1686_v55 }
  0x9c   : > { %1137 = vmatpush2.bf16.msra.mxu1 %v1687_v56  ;;  %1085 = vmatprep.subr.bf16.mxu0 %v1688_v57 }
  0x9d   : > { %1138 = vmatprep.subr.bf16.mxu1 %v1690_v59 }
  0x9f   : > { %1086 = vmatpush2.bf16.msra.mxu0 %v1692_v61 }
  0xa0   : > { %1139 = vmatpush2.bf16.msra.mxu1 %v1693_v62  ;;  %1087 = vmatprep.subr.bf16.mxu0 %v1694_v63 }
  0xa1   : > { %1140 = vmatprep.subr.bf16.mxu1 %v1696_v0 }
  0xa3   : > { %1088 = vmatpush2.bf16.msra.mxu0 %v1698_v1 }
  0xa4   : > { %1141 = vmatpush2.bf16.msra.mxu1 %v1699_v2  ;;  %1089 = vmatprep.subr.bf16.mxu0 %v1700_v3 }
  0xa5   : > { %1142 = vmatprep.subr.bf16.mxu1 %v1702_v4 }
  0xa7   : > { %1090 = vmatpush2.bf16.msra.mxu0 %v1704_v5 }
  0xa8   : > { %1143 = vmatpush2.bf16.msra.mxu1 %v1705_v6  ;;  %1091 = vmatprep.subr.bf16.mxu0 %v1706_v7 }
  0xa9   : > { %1144 = vmatprep.subr.bf16.mxu1 %v1708_v8 }
  0xab   : > { %1092 = vmatpush2.bf16.msra.mxu0 %v1710_v9 }
  0xac   : > { %1145 = vmatpush2.bf16.msra.mxu1 %v1711_v10 }
  0xae   : > { %1094 = vmatmul.mubr.bf16.vlgmr.msra.gmra.mxu0 %v1712_v11 }
  0xaf   : > { %1147 = vmatmul.mubr.bf16.vlgmr.msra.gmra.mxu1 %v1715_v12  ;;  %1103 = vmatprep.mubr.bf16.mxu0 %v1718_v13 }
  0xb0   : > { %1156 = vmatprep.mubr.bf16.mxu1 %v1720_v14 }
  0xb6   : > { %1104 = vmatmul.mubr.bf16.gmra.mxu0 %v1722_v15 }
  0xb7   : > { %1157 = vmatmul.mubr.bf16.gmra.mxu1 %v1723_v16 }
 0x16e   : > { %v1095_v17 = vpop.f32.mrf.mxu0 }
 0x16f   : > { %v1148_v19 = vpop.f32.mrf.mxu1 }
 0x170   : > { %v1149_v20 = vadd.f32 %v1148_v19, %v1095_v17  ;;  %v1097_v21 = vpop.f32.mrf.mxu0 }
 0x171   : > { %v1150_v23 = vpop.f32.mrf.mxu1 }
 0x172   : > { %v1167_v24 = vadd.f32 %v1149_v20, %v621_v18  ;;  %v1151_v25 = vadd.f32 %v1150_v23, %v1097_v21  ;;  %v1099_v26 = vpop.f32.mrf.mxu0 }
 0x173   : > { %v1152_v28 = vpop.f32.mrf.mxu1 }
 0x174   : > { %1175 = vst [vmem:[%s2104_s15] sm:$0xff] %v1167_v24  ;;  %v1168_v29 = vadd.f32 %v1151_v25, %v622_v22  ;;  %v1153_v30 = vadd.f32 %v1152_v28, %v1099_v26  ;;  %v1101_v31 = vpop.f32.mrf.mxu0 }
 0x175   : > { %v1154_v33 = vpop.f32.mrf.mxu1 }
 0x176   : > { %1176 = vst [vmem:[%s2104_s15 + $0x8] sm:$0xff] %v1168_v29  ;;  %v1169_v34 = vadd.f32 %v1153_v30, %v623_v27  ;;  %v1155_v35 = vadd.f32 %v1154_v33, %v1101_v31  ;;  %v1105_v36 = vpop.f32.mrf.mxu0 }
 0x177   : > { %v1158_v38 = vpop.f32.mrf.mxu1 }
 0x178   : > { %1177 = vst [vmem:[%s2104_s15 + $0x10] sm:$0xff] %v1169_v34  ;;  %v1170_v39 = vadd.f32 %v1155_v35, %v624_v32  ;;  %v1159_v40 = vadd.f32 %v1158_v38, %v1105_v36  ;;  %v1107_v41 = vpop.f32.mrf.mxu0 }
 0x179   : > { %v1160_v43 = vpop.f32.mrf.mxu1 }
 0x17a   : > { %1178 = vst [vmem:[%s2104_s15 + $0x18] sm:$0xff] %v1170_v39  ;;  %v1171_v44 = vadd.f32 %v1159_v40, %v625_v37  ;;  %v1161_v45 = vadd.f32 %v1160_v43, %v1107_v41  ;;  %v1109_v46 = vpop.f32.mrf.mxu0 }
 0x17b   : > { %v1162_v48 = vpop.f32.mrf.mxu1 }
 0x17c   : > { %1179 = vst [vmem:[%s2104_s15 + $0x20] sm:$0xff] %v1171_v44  ;;  %v1172_v49 = vadd.f32 %v1161_v45, %v626_v42  ;;  %v1163_v50 = vadd.f32 %v1162_v48, %v1109_v46  ;;  %v1111_v51 = vpop.f32.mrf.mxu0 }
 0x17d   : > { %v1164_v53 = vpop.f32.mrf.mxu1 }
 0x17e   : > { %1180 = vst [vmem:[%s2104_s15 + $0x28] sm:$0xff] %v1172_v49  ;;  %v1173_v54 = vadd.f32 %v1163_v50, %v627_v47  ;;  %v1165_v55 = vadd.f32 %v1164_v53, %v1111_v51  ;;  %1186 = sbr.rel (%p1518_p5) target bundleno = 408 (0x198), region = 105 }
 0x180   : > { %1181 = vst [vmem:[%s2104_s15 + $0x30] sm:$0xff] %v1173_v54  ;;  %v1174_v56 = vadd.f32 %v1165_v55, %v628_v52 }
 0x182   : > { %1182 = vst [vmem:[%s2104_s15 + $0x38] sm:$0xff] %v1174_v56 }
 0x183   : > { %v1197_v57 = vlaneseq  ;;  %v1195_v59 = vld [vmem:[%s600_s6] sm:$0x3]  ;;  %v1188_v63 = vld [vmem:[%s2104_s15 + $0x8] sm:$0xff]  ;;  %v1189_v1 = vld [vmem:[%s2104_s15 + $0x10] sm:$0xff] }
 0x184   : > { %v1215_v60 = vld [vmem:[%s605_s1] sm:$0x3]  ;;  %v1190_v2 = vld [vmem:[%s2104_s15 + $0x18] sm:$0xff] }
 0x185   : > { %v1198_v58 = vshrl.u32 %v1197_v57, 7  ;;  %v1187_v61 = vld [vmem:[%s2104_s15] sm:$0xff]  ;;  %v1192_v8 = vld [vmem:[%s2104_s15 + $0x28] sm:$0xff] }
 0x186   : > { %v1191_v3 = vld [vmem:[%s2104_s15 + $0x20] sm:$0xff] }
 0x187   : > { %v1199_v62 = vsub.s32 0, %v1198_v58  ;;  %v1203_v0 = vsub.s32 1, %v1198_v58  ;;  %v1193_v9 = vld [vmem:[%s2104_s15 + $0x30] sm:$0xff] }
 0x189   : > { %v1200_v4 = vrot.slane %v1195_v59, %v1199_v62  ;;  %v1220_v5 = vrot.slane %v1215_v60, %v1199_v62  ;;  %v1204_v6 = vrot.slane %v1195_v59, %v1203_v0  ;;  %v1224_v7 = vrot.slane %v1215_v60, %v1203_v0  ;;  %v1194_v10 = vld [vmem:[%s2104_s15 + $0x38] sm:$0xff] }
 0x18b   : > { %v1207_v11 = vmul.f32 %v1200_v4, %v1187_v61  ;;  %v1208_v12 = vmul.f32 %v1204_v6, %v1188_v63  ;;  %v1209_v13 = vmul.f32 %v1200_v4, %v1189_v1  ;;  %v1210_v14 = vmul.f32 %v1204_v6, %v1190_v2 }
 0x18c   : > { %v1211_v15 = vmul.f32 %v1200_v4, %v1191_v3  ;;  %v1212_v16 = vmul.f32 %v1204_v6, %v1192_v8  ;;  %v1213_v17 = vmul.f32 %v1200_v4, %v1193_v9  ;;  %v1214_v18 = vmul.f32 %v1204_v6, %v1194_v10 }
 0x18d   : > { %v1227_v19 = vadd.f32 %v1220_v5, %v1207_v11  ;;  %v1228_v20 = vadd.f32 %v1224_v7, %v1208_v12  ;;  %v1229_v21 = vadd.f32 %v1220_v5, %v1209_v13  ;;  %v1230_v22 = vadd.f32 %v1224_v7, %v1210_v14 }
 0x18e   : > { %v1231_v23 = vadd.f32 %v1220_v5, %v1211_v15  ;;  %v1232_v24 = vadd.f32 %v1224_v7, %v1212_v16  ;;  %v1233_v25 = vadd.f32 %v1220_v5, %v1213_v17  ;;  %v1234_v26 = vadd.f32 %v1224_v7, %v1214_v18 }
 0x18f   : > { %vm1235_vm0 = vcmp.ge.f32.partialorder %v1227_v19, 0.0  ;;  %v1243_v27 = vmul.f32 0.2, %v1227_v19  ;;  %vm1236_vm1 = vcmp.ge.f32.partialorder %v1228_v20, 0.0  ;;  %v1244_v28 = vmul.f32 0.2, %v1228_v20 }
 0x190   : > { %vm1237_vm2 = vcmp.ge.f32.partialorder %v1229_v21, 0.0  ;;  %v1245_v29 = vmul.f32 0.2, %v1229_v21  ;;  %vm1238_vm3 = vcmp.ge.f32.partialorder %v1230_v22, 0.0  ;;  %v1246_v30 = vmul.f32 0.2, %v1230_v22 }
 0x191   : > { %v1251_v31 = vsel %vm1235_vm0, %v1227_v19, %v1243_v27  ;;  %v1252_v32 = vsel %vm1236_vm1, %v1228_v20, %v1244_v28  ;;  %vm1239_vm4 = vcmp.ge.f32.partialorder %v1231_v23, 0.0  ;;  %v1247_v33 = vmul.f32 0.2, %v1231_v23 }
 0x192   : > { %1259 = vst [vmem:[%s2104_s15] sm:$0xff] %v1251_v31  ;;  %1260 = vst [vmem:[%s2104_s15 + $0x8] sm:$0xff] %v1252_v32  ;;  %v1253_v34 = vsel %vm1237_vm2, %v1229_v21, %v1245_v29  ;;  %v1254_v35 = vsel %vm1238_vm3, %v1230_v22, %v1246_v30  ;;  %vm1240_vm5 = vcmp.ge.f32.partialorder %v1232_v24, 0.0  ;;  %v1248_v36 = vmul.f32 0.2, %v1232_v24 }
 0x193   : > { %1261 = vst [vmem:[%s2104_s15 + $0x10] sm:$0xff] %v1253_v34  ;;  %1262 = vst [vmem:[%s2104_s15 + $0x18] sm:$0xff] %v1254_v35  ;;  %v1255_v37 = vsel %vm1239_vm4, %v1231_v23, %v1247_v33  ;;  %vm1241_vm6 = vcmp.ge.f32.partialorder %v1233_v25, 0.0  ;;  %v1249_v38 = vmul.f32 0.2, %v1233_v25  ;;  %vm1242_vm7 = vcmp.ge.f32.partialorder %v1234_v26, 0.0 }
 0x194   : > { %1263 = vst [vmem:[%s2104_s15 + $0x20] sm:$0xff] %v1255_v37  ;;  %v1256_v39 = vsel %vm1240_vm5, %v1232_v24, %v1248_v36  ;;  %v1250_v40 = vmul.f32 0.2, %v1234_v26 }
 0x195   : > { %1264 = vst [vmem:[%s2104_s15 + $0x28] sm:$0xff] %v1256_v39  ;;  %v1257_v41 = vsel %vm1241_vm6, %v1233_v25, %v1249_v38 }
 0x196   : > { %1265 = vst [vmem:[%s2104_s15 + $0x30] sm:$0xff] %v1257_v41  ;;  %v1258_v42 = vsel %vm1242_vm7, %v1234_v26, %v1250_v40 }
 0x197   : > { %1266 = vst [vmem:[%s2104_s15 + $0x38] sm:$0xff] %v1258_v42 }
 0x198 PF: > { %1273 = sbr.rel (!%p1932_p12) target bundleno = 416 (0x1a0), region = 109  ;;  %s1526_s1 = sshll.u32 (%p1932_p12), %s1798_s22, 4 }
 0x199   : > { %v1292_v43 = vld [vmem:[%s2104_s15] sm:$0xff] (%p1932_p12)  ;;  %v1294_v44 = vld [vmem:[%s2104_s15 + $0x8] sm:$0xff] (%p1932_p12)  ;;  %s1279_s29 = scalar_lea.vmem (%p1932_p12), %s2281_s4, %s1526_s1 }
 0x19a   : > { %v1296_v45 = vld [vmem:[%s2104_s15 + $0x10] sm:$0xff] (%p1932_p12)  ;;  %v1298_v46 = vld [vmem:[%s2104_s15 + $0x18] sm:$0xff] (%p1932_p12)  ;;  %1293 = vst [vmem:[%s1279_s29] sm:$0xff] (%p1932_p12), %v1292_v43  ;;  %1295 = vst [vmem:[%s1279_s29 + $0x8] sm:$0xff] (%p1932_p12), %v1294_v44 }
 0x19b   : > { %v1300_v47 = vld [vmem:[%s2104_s15 + $0x20] sm:$0xff] (%p1932_p12)  ;;  %1297 = vst [vmem:[%s1279_s29 + $0x20] sm:$0xff] (%p1932_p12), %v1296_v45  ;;  %1299 = vst [vmem:[%s1279_s29 + $0x28] sm:$0xff] (%p1932_p12), %v1298_v46 }
 0x19c   : > { %v1302_v48 = vld [vmem:[%s2104_s15 + $0x28] sm:$0xff] (%p1932_p12)  ;;  %1301 = vst [vmem:[%s1279_s29 + $0x40] sm:$0xff] (%p1932_p12), %v1300_v47 }
 0x19d   : > { %1303 = vst [vmem:[%s1279_s29 + $0x48] sm:$0xff] %v1302_v48  ;;  %v1304_v49 = vld [vmem:[%s2104_s15 + $0x30] sm:$0xff] }
 0x19e   : > { %v1306_v50 = vld [vmem:[%s2104_s15 + $0x38] sm:$0xff]  ;;  %1305 = vst [vmem:[%s1279_s29 + $0x60] sm:$0xff] %v1304_v49 }
 0x19f   : > { %1307 = vst [vmem:[%s1279_s29 + $0x68] sm:$0xff] %v1306_v50 }
 0x1a0 PF: > { %s14_s25 = sadd.s32 1, %s1810_s25   ;;  %s2293_s14 = sld [smem:[#allocation5_spill]] }
 0x1a1   : > { %p11_p6 = scmp.ge.s32.totalorder %s14_s25, 18   ;;  %s2294_s27 = sld [smem:[#allocation6_spill]] }
 0x1a2   : > { %s2295_s15 = smov %s1774_s16  ;;  %s2296_s16 = smov %s1930_s13 }
 0x1a3   : > { %s2297_s17 = smov %s1782_s18  ;;  %s2298_s18 = smov %s1927_s12 }
 0x1a4   : > { %s2299_s19 = smov %s1790_s20  ;;  %s2300_s20 = smov %s1913_s7 }
 0x1a5   : > { %s2301_s21 = smov %s1802_s23  ;;  %s2302_s22 = smov %s1806_s24 }
 0x1a6   : > { %s2303_s23 = smov %s2293_s14  ;;  %13 = sbr.rel (!%p11_p6) target bundleno = 9 (0x9), region = 177 }
 0x1a7   : > { %s2304_s24 = smov %s2294_s27 }

// kernel: discriminator_forward.10
= control target key start
LH: loop header
LB: loop body
LE: loop exit
PB: predicated region body
PF: predicated region fallthrough
CT: control target
= control target key end

     0   :  { %s2135_s0 = inlined_call_operand.vmem [shape: bf16[16,8192], index: 0, kind: input, shape index: {}]   ;;  %s2136_s1 = inlined_call_operand.vmem [shape: bf16[8192,1024], index: 1, kind: input, shape index: {}]   ;;  %s2137_s2 = inlined_call_operand.vmem [shape: f32[1,1024], index: 2, kind: input, shape index: {}]   ;;  %s2138_s3 = inlined_call_operand.vmem [shape: f32[1,1024], index: 3, kind: input, shape index: {}]   ;;  %s2139_s4 = inlined_call_operand.vmem [shape: f32[16,1024], index: 4, kind: output, shape index: {}]  }
   0x1   :  { %2142 = sst [smem:[#allocation7_spill]] %s2135_s0 }
   0x2   :  { %2143 = sst [smem:[#allocation8_spill]] %s2136_s1 }
   0x3   :  { %s1724_s15 = smov 0   ;;  %s1726_s16 = smov 0  }
   0x4   :  { %s1728_s17 = smov 0   ;;  %s1730_s18 = smov 0  }
   0x5   :  { %s1732_s19 = smov 0   ;;  %s1734_s20 = smov 0  }
   0x6   :  { %s1736_s21 = smov 0   ;;  %s1738_s22 = smov 0  }
   0x7   :  { %s1740_s23 = smov 0   ;;  %s1742_s24 = smov 0  }
   0x8   :  { %s1744_s25 = smov 0  }
   0x9 LB: > { %s1323_s26 = sadd.s32 4294967295, %s1696_s25   ;;  %s26_s27 = sadd.s32 1, %s1688_s23  ;;  %s1696_s25 = sphi %s1744_s25, %s14_s25   ;;  %s1692_s24 = sphi %s1742_s24, %s2162_s24   ;;  %s1688_s23 = sphi %s1740_s23, %s2161_s23   ;;  %s1684_s22 = sphi %s1738_s22, %s2160_s22   ;;  %s1680_s21 = sphi %s1736_s21, %s2159_s21   ;;  %s1676_s20 = sphi %s1734_s20, %s2158_s20   ;;  %s1672_s19 = sphi %s1732_s19, %s2157_s19   ;;  %s1668_s18 = sphi %s1730_s18, %s2156_s18   ;;  %s1664_s17 = sphi %s1728_s17, %s2155_s17   ;;  %s1660_s16 = sphi %s1726_s16, %s2154_s16   ;;  %s1656_s15 = sphi %s1724_s15, %s2153_s15  }
   0xa   : > { %p27_p0 = scmp.ge.s32.totalorder %s26_s27, 16  ;;  %s29_s28 = sadd.s32 1, %s1692_s24 }
   0xb   : > { %s42_s29 = sadd.s32 1, %s1676_s20  ;;  %p49_p1 = scmp.ne.s32.totalorder %s1676_s20, %s1672_s19 }
   0xc   : > { %s2164_s27 = smov (%p27_p0, %s26_s27), 0  ;;  %s2166_s28 = smov (!%p27_p0, %s29_s28), %s1692_s24 }
   0xd   : > { %2144 = sst [smem:[#allocation5_spill]] %s2164_s27  ;;  %s38_s30 = ssub.s32 %s1688_s23, %s2164_s27 }
   0xe   : > { %p50_p2 = scmp.eq.s32.totalorder %s1696_s25, 0  ;;  %p31_p3 = scmp.ge.s32.totalorder %s2166_s28, 4 }
   0xf   : > { %p40_p4 = scmp.eq.s32.totalorder %s38_s30, 0  ;;  %s70_s6 = sadd.s32 1, %s1668_s18 }
  0x10   : > { %p1791_p5 = por %p50_p2, %p49_p1  ;;  %s2168_s28 = smov (%p31_p3, %s2166_s28), 0 }
  0x11   : > { %2146 = sst [smem:[#allocation6_spill]] %s2168_s28  ;;  %s66_s8 = ssub.s32 %s1692_s24, %s2168_s28 }
  0x12   : > { %s1799_s7 = scalar_select %p40_p4, %s1676_s20, %s42_s29  }
  0x13   : > { %p77_p6 = scmp.ne.s32.totalorder %s1668_s18, %s1664_s17  ;;  %s67_s9 = sor.u32 %s66_s8, %s38_s30 }
  0x14   : > { %p148_p7 = scmp.eq.s32.totalorder %s66_s8, 0  ;;  %p68_p8 = scmp.eq.s32.totalorder %s67_s9, 0 }
  0x15   : > { %p1805_p9 = por %p77_p6, %p50_p2  ;;  %s150_s11 = sadd.s32 1, %s1660_s16 }
  0x16   : > { %p160_p10 = scmp.ne.s32.totalorder %s1660_s16, %s1656_s15  ;;  %p161_p11 = scmp.eq.s32.totalorder %s1323_s26, 63 }
  0x17   : > { %s1813_s12 = scalar_select %p68_p8, %s1668_s18, %s70_s6  }
  0x18   : > { %s1816_s13 = scalar_select %p148_p7, %s1660_s16, %s150_s11  }
  0x19   : > { %p1818_p12 = por %p161_p11, %p160_p10  ;;  %p1326_p13 = scmp.ge.s32.totalorder %s1696_s25, 64 }
  0x1b   : > { %183 = sbr.rel (%p1326_p13) target bundleno = 118 (0x76), region = 16 }
  0x20   : > { %186 = sbr.rel (!%p1791_p5) target bundleno = 44 (0x2c), region = 20  ;;  %s188_s29 = sand.u32 (%p1791_p5), 1, %s1676_s20  }
  0x21   : > { %s1416_s30 = sshll.u32 (%p1791_p5), %s1688_s23, 4  ;;  %s1327_s8 = sshll.u32 (%p1791_p5), %s188_s29, 5 }
  0x22   : > { %s2149_s0 = sld [smem:[#allocation7_spill]] (%p1791_p5)  ;;  %s190_s26 = scalar_lea.vmem (%p1791_p5), [#allocation2], %s1327_s8 }
  0x28   : > { %s196_s11 = scalar_lea.vmem %s2149_s0, %s1416_s30 }
  0x29   : > { %v209_v0 = vld [vmem:[%s196_s11] sm:$0xff]  ;;  %v211_v1 = vld [vmem:[%s196_s11 + $0x8] sm:$0xff] }
  0x2a   : > { %v213_v2 = vld [vmem:[%s196_s11 + $0x100] sm:$0xff]  ;;  %210 = vst [vmem:[%s190_s26] sm:$0xff] %v209_v0  ;;  %212 = vst [vmem:[%s190_s26 + $0x8] sm:$0xff] %v211_v1  ;;  %v215_v3 = vld [vmem:[%s196_s11 + $0x108] sm:$0xff] }
  0x2b   : > { %214 = vst [vmem:[%s190_s26 + $0x10] sm:$0xff] %v213_v2  ;;  %216 = vst [vmem:[%s190_s26 + $0x18] sm:$0xff] %v215_v3 }
  0x2c PF: > { %222 = sbr.rel (!%p1805_p9) target bundleno = 118 (0x76), region = 43  ;;  %s224_s5 = sand.u32 (%p1805_p9), 1, %s1668_s18  }
  0x2d   : > { %s1332_s29 = sshll.u32 (%p1805_p9), %s1692_s24, 1  ;;  %s1330_s6 = sshll.u32 (%p1805_p9), %s224_s5, 9 }
  0x2e   : > { %s1417_s30 = sshll.u32 (%p1805_p9), %s1688_s23, 9  ;;  %s2150_s1 = sld [smem:[#allocation8_spill]] (%p1805_p9) }
  0x2f   : > { %s230_s9 = sadd.s32 (%p1805_p9), %s1417_s30, %s1332_s29  ;;  %s1843_s10 = scalar_lea.vmem (%p1805_p9), [#allocation3], %s1330_s6 }
  0x30   : > { %s1334_s0 = sshll.u32 (%p1805_p9), %s230_s9, 2 }
  0x34   : > { %s1838_s27 = scalar_lea.vmem %s2150_s1, %s1334_s0 }
  0x35   : > { %v387_v4 = vld [vmem:[%s1838_s27] sm:$0xff] }
  0x36   : > { %v389_v5 = vld [vmem:[%s1838_s27 + $0x20] sm:$0xff]  ;;  %388 = vst [vmem:[%s1843_s10] sm:$0xff] %v387_v4 }
  0x37   : > { %v391_v6 = vld [vmem:[%s1838_s27 + $0x40] sm:$0xff]  ;;  %390 = vst [vmem:[%s1843_s10 + $0x8] sm:$0xff] %v389_v5 }
  0x38   : > { %392 = vst [vmem:[%s1843_s10 + $0x10] sm:$0xff] %v391_v6  ;;  %v393_v7 = vld [vmem:[%s1838_s27 + $0x60] sm:$0xff] }
  0x39   : > { %v395_v8 = vld [vmem:[%s1838_s27 + $0x80] sm:$0xff]  ;;  %394 = vst [vmem:[%s1843_s10 + $0x18] sm:$0xff] %v393_v7 }
  0x3a   : > { %v397_v9 = vld [vmem:[%s1838_s27 + $0xa0] sm:$0xff]  ;;  %396 = vst [vmem:[%s1843_s10 + $0x20] sm:$0xff] %v395_v8 }
  0x3b   : > { %398 = vst [vmem:[%s1843_s10 + $0x28] sm:$0xff] %v397_v9  ;;  %v399_v10 = vld [vmem:[%s1838_s27 + $0xc0] sm:$0xff] }
  0x3c   : > { %v401_v11 = vld [vmem:[%s1838_s27 + $0xe0] sm:$0xff]  ;;  %400 = vst [vmem:[%s1843_s10 + $0x30] sm:$0xff] %v399_v10 }
  0x3d   : > { %v403_v12 = vld [vmem:[%s1838_s27 + $0x100] sm:$0xff]  ;;  %402 = vst [vmem:[%s1843_s10 + $0x38] sm:$0xff] %v401_v11 }
  0x3e   : > { %404 = vst [vmem:[%s1843_s10 + $0x40] sm:$0xff] %v403_v12  ;;  %v405_v13 = vld [vmem:[%s1838_s27 + $0x120] sm:$0xff] }
  0x3f   : > { %v407_v14 = vld [vmem:[%s1838_s27 + $0x140] sm:$0xff]  ;;  %406 = vst [vmem:[%s1843_s10 + $0x48] sm:$0xff] %v405_v13 }
  0x40   : > { %v409_v15 = vld [vmem:[%s1838_s27 + $0x160] sm:$0xff]  ;;  %408 = vst [vmem:[%s1843_s10 + $0x50] sm:$0xff] %v407_v14 }
  0x41   : > { %410 = vst [vmem:[%s1843_s10 + $0x58] sm:$0xff] %v409_v15  ;;  %v411_v16 = vld [vmem:[%s1838_s27 + $0x180] sm:$0xff] }
  0x42   : > { %v413_v17 = vld [vmem:[%s1838_s27 + $0x1a0] sm:$0xff]  ;;  %412 = vst [vmem:[%s1843_s10 + $0x60] sm:$0xff] %v411_v16 }
  0x43   : > { %v415_v18 = vld [vmem:[%s1838_s27 + $0x1c0] sm:$0xff]  ;;  %414 = vst [vmem:[%s1843_s10 + $0x68] sm:$0xff] %v413_v17 }
  0x44   : > { %416 = vst [vmem:[%s1843_s10 + $0x70] sm:$0xff] %v415_v18  ;;  %v417_v19 = vld [vmem:[%s1838_s27 + $0x1e0] sm:$0xff] }
  0x45   : > { %v419_v20 = vld [vmem:[%s1838_s27 + $0x200] sm:$0xff]  ;;  %418 = vst [vmem:[%s1843_s10 + $0x78] sm:$0xff] %v417_v19 }
  0x46   : > { %v421_v21 = vld [vmem:[%s1838_s27 + $0x220] sm:$0xff]  ;;  %420 = vst [vmem:[%s1843_s10 + $0x80] sm:$0xff] %v419_v20 }
  0x47   : > { %422 = vst [vmem:[%s1843_s10 + $0x88] sm:$0xff] %v421_v21  ;;  %v423_v22 = vld [vmem:[%s1838_s27 + $0x240] sm:$0xff] }
  0x48   : > { %v425_v23 = vld [vmem:[%s1838_s27 + $0x260] sm:$0xff]  ;;  %424 = vst [vmem:[%s1843_s10 + $0x90] sm:$0xff] %v423_v22 }
  0x49   : > { %v427_v24 = vld [vmem:[%s1838_s27 + $0x280] sm:$0xff]  ;;  %426 = vst [vmem:[%s1843_s10 + $0x98] sm:$0xff] %v425_v23 }
  0x4a   : > { %428 = vst [vmem:[%s1843_s10 + $0xa0] sm:$0xff] %v427_v24  ;;  %v429_v25 = vld [vmem:[%s1838_s27 + $0x2a0] sm:$0xff] }
  0x4b   : > { %v431_v26 = vld [vmem:[%s1838_s27 + $0x2c0] sm:$0xff]  ;;  %430 = vst [vmem:[%s1843_s10 + $0xa8] sm:$0xff] %v429_v25 }
  0x4c   : > { %v433_v27 = vld [vmem:[%s1838_s27 + $0x2e0] sm:$0xff]  ;;  %432 = vst [vmem:[%s1843_s10 + $0xb0] sm:$0xff] %v431_v26 }
  0x4d   : > { %434 = vst [vmem:[%s1843_s10 + $0xb8] sm:$0xff] %v433_v27  ;;  %v435_v28 = vld [vmem:[%s1838_s27 + $0x300] sm:$0xff] }
  0x4e   : > { %v437_v29 = vld [vmem:[%s1838_s27 + $0x320] sm:$0xff]  ;;  %436 = vst [vmem:[%s1843_s10 + $0xc0] sm:$0xff] %v435_v28 }
  0x4f   : > { %v439_v30 = vld [vmem:[%s1838_s27 + $0x340] sm:$0xff]  ;;  %438 = vst [vmem:[%s1843_s10 + $0xc8] sm:$0xff] %v437_v29 }
  0x50   : > { %440 = vst [vmem:[%s1843_s10 + $0xd0] sm:$0xff] %v439_v30  ;;  %v441_v31 = vld [vmem:[%s1838_s27 + $0x360] sm:$0xff] }
  0x51   : > { %v443_v32 = vld [vmem:[%s1838_s27 + $0x380] sm:$0xff]  ;;  %442 = vst [vmem:[%s1843_s10 + $0xd8] sm:$0xff] %v441_v31 }
  0x52   : > { %v445_v33 = vld [vmem:[%s1838_s27 + $0x3a0] sm:$0xff]  ;;  %444 = vst [vmem:[%s1843_s10 + $0xe0] sm:$0xff] %v443_v32 }
  0x53   : > { %446 = vst [vmem:[%s1843_s10 + $0xe8] sm:$0xff] %v445_v33  ;;  %v447_v34 = vld [vmem:[%s1838_s27 + $0x3c0] sm:$0xff] }
  0x54   : > { %v449_v35 = vld [vmem:[%s1838_s27 + $0x3e0] sm:$0xff]  ;;  %448 = vst [vmem:[%s1843_s10 + $0xf0] sm:$0xff] %v447_v34 }
  0x55   : > { %v451_v36 = vld [vmem:[%s1838_s27 + $0x400] sm:$0xff]  ;;  %450 = vst [vmem:[%s1843_s10 + $0xf8] sm:$0xff] %v449_v35 }
  0x56   : > { %452 = vst [vmem:[%s1843_s10 + $0x100] sm:$0xff] %v451_v36  ;;  %v453_v37 = vld [vmem:[%s1838_s27 + $0x420] sm:$0xff] }
  0x57   : > { %v455_v38 = vld [vmem:[%s1838_s27 + $0x440] sm:$0xff]  ;;  %454 = vst [vmem:[%s1843_s10 + $0x108] sm:$0xff] %v453_v37 }
  0x58   : > { %v457_v39 = vld [vmem:[%s1838_s27 + $0x460] sm:$0xff]  ;;  %456 = vst [vmem:[%s1843_s10 + $0x110] sm:$0xff] %v455_v38 }
  0x59   : > { %458 = vst [vmem:[%s1843_s10 + $0x118] sm:$0xff] %v457_v39  ;;  %v459_v40 = vld [vmem:[%s1838_s27 + $0x480] sm:$0xff] }
  0x5a   : > { %v461_v41 = vld [vmem:[%s1838_s27 + $0x4a0] sm:$0xff]  ;;  %460 = vst [vmem:[%s1843_s10 + $0x120] sm:$0xff] %v459_v40 }
  0x5b   : > { %v463_v42 = vld [vmem:[%s1838_s27 + $0x4c0] sm:$0xff]  ;;  %462 = vst [vmem:[%s1843_s10 + $0x128] sm:$0xff] %v461_v41 }
  0x5c   : > { %464 = vst [vmem:[%s1843_s10 + $0x130] sm:$0xff] %v463_v42  ;;  %v465_v43 = vld [vmem:[%s1838_s27 + $0x4e0] sm:$0xff] }
  0x5d   : > { %v467_v44 = vld [vmem:[%s1838_s27 + $0x500] sm:$0xff]  ;;  %466 = vst [vmem:[%s1843_s10 + $0x138] sm:$0xff] %v465_v43 }
  0x5e   : > { %v469_v45 = vld [vmem:[%s1838_s27 + $0x520] sm:$0xff]  ;;  %468 = vst [vmem:[%s1843_s10 + $0x140] sm:$0xff] %v467_v44 }
  0x5f   : > { %470 = vst [vmem:[%s1843_s10 + $0x148] sm:$0xff] %v469_v45  ;;  %v471_v46 = vld [vmem:[%s1838_s27 + $0x540] sm:$0xff] }
  0x60   : > { %v473_v47 = vld [vmem:[%s1838_s27 + $0x560] sm:$0xff]  ;;  %472 = vst [vmem:[%s1843_s10 + $0x150] sm:$0xff] %v471_v46 }
  0x61   : > { %v475_v48 = vld [vmem:[%s1838_s27 + $0x580] sm:$0xff]  ;;  %474 = vst [vmem:[%s1843_s10 + $0x158] sm:$0xff] %v473_v47 }
  0x62   : > { %476 = vst [vmem:[%s1843_s10 + $0x160] sm:$0xff] %v475_v48  ;;  %v477_v49 = vld [vmem:[%s1838_s27 + $0x5a0] sm:$0xff] }
  0x63   : > { %v479_v50 = vld [vmem:[%s1838_s27 + $0x5c0] sm:$0xff]  ;;  %478 = vst [vmem:[%s1843_s10 + $0x168] sm:$0xff] %v477_v49 }
  0x64   : > { %v481_v51 = vld [vmem:[%s1838_s27 + $0x5e0] sm:$0xff]  ;;  %480 = vst [vmem:[%s1843_s10 + $0x170] sm:$0xff] %v479_v50 }
  0x65   : > { %482 = vst [vmem:[%s1843_s10 + $0x178] sm:$0xff] %v481_v51  ;;  %v483_v52 = vld [vmem:[%s1838_s27 + $0x600] sm:$0xff] }
  0x66   : > { %v485_v53 = vld [vmem:[%s1838_s27 + $0x620] sm:$0xff]  ;;  %484 = vst [vmem:[%s1843_s10 + $0x180] sm:$0xff] %v483_v52 }
  0x67   : > { %v487_v54 = vld [vmem:[%s1838_s27 + $0x640] sm:$0xff]  ;;  %486 = vst [vmem:[%s1843_s10 + $0x188] sm:$0xff] %v485_v53 }
  0x68   : > { %488 = vst [vmem:[%s1843_s10 + $0x190] sm:$0xff] %v487_v54  ;;  %v489_v55 = vld [vmem:[%s1838_s27 + $0x660] sm:$0xff] }
  0x69   : > { %v491_v56 = vld [vmem:[%s1838_s27 + $0x680] sm:$0xff]  ;;  %490 = vst [vmem:[%s1843_s10 + $0x198] sm:$0xff] %v489_v55 }
  0x6a   : > { %v493_v57 = vld [vmem:[%s1838_s27 + $0x6a0] sm:$0xff]  ;;  %492 = vst [vmem:[%s1843_s10 + $0x1a0] sm:$0xff] %v491_v56 }
  0x6b   : > { %494 = vst [vmem:[%s1843_s10 + $0x1a8] sm:$0xff] %v493_v57  ;;  %v495_v58 = vld [vmem:[%s1838_s27 + $0x6c0] sm:$0xff] }
  0x6c   : > { %v497_v59 = vld [vmem:[%s1838_s27 + $0x6e0] sm:$0xff]  ;;  %496 = vst [vmem:[%s1843_s10 + $0x1b0] sm:$0xff] %v495_v58 }
  0x6d   : > { %v499_v60 = vld [vmem:[%s1838_s27 + $0x700] sm:$0xff]  ;;  %498 = vst [vmem:[%s1843_s10 + $0x1b8] sm:$0xff] %v497_v59 }
  0x6e   : > { %500 = vst [vmem:[%s1843_s10 + $0x1c0] sm:$0xff] %v499_v60  ;;  %v501_v61 = vld [vmem:[%s1838_s27 + $0x720] sm:$0xff] }
  0x6f   : > { %v503_v62 = vld [vmem:[%s1838_s27 + $0x740] sm:$0xff]  ;;  %502 = vst [vmem:[%s1843_s10 + $0x1c8] sm:$0xff] %v501_v61 }
  0x70   : > { %v505_v63 = vld [vmem:[%s1838_s27 + $0x760] sm:$0xff]  ;;  %504 = vst [vmem:[%s1843_s10 + $0x1d0] sm:$0xff] %v503_v62 }
  0x71   : > { %506 = vst [vmem:[%s1843_s10 + $0x1d8] sm:$0xff] %v505_v63  ;;  %v507_v0 = vld [vmem:[%s1838_s27 + $0x780] sm:$0xff] }
  0x72   : > { %v509_v1 = vld [vmem:[%s1838_s27 + $0x7a0] sm:$0xff]  ;;  %508 = vst [vmem:[%s1843_s10 + $0x1e0] sm:$0xff] %v507_v0 }
  0x73   : > { %v511_v2 = vld [vmem:[%s1838_s27 + $0x7c0] sm:$0xff]  ;;  %510 = vst [vmem:[%s1843_s10 + $0x1e8] sm:$0xff] %v509_v1 }
  0x74   : > { %512 = vst [vmem:[%s1843_s10 + $0x1f0] sm:$0xff] %v511_v2  ;;  %v513_v3 = vld [vmem:[%s1838_s27 + $0x7e0] sm:$0xff] }
  0x75   : > { %514 = vst [vmem:[%s1843_s10 + $0x1f8] sm:$0xff] %v513_v3 }
  0x76 PF: > { %p1335_p0 = scmp.ge.s32.totalorder %s1696_s25, 1  ;;  %p535_p1 = scmp.lt.s32.totalorder %s1696_s25, 65 }
  0x78   : > { %p536_p2 = pnand %p1335_p0, %p535_p1 }
  0x79   : > { %s542_s0 = sand.u32 (!%p536_p2), 1, %s1672_s19   ;;  %s549_s28 = sand.u32 (!%p536_p2), 1, %s1664_s17  }
  0x7a   : > { %539 = sbr.rel (%p536_p2) target bundleno = 432 (0x1b0), region = 89  ;;  %s1336_s11 = sshll.u32 (!%p536_p2), %s542_s0, 5 }
  0x7b   : > { %s1337_s26 = sshll.u32 (!%p536_p2), %s549_s28, 9  ;;  %s582_s5 = sand.u32 (!%p536_p2), 1, %s1656_s15  }
  0x7c   : > { %s1339_s29 = sshll.u32 (!%p536_p2), %s1684_s22, 1  ;;  %s1338_s27 = sshll.u32 (!%p536_p2), %s582_s5, 5 }
  0x7d   : > { %p590_p3 = scmp.lt.s32.totalorder (!%p536_p2), %s1339_s29, 7  ;;  %s1986_s19 = scalar_lea.vmem (!%p536_p2), [#allocation2], %s1336_s11 }
  0x7e   : > { %s1988_s17 = scalar_lea.vmem (!%p536_p2), [#allocation3], %s1337_s26  ;;  %s1990_s15 = scalar_lea.vmem (!%p536_p2), [#allocation4], %s1338_s27 }
  0x7f   : > { %s2170_s29 = smov (!%p590_p3, %s1339_s29), 7  ;;  %p1341_p4 = scmp.ne.s32.totalorder %s1680_s21, 0 }
  0x80   : > { %s592_s9 = scalar_lea.vmem %s2137_s2, %s2170_s29  ;;  %s597_s1 = scalar_lea.vmem %s2138_s3, %s2170_s29 }
  0x81   : > { %604 = sbr.rel (%p1341_p4) target bundleno = 137 (0x89), region = 101 }
  0x86   : > { %v1698_v4 = vmov 0.0  }
  0x87   : > { %605 = vst [vmem:[%s1990_s15] sm:$0xff] %v1698_v4  ;;  %606 = vst [vmem:[%s1990_s15 + $0x8] sm:$0xff] %v1698_v4 }
  0x88   : > { %607 = vst [vmem:[%s1990_s15 + $0x10] sm:$0xff] %v1698_v4  ;;  %608 = vst [vmem:[%s1990_s15 + $0x18] sm:$0xff] %v1698_v4 }
  0x89 PF: > { %v1508_v5 = vld [vmem:[%s1988_s17 + $0x74] ss:$8 sps:$4 sm:$0xff]   ;;  %v1512_v7 = vld [vmem:[%s1988_s17 + $0x70] ss:$8 sps:$4 sm:$0xff]   ;;  %v1514_v9 = vld [vmem:[%s1988_s17 + $0x64] ss:$8 sps:$4 sm:$0xff]  }
  0x8a   : > { %v1510_v6 = vld [vmem:[%s1988_s17 + $0x174] ss:$8 sps:$4 sm:$0xff]   ;;  %1021 = vmatprep.subr.bf16.mxu0 %v1508_v5  ;;  %v1513_v8 = vld [vmem:[%s1988_s17 + $0x170] ss:$8 sps:$4 sm:$0xff]   ;;  %v1516_v10 = vld [vmem:[%s1988_s17 + $0x164] ss:$8 sps:$4 sm:$0xff]  }
  0x8b   : > { %1064 = vmatprep.subr.bf16.mxu1 %v1510_v6  ;;  %1022 = vmatpush1.bf16.msra.mxu0 %v1512_v7  ;;  %v1518_v11 = vld [vmem:[%s1988_s17 + $0x60] ss:$8 sps:$4 sm:$0xff]   ;;  %v1520_v13 = vld [vmem:[%s1988_s17 + $0x54] ss:$8 sps:$4 sm:$0xff]   ;;  %v1524_v15 = vld [vmem:[%s1988_s17 + $0x50] ss:$8 sps:$4 sm:$0xff]  }
  0x8c   : > { %1065 = vmatpush1.bf16.msra.mxu1 %v1513_v8  ;;  %1023 = vmatprep.subr.bf16.mxu0 %v1514_v9  ;;  %v1519_v12 = vld [vmem:[%s1988_s17 + $0x160] ss:$8 sps:$4 sm:$0xff]   ;;  %v1522_v14 = vld [vmem:[%s1988_s17 + $0x154] ss:$8 sps:$4 sm:$0xff]   ;;  %v1525_v16 = vld [vmem:[%s1988_s17 + $0x150] ss:$8 sps:$4 sm:$0xff]  }
  0x8d   : > { %1066 = vmatprep.subr.bf16.mxu1 %v1516_v10  ;;  %v1526_v17 = vld [vmem:[%s1988_s17 + $0x44] ss:$8 sps:$4 sm:$0xff]   ;;  %v1530_v19 = vld [vmem:[%s1988_s17 + $0x40] ss:$8 sps:$4 sm:$0xff]   ;;  %v1532_v21 = vld [vmem:[%s1988_s17 + $0x34] ss:$8 sps:$4 sm:$0xff]  }
  0x8e   : > { %v1528_v18 = vld [vmem:[%s1988_s17 + $0x144] ss:$8 sps:$4 sm:$0xff]   ;;  %v1531_v20 = vld [vmem:[%s1988_s17 + $0x140] ss:$8 sps:$4 sm:$0xff]   ;;  %v1534_v22 = vld [vmem:[%s1988_s17 + $0x134] ss:$8 sps:$4 sm:$0xff]  }
  0x8f   : > { %1024 = vmatpush1.bf16.msra.mxu0 %v1518_v11  ;;  %v1536_v23 = vld [vmem:[%s1988_s17 + $0x30] ss:$8 sps:$4 sm:$0xff]   ;;  %v1538_v25 = vld [vmem:[%s1988_s17 + $0x24] ss:$8 sps:$4 sm:$0xff]   ;;  %v1542_v27 = vld [vmem:[%s1988_s17 + $0x20] ss:$8 sps:$4 sm:$0xff]  }
  0x90   : > { %1067 = vmatpush1.bf16.msra.mxu1 %v1519_v12  ;;  %1025 = vmatprep.subr.bf16.mxu0 %v1520_v13  ;;  %v1537_v24 = vld [vmem:[%s1988_s17 + $0x130] ss:$8 sps:$4 sm:$0xff]   ;;  %v1540_v26 = vld [vmem:[%s1988_s17 + $0x124] ss:$8 sps:$4 sm:$0xff]   ;;  %v1543_v28 = vld [vmem:[%s1988_s17 + $0x120] ss:$8 sps:$4 sm:$0xff]  }
  0x91   : > { %1068 = vmatprep.subr.bf16.mxu1 %v1522_v14  ;;  %v1544_v29 = vld [vmem:[%s1988_s17 + $0x14] ss:$8 sps:$4 sm:$0xff]   ;;  %v1548_v31 = vld [vmem:[%s1988_s17 + $0x10] ss:$8 sps:$4 sm:$0xff]   ;;  %v1550_v33 = vld [vmem:[%s1988_s17 + $0x4] ss:$8 sps:$4 sm:$0xff]  }
  0x92   : > { %v1546_v30 = vld [vmem:[%s1988_s17 + $0x114] ss:$8 sps:$4 sm:$0xff]   ;;  %v1549_v32 = vld [vmem:[%s1988_s17 + $0x110] ss:$8 sps:$4 sm:$0xff]   ;;  %v1552_v34 = vld [vmem:[%s1988_s17 + $0x104] ss:$8 sps:$4 sm:$0xff]  }
  0x93   : > { %1026 = vmatpush1.bf16.msra.mxu0 %v1524_v15  ;;  %v1554_v35 = vld [vmem:[%s1988_s17] ss:$8 sps:$4 sm:$0xff]   ;;  %v1556_v37 = vld [vmem:[%s1988_s17 + $0xf4] ss:$8 sps:$4 sm:$0xff]   ;;  %v1560_v39 = vld [vmem:[%s1988_s17 + $0xf0] ss:$8 sps:$4 sm:$0xff]  }
  0x94   : > { %1069 = vmatpush1.bf16.msra.mxu1 %v1525_v16  ;;  %1027 = vmatprep.subr.bf16.mxu0 %v1526_v17  ;;  %v1555_v36 = vld [vmem:[%s1988_s17 + $0x100] ss:$8 sps:$4 sm:$0xff]   ;;  %v1558_v38 = vld [vmem:[%s1988_s17 + $0x1f4] ss:$8 sps:$4 sm:$0xff]   ;;  %v1561_v40 = vld [vmem:[%s1988_s17 + $0x1f0] ss:$8 sps:$4 sm:$0xff]  }
  0x95   : > { %1070 = vmatprep.subr.bf16.mxu1 %v1528_v18  ;;  %v1562_v41 = vld [vmem:[%s1988_s17 + $0xe4] ss:$8 sps:$4 sm:$0xff]   ;;  %v1566_v43 = vld [vmem:[%s1988_s17 + $0xe0] ss:$8 sps:$4 sm:$0xff]   ;;  %v1568_v45 = vld [vmem:[%s1988_s17 + $0xd4] ss:$8 sps:$4 sm:$0xff]  }
  0x96   : > { %v1564_v42 = vld [vmem:[%s1988_s17 + $0x1e4] ss:$8 sps:$4 sm:$0xff]   ;;  %v1567_v44 = vld [vmem:[%s1988_s17 + $0x1e0] ss:$8 sps:$4 sm:$0xff]   ;;  %v1570_v46 = vld [vmem:[%s1988_s17 + $0x1d4] ss:$8 sps:$4 sm:$0xff]  }
  0x97   : > { %1028 = vmatpush1.bf16.msra.mxu0 %v1530_v19  ;;  %v1572_v47 = vld [vmem:[%s1988_s17 + $0xd0] ss:$8 sps:$4 sm:$0xff]   ;;  %v1574_v49 = vld [vmem:[%s1988_s17 + $0xc4] ss:$8 sps:$4 sm:$0xff]   ;;  %v1578_v51 = vld [vmem:[%s1988_s17 + $0xc0] ss:$8 sps:$4 sm:$0xff]  }
  0x98   : > { %1071 = vmatpush1.bf16.msra.mxu1 %v1531_v20  ;;  %1029 = vmatprep.subr.bf16.mxu0 %v1532_v21  ;;  %v1573_v48 = vld [vmem:[%s1988_s17 + $0x1d0] ss:$8 sps:$4 sm:$0xff]   ;;  %v1576_v50 = vld [vmem:[%s1988_s17 + $0x1c4] ss:$8 sps:$4 sm:$0xff]   ;;  %v1579_v53 = vld [vmem:[%s1988_s17 + $0x1c0] ss:$8 sps:$4 sm:$0xff]  }
  0x99   : > { %1072 = vmatprep.subr.bf16.mxu1 %v1534_v22  ;;  %v1606_v52 = vld [vmem:[%s1986_s19 + $0x4] ss:$16 sps:$4 sm:$0xff]   ;;  %v1609_v56 = vld [vmem:[%s1986_s19 + $0xc] ss:$16 sps:$4 sm:$0xff]   ;;  %v1584_v57 = vld [vmem:[%s1988_s17 + $0xb0] ss:$8 sps:$4 sm:$0xff]  }
  0x9a   : > { %v1580_v54 = vld [vmem:[%s1988_s17 + $0xb4] ss:$8 sps:$4 sm:$0xff]   ;;  %1053 = vmatprep.mubr.bf16.mxu0 %v1606_v52  ;;  %1096 = vmatprep.mubr.bf16.mxu1 %v1609_v56  ;;  %v1585_v58 = vld [vmem:[%s1988_s17 + $0x1b0] ss:$8 sps:$4 sm:$0xff]   ;;  %v1586_v59 = vld [vmem:[%s1988_s17 + $0xa4] ss:$8 sps:$4 sm:$0xff]  }
  0x9b   : > { %1030 = vmatpush1.bf16.msra.mxu0 %v1536_v23  ;;  %v1582_v55 = vld [vmem:[%s1988_s17 + $0x1b4] ss:$8 sps:$4 sm:$0xff]   ;;  %v1588_v60 = vld [vmem:[%s1988_s17 + $0x1a4] ss:$8 sps:$4 sm:$0xff]   ;;  %v1590_v61 = vld [vmem:[%s1988_s17 + $0xa0] ss:$8 sps:$4 sm:$0xff]  }
  0x9c   : > { %1073 = vmatpush1.bf16.msra.mxu1 %v1537_v24  ;;  %1031 = vmatprep.subr.bf16.mxu0 %v1538_v25  ;;  %v1591_v62 = vld [vmem:[%s1988_s17 + $0x1a0] ss:$8 sps:$4 sm:$0xff]   ;;  %v1592_v63 = vld [vmem:[%s1988_s17 + $0x94] ss:$8 sps:$4 sm:$0xff]   ;;  %v1596_v1 = vld [vmem:[%s1988_s17 + $0x90] ss:$8 sps:$4 sm:$0xff]  }
  0x9d   : > { %1074 = vmatprep.subr.bf16.mxu1 %v1540_v26  ;;  %v1594_v0 = vld [vmem:[%s1988_s17 + $0x194] ss:$8 sps:$4 sm:$0xff]   ;;  %v1597_v2 = vld [vmem:[%s1988_s17 + $0x190] ss:$8 sps:$4 sm:$0xff]   ;;  %v1598_v3 = vld [vmem:[%s1988_s17 + $0x84] ss:$8 sps:$4 sm:$0xff]  }
  0x9e   : > { %v1600_v4 = vld [vmem:[%s1988_s17 + $0x184] ss:$8 sps:$4 sm:$0xff]   ;;  %v1602_v5 = vld [vmem:[%s1988_s17 + $0x80] ss:$8 sps:$4 sm:$0xff]   ;;  %v611_v19 = vld [vmem:[%s1990_s15 + $0x10] sm:$0xff]  ;;  %p1410_p5 = scmp.ne.s32.totalorder %s1680_s21, 15 }
  0x9f   : > { %1032 = vmatpush1.bf16.msra.mxu0 %v1542_v27  ;;  %v1603_v6 = vld [vmem:[%s1988_s17 + $0x180] ss:$8 sps:$4 sm:$0xff]   ;;  %v612_v24 = vld [vmem:[%s1990_s15 + $0x18] sm:$0xff] }
  0xa0   : > { %1075 = vmatpush1.bf16.msra.mxu1 %v1543_v28  ;;  %1033 = vmatprep.subr.bf16.mxu0 %v1544_v29  ;;  %v1604_v7 = vld [vmem:[%s1986_s19] ss:$16 sps:$4 sm:$0xff]   ;;  %v1607_v8 = vld [vmem:[%s1986_s19 + $0x8] ss:$16 sps:$4 sm:$0xff]  }
  0xa1   : > { %1076 = vmatprep.subr.bf16.mxu1 %v1546_v30  ;;  %v609_v10 = vld [vmem:[%s1990_s15] sm:$0xff]  ;;  %v610_v14 = vld [vmem:[%s1990_s15 + $0x8] sm:$0xff] }
  0xa3   : > { %1034 = vmatpush1.bf16.msra.mxu0 %v1548_v31 }
  0xa4   : > { %1077 = vmatpush1.bf16.msra.mxu1 %v1549_v32  ;;  %1035 = vmatprep.subr.bf16.mxu0 %v1550_v33 }
  0xa5   : > { %1078 = vmatprep.subr.bf16.mxu1 %v1552_v34 }
  0xa7   : > { %1036 = vmatpush1.bf16.msra.mxu0 %v1554_v35 }
  0xa8   : > { %1079 = vmatpush1.bf16.msra.mxu1 %v1555_v36  ;;  %1037 = vmatprep.subr.bf16.mxu0 %v1556_v37 }
  0xa9   : > { %1080 = vmatprep.subr.bf16.mxu1 %v1558_v38 }
  0xab   : > { %1038 = vmatpush2.bf16.msra.mxu0 %v1560_v39 }
  0xac   : > { %1081 = vmatpush2.bf16.msra.mxu1 %v1561_v40  ;;  %1039 = vmatprep.subr.bf16.mxu0 %v1562_v41 }
  0xad   : > { %1082 = vmatprep.subr.bf16.mxu1 %v1564_v42 }
  0xaf   : > { %1040 = vmatpush2.bf16.msra.mxu0 %v1566_v43 }
  0xb0   : > { %1083 = vmatpush2.bf16.msra.mxu1 %v1567_v44  ;;  %1041 = vmatprep.subr.bf16.mxu0 %v1568_v45 }
  0xb1   : > { %1084 = vmatprep.subr.bf16.mxu1 %v1570_v46 }
  0xb3   : > { %1042 = vmatpush2.bf16.msra.mxu0 %v1572_v47 }
  0xb4   : > { %1085 = vmatpush2.bf16.msra.mxu1 %v1573_v48  ;;  %1043 = vmatprep.subr.bf16.mxu0 %v1574_v49 }
  0xb5   : > { %1086 = vmatprep.subr.bf16.mxu1 %v1576_v50 }
  0xb7   : > { %1044 = vmatpush2.bf16.msra.mxu0 %v1578_v51 }
  0xb8   : > { %1087 = vmatpush2.bf16.msra.mxu1 %v1579_v53  ;;  %1045 = vmatprep.subr.bf16.mxu0 %v1580_v54 }
  0xb9   : > { %1088 = vmatprep.subr.bf16.mxu1 %v1582_v55 }
  0xbb   : > { %1046 = vmatpush2.bf16.msra.mxu0 %v1584_v57 }
  0xbc   : > { %1089 = vmatpush2.bf16.msra.mxu1 %v1585_v58  ;;  %1047 = vmatprep.subr.bf16.mxu0 %v1586_v59 }
  0xbd   : > { %1090 = vmatprep.subr.bf16.mxu1 %v1588_v60 }
  0xbf   : > { %1048 = vmatpush2.bf16.msra.mxu0 %v1590_v61 }
  0xc0   : > { %1091 = vmatpush2.bf16.msra.mxu1 %v1591_v62  ;;  %1049 = vmatprep.subr.bf16.mxu0 %v1592_v63 }
  0xc1   : > { %1092 = vmatprep.subr.bf16.mxu1 %v1594_v0 }
  0xc3   : > { %1050 = vmatpush2.bf16.msra.mxu0 %v1596_v1 }
  0xc4   : > { %1093 = vmatpush2.bf16.msra.mxu1 %v1597_v2  ;;  %1051 = vmatprep.subr.bf16.mxu0 %v1598_v3 }
  0xc5   : > { %1094 = vmatprep.subr.bf16.mxu1 %v1600_v4 }
  0xc7   : > { %1052 = vmatpush2.bf16.msra.mxu0 %v1602_v5 }
  0xc8   : > { %1095 = vmatpush2.bf16.msra.mxu1 %v1603_v6 }
  0xca   : > { %1054 = vmatmul.mubr.bf16.vlgmr.msra.gmra.mxu0 %v1604_v7 }
  0xcb   : > { %1097 = vmatmul.mubr.bf16.vlgmr.msra.gmra.mxu1 %v1607_v8 }
 0x18a   : > { %v1055_v9 = vpop.f32.mrf.mxu0 }
 0x18b   : > { %v1098_v11 = vpop.f32.mrf.mxu1 }
 0x18c   : > { %v1099_v12 = vadd.f32 %v1098_v11, %v1055_v9  ;;  %v1057_v13 = vpop.f32.mrf.mxu0 }
 0x18d   : > { %v1100_v15 = vpop.f32.mrf.mxu1 }
 0x18e   : > { %v1107_v16 = vadd.f32 %v1099_v12, %v609_v10  ;;  %v1101_v17 = vadd.f32 %v1100_v15, %v1057_v13  ;;  %v1059_v18 = vpop.f32.mrf.mxu0 }
 0x18f   : > { %v1102_v20 = vpop.f32.mrf.mxu1 }
 0x190   : > { %1111 = vst [vmem:[%s1990_s15] sm:$0xff] %v1107_v16  ;;  %v1108_v21 = vadd.f32 %v1101_v17, %v610_v14  ;;  %v1103_v22 = vadd.f32 %v1102_v20, %v1059_v18  ;;  %v1061_v23 = vpop.f32.mrf.mxu0 }
 0x191   : > { %v1104_v25 = vpop.f32.mrf.mxu1 }
 0x192   : > { %1112 = vst [vmem:[%s1990_s15 + $0x8] sm:$0xff] %v1108_v21  ;;  %v1109_v26 = vadd.f32 %v1103_v22, %v611_v19  ;;  %v1105_v27 = vadd.f32 %v1104_v25, %v1061_v23  ;;  %1118 = sbr.rel (%p1410_p5) target bundleno = 424 (0x1a8), region = 105 }
 0x194   : > { %1113 = vst [vmem:[%s1990_s15 + $0x10] sm:$0xff] %v1109_v26  ;;  %v1110_v28 = vadd.f32 %v1105_v27, %v612_v24 }
 0x196   : > { %1114 = vst [vmem:[%s1990_s15 + $0x18] sm:$0xff] %v1110_v28 }
 0x197   : > { %v1125_v29 = vlaneseq  ;;  %v1123_v31 = vld [vmem:[%s592_s9] sm:$0x3] }
 0x198   : > { %v1139_v32 = vld [vmem:[%s597_s1] sm:$0x3] }
 0x199   : > { %v1126_v30 = vshrl.u32 %v1125_v29, 7  ;;  %v1119_v33 = vld [vmem:[%s1990_s15] sm:$0xff]  ;;  %v1120_v36 = vld [vmem:[%s1990_s15 + $0x8] sm:$0xff] }
 0x19b   : > { %v1127_v34 = vsub.s32 0, %v1126_v30  ;;  %v1131_v35 = vsub.s32 1, %v1126_v30  ;;  %v1121_v37 = vld [vmem:[%s1990_s15 + $0x10] sm:$0xff] }
 0x19d   : > { %v1122_v38 = vld [vmem:[%s1990_s15 + $0x18] sm:$0xff]  ;;  %v1128_v39 = vrot.slane %v1123_v31, %v1127_v34  ;;  %v1144_v40 = vrot.slane %v1139_v32, %v1127_v34  ;;  %v1132_v41 = vrot.slane %v1123_v31, %v1131_v35  ;;  %v1148_v42 = vrot.slane %v1139_v32, %v1131_v35 }
 0x19f   : > { %v1135_v43 = vmul.f32 %v1128_v39, %v1119_v33  ;;  %v1136_v44 = vmul.f32 %v1132_v41, %v1120_v36  ;;  %v1137_v45 = vmul.f32 %v1128_v39, %v1121_v37  ;;  %v1138_v46 = vmul.f32 %v1132_v41, %v1122_v38 }
 0x1a1   : > { %v1151_v47 = vadd.f32 %v1144_v40, %v1135_v43  ;;  %v1152_v48 = vadd.f32 %v1148_v42, %v1136_v44  ;;  %v1153_v49 = vadd.f32 %v1144_v40, %v1137_v45  ;;  %v1154_v50 = vadd.f32 %v1148_v42, %v1138_v46 }
 0x1a3   : > { %vm1155_vm0 = vcmp.ge.f32.partialorder %v1151_v47, 0.0  ;;  %v1159_v51 = vmul.f32 0.2, %v1151_v47  ;;  %vm1156_vm1 = vcmp.ge.f32.partialorder %v1152_v48, 0.0  ;;  %v1160_v52 = vmul.f32 0.2, %v1152_v48 }
 0x1a4   : > { %vm1157_vm2 = vcmp.ge.f32.partialorder %v1153_v49, 0.0  ;;  %v1161_v53 = vmul.f32 0.2, %v1153_v49  ;;  %vm1158_vm3 = vcmp.ge.f32.partialorder %v1154_v50, 0.0  ;;  %v1162_v54 = vmul.f32 0.2, %v1154_v50 }
 0x1a5   : > { %v1163_v55 = vsel %vm1155_vm0, %v1151_v47, %v1159_v51  ;;  %v1164_v56 = vsel %vm1156_vm1, %v1152_v48, %v1160_v52 }
 0x1a6   : > { %1167 = vst [vmem:[%s1990_s15] sm:$0xff] %v1163_v55  ;;  %1168 = vst [vmem:[%s1990_s15 + $0x8] sm:$0xff] %v1164_v56  ;;  %v1165_v57 = vsel %vm1157_vm2, %v1153_v49, %v1161_v53  ;;  %v1166_v58 = vsel %vm1158_vm3, %v1154_v50, %v1162_v54 }
 0x1a7   : > { %1169 = vst [vmem:[%s1990_s15 + $0x10] sm:$0xff] %v1165_v57  ;;  %1170 = vst [vmem:[%s1990_s15 + $0x18] sm:$0xff] %v1166_v58 }
 0x1a8 PF: > { %1177 = sbr.rel (!%p1818_p12) target bundleno = 432 (0x1b0), region = 109  ;;  %s1418_s1 = sshll.u32 (%p1818_p12), %s1684_s22, 4 }
 0x1a9   : > { %s1183_s29 = scalar_lea.vmem (%p1818_p12), %s2139_s4, %s1418_s1 }
 0x1ad   : > { %v1196_v59 = vld [vmem:[%s1990_s15] sm:$0xff]  ;;  %v1198_v60 = vld [vmem:[%s1990_s15 + $0x8] sm:$0xff] }
 0x1ae   : > { %v1200_v61 = vld [vmem:[%s1990_s15 + $0x10] sm:$0xff]  ;;  %v1202_v62 = vld [vmem:[%s1990_s15 + $0x18] sm:$0xff]  ;;  %1197 = vst [vmem:[%s1183_s29] sm:$0xff] %v1196_v59  ;;  %1199 = vst [vmem:[%s1183_s29 + $0x8] sm:$0xff] %v1198_v60 }
 0x1af   : > { %1201 = vst [vmem:[%s1183_s29 + $0x40] sm:$0xff] %v1200_v61  ;;  %1203 = vst [vmem:[%s1183_s29 + $0x48] sm:$0xff] %v1202_v62 }
 0x1b0 PF: > { %s14_s25 = sadd.s32 1, %s1696_s25   ;;  %s2151_s14 = sld [smem:[#allocation5_spill]] }
 0x1b1   : > { %p11_p6 = scmp.ge.s32.totalorder %s14_s25, 66   ;;  %s2152_s27 = sld [smem:[#allocation6_spill]] }
 0x1b2   : > { %s2153_s15 = smov %s1660_s16  ;;  %s2154_s16 = smov %s1816_s13 }
 0x1b3   : > { %s2155_s17 = smov %s1668_s18  ;;  %s2156_s18 = smov %s1813_s12 }
 0x1b4   : > { %s2157_s19 = smov %s1676_s20  ;;  %s2158_s20 = smov %s1799_s7 }
 0x1b5   : > { %s2159_s21 = smov %s1688_s23  ;;  %s2160_s22 = smov %s1692_s24 }
 0x1b6   : > { %s2161_s23 = smov %s2151_s14  ;;  %13 = sbr.rel (!%p11_p6) target bundleno = 9 (0x9), region = 177 }
 0x1b7   : > { %s2162_s24 = smov %s2152_s27 }

// kernel: discriminator_forward.11
= control target key start
LH: loop header
LB: loop body
LE: loop exit
PB: predicated region body
PF: predicated region fallthrough
CT: control target
= control target key end

     0   :  { %s4753_s1 = inlined_call_operand.vmem [shape: bf16[1024,512], index: 1, kind: input, shape index: {}]   ;;  %s4754_s0 = inlined_call_operand.vmem [shape: bf16[16,1024], index: 0, kind: input, shape index: {}]   ;;  %s4755_s3 = inlined_call_operand.vmem [shape: bf16[512,256], index: 3, kind: input, shape index: {}]   ;;  %s4756_s2 = inlined_call_operand.vmem [shape: f32[1,512], index: 2, kind: input, shape index: {}]   ;;  %s4757_s5 = inlined_call_operand.vmem [shape: bf16[256,128], index: 5, kind: input, shape index: {}]   ;;  %s4758_s4 = inlined_call_operand.vmem [shape: f32[1,256], index: 4, kind: input, shape index: {}]   ;;  %s4759_s6 = inlined_call_operand.vmem [shape: f32[1,128], index: 6, kind: input, shape index: {}]   ;;  %s4760_s7 = inlined_call_operand.vmem [shape: f32[16,128], index: 7, kind: output, shape index: {}]  }
   0x1   :  { %v3080_v0 = vld [vmem:[%s4753_s1 + $0xe4] ss:$16 sps:$4 sm:$0xff]   ;;  %v3084_v2 = vld [vmem:[%s4753_s1 + $0xe0] ss:$16 sps:$4 sm:$0xff]   ;;  %v28_v50 = vld [vmem:[%s4754_s0 + $0x8] sm:$0xff] }
   0x2   :  { %v3082_v1 = vld [vmem:[%s4753_s1 + $0x2e4] ss:$16 sps:$4 sm:$0xff]   ;;  %1633 = vmatprep.subr.bf16.mxu0 %v3080_v0  ;;  %v3085_v3 = vld [vmem:[%s4753_s1 + $0x2e0] ss:$16 sps:$4 sm:$0xff]   ;;  %v32_v51 = vld [vmem:[%s4754_s0 + $0x28] sm:$0xff] }
   0x3   :  { %1676 = vmatprep.subr.bf16.mxu1 %v3082_v1  ;;  %v3086_v4 = vld [vmem:[%s4753_s1 + $0xc4] ss:$16 sps:$4 sm:$0xff]   ;;  %1634 = vmatpush1.bf16.msra.mxu0 %v3084_v2  ;;  %v3090_v6 = vld [vmem:[%s4753_s1 + $0xc0] ss:$16 sps:$4 sm:$0xff]   ;;  %v3788_v55 = vcombine.high %v28_v50, %v32_v51 }
   0x4   :  { %1677 = vmatpush1.bf16.msra.mxu1 %v3085_v3  ;;  %v3088_v5 = vld [vmem:[%s4753_s1 + $0x2c4] ss:$16 sps:$4 sm:$0xff]   ;;  %1635 = vmatprep.subr.bf16.mxu0 %v3086_v4  ;;  %v3091_v7 = vld [vmem:[%s4753_s1 + $0x2c0] ss:$16 sps:$4 sm:$0xff]  }
   0x5   :  { %1678 = vmatprep.subr.bf16.mxu1 %v3088_v5  ;;  %v3092_v8 = vld [vmem:[%s4753_s1 + $0xa4] ss:$16 sps:$4 sm:$0xff]   ;;  %v3096_v10 = vld [vmem:[%s4753_s1 + $0xa0] ss:$16 sps:$4 sm:$0xff]   ;;  %1708 = vmatprep.mubr.bf16.mxu1 %v3788_v55 }
   0x6   :  { %v3094_v9 = vld [vmem:[%s4753_s1 + $0x2a4] ss:$16 sps:$4 sm:$0xff]   ;;  %v3097_v11 = vld [vmem:[%s4753_s1 + $0x2a0] ss:$16 sps:$4 sm:$0xff]  }
   0x7   :  { %1636 = vmatpush1.bf16.msra.mxu0 %v3090_v6  ;;  %v3098_v12 = vld [vmem:[%s4753_s1 + $0x84] ss:$16 sps:$4 sm:$0xff]   ;;  %v3102_v14 = vld [vmem:[%s4753_s1 + $0x80] ss:$16 sps:$4 sm:$0xff]  }
   0x8   :  { %1679 = vmatpush1.bf16.msra.mxu1 %v3091_v7  ;;  %1637 = vmatprep.subr.bf16.mxu0 %v3092_v8  ;;  %v3100_v13 = vld [vmem:[%s4753_s1 + $0x284] ss:$16 sps:$4 sm:$0xff]   ;;  %v3103_v15 = vld [vmem:[%s4753_s1 + $0x280] ss:$16 sps:$4 sm:$0xff]  }
   0x9   :  { %1680 = vmatprep.subr.bf16.mxu1 %v3094_v9  ;;  %v3104_v16 = vld [vmem:[%s4753_s1 + $0x64] ss:$16 sps:$4 sm:$0xff]   ;;  %v3108_v18 = vld [vmem:[%s4753_s1 + $0x60] ss:$16 sps:$4 sm:$0xff]   ;;  %v3842_v9 = vcombine.low %v28_v50, %v32_v51 }
   0xa   :  { %v3106_v17 = vld [vmem:[%s4753_s1 + $0x264] ss:$16 sps:$4 sm:$0xff]   ;;  %v3109_v19 = vld [vmem:[%s4753_s1 + $0x260] ss:$16 sps:$4 sm:$0xff]  }
   0xb   :  { %1638 = vmatpush1.bf16.msra.mxu0 %v3096_v10  ;;  %v3110_v20 = vld [vmem:[%s4753_s1 + $0x44] ss:$16 sps:$4 sm:$0xff]   ;;  %v3114_v22 = vld [vmem:[%s4753_s1 + $0x40] ss:$16 sps:$4 sm:$0xff]  }
   0xc   :  { %1681 = vmatpush1.bf16.msra.mxu1 %v3097_v11  ;;  %1639 = vmatprep.subr.bf16.mxu0 %v3098_v12  ;;  %v3112_v21 = vld [vmem:[%s4753_s1 + $0x244] ss:$16 sps:$4 sm:$0xff]   ;;  %v3115_v23 = vld [vmem:[%s4753_s1 + $0x240] ss:$16 sps:$4 sm:$0xff]  }
   0xd   :  { %1682 = vmatprep.subr.bf16.mxu1 %v3100_v13  ;;  %v3116_v24 = vld [vmem:[%s4753_s1 + $0x24] ss:$16 sps:$4 sm:$0xff]   ;;  %v3120_v26 = vld [vmem:[%s4753_s1 + $0x20] ss:$16 sps:$4 sm:$0xff]  }
   0xe   :  { %v3118_v25 = vld [vmem:[%s4753_s1 + $0x224] ss:$16 sps:$4 sm:$0xff]   ;;  %v3121_v27 = vld [vmem:[%s4753_s1 + $0x220] ss:$16 sps:$4 sm:$0xff]  }
   0xf   :  { %1640 = vmatpush1.bf16.msra.mxu0 %v3102_v14  ;;  %v3122_v28 = vld [vmem:[%s4753_s1 + $0x4] ss:$16 sps:$4 sm:$0xff]   ;;  %v3126_v30 = vld [vmem:[%s4753_s1] ss:$16 sps:$4 sm:$0xff]  }
  0x10   :  { %1683 = vmatpush1.bf16.msra.mxu1 %v3103_v15  ;;  %1641 = vmatprep.subr.bf16.mxu0 %v3104_v16  ;;  %v3124_v29 = vld [vmem:[%s4753_s1 + $0x204] ss:$16 sps:$4 sm:$0xff]   ;;  %v3127_v31 = vld [vmem:[%s4753_s1 + $0x200] ss:$16 sps:$4 sm:$0xff]  }
  0x11   :  { %1684 = vmatprep.subr.bf16.mxu1 %v3106_v17  ;;  %v3128_v32 = vld [vmem:[%s4753_s1 + $0x1e4] ss:$16 sps:$4 sm:$0xff]   ;;  %v3132_v34 = vld [vmem:[%s4753_s1 + $0x1e0] ss:$16 sps:$4 sm:$0xff]  }
  0x12   :  { %v3130_v33 = vld [vmem:[%s4753_s1 + $0x3e4] ss:$16 sps:$4 sm:$0xff]   ;;  %v3133_v35 = vld [vmem:[%s4753_s1 + $0x3e0] ss:$16 sps:$4 sm:$0xff]  }
  0x13   :  { %1642 = vmatpush1.bf16.msra.mxu0 %v3108_v18  ;;  %v3134_v36 = vld [vmem:[%s4753_s1 + $0x1c4] ss:$16 sps:$4 sm:$0xff]   ;;  %v3138_v38 = vld [vmem:[%s4753_s1 + $0x1c0] ss:$16 sps:$4 sm:$0xff]  }
  0x14   :  { %1685 = vmatpush1.bf16.msra.mxu1 %v3109_v19  ;;  %1643 = vmatprep.subr.bf16.mxu0 %v3110_v20  ;;  %v3136_v37 = vld [vmem:[%s4753_s1 + $0x3c4] ss:$16 sps:$4 sm:$0xff]   ;;  %v3139_v39 = vld [vmem:[%s4753_s1 + $0x3c0] ss:$16 sps:$4 sm:$0xff]  }
  0x15   :  { %1686 = vmatprep.subr.bf16.mxu1 %v3112_v21  ;;  %v3140_v40 = vld [vmem:[%s4753_s1 + $0x1a4] ss:$16 sps:$4 sm:$0xff]   ;;  %v3144_v42 = vld [vmem:[%s4753_s1 + $0x1a0] ss:$16 sps:$4 sm:$0xff]  }
  0x16   :  { %v3142_v41 = vld [vmem:[%s4753_s1 + $0x3a4] ss:$16 sps:$4 sm:$0xff]   ;;  %v3145_v43 = vld [vmem:[%s4753_s1 + $0x3a0] ss:$16 sps:$4 sm:$0xff]  }
  0x17   :  { %1644 = vmatpush1.bf16.msra.mxu0 %v3114_v22  ;;  %v3146_v44 = vld [vmem:[%s4753_s1 + $0x184] ss:$16 sps:$4 sm:$0xff]   ;;  %v3150_v46 = vld [vmem:[%s4753_s1 + $0x180] ss:$16 sps:$4 sm:$0xff]  }
  0x18   :  { %1687 = vmatpush1.bf16.msra.mxu1 %v3115_v23  ;;  %1645 = vmatprep.subr.bf16.mxu0 %v3116_v24  ;;  %v3148_v45 = vld [vmem:[%s4753_s1 + $0x384] ss:$16 sps:$4 sm:$0xff]   ;;  %v3151_v47 = vld [vmem:[%s4753_s1 + $0x380] ss:$16 sps:$4 sm:$0xff]  }
  0x19   :  { %1688 = vmatprep.subr.bf16.mxu1 %v3118_v25  ;;  %v27_v48 = vld [vmem:[%s4754_s0] sm:$0xff] }
  0x1a   :  { %v31_v49 = vld [vmem:[%s4754_s0 + $0x20] sm:$0xff] }
  0x1b   :  { %1646 = vmatpush1.bf16.msra.mxu0 %v3120_v26  ;;  %v3152_v52 = vld [vmem:[%s4753_s1 + $0x164] ss:$16 sps:$4 sm:$0xff]   ;;  %v3783_v53 = vcombine.high %v27_v48, %v31_v49  ;;  %v3156_v56 = vld [vmem:[%s4753_s1 + $0x160] ss:$16 sps:$4 sm:$0xff]   ;;  %v3840_v8 = vcombine.low %v27_v48, %v31_v49 }
  0x1c   :  { %1689 = vmatpush1.bf16.msra.mxu1 %v3121_v27  ;;  %1647 = vmatprep.subr.bf16.mxu0 %v3122_v28  ;;  %v3154_v54 = vld [vmem:[%s4753_s1 + $0x364] ss:$16 sps:$4 sm:$0xff]   ;;  %v3157_v57 = vld [vmem:[%s4753_s1 + $0x360] ss:$16 sps:$4 sm:$0xff]  }
  0x1d   :  { %1690 = vmatprep.subr.bf16.mxu1 %v3124_v29  ;;  %1665 = vmatprep.mubr.bf16.mxu0 %v3783_v53  ;;  %v3158_v58 = vld [vmem:[%s4753_s1 + $0x144] ss:$16 sps:$4 sm:$0xff]   ;;  %v3162_v60 = vld [vmem:[%s4753_s1 + $0x140] ss:$16 sps:$4 sm:$0xff]  }
  0x1e   :  { %v3160_v59 = vld [vmem:[%s4753_s1 + $0x344] ss:$16 sps:$4 sm:$0xff]   ;;  %v3163_v61 = vld [vmem:[%s4753_s1 + $0x340] ss:$16 sps:$4 sm:$0xff]  }
  0x1f   :  { %1648 = vmatpush1.bf16.msra.mxu0 %v3126_v30  ;;  %v3164_v62 = vld [vmem:[%s4753_s1 + $0x124] ss:$16 sps:$4 sm:$0xff]   ;;  %v3168_v0 = vld [vmem:[%s4753_s1 + $0x120] ss:$16 sps:$4 sm:$0xff]  }
  0x20   :  { %1691 = vmatpush1.bf16.msra.mxu1 %v3127_v31  ;;  %1649 = vmatprep.subr.bf16.mxu0 %v3128_v32  ;;  %v3166_v63 = vld [vmem:[%s4753_s1 + $0x324] ss:$16 sps:$4 sm:$0xff]   ;;  %v3169_v1 = vld [vmem:[%s4753_s1 + $0x320] ss:$16 sps:$4 sm:$0xff]  }
  0x21   :  { %1692 = vmatprep.subr.bf16.mxu1 %v3130_v33  ;;  %v3170_v2 = vld [vmem:[%s4753_s1 + $0x104] ss:$16 sps:$4 sm:$0xff]   ;;  %v3174_v4 = vld [vmem:[%s4753_s1 + $0x100] ss:$16 sps:$4 sm:$0xff]  }
  0x22   :  { %v3172_v3 = vld [vmem:[%s4753_s1 + $0x304] ss:$16 sps:$4 sm:$0xff]   ;;  %v3175_v5 = vld [vmem:[%s4753_s1 + $0x300] ss:$16 sps:$4 sm:$0xff]  }
  0x23   :  { %1650 = vmatpush2.bf16.msra.mxu0 %v3132_v34  ;;  %v3178_v6 = vld [vmem:[%s4753_s1 + $0x4e4] ss:$16 sps:$4 sm:$0xff]   ;;  %v3176_v10 = vld [vmem:[%s4753_s1 + $0x4e0] ss:$16 sps:$4 sm:$0xff]  }
  0x24   :  { %1693 = vmatpush2.bf16.msra.mxu1 %v3133_v35  ;;  %1651 = vmatprep.subr.bf16.mxu0 %v3134_v36  ;;  %v3181_v7 = vld [vmem:[%s4753_s1 + $0x6e4] ss:$16 sps:$4 sm:$0xff]   ;;  %v3179_v11 = vld [vmem:[%s4753_s1 + $0x6e0] ss:$16 sps:$4 sm:$0xff]  }
  0x25   :  { %1694 = vmatprep.subr.bf16.mxu1 %v3136_v37  ;;  %v3184_v12 = vld [vmem:[%s4753_s1 + $0x4c4] ss:$16 sps:$4 sm:$0xff]   ;;  %v3182_v14 = vld [vmem:[%s4753_s1 + $0x4c0] ss:$16 sps:$4 sm:$0xff]  }
  0x26   :  { %v3187_v13 = vld [vmem:[%s4753_s1 + $0x6c4] ss:$16 sps:$4 sm:$0xff]   ;;  %v3185_v15 = vld [vmem:[%s4753_s1 + $0x6c0] ss:$16 sps:$4 sm:$0xff]  }
  0x27   :  { %1652 = vmatpush2.bf16.msra.mxu0 %v3138_v38  ;;  %v3190_v16 = vld [vmem:[%s4753_s1 + $0x4a4] ss:$16 sps:$4 sm:$0xff]   ;;  %v3188_v18 = vld [vmem:[%s4753_s1 + $0x4a0] ss:$16 sps:$4 sm:$0xff]   ;;  %v3937_v38 = vld [vmem:[%s4754_s0 + $0x18] sm:$0xff] }
  0x28   :  { %1695 = vmatpush2.bf16.msra.mxu1 %v3139_v39  ;;  %1653 = vmatprep.subr.bf16.mxu0 %v3140_v40  ;;  %v3193_v17 = vld [vmem:[%s4753_s1 + $0x6a4] ss:$16 sps:$4 sm:$0xff]   ;;  %v3191_v19 = vld [vmem:[%s4753_s1 + $0x6a0] ss:$16 sps:$4 sm:$0xff]   ;;  %v3942_v39 = vld [vmem:[%s4754_s0 + $0x38] sm:$0xff] }
  0x29   :  { %1696 = vmatprep.subr.bf16.mxu1 %v3142_v41  ;;  %v3196_v20 = vld [vmem:[%s4753_s1 + $0x484] ss:$16 sps:$4 sm:$0xff]   ;;  %v3194_v22 = vld [vmem:[%s4753_s1 + $0x480] ss:$16 sps:$4 sm:$0xff]  }
  0x2a   :  { %v3199_v21 = vld [vmem:[%s4753_s1 + $0x684] ss:$16 sps:$4 sm:$0xff]   ;;  %v3197_v23 = vld [vmem:[%s4753_s1 + $0x680] ss:$16 sps:$4 sm:$0xff]  }
  0x2b   :  { %1654 = vmatpush2.bf16.msra.mxu0 %v3144_v42  ;;  %v3202_v24 = vld [vmem:[%s4753_s1 + $0x464] ss:$16 sps:$4 sm:$0xff]   ;;  %v3200_v26 = vld [vmem:[%s4753_s1 + $0x460] ss:$16 sps:$4 sm:$0xff]  }
  0x2c   :  { %1697 = vmatpush2.bf16.msra.mxu1 %v3145_v43  ;;  %1655 = vmatprep.subr.bf16.mxu0 %v3146_v44  ;;  %v3205_v25 = vld [vmem:[%s4753_s1 + $0x664] ss:$16 sps:$4 sm:$0xff]   ;;  %v3203_v27 = vld [vmem:[%s4753_s1 + $0x660] ss:$16 sps:$4 sm:$0xff]   ;;  %v3956_v43 = vcombine.high %v3937_v38, %v3942_v39 }
  0x2d   :  { %1698 = vmatprep.subr.bf16.mxu1 %v3148_v45  ;;  %v3208_v28 = vld [vmem:[%s4753_s1 + $0x444] ss:$16 sps:$4 sm:$0xff]   ;;  %v3206_v30 = vld [vmem:[%s4753_s1 + $0x440] ss:$16 sps:$4 sm:$0xff]  }
  0x2e   :  { %v3211_v29 = vld [vmem:[%s4753_s1 + $0x644] ss:$16 sps:$4 sm:$0xff]   ;;  %v3209_v31 = vld [vmem:[%s4753_s1 + $0x640] ss:$16 sps:$4 sm:$0xff]  }
  0x2f   :  { %1656 = vmatpush2.bf16.msra.mxu0 %v3150_v46  ;;  %v3214_v32 = vld [vmem:[%s4753_s1 + $0x424] ss:$16 sps:$4 sm:$0xff]   ;;  %v3212_v34 = vld [vmem:[%s4753_s1 + $0x420] ss:$16 sps:$4 sm:$0xff]  }
  0x30   :  { %1699 = vmatpush2.bf16.msra.mxu1 %v3151_v47  ;;  %1657 = vmatprep.subr.bf16.mxu0 %v3152_v52  ;;  %v3217_v33 = vld [vmem:[%s4753_s1 + $0x624] ss:$16 sps:$4 sm:$0xff]   ;;  %v3215_v35 = vld [vmem:[%s4753_s1 + $0x620] ss:$16 sps:$4 sm:$0xff]  }
  0x31   :  { %1700 = vmatprep.subr.bf16.mxu1 %v3154_v54  ;;  %v3927_v36 = vld [vmem:[%s4754_s0 + $0x10] sm:$0xff] }
  0x32   :  { %v3932_v37 = vld [vmem:[%s4754_s0 + $0x30] sm:$0xff] }
  0x33   :  { %1658 = vmatpush2.bf16.msra.mxu0 %v3156_v56  ;;  %v3220_v40 = vld [vmem:[%s4753_s1 + $0x404] ss:$16 sps:$4 sm:$0xff]   ;;  %v3949_v41 = vcombine.high %v3927_v36, %v3932_v37  ;;  %v3218_v44 = vld [vmem:[%s4753_s1 + $0x400] ss:$16 sps:$4 sm:$0xff]  }
  0x34   :  { %1701 = vmatpush2.bf16.msra.mxu1 %v3157_v57  ;;  %1659 = vmatprep.subr.bf16.mxu0 %v3158_v58  ;;  %v3223_v42 = vld [vmem:[%s4753_s1 + $0x604] ss:$16 sps:$4 sm:$0xff]   ;;  %v3221_v45 = vld [vmem:[%s4753_s1 + $0x600] ss:$16 sps:$4 sm:$0xff]  }
  0x35   :  { %1702 = vmatprep.subr.bf16.mxu1 %v3160_v59  ;;  %v3226_v46 = vld [vmem:[%s4753_s1 + $0x5e4] ss:$16 sps:$4 sm:$0xff]   ;;  %v3224_v48 = vld [vmem:[%s4753_s1 + $0x5e0] ss:$16 sps:$4 sm:$0xff]  }
  0x36   :  { %v3229_v47 = vld [vmem:[%s4753_s1 + $0x7e4] ss:$16 sps:$4 sm:$0xff]   ;;  %v3227_v49 = vld [vmem:[%s4753_s1 + $0x7e0] ss:$16 sps:$4 sm:$0xff]  }
  0x37   :  { %1660 = vmatpush2.bf16.msra.mxu0 %v3162_v60  ;;  %v3232_v50 = vld [vmem:[%s4753_s1 + $0x5c4] ss:$16 sps:$4 sm:$0xff]   ;;  %v3230_v52 = vld [vmem:[%s4753_s1 + $0x5c0] ss:$16 sps:$4 sm:$0xff]  }
  0x38   :  { %1703 = vmatpush2.bf16.msra.mxu1 %v3163_v61  ;;  %1661 = vmatprep.subr.bf16.mxu0 %v3164_v62  ;;  %v3235_v51 = vld [vmem:[%s4753_s1 + $0x7c4] ss:$16 sps:$4 sm:$0xff]   ;;  %v3233_v54 = vld [vmem:[%s4753_s1 + $0x7c0] ss:$16 sps:$4 sm:$0xff]  }
  0x39   :  { %1704 = vmatprep.subr.bf16.mxu1 %v3166_v63  ;;  %v3238_v56 = vld [vmem:[%s4753_s1 + $0x5a4] ss:$16 sps:$4 sm:$0xff]   ;;  %v3236_v58 = vld [vmem:[%s4753_s1 + $0x5a0] ss:$16 sps:$4 sm:$0xff]  }
  0x3a   :  { %v3241_v57 = vld [vmem:[%s4753_s1 + $0x7a4] ss:$16 sps:$4 sm:$0xff]   ;;  %v3239_v59 = vld [vmem:[%s4753_s1 + $0x7a0] ss:$16 sps:$4 sm:$0xff]  }
  0x3b   :  { %1662 = vmatpush2.bf16.msra.mxu0 %v3168_v0  ;;  %v3244_v60 = vld [vmem:[%s4753_s1 + $0x584] ss:$16 sps:$4 sm:$0xff]   ;;  %v3242_v62 = vld [vmem:[%s4753_s1 + $0x580] ss:$16 sps:$4 sm:$0xff]  }
  0x3c   :  { %1705 = vmatpush2.bf16.msra.mxu1 %v3169_v1  ;;  %1663 = vmatprep.subr.bf16.mxu0 %v3170_v2  ;;  %v3247_v61 = vld [vmem:[%s4753_s1 + $0x784] ss:$16 sps:$4 sm:$0xff]   ;;  %v3245_v63 = vld [vmem:[%s4753_s1 + $0x780] ss:$16 sps:$4 sm:$0xff]  }
  0x3d   :  { %1706 = vmatprep.subr.bf16.mxu1 %v3172_v3  ;;  %v3250_v0 = vld [vmem:[%s4753_s1 + $0x564] ss:$16 sps:$4 sm:$0xff]   ;;  %v3248_v2 = vld [vmem:[%s4753_s1 + $0x560] ss:$16 sps:$4 sm:$0xff]  }
  0x3e   :  { %v3253_v1 = vld [vmem:[%s4753_s1 + $0x764] ss:$16 sps:$4 sm:$0xff]   ;;  %v3251_v3 = vld [vmem:[%s4753_s1 + $0x760] ss:$16 sps:$4 sm:$0xff]  }
  0x3f   :  { %1664 = vmatpush2.bf16.msra.mxu0 %v3174_v4  ;;  %v3256_v4 = vld [vmem:[%s4753_s1 + $0x544] ss:$16 sps:$4 sm:$0xff]  }
  0x40   :  { %1707 = vmatpush2.bf16.msra.mxu1 %v3175_v5  ;;  %1719 = vmatprep.subr.bf16.mxu0 %v3178_v6  ;;  %v3259_v5 = vld [vmem:[%s4753_s1 + $0x744] ss:$16 sps:$4 sm:$0xff]   ;;  %v3254_v6 = vld [vmem:[%s4753_s1 + $0x540] ss:$16 sps:$4 sm:$0xff]  }
  0x41   :  { %1762 = vmatprep.subr.bf16.mxu1 %v3181_v7  ;;  %v3257_v7 = vld [vmem:[%s4753_s1 + $0x740] ss:$16 sps:$4 sm:$0xff]  }
  0x42   :  { %1666 = vmatmul.mubr.bf16.vlgmr.msra.gmra.mxu0 %v3840_v8 }
  0x43   :  { %1709 = vmatmul.mubr.bf16.vlgmr.msra.gmra.mxu1 %v3842_v9  ;;  %1720 = vmatpush1.bf16.msra.mxu0 %v3176_v10  ;;  %v3262_v10 = vld [vmem:[%s4753_s1 + $0x524] ss:$16 sps:$4 sm:$0xff]  }
  0x44   :  { %1763 = vmatpush1.bf16.msra.mxu1 %v3179_v11  ;;  %1721 = vmatprep.subr.bf16.mxu0 %v3184_v12  ;;  %v3265_v11 = vld [vmem:[%s4753_s1 + $0x724] ss:$16 sps:$4 sm:$0xff]   ;;  %v3260_v12 = vld [vmem:[%s4753_s1 + $0x520] ss:$16 sps:$4 sm:$0xff]  }
  0x45   :  { %1764 = vmatprep.subr.bf16.mxu1 %v3187_v13  ;;  %1751 = vmatprep.mubr.bf16.mxu0 %v3949_v41  ;;  %v3263_v13 = vld [vmem:[%s4753_s1 + $0x720] ss:$16 sps:$4 sm:$0xff]  }
  0x46   :  { %1794 = vmatprep.mubr.bf16.mxu1 %v3956_v43 }
  0x47   :  { %1722 = vmatpush1.bf16.msra.mxu0 %v3182_v14  ;;  %v3268_v14 = vld [vmem:[%s4753_s1 + $0x504] ss:$16 sps:$4 sm:$0xff]  }
  0x48   :  { %1765 = vmatpush1.bf16.msra.mxu1 %v3185_v15  ;;  %1723 = vmatprep.subr.bf16.mxu0 %v3190_v16  ;;  %v3271_v15 = vld [vmem:[%s4753_s1 + $0x704] ss:$16 sps:$4 sm:$0xff]   ;;  %v3266_v16 = vld [vmem:[%s4753_s1 + $0x500] ss:$16 sps:$4 sm:$0xff]  }
  0x49   :  { %1766 = vmatprep.subr.bf16.mxu1 %v3193_v17  ;;  %v3269_v17 = vld [vmem:[%s4753_s1 + $0x700] ss:$16 sps:$4 sm:$0xff]  }
  0x4b   :  { %1724 = vmatpush1.bf16.msra.mxu0 %v3188_v18  ;;  %v3274_v18 = vld [vmem:[%s4753_s1 + $0xec] ss:$16 sps:$4 sm:$0xff]  }
  0x4c   :  { %1767 = vmatpush1.bf16.msra.mxu1 %v3191_v19  ;;  %1725 = vmatprep.subr.bf16.mxu0 %v3196_v20  ;;  %v3277_v19 = vld [vmem:[%s4753_s1 + $0x2ec] ss:$16 sps:$4 sm:$0xff]   ;;  %v4070_v20 = vcombine.low %v3927_v36, %v3932_v37  ;;  %v3296_v36 = vld [vmem:[%s4753_s1 + $0x68] ss:$16 sps:$4 sm:$0xff]  }
  0x4d   :  { %1768 = vmatprep.subr.bf16.mxu1 %v3199_v21  ;;  %v4074_v21 = vcombine.low %v3937_v38, %v3942_v39  ;;  %v3299_v37 = vld [vmem:[%s4753_s1 + $0x268] ss:$16 sps:$4 sm:$0xff]   ;;  %v3304_v38 = vld [vmem:[%s4753_s1 + $0x4c] ss:$16 sps:$4 sm:$0xff]  }
  0x4e   :  { %v3307_v39 = vld [vmem:[%s4753_s1 + $0x24c] ss:$16 sps:$4 sm:$0xff]  }
  0x4f   :  { %1726 = vmatpush1.bf16.msra.mxu0 %v3194_v22  ;;  %v3272_v22 = vld [vmem:[%s4753_s1 + $0xe8] ss:$16 sps:$4 sm:$0xff]  }
  0x50   :  { %1769 = vmatpush1.bf16.msra.mxu1 %v3197_v23  ;;  %1727 = vmatprep.subr.bf16.mxu0 %v3202_v24  ;;  %v3275_v23 = vld [vmem:[%s4753_s1 + $0x2e8] ss:$16 sps:$4 sm:$0xff]   ;;  %v3280_v24 = vld [vmem:[%s4753_s1 + $0xcc] ss:$16 sps:$4 sm:$0xff]  }
  0x51   :  { %1770 = vmatprep.subr.bf16.mxu1 %v3205_v25  ;;  %v3283_v25 = vld [vmem:[%s4753_s1 + $0x2cc] ss:$16 sps:$4 sm:$0xff]  }
  0x53   :  { %1728 = vmatpush1.bf16.msra.mxu0 %v3200_v26  ;;  %v3278_v26 = vld [vmem:[%s4753_s1 + $0xc8] ss:$16 sps:$4 sm:$0xff]  }
  0x54   :  { %1771 = vmatpush1.bf16.msra.mxu1 %v3203_v27  ;;  %1729 = vmatprep.subr.bf16.mxu0 %v3208_v28  ;;  %v3281_v27 = vld [vmem:[%s4753_s1 + $0x2c8] ss:$16 sps:$4 sm:$0xff]   ;;  %v3286_v28 = vld [vmem:[%s4753_s1 + $0xac] ss:$16 sps:$4 sm:$0xff]  }
  0x55   :  { %1772 = vmatprep.subr.bf16.mxu1 %v3211_v29  ;;  %v3289_v29 = vld [vmem:[%s4753_s1 + $0x2ac] ss:$16 sps:$4 sm:$0xff]  }
  0x57   :  { %1730 = vmatpush1.bf16.msra.mxu0 %v3206_v30  ;;  %v3284_v30 = vld [vmem:[%s4753_s1 + $0xa8] ss:$16 sps:$4 sm:$0xff]  }
  0x58   :  { %1773 = vmatpush1.bf16.msra.mxu1 %v3209_v31  ;;  %1731 = vmatprep.subr.bf16.mxu0 %v3214_v32  ;;  %v3287_v31 = vld [vmem:[%s4753_s1 + $0x2a8] ss:$16 sps:$4 sm:$0xff]   ;;  %v3292_v32 = vld [vmem:[%s4753_s1 + $0x8c] ss:$16 sps:$4 sm:$0xff]  }
  0x59   :  { %1774 = vmatprep.subr.bf16.mxu1 %v3217_v33  ;;  %v3293_v33 = vld [vmem:[%s4753_s1 + $0x288] ss:$16 sps:$4 sm:$0xff]  }
  0x5b   :  { %1732 = vmatpush1.bf16.msra.mxu0 %v3212_v34  ;;  %v3298_v34 = vld [vmem:[%s4753_s1 + $0x6c] ss:$16 sps:$4 sm:$0xff]  }
  0x5c   :  { %1775 = vmatpush1.bf16.msra.mxu1 %v3215_v35  ;;  %1733 = vmatprep.subr.bf16.mxu0 %v3220_v40  ;;  %v3301_v35 = vld [vmem:[%s4753_s1 + $0x26c] ss:$16 sps:$4 sm:$0xff]   ;;  %v3302_v40 = vld [vmem:[%s4753_s1 + $0x48] ss:$16 sps:$4 sm:$0xff]  }
  0x5d   :  { %1776 = vmatprep.subr.bf16.mxu1 %v3223_v42  ;;  %v3305_v42 = vld [vmem:[%s4753_s1 + $0x248] ss:$16 sps:$4 sm:$0xff]  }
  0x5f   :  { %1734 = vmatpush1.bf16.msra.mxu0 %v3218_v44  ;;  %v3310_v44 = vld [vmem:[%s4753_s1 + $0x2c] ss:$16 sps:$4 sm:$0xff]  }
  0x60   :  { %1777 = vmatpush1.bf16.msra.mxu1 %v3221_v45  ;;  %1735 = vmatprep.subr.bf16.mxu0 %v3226_v46  ;;  %v3313_v45 = vld [vmem:[%s4753_s1 + $0x22c] ss:$16 sps:$4 sm:$0xff]   ;;  %v3308_v46 = vld [vmem:[%s4753_s1 + $0x28] ss:$16 sps:$4 sm:$0xff]  }
  0x61   :  { %1778 = vmatprep.subr.bf16.mxu1 %v3229_v47  ;;  %v3311_v47 = vld [vmem:[%s4753_s1 + $0x228] ss:$16 sps:$4 sm:$0xff]  }
  0x63   :  { %1736 = vmatpush2.bf16.msra.mxu0 %v3224_v48  ;;  %v3316_v48 = vld [vmem:[%s4753_s1 + $0xc] ss:$16 sps:$4 sm:$0xff]  }
  0x64   :  { %1779 = vmatpush2.bf16.msra.mxu1 %v3227_v49  ;;  %1737 = vmatprep.subr.bf16.mxu0 %v3232_v50  ;;  %v3319_v49 = vld [vmem:[%s4753_s1 + $0x20c] ss:$16 sps:$4 sm:$0xff]   ;;  %v3314_v50 = vld [vmem:[%s4753_s1 + $0x8] ss:$16 sps:$4 sm:$0xff]  }
  0x65   :  { %1780 = vmatprep.subr.bf16.mxu1 %v3235_v51  ;;  %v3317_v51 = vld [vmem:[%s4753_s1 + $0x208] ss:$16 sps:$4 sm:$0xff]  }
  0x67   :  { %1738 = vmatpush2.bf16.msra.mxu0 %v3230_v52  ;;  %v3322_v52 = vld [vmem:[%s4753_s1 + $0x1ec] ss:$16 sps:$4 sm:$0xff]  }
  0x68   :  { %1781 = vmatpush2.bf16.msra.mxu1 %v3233_v54  ;;  %1739 = vmatprep.subr.bf16.mxu0 %v3238_v56  ;;  %v3325_v54 = vld [vmem:[%s4753_s1 + $0x3ec] ss:$16 sps:$4 sm:$0xff]   ;;  %v3320_v56 = vld [vmem:[%s4753_s1 + $0x1e8] ss:$16 sps:$4 sm:$0xff]  }
  0x69   :  { %1782 = vmatprep.subr.bf16.mxu1 %v3241_v57  ;;  %v3323_v57 = vld [vmem:[%s4753_s1 + $0x3e8] ss:$16 sps:$4 sm:$0xff]  }
  0x6b   :  { %1740 = vmatpush2.bf16.msra.mxu0 %v3236_v58  ;;  %v3328_v58 = vld [vmem:[%s4753_s1 + $0x1cc] ss:$16 sps:$4 sm:$0xff]  }
  0x6c   :  { %1783 = vmatpush2.bf16.msra.mxu1 %v3239_v59  ;;  %1741 = vmatprep.subr.bf16.mxu0 %v3244_v60  ;;  %v3331_v59 = vld [vmem:[%s4753_s1 + $0x3cc] ss:$16 sps:$4 sm:$0xff]   ;;  %v3326_v60 = vld [vmem:[%s4753_s1 + $0x1c8] ss:$16 sps:$4 sm:$0xff]  }
  0x6d   :  { %1784 = vmatprep.subr.bf16.mxu1 %v3247_v61  ;;  %v3329_v61 = vld [vmem:[%s4753_s1 + $0x3c8] ss:$16 sps:$4 sm:$0xff]  }
  0x6f   :  { %1742 = vmatpush2.bf16.msra.mxu0 %v3242_v62  ;;  %v3334_v62 = vld [vmem:[%s4753_s1 + $0x1ac] ss:$16 sps:$4 sm:$0xff]  }
  0x70   :  { %1785 = vmatpush2.bf16.msra.mxu1 %v3245_v63  ;;  %1743 = vmatprep.subr.bf16.mxu0 %v3250_v0  ;;  %v3337_v63 = vld [vmem:[%s4753_s1 + $0x3ac] ss:$16 sps:$4 sm:$0xff]   ;;  %v3332_v0 = vld [vmem:[%s4753_s1 + $0x1a8] ss:$16 sps:$4 sm:$0xff]  }
  0x71   :  { %1786 = vmatprep.subr.bf16.mxu1 %v3253_v1  ;;  %v3335_v1 = vld [vmem:[%s4753_s1 + $0x3a8] ss:$16 sps:$4 sm:$0xff]  }
  0x73   :  { %1744 = vmatpush2.bf16.msra.mxu0 %v3248_v2  ;;  %v3340_v2 = vld [vmem:[%s4753_s1 + $0x18c] ss:$16 sps:$4 sm:$0xff]  }
  0x74   :  { %1787 = vmatpush2.bf16.msra.mxu1 %v3251_v3  ;;  %1745 = vmatprep.subr.bf16.mxu0 %v3256_v4  ;;  %v3343_v3 = vld [vmem:[%s4753_s1 + $0x38c] ss:$16 sps:$4 sm:$0xff]   ;;  %v3338_v4 = vld [vmem:[%s4753_s1 + $0x188] ss:$16 sps:$4 sm:$0xff]  }
  0x75   :  { %1788 = vmatprep.subr.bf16.mxu1 %v3259_v5  ;;  %v3341_v5 = vld [vmem:[%s4753_s1 + $0x388] ss:$16 sps:$4 sm:$0xff]  }
  0x77   :  { %1746 = vmatpush2.bf16.msra.mxu0 %v3254_v6  ;;  %v3346_v6 = vld [vmem:[%s4753_s1 + $0x16c] ss:$16 sps:$4 sm:$0xff]  }
  0x78   :  { %1789 = vmatpush2.bf16.msra.mxu1 %v3257_v7  ;;  %1747 = vmatprep.subr.bf16.mxu0 %v3262_v10  ;;  %v3349_v7 = vld [vmem:[%s4753_s1 + $0x36c] ss:$16 sps:$4 sm:$0xff]   ;;  %v3344_v10 = vld [vmem:[%s4753_s1 + $0x168] ss:$16 sps:$4 sm:$0xff]  }
  0x79   :  { %1790 = vmatprep.subr.bf16.mxu1 %v3265_v11  ;;  %v3347_v11 = vld [vmem:[%s4753_s1 + $0x368] ss:$16 sps:$4 sm:$0xff]  }
  0x7b   :  { %1748 = vmatpush2.bf16.msra.mxu0 %v3260_v12  ;;  %v3352_v12 = vld [vmem:[%s4753_s1 + $0x14c] ss:$16 sps:$4 sm:$0xff]  }
  0x7c   :  { %1791 = vmatpush2.bf16.msra.mxu1 %v3263_v13  ;;  %1749 = vmatprep.subr.bf16.mxu0 %v3268_v14  ;;  %v3355_v13 = vld [vmem:[%s4753_s1 + $0x34c] ss:$16 sps:$4 sm:$0xff]   ;;  %v3350_v14 = vld [vmem:[%s4753_s1 + $0x148] ss:$16 sps:$4 sm:$0xff]  }
  0x7d   :  { %1792 = vmatprep.subr.bf16.mxu1 %v3271_v15  ;;  %v3353_v15 = vld [vmem:[%s4753_s1 + $0x348] ss:$16 sps:$4 sm:$0xff]  }
  0x7f   :  { %1750 = vmatpush2.bf16.msra.mxu0 %v3266_v16  ;;  %v3358_v16 = vld [vmem:[%s4753_s1 + $0x12c] ss:$16 sps:$4 sm:$0xff]  }
  0x80   :  { %1793 = vmatpush2.bf16.msra.mxu1 %v3269_v17  ;;  %1805 = vmatprep.subr.bf16.mxu0 %v3274_v18  ;;  %v3361_v17 = vld [vmem:[%s4753_s1 + $0x32c] ss:$16 sps:$4 sm:$0xff]   ;;  %v3356_v18 = vld [vmem:[%s4753_s1 + $0x128] ss:$16 sps:$4 sm:$0xff]  }
  0x81   :  { %1848 = vmatprep.subr.bf16.mxu1 %v3277_v19  ;;  %v3359_v19 = vld [vmem:[%s4753_s1 + $0x328] ss:$16 sps:$4 sm:$0xff]  }
  0x82   :  { %1752 = vmatmul.mubr.bf16.vlgmr.msra.gmra.mxu0 %v4070_v20 }
  0x83   :  { %1795 = vmatmul.mubr.bf16.vlgmr.msra.gmra.mxu1 %v4074_v21  ;;  %1806 = vmatpush1.bf16.msra.mxu0 %v3272_v22  ;;  %v3364_v22 = vld [vmem:[%s4753_s1 + $0x10c] ss:$16 sps:$4 sm:$0xff]  }
  0x84   :  { %1849 = vmatpush1.bf16.msra.mxu1 %v3275_v23  ;;  %1807 = vmatprep.subr.bf16.mxu0 %v3280_v24  ;;  %v3367_v23 = vld [vmem:[%s4753_s1 + $0x30c] ss:$16 sps:$4 sm:$0xff]   ;;  %v3362_v24 = vld [vmem:[%s4753_s1 + $0x108] ss:$16 sps:$4 sm:$0xff]  }
  0x85   :  { %1850 = vmatprep.subr.bf16.mxu1 %v3283_v25  ;;  %1837 = vmatprep.mubr.bf16.mxu0 %v3783_v53  ;;  %v3295_v53 = vld [vmem:[%s4753_s1 + $0x28c] ss:$16 sps:$4 sm:$0xff]   ;;  %v3365_v25 = vld [vmem:[%s4753_s1 + $0x308] ss:$16 sps:$4 sm:$0xff]  }
  0x86   :  { %1880 = vmatprep.mubr.bf16.mxu1 %v3788_v55  ;;  %v3290_v55 = vld [vmem:[%s4753_s1 + $0x88] ss:$16 sps:$4 sm:$0xff]  }
  0x87   :  { %1808 = vmatpush1.bf16.msra.mxu0 %v3278_v26  ;;  %v3370_v26 = vld [vmem:[%s4753_s1 + $0x4ec] ss:$16 sps:$4 sm:$0xff]  }
  0x88   :  { %1851 = vmatpush1.bf16.msra.mxu1 %v3281_v27  ;;  %1809 = vmatprep.subr.bf16.mxu0 %v3286_v28  ;;  %v3373_v27 = vld [vmem:[%s4753_s1 + $0x6ec] ss:$16 sps:$4 sm:$0xff]   ;;  %v3368_v28 = vld [vmem:[%s4753_s1 + $0x4e8] ss:$16 sps:$4 sm:$0xff]  }
  0x89   :  { %1852 = vmatprep.subr.bf16.mxu1 %v3289_v29  ;;  %v3371_v29 = vld [vmem:[%s4753_s1 + $0x6e8] ss:$16 sps:$4 sm:$0xff]  }
  0x8b   :  { %1810 = vmatpush1.bf16.msra.mxu0 %v3284_v30  ;;  %v3376_v30 = vld [vmem:[%s4753_s1 + $0x4cc] ss:$16 sps:$4 sm:$0xff]  }
  0x8c   :  { %1853 = vmatpush1.bf16.msra.mxu1 %v3287_v31  ;;  %1811 = vmatprep.subr.bf16.mxu0 %v3292_v32  ;;  %v3379_v31 = vld [vmem:[%s4753_s1 + $0x6cc] ss:$16 sps:$4 sm:$0xff]   ;;  %v3374_v32 = vld [vmem:[%s4753_s1 + $0x4c8] ss:$16 sps:$4 sm:$0xff]  }
  0x8d   :  { %1854 = vmatprep.subr.bf16.mxu1 %v3295_v53  ;;  %v3377_v53 = vld [vmem:[%s4753_s1 + $0x6c8] ss:$16 sps:$4 sm:$0xff]  }
  0x8f   :  { %1812 = vmatpush1.bf16.msra.mxu0 %v3290_v55  ;;  %v3382_v55 = vld [vmem:[%s4753_s1 + $0x4ac] ss:$16 sps:$4 sm:$0xff]  }
  0x90   :  { %1855 = vmatpush1.bf16.msra.mxu1 %v3293_v33  ;;  %1813 = vmatprep.subr.bf16.mxu0 %v3298_v34  ;;  %v3385_v33 = vld [vmem:[%s4753_s1 + $0x6ac] ss:$16 sps:$4 sm:$0xff]   ;;  %v3380_v34 = vld [vmem:[%s4753_s1 + $0x4a8] ss:$16 sps:$4 sm:$0xff]  }
  0x91   :  { %1856 = vmatprep.subr.bf16.mxu1 %v3301_v35  ;;  %v3391_v35 = vld [vmem:[%s4753_s1 + $0x68c] ss:$16 sps:$4 sm:$0xff]  }
  0x93   :  { %1814 = vmatpush1.bf16.msra.mxu0 %v3296_v36  ;;  %v3386_v36 = vld [vmem:[%s4753_s1 + $0x488] ss:$16 sps:$4 sm:$0xff]  }
  0x94   :  { %1857 = vmatpush1.bf16.msra.mxu1 %v3299_v37  ;;  %1815 = vmatprep.subr.bf16.mxu0 %v3304_v38  ;;  %v3397_v37 = vld [vmem:[%s4753_s1 + $0x66c] ss:$16 sps:$4 sm:$0xff]   ;;  %v3392_v38 = vld [vmem:[%s4753_s1 + $0x468] ss:$16 sps:$4 sm:$0xff]  }
  0x95   :  { %1858 = vmatprep.subr.bf16.mxu1 %v3307_v39  ;;  %v3395_v39 = vld [vmem:[%s4753_s1 + $0x668] ss:$16 sps:$4 sm:$0xff]  }
  0x97   :  { %1816 = vmatpush1.bf16.msra.mxu0 %v3302_v40  ;;  %v3400_v40 = vld [vmem:[%s4753_s1 + $0x44c] ss:$16 sps:$4 sm:$0xff]  }
  0x98   :  { %1859 = vmatpush1.bf16.msra.mxu1 %v3305_v42  ;;  %1817 = vmatprep.subr.bf16.mxu0 %v3310_v44  ;;  %v3403_v42 = vld [vmem:[%s4753_s1 + $0x64c] ss:$16 sps:$4 sm:$0xff]   ;;  %v3398_v44 = vld [vmem:[%s4753_s1 + $0x448] ss:$16 sps:$4 sm:$0xff]  }
  0x99   :  { %1860 = vmatprep.subr.bf16.mxu1 %v3313_v45  ;;  %v3401_v45 = vld [vmem:[%s4753_s1 + $0x648] ss:$16 sps:$4 sm:$0xff]  }
  0x9b   :  { %1818 = vmatpush1.bf16.msra.mxu0 %v3308_v46  ;;  %v3406_v46 = vld [vmem:[%s4753_s1 + $0x42c] ss:$16 sps:$4 sm:$0xff]  }
  0x9c   :  { %1861 = vmatpush1.bf16.msra.mxu1 %v3311_v47  ;;  %1819 = vmatprep.subr.bf16.mxu0 %v3316_v48  ;;  %v3409_v47 = vld [vmem:[%s4753_s1 + $0x62c] ss:$16 sps:$4 sm:$0xff]   ;;  %v3404_v48 = vld [vmem:[%s4753_s1 + $0x428] ss:$16 sps:$4 sm:$0xff]  }
  0x9d   :  { %1862 = vmatprep.subr.bf16.mxu1 %v3319_v49  ;;  %v3407_v49 = vld [vmem:[%s4753_s1 + $0x628] ss:$16 sps:$4 sm:$0xff]  }
  0x9f   :  { %1820 = vmatpush1.bf16.msra.mxu0 %v3314_v50  ;;  %v3412_v50 = vld [vmem:[%s4753_s1 + $0x40c] ss:$16 sps:$4 sm:$0xff]  }
  0xa0   :  { %1863 = vmatpush1.bf16.msra.mxu1 %v3317_v51  ;;  %1821 = vmatprep.subr.bf16.mxu0 %v3322_v52  ;;  %v3415_v51 = vld [vmem:[%s4753_s1 + $0x60c] ss:$16 sps:$4 sm:$0xff]   ;;  %v3410_v52 = vld [vmem:[%s4753_s1 + $0x408] ss:$16 sps:$4 sm:$0xff]  }
  0xa1   :  { %1864 = vmatprep.subr.bf16.mxu1 %v3325_v54  ;;  %v3413_v54 = vld [vmem:[%s4753_s1 + $0x608] ss:$16 sps:$4 sm:$0xff]  }
  0xa3   :  { %1822 = vmatpush2.bf16.msra.mxu0 %v3320_v56  ;;  %v3418_v56 = vld [vmem:[%s4753_s1 + $0x5ec] ss:$16 sps:$4 sm:$0xff]  }
  0xa4   :  { %1865 = vmatpush2.bf16.msra.mxu1 %v3323_v57  ;;  %1823 = vmatprep.subr.bf16.mxu0 %v3328_v58  ;;  %v3421_v57 = vld [vmem:[%s4753_s1 + $0x7ec] ss:$16 sps:$4 sm:$0xff]   ;;  %v3416_v58 = vld [vmem:[%s4753_s1 + $0x5e8] ss:$16 sps:$4 sm:$0xff]  }
  0xa5   :  { %1866 = vmatprep.subr.bf16.mxu1 %v3331_v59  ;;  %v3419_v59 = vld [vmem:[%s4753_s1 + $0x7e8] ss:$16 sps:$4 sm:$0xff]  }
  0xa7   :  { %1824 = vmatpush2.bf16.msra.mxu0 %v3326_v60  ;;  %v3424_v60 = vld [vmem:[%s4753_s1 + $0x5cc] ss:$16 sps:$4 sm:$0xff]  }
  0xa8   :  { %1867 = vmatpush2.bf16.msra.mxu1 %v3329_v61  ;;  %1825 = vmatprep.subr.bf16.mxu0 %v3334_v62  ;;  %v3427_v61 = vld [vmem:[%s4753_s1 + $0x7cc] ss:$16 sps:$4 sm:$0xff]   ;;  %v3422_v62 = vld [vmem:[%s4753_s1 + $0x5c8] ss:$16 sps:$4 sm:$0xff]  }
  0xa9   :  { %1868 = vmatprep.subr.bf16.mxu1 %v3337_v63  ;;  %v3425_v63 = vld [vmem:[%s4753_s1 + $0x7c8] ss:$16 sps:$4 sm:$0xff]  }
  0xab   :  { %1826 = vmatpush2.bf16.msra.mxu0 %v3332_v0  ;;  %v3430_v0 = vld [vmem:[%s4753_s1 + $0x5ac] ss:$16 sps:$4 sm:$0xff]  }
  0xac   :  { %1869 = vmatpush2.bf16.msra.mxu1 %v3335_v1  ;;  %1827 = vmatprep.subr.bf16.mxu0 %v3340_v2  ;;  %v3433_v1 = vld [vmem:[%s4753_s1 + $0x7ac] ss:$16 sps:$4 sm:$0xff]   ;;  %v3428_v2 = vld [vmem:[%s4753_s1 + $0x5a8] ss:$16 sps:$4 sm:$0xff]  }
  0xad   :  { %1870 = vmatprep.subr.bf16.mxu1 %v3343_v3  ;;  %v3431_v3 = vld [vmem:[%s4753_s1 + $0x7a8] ss:$16 sps:$4 sm:$0xff]  }
  0xaf   :  { %1828 = vmatpush2.bf16.msra.mxu0 %v3338_v4  ;;  %v3436_v4 = vld [vmem:[%s4753_s1 + $0x58c] ss:$16 sps:$4 sm:$0xff]  }
  0xb0   :  { %1871 = vmatpush2.bf16.msra.mxu1 %v3341_v5  ;;  %1829 = vmatprep.subr.bf16.mxu0 %v3346_v6  ;;  %v3439_v5 = vld [vmem:[%s4753_s1 + $0x78c] ss:$16 sps:$4 sm:$0xff]   ;;  %v3434_v6 = vld [vmem:[%s4753_s1 + $0x588] ss:$16 sps:$4 sm:$0xff]  }
  0xb1   :  { %1872 = vmatprep.subr.bf16.mxu1 %v3349_v7  ;;  %v3437_v7 = vld [vmem:[%s4753_s1 + $0x788] ss:$16 sps:$4 sm:$0xff]  }
  0xb3   :  { %1830 = vmatpush2.bf16.msra.mxu0 %v3344_v10  ;;  %v3442_v10 = vld [vmem:[%s4753_s1 + $0x56c] ss:$16 sps:$4 sm:$0xff]  }
  0xb4   :  { %1873 = vmatpush2.bf16.msra.mxu1 %v3347_v11  ;;  %1831 = vmatprep.subr.bf16.mxu0 %v3352_v12  ;;  %v3445_v11 = vld [vmem:[%s4753_s1 + $0x76c] ss:$16 sps:$4 sm:$0xff]   ;;  %v3440_v12 = vld [vmem:[%s4753_s1 + $0x568] ss:$16 sps:$4 sm:$0xff]  }
  0xb5   :  { %1874 = vmatprep.subr.bf16.mxu1 %v3355_v13  ;;  %v3443_v13 = vld [vmem:[%s4753_s1 + $0x768] ss:$16 sps:$4 sm:$0xff]  }
  0xb7   :  { %1832 = vmatpush2.bf16.msra.mxu0 %v3350_v14  ;;  %v3448_v14 = vld [vmem:[%s4753_s1 + $0x54c] ss:$16 sps:$4 sm:$0xff]  }
  0xb8   :  { %1875 = vmatpush2.bf16.msra.mxu1 %v3353_v15  ;;  %1833 = vmatprep.subr.bf16.mxu0 %v3358_v16  ;;  %v3451_v15 = vld [vmem:[%s4753_s1 + $0x74c] ss:$16 sps:$4 sm:$0xff]   ;;  %v3446_v16 = vld [vmem:[%s4753_s1 + $0x548] ss:$16 sps:$4 sm:$0xff]  }
  0xb9   :  { %1876 = vmatprep.subr.bf16.mxu1 %v3361_v17  ;;  %v3449_v17 = vld [vmem:[%s4753_s1 + $0x748] ss:$16 sps:$4 sm:$0xff]  }
  0xbb   :  { %1834 = vmatpush2.bf16.msra.mxu0 %v3356_v18  ;;  %v3454_v18 = vld [vmem:[%s4753_s1 + $0x52c] ss:$16 sps:$4 sm:$0xff]  }
  0xbc   :  { %1877 = vmatpush2.bf16.msra.mxu1 %v3359_v19  ;;  %1835 = vmatprep.subr.bf16.mxu0 %v3364_v22  ;;  %v3457_v19 = vld [vmem:[%s4753_s1 + $0x72c] ss:$16 sps:$4 sm:$0xff]   ;;  %v3452_v22 = vld [vmem:[%s4753_s1 + $0x528] ss:$16 sps:$4 sm:$0xff]  }
  0xbd   :  { %1878 = vmatprep.subr.bf16.mxu1 %v3367_v23  ;;  %v3455_v23 = vld [vmem:[%s4753_s1 + $0x728] ss:$16 sps:$4 sm:$0xff]  }
  0xbf   :  { %1836 = vmatpush2.bf16.msra.mxu0 %v3362_v24  ;;  %v3460_v24 = vld [vmem:[%s4753_s1 + $0x50c] ss:$16 sps:$4 sm:$0xff]  }
  0xc0   :  { %1879 = vmatpush2.bf16.msra.mxu1 %v3365_v25  ;;  %1891 = vmatprep.subr.bf16.mxu0 %v3370_v26  ;;  %v3463_v25 = vld [vmem:[%s4753_s1 + $0x70c] ss:$16 sps:$4 sm:$0xff]   ;;  %v3458_v26 = vld [vmem:[%s4753_s1 + $0x508] ss:$16 sps:$4 sm:$0xff]  }
  0xc1   :  { %1934 = vmatprep.subr.bf16.mxu1 %v3373_v27  ;;  %v3461_v27 = vld [vmem:[%s4753_s1 + $0x708] ss:$16 sps:$4 sm:$0xff]  }
  0xc2   :  { %1838 = vmatmul.mubr.bf16.vlgmr.msra.gmra.mxu0 %v3840_v8  ;;  %v3383_v8 = vld [vmem:[%s4753_s1 + $0x6a8] ss:$16 sps:$4 sm:$0xff]  }
  0xc3   :  { %1881 = vmatmul.mubr.bf16.vlgmr.msra.gmra.mxu1 %v3842_v9  ;;  %1892 = vmatpush1.bf16.msra.mxu0 %v3368_v28  ;;  %v3388_v9 = vld [vmem:[%s4753_s1 + $0x48c] ss:$16 sps:$4 sm:$0xff]  }
  0xc4   :  { %1935 = vmatpush1.bf16.msra.mxu1 %v3371_v29  ;;  %1893 = vmatprep.subr.bf16.mxu0 %v3376_v30  ;;  %v3466_v28 = vld [vmem:[%s4755_s3 + $0x74] ss:$8 sps:$4 sm:$0xff]   ;;  %v3464_v29 = vld [vmem:[%s4755_s3 + $0x70] ss:$8 sps:$4 sm:$0xff]   ;;  %v3469_v30 = vld [vmem:[%s4755_s3 + $0x64] ss:$8 sps:$4 sm:$0xff]  }
  0xc5   :  { %1936 = vmatprep.subr.bf16.mxu1 %v3379_v31  ;;  %1923 = vmatprep.mubr.bf16.mxu0 %v3949_v41  ;;  %v3389_v41 = vld [vmem:[%s4753_s1 + $0x688] ss:$16 sps:$4 sm:$0xff]  }
  0xc6   :  { %1966 = vmatprep.mubr.bf16.mxu1 %v3956_v43  ;;  %v3394_v43 = vld [vmem:[%s4753_s1 + $0x46c] ss:$16 sps:$4 sm:$0xff]   ;;  %v3467_v31 = vld [vmem:[%s4755_s3 + $0x60] ss:$8 sps:$4 sm:$0xff]  }
  0xc7   :  { %1894 = vmatpush1.bf16.msra.mxu0 %v3374_v32  ;;  %v3472_v32 = vld [vmem:[%s4755_s3 + $0x54] ss:$8 sps:$4 sm:$0xff]  }
  0xc8   :  { %1937 = vmatpush1.bf16.msra.mxu1 %v3377_v53  ;;  %1895 = vmatprep.subr.bf16.mxu0 %v3382_v55  ;;  %v3470_v53 = vld [vmem:[%s4755_s3 + $0x50] ss:$8 sps:$4 sm:$0xff]  }
  0xc9   :  { %1938 = vmatprep.subr.bf16.mxu1 %v3385_v33  ;;  %v3512_v55 = vld [vmem:[%s4755_s3 + $0x170] ss:$8 sps:$4 sm:$0xff]   ;;  %v3514_v33 = vld [vmem:[%s4755_s3 + $0x174] ss:$8 sps:$4 sm:$0xff]  }
  0xcb   :  { %1896 = vmatpush1.bf16.msra.mxu0 %v3380_v34  ;;  %v3478_v34 = vld [vmem:[%s4755_s3 + $0x34] ss:$8 sps:$4 sm:$0xff]  }
  0xcc   :  { %1939 = vmatpush1.bf16.msra.mxu1 %v3383_v8  ;;  %1897 = vmatprep.subr.bf16.mxu0 %v3388_v9  ;;  %v3517_v8 = vld [vmem:[%s4755_s3 + $0x164] ss:$8 sps:$4 sm:$0xff]   ;;  %v3515_v9 = vld [vmem:[%s4755_s3 + $0x160] ss:$8 sps:$4 sm:$0xff]  }
  0xcd   :  { %1940 = vmatprep.subr.bf16.mxu1 %v3391_v35  ;;  %v3476_v35 = vld [vmem:[%s4755_s3 + $0x30] ss:$8 sps:$4 sm:$0xff]  }
  0xcf   :  { %1898 = vmatpush1.bf16.msra.mxu0 %v3386_v36  ;;  %v3520_v36 = vld [vmem:[%s4755_s3 + $0x154] ss:$8 sps:$4 sm:$0xff]  }
  0xd0   :  { %1941 = vmatpush1.bf16.msra.mxu1 %v3389_v41  ;;  %1899 = vmatprep.subr.bf16.mxu0 %v3394_v43  ;;  %v3481_v41 = vld [vmem:[%s4755_s3 + $0x24] ss:$8 sps:$4 sm:$0xff]   ;;  %v3518_v43 = vld [vmem:[%s4755_s3 + $0x150] ss:$8 sps:$4 sm:$0xff]  }
  0xd1   :  { %1942 = vmatprep.subr.bf16.mxu1 %v3397_v37  ;;  %v3479_v37 = vld [vmem:[%s4755_s3 + $0x20] ss:$8 sps:$4 sm:$0xff]  }
  0xd3   :  { %1900 = vmatpush1.bf16.msra.mxu0 %v3392_v38  ;;  %v3523_v38 = vld [vmem:[%s4755_s3 + $0x144] ss:$8 sps:$4 sm:$0xff]  }
  0xd4   :  { %1943 = vmatpush1.bf16.msra.mxu1 %v3395_v39  ;;  %1901 = vmatprep.subr.bf16.mxu0 %v3400_v40  ;;  %v3484_v39 = vld [vmem:[%s4755_s3 + $0x14] ss:$8 sps:$4 sm:$0xff]   ;;  %v3521_v40 = vld [vmem:[%s4755_s3 + $0x140] ss:$8 sps:$4 sm:$0xff]  }
  0xd5   :  { %1944 = vmatprep.subr.bf16.mxu1 %v3403_v42  ;;  %v3482_v42 = vld [vmem:[%s4755_s3 + $0x10] ss:$8 sps:$4 sm:$0xff]  }
  0xd7   :  { %1902 = vmatpush1.bf16.msra.mxu0 %v3398_v44  ;;  %v3526_v44 = vld [vmem:[%s4755_s3 + $0x134] ss:$8 sps:$4 sm:$0xff]  }
  0xd8   :  { %1945 = vmatpush1.bf16.msra.mxu1 %v3401_v45  ;;  %1903 = vmatprep.subr.bf16.mxu0 %v3406_v46  ;;  %v3487_v45 = vld [vmem:[%s4755_s3 + $0x4] ss:$8 sps:$4 sm:$0xff]   ;;  %v3524_v46 = vld [vmem:[%s4755_s3 + $0x130] ss:$8 sps:$4 sm:$0xff]  }
  0xd9   :  { %1946 = vmatprep.subr.bf16.mxu1 %v3409_v47  ;;  %v3485_v47 = vld [vmem:[%s4755_s3] ss:$8 sps:$4 sm:$0xff]  }
  0xdb   :  { %1904 = vmatpush1.bf16.msra.mxu0 %v3404_v48  ;;  %v3529_v48 = vld [vmem:[%s4755_s3 + $0x124] ss:$8 sps:$4 sm:$0xff]  }
  0xdc   :  { %1947 = vmatpush1.bf16.msra.mxu1 %v3407_v49  ;;  %1905 = vmatprep.subr.bf16.mxu0 %v3412_v50  ;;  %v3490_v49 = vld [vmem:[%s4755_s3 + $0xf4] ss:$8 sps:$4 sm:$0xff]   ;;  %v3527_v50 = vld [vmem:[%s4755_s3 + $0x120] ss:$8 sps:$4 sm:$0xff]  }
  0xdd   :  { %1948 = vmatprep.subr.bf16.mxu1 %v3415_v51  ;;  %v3488_v51 = vld [vmem:[%s4755_s3 + $0xf0] ss:$8 sps:$4 sm:$0xff]  }
  0xdf   :  { %1906 = vmatpush1.bf16.msra.mxu0 %v3410_v52  ;;  %v3532_v52 = vld [vmem:[%s4755_s3 + $0x114] ss:$8 sps:$4 sm:$0xff]  }
  0xe0   :  { %1949 = vmatpush1.bf16.msra.mxu1 %v3413_v54  ;;  %1907 = vmatprep.subr.bf16.mxu0 %v3418_v56  ;;  %v3493_v54 = vld [vmem:[%s4755_s3 + $0xe4] ss:$8 sps:$4 sm:$0xff]   ;;  %v3530_v56 = vld [vmem:[%s4755_s3 + $0x110] ss:$8 sps:$4 sm:$0xff]  }
  0xe1   :  { %1950 = vmatprep.subr.bf16.mxu1 %v3421_v57  ;;  %v3491_v57 = vld [vmem:[%s4755_s3 + $0xe0] ss:$8 sps:$4 sm:$0xff]  }
  0xe3   :  { %1908 = vmatpush2.bf16.msra.mxu0 %v3416_v58  ;;  %v3535_v58 = vld [vmem:[%s4755_s3 + $0x104] ss:$8 sps:$4 sm:$0xff]  }
  0xe4   :  { %1951 = vmatpush2.bf16.msra.mxu1 %v3419_v59  ;;  %1909 = vmatprep.subr.bf16.mxu0 %v3424_v60  ;;  %v3496_v59 = vld [vmem:[%s4755_s3 + $0xd4] ss:$8 sps:$4 sm:$0xff]   ;;  %v3533_v60 = vld [vmem:[%s4755_s3 + $0x100] ss:$8 sps:$4 sm:$0xff]  }
  0xe5   :  { %1952 = vmatprep.subr.bf16.mxu1 %v3427_v61  ;;  %v3494_v61 = vld [vmem:[%s4755_s3 + $0xd0] ss:$8 sps:$4 sm:$0xff]  }
  0xe7   :  { %1910 = vmatpush2.bf16.msra.mxu0 %v3422_v62  ;;  %v3538_v62 = vld [vmem:[%s4755_s3 + $0x1f4] ss:$8 sps:$4 sm:$0xff]  }
  0xe8   :  { %1953 = vmatpush2.bf16.msra.mxu1 %v3425_v63  ;;  %1911 = vmatprep.subr.bf16.mxu0 %v3430_v0  ;;  %v3499_v63 = vld [vmem:[%s4755_s3 + $0xc4] ss:$8 sps:$4 sm:$0xff]   ;;  %v3536_v0 = vld [vmem:[%s4755_s3 + $0x1f0] ss:$8 sps:$4 sm:$0xff]  }
  0xe9   :  { %1954 = vmatprep.subr.bf16.mxu1 %v3433_v1  ;;  %v3497_v1 = vld [vmem:[%s4755_s3 + $0xc0] ss:$8 sps:$4 sm:$0xff]  }
  0xeb   :  { %1912 = vmatpush2.bf16.msra.mxu0 %v3428_v2  ;;  %v3541_v2 = vld [vmem:[%s4755_s3 + $0x1e4] ss:$8 sps:$4 sm:$0xff]  }
  0xec   :  { %1955 = vmatpush2.bf16.msra.mxu1 %v3431_v3  ;;  %1913 = vmatprep.subr.bf16.mxu0 %v3436_v4  ;;  %v3502_v3 = vld [vmem:[%s4755_s3 + $0xb4] ss:$8 sps:$4 sm:$0xff]   ;;  %v3539_v4 = vld [vmem:[%s4755_s3 + $0x1e0] ss:$8 sps:$4 sm:$0xff]  }
  0xed   :  { %1956 = vmatprep.subr.bf16.mxu1 %v3439_v5  ;;  %v293_v5 = vlaneseq }
  0xef   :  { %1914 = vmatpush2.bf16.msra.mxu0 %v3434_v6  ;;  %v3500_v6 = vld [vmem:[%s4755_s3 + $0xb0] ss:$8 sps:$4 sm:$0xff]  }
  0xf0   :  { %1957 = vmatpush2.bf16.msra.mxu1 %v3437_v7  ;;  %1915 = vmatprep.subr.bf16.mxu0 %v3442_v10  ;;  %v3544_v7 = vld [vmem:[%s4755_s3 + $0x1d4] ss:$8 sps:$4 sm:$0xff]   ;;  %v3505_v10 = vld [vmem:[%s4755_s3 + $0xa4] ss:$8 sps:$4 sm:$0xff]  }
  0xf1   :  { %1958 = vmatprep.subr.bf16.mxu1 %v3445_v11  ;;  %v3542_v11 = vld [vmem:[%s4755_s3 + $0x1d0] ss:$8 sps:$4 sm:$0xff]  }
  0xf3   :  { %1916 = vmatpush2.bf16.msra.mxu0 %v3440_v12  ;;  %v4612_v12 = vshrl.u32 %v293_v5, 7 }
  0xf4   :  { %1959 = vmatpush2.bf16.msra.mxu1 %v3443_v13  ;;  %1917 = vmatprep.subr.bf16.mxu0 %v3448_v14  ;;  %v3503_v13 = vld [vmem:[%s4755_s3 + $0xa0] ss:$8 sps:$4 sm:$0xff]   ;;  %v3547_v14 = vld [vmem:[%s4755_s3 + $0x1c4] ss:$8 sps:$4 sm:$0xff]  }
  0xf5   :  { %1960 = vmatprep.subr.bf16.mxu1 %v3451_v15 }
  0xf7   :  { %1918 = vmatpush2.bf16.msra.mxu0 %v3446_v16 }
  0xf8   :  { %1961 = vmatpush2.bf16.msra.mxu1 %v3449_v17  ;;  %1919 = vmatprep.subr.bf16.mxu0 %v3454_v18  ;;  %v3508_v17 = vld [vmem:[%s4755_s3 + $0x94] ss:$8 sps:$4 sm:$0xff]   ;;  %v3545_v18 = vld [vmem:[%s4755_s3 + $0x1c0] ss:$8 sps:$4 sm:$0xff]  }
  0xf9   :  { %1962 = vmatprep.subr.bf16.mxu1 %v3457_v19  ;;  %v295_v19 = vsub.s32 0, %v4612_v12 }
  0xfb   :  { %1920 = vmatpush2.bf16.msra.mxu0 %v3452_v22  ;;  %v299_v22 = vsub.s32 1, %v4612_v12 }
  0xfc   :  { %1963 = vmatpush2.bf16.msra.mxu1 %v3455_v23  ;;  %1921 = vmatprep.subr.bf16.mxu0 %v3460_v24  ;;  %v3506_v23 = vld [vmem:[%s4755_s3 + $0x90] ss:$8 sps:$4 sm:$0xff]   ;;  %v4634_v24 = vld [vmem:[%s4756_s2] sm:$0xf] }
  0xfd   :  { %1964 = vmatprep.subr.bf16.mxu1 %v3463_v25 }
  0xff   :  { %1922 = vmatpush2.bf16.msra.mxu0 %v3458_v26 }
 0x100   :  { %1965 = vmatpush2.bf16.msra.mxu1 %v3461_v27  ;;  %2401 = vmatprep.subr.bf16.mxu0 %v3466_v28  ;;  %v3511_v27 = vld [vmem:[%s4755_s3 + $0x84] ss:$8 sps:$4 sm:$0xff]   ;;  %v296_v28 = vrot.slane %v4634_v24, %v295_v19 }
 0x101   :  { %2444 = vmatprep.subr.bf16.mxu1 %v3514_v33 }
 0x102   :  { %1924 = vmatmul.mubr.bf16.vlgmr.msra.gmra.mxu0 %v4070_v20  ;;  %v3475_v20 = vld [vmem:[%s4755_s3 + $0x44] ss:$8 sps:$4 sm:$0xff]   ;;  %v1667_v15 = vpop.f32.mrf.mxu0 }
 0x103   :  { %1967 = vmatmul.mubr.bf16.vlgmr.msra.gmra.mxu1 %v4074_v21  ;;  %2402 = vmatpush1.bf16.msra.mxu0 %v3464_v29  ;;  %v3473_v21 = vld [vmem:[%s4755_s3 + $0x40] ss:$8 sps:$4 sm:$0xff]   ;;  %v1710_v16 = vpop.f32.mrf.mxu1  ;;  %v300_v29 = vrot.slane %v4634_v24, %v299_v22 }
 0x104   :  { %2403 = vmatprep.subr.bf16.mxu0 %v3469_v30  ;;  %2445 = vmatpush1.bf16.msra.mxu1 %v3512_v55  ;;  %v1669_v25 = vpop.f32.mrf.mxu0  ;;  %v3509_v30 = vld [vmem:[%s4755_s3 + $0x80] ss:$8 sps:$4 sm:$0xff]  }
 0x105   :  { %2446 = vmatprep.subr.bf16.mxu1 %v3517_v8  ;;  %v1712_v26 = vpop.f32.mrf.mxu1 }
 0x107   :  { %2404 = vmatpush1.bf16.msra.mxu0 %v3467_v31  ;;  %v1671_v31 = vpop.f32.mrf.mxu0 }
 0x108   :  { %2405 = vmatprep.subr.bf16.mxu0 %v3472_v32  ;;  %2447 = vmatpush1.bf16.msra.mxu1 %v3515_v9  ;;  %v1714_v32 = vpop.f32.mrf.mxu1  ;;  %v1672_v33 = vadd.f32 %v1671_v31, %v296_v28  ;;  %v3550_v9 = vld [vmem:[%s4755_s3 + $0x1b4] ss:$8 sps:$4 sm:$0xff]  }
 0x109   :  { %2448 = vmatprep.subr.bf16.mxu1 %v3520_v36 }
 0x10a   :  { %v1716_v55 = vpop.f32.mrf.mxu1 }
 0x10b   :  { %2406 = vmatpush1.bf16.msra.mxu0 %v3470_v53  ;;  %v1668_v53 = vadd.f32 %v1667_v15, %v296_v28  ;;  %v3562_v15 = vld [vmem:[%s4757_s5 + $0x70] sm:$0xff]  }
 0x10c   :  { %2407 = vmatprep.subr.bf16.mxu0 %v3475_v20  ;;  %2449 = vmatpush1.bf16.msra.mxu1 %v3518_v43  ;;  %v1670_v20 = vadd.f32 %v1669_v25, %v300_v29  ;;  %v3567_v25 = vld [vmem:[%s4757_s5 + $0x20] sm:$0xff]  }
 0x10d   :  { %2450 = vmatprep.subr.bf16.mxu1 %v3523_v38 }
 0x10e   :  { %v1713_v36 = vadd.f32 %v1712_v26, %v1670_v20  ;;  %v3568_v26 = vld [vmem:[%s4757_s5 + $0x58] sm:$0xff]  }
 0x10f   :  { %2408 = vmatpush1.bf16.msra.mxu0 %v3473_v21  ;;  %v1673_v21 = vpop.f32.mrf.mxu0 }
 0x110   :  { %2409 = vmatprep.subr.bf16.mxu0 %v3478_v34  ;;  %2451 = vmatpush1.bf16.msra.mxu1 %v3521_v40  ;;  %v1674_v43 = vadd.f32 %v1673_v21, %v300_v29  ;;  %v303_v29 = vsub.s32 2, %v4612_v12 }
 0x111   :  { %2452 = vmatprep.subr.bf16.mxu1 %v3526_v44 }
 0x113   :  { %2410 = vmatpush1.bf16.msra.mxu0 %v3476_v35  ;;  %v1711_v35 = vadd.f32 %v1710_v16, %v1668_v53  ;;  %v3563_v16 = vld [vmem:[%s4757_s5 + $0x30] sm:$0xff]   ;;  %v304_v53 = vrot.slane %v4634_v24, %v303_v29 }
 0x114   :  { %2411 = vmatprep.subr.bf16.mxu0 %v3481_v41  ;;  %2453 = vmatpush1.bf16.msra.mxu1 %v3524_v46  ;;  %v3548_v41 = vld [vmem:[%s4755_s3 + $0x1b0] ss:$8 sps:$4 sm:$0xff]  }
 0x115   :  { %2454 = vmatprep.subr.bf16.mxu1 %v3529_v48  ;;  %v3551_v48 = vld [vmem:[%s4755_s3 + $0x1a0] ss:$8 sps:$4 sm:$0xff]  }
 0x117   :  { %2412 = vmatpush1.bf16.msra.mxu0 %v3479_v37 }
 0x118   :  { %2413 = vmatprep.subr.bf16.mxu0 %v3484_v39  ;;  %2455 = vmatpush1.bf16.msra.mxu1 %v3527_v50  ;;  %v1715_v39 = vadd.f32 %v1714_v32, %v1672_v33 }
 0x119   :  { %2456 = vmatprep.subr.bf16.mxu1 %v3532_v52 }
 0x11b   :  { %2414 = vmatpush1.bf16.msra.mxu0 %v3482_v42 }
 0x11c   :  { %2415 = vmatprep.subr.bf16.mxu0 %v3487_v45  ;;  %2457 = vmatpush1.bf16.msra.mxu1 %v3530_v56  ;;  %v3553_v45 = vld [vmem:[%s4755_s3 + $0x1a4] ss:$8 sps:$4 sm:$0xff]  }
 0x11d   :  { %2458 = vmatprep.subr.bf16.mxu1 %v3535_v58 }
 0x11f   :  { %2416 = vmatpush1.bf16.msra.mxu0 %v3485_v47 }
 0x120   :  { %2417 = vmatprep.subr.bf16.mxu0 %v3490_v49  ;;  %2459 = vmatpush1.bf16.msra.mxu1 %v3533_v60  ;;  %v1717_v49 = vadd.f32 %v1716_v55, %v1674_v43  ;;  %v3554_v60 = vld [vmem:[%s4755_s3 + $0x190] ss:$8 sps:$4 sm:$0xff]  }
 0x121   :  { %2460 = vmatprep.subr.bf16.mxu1 %v3538_v62 }
 0x123   :  { %2418 = vmatpush2.bf16.msra.mxu0 %v3488_v51 }
 0x124   :  { %2419 = vmatprep.subr.bf16.mxu0 %v3493_v54  ;;  %2461 = vmatpush2.bf16.msra.mxu1 %v3536_v0 }
 0x125   :  { %2462 = vmatprep.subr.bf16.mxu1 %v3541_v2 }
 0x127   :  { %2420 = vmatpush2.bf16.msra.mxu0 %v3491_v57  ;;  %v3556_v57 = vld [vmem:[%s4755_s3 + $0x194] ss:$8 sps:$4 sm:$0xff]  }
 0x128   :  { %2421 = vmatprep.subr.bf16.mxu0 %v3496_v59  ;;  %2463 = vmatpush2.bf16.msra.mxu1 %v3539_v4 }
 0x129   :  { %2464 = vmatprep.subr.bf16.mxu1 %v3544_v7 }
 0x12b   :  { %2422 = vmatpush2.bf16.msra.mxu0 %v3494_v61 }
 0x12c   :  { %2423 = vmatprep.subr.bf16.mxu0 %v3499_v63  ;;  %2465 = vmatpush2.bf16.msra.mxu1 %v3542_v11 }
 0x12d   :  { %2466 = vmatprep.subr.bf16.mxu1 %v3547_v14  ;;  %v3561_v14 = vld [vmem:[%s4757_s5 + $0x38] sm:$0xff]  }
 0x12f   :  { %2424 = vmatpush2.bf16.msra.mxu0 %v3497_v1  ;;  %v3557_v1 = vld [vmem:[%s4755_s3 + $0x180] ss:$8 sps:$4 sm:$0xff]  }
 0x130   :  { %2425 = vmatprep.subr.bf16.mxu0 %v3502_v3  ;;  %2467 = vmatpush2.bf16.msra.mxu1 %v3545_v18  ;;  %v3559_v3 = vld [vmem:[%s4755_s3 + $0x184] ss:$8 sps:$4 sm:$0xff]  }
 0x131   :  { %2468 = vmatprep.subr.bf16.mxu1 %v3550_v9  ;;  %v3565_v18 = vld [vmem:[%s4757_s5 + $0x28] sm:$0xff]  }
 0x133   :  { %2426 = vmatpush2.bf16.msra.mxu0 %v3500_v6 }
 0x134   :  { %2427 = vmatprep.subr.bf16.mxu0 %v3505_v10  ;;  %2469 = vmatpush2.bf16.msra.mxu1 %v3548_v41 }
 0x135   :  { %2470 = vmatprep.subr.bf16.mxu1 %v3553_v45 }
 0x137   :  { %2428 = vmatpush2.bf16.msra.mxu0 %v3503_v13  ;;  %v3560_v13 = vld [vmem:[%s4757_s5 + $0x78] sm:$0xff]  }
 0x138   :  { %2429 = vmatprep.subr.bf16.mxu0 %v3508_v17  ;;  %2471 = vmatpush2.bf16.msra.mxu1 %v3551_v48  ;;  %v3564_v17 = vld [vmem:[%s4757_s5 + $0x68] sm:$0xff]  }
 0x139   :  { %2472 = vmatprep.subr.bf16.mxu1 %v3556_v57 }
 0x13b   :  { %2430 = vmatpush2.bf16.msra.mxu0 %v3506_v23  ;;  %v3566_v23 = vld [vmem:[%s4757_s5 + $0x60] sm:$0xff]  }
 0x13c   :  { %2431 = vmatprep.subr.bf16.mxu0 %v3511_v27  ;;  %2473 = vmatpush2.bf16.msra.mxu1 %v3554_v60 }
 0x13d   :  { %2474 = vmatprep.subr.bf16.mxu1 %v3559_v3 }
 0x13f   :  { %2432 = vmatpush2.bf16.msra.mxu0 %v3509_v30  ;;  %v307_v30 = vsub.s32 3, %v4612_v12 }
 0x140   :  { %2475 = vmatpush2.bf16.msra.mxu1 %v3557_v1  ;;  %3058 = vmatprep.subr.bf16.mxu0 %v3560_v13  ;;  %v3574_v13 = vld [vmem:[%s4757_s5 + $0x40] sm:$0xff]  }
 0x141   :  { %v308_v20 = vrot.slane %v4634_v24, %v307_v30 }
 0x142   :  { %v1753_v34 = vpop.f32.mrf.mxu0 }
 0x143   :  { %v1796_v8 = vpop.f32.mrf.mxu1  ;;  %v1754_v40 = vadd.f32 %v1753_v34, %v1711_v35 }
 0x144   :  { %v1755_v37 = vpop.f32.mrf.mxu0 }
 0x145   :  { %v1798_v38 = vpop.f32.mrf.mxu1  ;;  %v1756_v42 = vadd.f32 %v1755_v37, %v1713_v36  ;;  %v1797_v52 = vadd.f32 %v1796_v8, %v1754_v40 }
 0x146   :  { %v1757_v44 = vpop.f32.mrf.mxu0 }
 0x147   :  { %v1758_v46 = vadd.f32 %v1757_v44, %v1715_v39  ;;  %v1800_v47 = vpop.f32.mrf.mxu1  ;;  %v1799_v50 = vadd.f32 %v1798_v38, %v1756_v42  ;;  %v1985_v63 = vmul.f32 0.2, %v1797_v52  ;;  %vm1977_vm2 = vcmp.ge.f32.partialorder %v1797_v52, 0.0 }
 0x148   :  { %v1759_v51 = vpop.f32.mrf.mxu0 }
 0x149   :  { %v1801_v54 = vadd.f32 %v1800_v47, %v1758_v46  ;;  %v1760_v56 = vadd.f32 %v1759_v51, %v1717_v49  ;;  %v1802_v59 = vpop.f32.mrf.mxu1  ;;  %v1986_v61 = vmul.f32 0.2, %v1799_v50  ;;  %vm1978_vm1 = vcmp.ge.f32.partialorder %v1799_v50, 0.0 }
 0x14a   :  { %v1993_v7 = vsel %vm1977_vm2, %v1797_v52, %v1985_v63 }
 0x14b   :  { %v1989_v58 = vmul.f32 0.2, %v1801_v54  ;;  %vm1981_vm0 = vcmp.ge.f32.partialorder %v1801_v54, 0.0  ;;  %v1803_v62 = vadd.f32 %v1802_v59, %v1760_v56  ;;  %v1994_v4 = vsel %vm1978_vm1, %v1799_v50, %v1986_v61 }
 0x14d   :  { %vm1982_vm3 = vcmp.ge.f32.partialorder %v1803_v62, 0.0  ;;  %v1990_v0 = vmul.f32 0.2, %v1803_v62  ;;  %v1997_v2 = vsel %vm1981_vm0, %v1801_v54, %v1989_v58 }
 0x14e   :  { %v2001_v11 = vpack.c.bf16 %v1997_v2, %v1993_v7  ;;  %v3571_v7 = vld [vmem:[%s4757_s5 + $0x10] sm:$0xff]  }
 0x14f   :  { %v1998_v6 = vsel %vm1982_vm3, %v1803_v62, %v1990_v0 }
 0x150   :  { %v2002_v10 = vpack.c.bf16 %v1998_v6, %v1994_v4  ;;  %v3569_v4 = vld [vmem:[%s4757_s5 + $0x18] sm:$0xff]   ;;  %v3570_v6 = vld [vmem:[%s4757_s5 + $0x50] sm:$0xff]  }
 0x152   :  { %2433 = vmatprep.mubr.bf16.mxu0 %v2002_v10  ;;  %v3572_v10 = vld [vmem:[%s4757_s5 + $0x48] sm:$0xff]  }
 0x153   :  { %2434 = vmatmul.mubr.bf16.vlgmr.msra.gmra.mxu0 %v2001_v11  ;;  %v3573_v11 = vld [vmem:[%s4757_s5 + $0x8] sm:$0xff]  }
 0x154   :  { %3059 = vmatpush3.bf16.msra.mxu0 %v3561_v14  ;;  %v3575_v14 = vld [vmem:[%s4757_s5] sm:$0xff]  }
 0x155   :  { %3060 = vmatprep.subr.bf16.mxu0 %v3562_v15 }
 0x158   :  { %3061 = vmatpush3.bf16.msra.mxu0 %v3563_v16 }
 0x159   :  { %3062 = vmatprep.subr.bf16.mxu0 %v3564_v17  ;;  %v2069_v17 = vld [vmem:[%s4758_s4] sm:$0x3] }
 0x15c   :  { %3063 = vmatpush3.bf16.msra.mxu0 %v3565_v18  ;;  %v2078_v18 = vrot.slane %v2069_v17, %v299_v22 }
 0x15d   :  { %3064 = vmatprep.subr.bf16.mxu0 %v3566_v23  ;;  %v2074_v23 = vrot.slane %v2069_v17, %v295_v19 }
 0x160   :  { %3065 = vmatpush3.bf16.msra.mxu0 %v3567_v25 }
 0x161   :  { %3066 = vmatprep.subr.bf16.mxu0 %v3568_v26 }
 0x164   :  { %3067 = vmatpush3.bf16.msra.mxu0 %v3569_v4 }
 0x165   :  { %3068 = vmatprep.subr.bf16.mxu0 %v3570_v6 }
 0x168   :  { %3069 = vmatpush3.bf16.msra.mxu0 %v3571_v7 }
 0x169   :  { %3070 = vmatprep.subr.bf16.mxu0 %v3572_v10 }
 0x16c   :  { %3071 = vmatpush3.bf16.msra.mxu0 %v3573_v11 }
 0x16d   :  { %3072 = vmatprep.subr.bf16.mxu0 %v3574_v13 }
 0x170   :  { %3073 = vmatpush3.bf16.msra.mxu0 %v3575_v14 }
 0x182   :  { %v1839_v27 = vpop.f32.mrf.mxu0 }
 0x183   :  { %v1882_v28 = vpop.f32.mrf.mxu1  ;;  %v1840_v33 = vadd.f32 %v1839_v27, %v304_v53 }
 0x184   :  { %v1841_v31 = vpop.f32.mrf.mxu0 }
 0x185   :  { %v1884_v32 = vpop.f32.mrf.mxu1  ;;  %v1842_v34 = vadd.f32 %v1841_v31, %v308_v20  ;;  %v1883_v43 = vadd.f32 %v1882_v28, %v1840_v33 }
 0x186   :  { %v1843_v21 = vpop.f32.mrf.mxu0 }
 0x187   :  { %v1886_v55 = vpop.f32.mrf.mxu1  ;;  %v1844_v35 = vadd.f32 %v1843_v21, %v304_v53  ;;  %v1885_v37 = vadd.f32 %v1884_v32, %v1842_v34 }
 0x188   :  { %v1845_v8 = vpop.f32.mrf.mxu0 }
 0x189   :  { %v1888_v9 = vpop.f32.mrf.mxu1  ;;  %v1846_v38 = vadd.f32 %v1845_v8, %v308_v20  ;;  %v1887_v42 = vadd.f32 %v1886_v55, %v1844_v35 }
 0x18b   :  { %v1889_v48 = vadd.f32 %v1888_v9, %v1846_v38  ;;  %v2678_v38 = vand.u32 127, %v293_v5 }
 0x18d   :  { %vm2679_vm12 = vcmp.ge.s32.totalorder %v2678_v38, 1  ;;  %vm2680_vm13 = vcmp.le.s32.totalorder %v2678_v38, 5  ;;  %vm2704_vm15 = vcmp.eq.s32.totalorder %v2678_v38, 0 }
 0x18e   :  { %vm4735_vm14 = vmand %vm2679_vm12, %vm2680_vm13 }
 0x1c2   :  { %v1925_v36 = vpop.f32.mrf.mxu0 }
 0x1c3   :  { %v1968_v41 = vpop.f32.mrf.mxu1  ;;  %v1926_v44 = vadd.f32 %v1925_v36, %v1883_v43 }
 0x1c4   :  { %v1927_v39 = vpop.f32.mrf.mxu0 }
 0x1c5   :  { %v1970_v40 = vpop.f32.mrf.mxu1  ;;  %v1928_v45 = vadd.f32 %v1927_v39, %v1885_v37  ;;  %v1969_v51 = vadd.f32 %v1968_v41, %v1926_v44 }
 0x1c6   :  { %v1929_v46 = vpop.f32.mrf.mxu0 }
 0x1c7   :  { %v1930_v47 = vadd.f32 %v1929_v46, %v1887_v42  ;;  %v1972_v24 = vpop.f32.mrf.mxu1  ;;  %v1971_v49 = vadd.f32 %v1970_v40, %v1928_v45  ;;  %v1987_v60 = vmul.f32 0.2, %v1969_v51  ;;  %vm1979_vm6 = vcmp.ge.f32.partialorder %v1969_v51, 0.0  ;;  %v3041_v40 = vld [vmem:[%s4759_s6] ss:$0 sm:$0xff] }
 0x1c8   :  { %v1931_v50 = vpop.f32.mrf.mxu0 }
 0x1c9   :  { %v1973_v52 = vadd.f32 %v1972_v24, %v1930_v47  ;;  %v1932_v54 = vadd.f32 %v1931_v50, %v1889_v48  ;;  %v1974_v57 = vpop.f32.mrf.mxu1  ;;  %v1988_v58 = vmul.f32 0.2, %v1971_v49  ;;  %vm1980_vm5 = vcmp.ge.f32.partialorder %v1971_v49, 0.0 }
 0x1ca   :  { %v1995_v1 = vsel %vm1979_vm6, %v1969_v51, %v1987_v60 }
 0x1cb   :  { %v1991_v56 = vmul.f32 0.2, %v1973_v52  ;;  %vm1983_vm4 = vcmp.ge.f32.partialorder %v1973_v52, 0.0  ;;  %v1975_v59 = vadd.f32 %v1974_v57, %v1932_v54  ;;  %v1996_v63 = vsel %vm1980_vm5, %v1971_v49, %v1988_v58 }
 0x1cd   :  { %vm1984_vm7 = vcmp.ge.f32.partialorder %v1975_v59, 0.0  ;;  %v1992_v61 = vmul.f32 0.2, %v1975_v59  ;;  %v1999_v62 = vsel %vm1983_vm4, %v1973_v52, %v1991_v56 }
 0x1ce   :  { %v2003_v3 = vpack.c.bf16 %v1999_v62, %v1995_v1 }
 0x1cf   :  { %v2000_v0 = vsel %vm1984_vm7, %v1975_v59, %v1992_v61 }
 0x1d0   :  { %v2004_v2 = vpack.c.bf16 %v2000_v0, %v1996_v63 }
 0x1d2   :  { %2476 = vmatprep.mubr.bf16.mxu1 %v2004_v2 }
 0x1d3   :  { %2477 = vmatmul.mubr.bf16.vlgmr.msra.gmra.mxu1 %v2003_v3 }
 0x213   :  { %v2435_v15 = vpop.f32.mrf.mxu0 }
 0x214   :  { %v2436_v28 = vadd.f32 %v2435_v15, %v2074_v23 }
 0x215   :  { %v2437_v16 = vpop.f32.mrf.mxu0 }
 0x216   :  { %v2438_v27 = vadd.f32 %v2437_v16, %v2078_v18 }
 0x217   :  { %v2439_v25 = vpop.f32.mrf.mxu0 }
 0x218   :  { %v2440_v31 = vadd.f32 %v2439_v25, %v2074_v23 }
 0x219   :  { %v2441_v29 = vpop.f32.mrf.mxu0 }
 0x21a   :  { %v2442_v21 = vadd.f32 %v2441_v29, %v2078_v18 }
 0x293   :  { %v2478_v26 = vpop.f32.mrf.mxu1 }
 0x294   :  { %v2479_v53 = vadd.f32 %v2478_v26, %v2436_v28 }
 0x295   :  { %v2480_v30 = vpop.f32.mrf.mxu1 }
 0x296   :  { %v2481_v32 = vadd.f32 %v2480_v30, %v2438_v27  ;;  %v2491_v9 = vmul.f32 0.2, %v2479_v53  ;;  %vm2487_vm10 = vcmp.ge.f32.partialorder %v2479_v53, 0.0 }
 0x297   :  { %v2482_v20 = vpop.f32.mrf.mxu1 }
 0x298   :  { %v2483_v55 = vadd.f32 %v2482_v20, %v2440_v31  ;;  %v2492_v34 = vmul.f32 0.2, %v2481_v32  ;;  %vm2488_vm9 = vcmp.ge.f32.partialorder %v2481_v32, 0.0  ;;  %v2495_v41 = vsel %vm2487_vm10, %v2479_v53, %v2491_v9 }
 0x299   :  { %v2484_v33 = vpop.f32.mrf.mxu1 }
 0x29a   :  { %vm2489_vm8 = vcmp.ge.f32.partialorder %v2483_v55, 0.0  ;;  %v2493_v8 = vmul.f32 0.2, %v2483_v55  ;;  %v2485_v22 = vadd.f32 %v2484_v33, %v2442_v21  ;;  %v2496_v35 = vsel %vm2488_vm9, %v2481_v32, %v2492_v34 }
 0x29c   :  { %vm2490_vm11 = vcmp.ge.f32.partialorder %v2485_v22, 0.0  ;;  %v2494_v12 = vmul.f32 0.2, %v2485_v22  ;;  %v2497_v19 = vsel %vm2489_vm8, %v2483_v55, %v2493_v8 }
 0x29d   :  { %v2499_v37 = vpack.c.bf16 %v2497_v19, %v2495_v41 }
 0x29e   :  { %v2498_v36 = vsel %vm2490_vm11, %v2485_v22, %v2494_v12 }
 0x29f   :  { %v2500_v43 = vpack.c.bf16 %v2498_v36, %v2496_v35 }
 0x2a1   :  { %2668 = vmatprep.mubr.bf16.mxu0 %v2500_v43 }
 0x2a2   :  { %2669 = vmatmul.mubr.bf16.vlgmr.msra.gmra.mxu0 %v2499_v37 }
 0x362   :  { %v3074_v39 = vpop.f32.mrf.mxu0 }
 0x364   :  { %v3075_v42 = vpop.f32.mrf.mxu0 }
 0x365   :  { %v3076_v44 = vadd.f32 %v3075_v42, %v3074_v39 }
 0x366   :  { %v3077_v45 = vpop.f32.mrf.mxu0 }
 0x367   :  { %v2671_v47 = vadd.f32 %v3076_v44, %v3041_v40 }
 0x368   :  { %v3078_v24 = vpop.f32.mrf.mxu0 }
 0x369   :  { %v3079_v48 = vadd.f32 %v3078_v24, %v3077_v45  ;;  %v2682_v5 = vsel %vm4735_vm14, %v2671_v47, -1e+30 }
 0x36a   :  { %2684 = vmax.xlane.f32.xlu0 %v2682_v5 }
 0x36b   :  { %v2674_v49 = vadd.f32 %v3079_v48, %v3041_v40 }
 0x36d   :  { %v2683_v50 = vsel %vm4735_vm14, %v2674_v49, -1e+30 }
 0x36e   :  { %2686 = vmax.xlane.f32.xlu0 %v2683_v50 }
 0x3f3   :  { %v2685_v51 = vpop.xlane.xlu0 %2684 }
 0x3f4   :  { %v2688_v52 = vsub.f32 %v2671_v47, %v2685_v51 }
 0x3f6   :  { %v2690_v54 = vmul.f32 1.442695, %v2688_v52 }
 0x3f7   :  { %v2687_v56 = vpop.xlane.xlu0 %2686 }
 0x3f8   :  { %3576 = vpow2.f32 %v2690_v54  ;;  %v2689_v57 = vsub.f32 %v2674_v49, %v2687_v56 }
 0x3fa   :  { %v2692_v58 = vmul.f32 1.442695, %v2689_v57 }
 0x3fc   :  { %3578 = vpow2.f32 %v2692_v58 }
 0x405   :  { %v3577_v59 = vpop.eup %3576 }
 0x406   :  { %v2694_v60 = vsel %vm4735_vm14, %v3577_v59, 0.0 }
 0x407   :  { %2696 = vadd.xlane.f32.xlu1 %v2694_v60 }
 0x409   :  { %v3579_v61 = vpop.eup %3578 }
 0x40a   :  { %v2695_v62 = vsel %vm4735_vm14, %v3579_v61, 0.0 }
 0x40b   :  { %2698 = vadd.xlane.f32.xlu1 %v2695_v62 }
 0x490   :  { %v2697_v63 = vpop.xlane.xlu1 %2696 }
 0x491   :  { %3580 = vrcp.f32 %v2697_v63 }
 0x494   :  { %v2699_v0 = vpop.xlane.xlu1 %2698 }
 0x495   :  { %3582 = vrcp.f32 %v2699_v0 }
 0x49e   :  { %v3581_v1 = vpop.eup %3580 }
 0x49f   :  { %v2702_v2 = vmul.f32 %v3581_v1, %v2694_v60 }
 0x4a1   :  { %v2705_v3 = vsel %vm2704_vm15, %v2671_v47, %v2702_v2 }
 0x4a2   :  { %v3583_v4 = vpop.eup %3582  ;;  %2707 = vst [vmem:[%s4760_s7] sm:$0xff] %v2705_v3 }
 0x4a3   :  { %v2703_v6 = vmul.f32 %v3583_v4, %v2695_v62 }
 0x4a5   :  { %v2706_v7 = vsel %vm2704_vm15, %v2674_v49, %v2703_v6 }
 0x4a6   :  { %2708 = vst [vmem:[%s4760_s7 + $0x8] sm:$0xff] %v2706_v7 }

</bundles_post_ra>
